<compile_context>
chip_gen: v7x
topology: tpu7x:2x2x1
jax: 0.10.0
libtpu: 0.0.40
codegen_flags: <defaults>
</compile_context>

<pallas_src>
import functools

import jax
import jax.numpy as jnp
import numpy as np
from jax import lax
from jax.experimental import pallas as pl
from jax.experimental.pallas import tpu as pltpu

KS = 3        # kernel_size
PAD = 1       # padding
STRIDE = 1    # stride
DILATION = 2  # dilation
LANES = 128   # TPU lane width


# ----------------------------------------------------------------------------
# Kernel A (fused): p/m/ad pre-convs as matmuls  +  sampling coords, boundary
# mask, bilinear weights (with modulation folded in), gather indices.
# Output: one lane-dense (tm, 128) slab:
#   lanes [0:36)  -> g*mod for corners (lt, rb, lb, rt), 9 taps each (f32)
#   lanes [36:72) -> flat gather indices for (lt, rb, lb, rt) as exact f32
#   lanes [72:128)-> zero padding
# ----------------------------------------------------------------------------
def _fused_coords_kernel(patch_ref, p0x_ref, p0y_ref, pnx_ref, pny_ref,
                         wox_ref, woy_ref, wm_ref, wad_ref,
                         box_ref, boy_ref, bm_ref, bad_ref,
                         pack_ref, *, n_taps, pad, dil, hp, wp):
    f32 = jnp.float32
    patches = patch_ref[...]                                          # (tm, N*c)

    # pre-activations (stay in VMEM, never round-trip to HBM)
    off_x = jnp.dot(patches, wox_ref[...], preferred_element_type=f32) + box_ref[...]
    off_y = jnp.dot(patches, woy_ref[...], preferred_element_type=f32) + boy_ref[...]
    m_raw = jnp.dot(patches, wm_ref[...], preferred_element_type=f32) + bm_ref[...]
    ad_raw = jnp.dot(patches, wad_ref[...], preferred_element_type=f32) + bad_ref[...]

    ad_base = 1.0 - jax.nn.sigmoid(ad_raw)
    ad = ad_base * dil
    pnx = pnx_ref[...]                                                # (1, N)
    pny = pny_ref[...]
    px = p0x_ref[...] + pnx + off_x + ad * pnx                        # (tm, N)
    py = p0y_ref[...] + pny + off_y + ad * pny

    fx = jnp.floor(px)
    fy = jnp.floor(py)
    qltx = jnp.clip(fx, 0.0, hp - 1.0)
    qlty = jnp.clip(fy, 0.0, wp - 1.0)
    qrbx = jnp.clip(fx + 1.0, 0.0, hp - 1.0)
    qrby = jnp.clip(fy + 1.0, 0.0, wp - 1.0)

    # boundary mask (p - (p - floor(p)) in the torch code is just floor(p))
    mask_x = jnp.logical_or(px < pad, px > hp - 1.0 - pad)
    mask_y = jnp.logical_or(py < pad, py > wp - 1.0 - pad)
    px = jnp.clip(jnp.where(mask_x, fx, px), 0.0, hp - 1.0)
    py = jnp.clip(jnp.where(mask_y, fy, py), 0.0, wp - 1.0)

    # modulation folded into the bilinear coefficients
    mod = jax.nn.sigmoid(m_raw) * ((ad_base - 0.5) * (2.0 * dil))
    gx_lt = 1.0 + (qltx - px)
    gx_rb = 1.0 - (qrbx - px)
    gy_lt = 1.0 + (qlty - py)
    gy_rb = 1.0 - (qrby - py)

    planes = (gx_lt * gy_lt * mod,     # g*mod  lt
              gx_rb * gy_rb * mod,     # g*mod  rb
              gx_lt * gy_rb * mod,     # g*mod  lb
              gx_rb * gy_lt * mod,     # g*mod  rt
              qltx * wp + qlty,        # index  lt  (whole numbers, exact in f32)
              qrbx * wp + qrby,        # index  rb
              qltx * wp + qrby,        # index  lb
              qrbx * wp + qlty)        # index  rt

    # lane-dense packing via exact one-hot placement matmuls (robust, uses idle MXU)
    rr = lax.broadcasted_iota(jnp.int32, (n_taps, LANES), 0)
    cc = lax.broadcasted_iota(jnp.int32, (n_taps, LANES), 1)
    packed = jnp.zeros((patches.shape[0], LANES), f32)
    for q, plane in enumerate(planes):
        place = (cc == q * n_taps + rr).astype(f32)                   # (N, 128) one-hot
        packed = packed + jnp.dot(plane, place, preferred_element_type=f32)
    pack_ref[...] = packed


# ----------------------------------------------------------------------------
# Kernel B: expand coefficients across channels (one-hot matmul), bilinear
# combine of the 4 gathered corners, final conv as a padded bf16 matmul.
# ----------------------------------------------------------------------------
def _deform_out_kernel(pack_ref, xall_ref, e_ref, w_ref, o_ref):
    # (tm,128) f32 @ (128, 4*N*c) 0/1 matrix -> per-column coefficient (exact)
    coef = jnp.dot(pack_ref[...], e_ref[...], preferred_element_type=jnp.float32)
    x_off = coef * xall_ref[...].astype(jnp.float32)                  # interpolation in f32
    o_ref[...] = jnp.dot(x_off.astype(jnp.bfloat16), w_ref[...],      # bf16 MXU fast path
                         preferred_element_type=jnp.float32)


def _pick_tile(m_rows, target=512):
    cands = [t for t in (target, 384, 256, 128, 64, 32, 16)
             if t <= m_rows and m_rows % t == 0]
    for t in cands:
        if m_rows // t >= 2:          # keep >=2 grid steps so v7x's 2nd TC has work
            return t
    return cands[0] if cands else m_rows


# ----------------------------------------------------------------------------
# Full forward pass
# ----------------------------------------------------------------------------
def deform_conv2d_pallas(x, params, tm=None):
    # layout: x is NCHW (b, inc, h, w); output is NCHW (b, outc, h, w)
    b, c, h, w = x.shape
    ks, pad, stride, dil = KS, PAD, STRIDE, DILATION
    N = ks * ks
    Nc = N * c
    M = b * h * w
    outc = params['conv_w'].shape[0]
    Hp, Wp = h + 2 * pad, w + 2 * pad
    f32, bf16 = jnp.float32, jnp.bfloat16
    outc_pad = ((outc + LANES - 1) // LANES) * LANES

    if tm is None:
        tm = _pick_tile(M)
    assert M % tm == 0 and tm % 8 == 0

    # --- XLA glue: channels-last input + shared zero pad (pre-convs & gather) ---
    x_cl = jnp.transpose(x, (0, 2, 3, 1))                                  # (b, h, w, c)
    x_pad_cl = jnp.pad(x_cl, ((0, 0), (pad, pad), (pad, pad), (0, 0)))     # (b, Hp, Wp, c)
    xp1 = x_pad_cl if pad == 1 else jnp.pad(x_cl, ((0, 0), (1, 1), (1, 1), (0, 0)))

    # im2col patches with feature order k = n*c + j (tap-major, channel-minor)
    pats = [xp1[:, ki:ki + h, kj:kj + w, :] for ki in range(ks) for kj in range(ks)]
    patches = jnp.stack(pats, axis=3).reshape(M, Nc).astype(f32)           # (M, N*c)

    # base grid p_0 as tiny (M, 1) streams and kernel-tap offsets p_n as (1, N) constants
    rows = jnp.arange(1, h * stride + 1, stride, dtype=f32)
    cols = jnp.arange(1, w * stride + 1, stride, dtype=f32)
    p0x = jnp.broadcast_to(rows[None, :, None], (b, h, w)).reshape(M, 1)
    p0y = jnp.broadcast_to(cols[None, None, :], (b, h, w)).reshape(M, 1)
    r = jnp.arange(-(ks - 1) // 2, (ks - 1) // 2 + 1, dtype=f32)
    pnx = jnp.repeat(r, ks)[None, :]                                       # (1, N)
    pny = jnp.tile(r, ks)[None, :]

    # pre-conv weights reshaped to (N*c, taps); row order matches patches (n*c + j)
    def to_mat(wgt):  # (t, c, ks, ks) -> (N*c, t)
        return jnp.transpose(wgt, (2, 3, 1, 0)).reshape(Nc, wgt.shape[0]).astype(f32)

    w_ox = to_mat(params['p_w'][:N])
    w_oy = to_mat(params['p_w'][N:2 * N])
    w_m = to_mat(params['m_w'])
    w_ad9 = jnp.tile(to_mat(params['ad_w']), (1, ks))     # column n uses ad filter (n % ks)
    b_ox = params['p_b'][:N][None, :].astype(f32)
    b_oy = params['p_b'][N:2 * N][None, :].astype(f32)
    b_m = params['m_b'][None, :].astype(f32)
    b_ad9 = jnp.tile(params['ad_b'], (ks,))[None, :].astype(f32)

    def row_spec(width):
        return pl.BlockSpec((tm, width), lambda i: (i, 0))

    def const_spec(shp):
        return pl.BlockSpec(shp, lambda i: (0, 0))

    coords_kernel = functools.partial(_fused_coords_kernel, n_taps=N, pad=float(pad),
                                      dil=float(dil), hp=float(Hp), wp=float(Wp))
    packed = pl.pallas_call(
        coords_kernel,
        out_shape=jax.ShapeDtypeStruct((M, LANES), f32),
        grid=(M // tm,),
        in_specs=[row_spec(Nc), row_spec(1), row_spec(1),
                  const_spec((1, N)), const_spec((1, N)),
                  const_spec((Nc, N)), const_spec((Nc, N)),
                  const_spec((Nc, N)), const_spec((Nc, N)),
                  const_spec((1, N)), const_spec((1, N)),
                  const_spec((1, N)), const_spec((1, N))],
        out_specs=row_spec(LANES),
        compiler_params=pltpu.CompilerParams(dimension_semantics=("parallel",)),
    )(patches, p0x, p0y, pnx, pny, w_ox, w_oy, w_m, w_ad9, b_ox, b_oy, b_m, b_ad9)

    # --- XLA glue: ONE channels-last gather for all 4 corners, in bf16 ---
    idx_all = packed[:, 4 * N:8 * N].astype(jnp.int32)                     # (M, 4N), exact
    x_flat = x_pad_cl.astype(bf16).reshape(b, Hp * Wp, c)
    idx_g = idx_all.reshape(b, h * w * 4 * N, 1)
    gathered = jnp.take_along_axis(x_flat, idx_g, axis=1)                  # (b, hw*4N, c)
    x_all = gathered.reshape(M, 4 * Nc)                                    # bf16, order (corner, n, c)

    # exact 0/1 expansion matrix: row (corner*N + n) -> columns corner*Nc + n*c + j
    e_np = np.zeros((LANES, 4 * Nc), np.float32)
    e_np[np.arange(4 * Nc) // c, np.arange(4 * Nc)] = 1.0
    e_ext = jnp.asarray(e_np)

    # final conv weight in (n, c) row order, replicated for the 4 corners, padded to 128 lanes
    w2 = jnp.transpose(params['conv_w'], (0, 2, 3, 1)).reshape(outc, Nc).T  # (Nc, outc)
    w4 = jnp.pad(jnp.tile(w2, (4, 1)), ((0, 0), (0, outc_pad - outc))).astype(bf16)

    out_pad = pl.pallas_call(
        _deform_out_kernel,
        out_shape=jax.ShapeDtypeStruct((M, outc_pad), f32),
        grid=(M // tm,),
        in_specs=[row_spec(LANES), row_spec(4 * Nc),
                  const_spec((LANES, 4 * Nc)), const_spec((4 * Nc, outc_pad))],
        out_specs=row_spec(outc_pad),
        compiler_params=pltpu.CompilerParams(dimension_semantics=("parallel",)),
    )(packed, x_all, e_ext, w4)

    out = out_pad[:, :outc].reshape(b, h, w, outc)
    return jnp.transpose(out, (0, 3, 1, 2))


# ----------------------------------------------------------------------------
# Pure-JAX reference (mirrors the PyTorch forward) for a numerical self-check
# ----------------------------------------------------------------------------
def _conv2d_nchw(x, wgt, bias=None, stride=1, padding=1):
    out = lax.conv_general_dilated(x, wgt, (stride, stride),
                                   [(padding, padding), (padding, padding)],
                                   dimension_numbers=('NCHW', 'OIHW', 'NCHW'))
    if bias is not None:
        out = out + bias[None, :, None, None]
    return out


def deform_conv2d_ref(x, params):
    ks, pad, stride, dil = KS, PAD, STRIDE, DILATION
    b, c, h, w = x.shape
    N = ks * ks
    outc = params['conv_w'].shape[0]

    offset = _conv2d_nchw(x, params['p_w'], params['p_b'], stride, 1)
    m = jax.nn.sigmoid(_conv2d_nchw(x, params['m_w'], params['m_b'], stride, 1))
    ad_base = 1.0 - jax.nn.sigmoid(_conv2d_nchw(x, params['ad_w'], params['ad_b'], stride, 1))
    ad = jnp.tile(ad_base, (1, 2 * ks, 1, 1)) * dil
    ad_m = jnp.tile((ad_base - 0.5) * 2.0, (1, ks, 1, 1)) * dil

    r = jnp.arange(-(ks - 1) // 2, (ks - 1) // 2 + 1, dtype=jnp.float32)
    p_n = jnp.concatenate([jnp.repeat(r, ks), jnp.tile(r, ks)]).reshape(1, 2 * N, 1, 1)
    rows = jnp.arange(1, h * stride + 1, stride, dtype=jnp.float32)
    cols = jnp.arange(1, w * stride + 1, stride, dtype=jnp.float32)
    p0x = jnp.broadcast_to(rows[:, None], (h, w))
    p0y = jnp.broadcast_to(cols[None, :], (h, w))
    p_0 = jnp.concatenate([jnp.broadcast_to(p0x[None], (N, h, w)),
                           jnp.broadcast_to(p0y[None], (N, h, w))], 0)[None]
    p = p_0 + p_n + offset + ad * p_n

    xp = jnp.pad(x, ((0, 0), (0, 0), (pad, pad), (pad, pad)))
    Hp, Wp = h + 2 * pad, w + 2 * pad
    p = jnp.transpose(p, (0, 2, 3, 1))
    q_lt = jnp.floor(p)
    q_rb = q_lt + 1.0
    q_lt = jnp.concatenate([jnp.clip(q_lt[..., :N], 0, Hp - 1),
                            jnp.clip(q_lt[..., N:], 0, Wp - 1)], -1).astype(jnp.int32)
    q_rb = jnp.concatenate([jnp.clip(q_rb[..., :N], 0, Hp - 1),
                            jnp.clip(q_rb[..., N:], 0, Wp - 1)], -1).astype(jnp.int32)
    q_lb = jnp.concatenate([q_lt[..., :N], q_rb[..., N:]], -1)
    q_rt = jnp.concatenate([q_rb[..., :N], q_lt[..., N:]], -1)
    mask = jnp.concatenate(
        [jnp.logical_or(p[..., :N] < pad, p[..., :N] > Hp - 1 - pad),
         jnp.logical_or(p[..., N:] < pad, p[..., N:] > Wp - 1 - pad)], -1).astype(p.dtype)
    floor_p = p - (p - jnp.floor(p))
    p = p * (1 - mask) + floor_p * mask
    p = jnp.concatenate([jnp.clip(p[..., :N], 0, Hp - 1),
                         jnp.clip(p[..., N:], 0, Wp - 1)], -1)
    px, py = p[..., :N], p[..., N:]
    qltf, qrbf = q_lt.astype(p.dtype), q_rb.astype(p.dtype)
    qlbf, qrtf = q_lb.astype(p.dtype), q_rt.astype(p.dtype)
    g_lt = (1 + (qltf[..., :N] - px)) * (1 + (qltf[..., N:] - py))
    g_rb = (1 - (qrbf[..., :N] - px)) * (1 - (qrbf[..., N:] - py))
    g_lb = (1 + (qlbf[..., :N] - px)) * (1 - (qlbf[..., N:] - py))
    g_rt = (1 - (qrtf[..., :N] - px)) * (1 + (qrtf[..., N:] - py))

    xf = xp.reshape(b, c, Hp * Wp)

    def get_x_q(q):
        idx = (q[..., :N] * Wp + q[..., N:]).reshape(b, 1, h * w * N)
        g = jnp.take_along_axis(xf, jnp.broadcast_to(idx, (b, c, h * w * N)), axis=2)
        return g.reshape(b, c, h, w, N)

    x_offset = (g_lt[:, None] * get_x_q(q_lt) + g_rb[:, None] * get_x_q(q_rb) +
                g_lb[:, None] * get_x_q(q_lb) + g_rt[:, None] * get_x_q(q_rt))
    mm = jnp.transpose(m * ad_m, (0, 2, 3, 1))[:, None]
    x_offset = x_offset * mm
    out = jnp.einsum('bchwn,ocn->bohw', x_offset, params['conv_w'].reshape(outc, c, N))
    return out


if __name__ == "__main__":
    b, inc, outc, h, w = 2, 4, 8, 16, 16
    N = KS * KS
    key = jax.random.PRNGKey(0)
    k = jax.random.split(key, 8)
    params = {
        'p_w': 0.1 * jax.random.normal(k[0], (2 * N, inc, 3, 3), jnp.float32),
        'p_b': 0.1 * jax.random.normal(k[1], (2 * N,), jnp.float32),
        'm_w': 0.1 * jax.random.normal(k[2], (N, inc, 3, 3), jnp.float32),
        'm_b': 0.1 * jax.random.normal(k[3], (N,), jnp.float32),
        'ad_w': 0.1 * jax.random.normal(k[4], (KS, inc, 3, 3), jnp.float32),
        'ad_b': 0.1 * jax.random.normal(k[5], (KS,), jnp.float32),
        'conv_w': 0.1 * jax.random.normal(k[6], (outc, inc, KS, KS), jnp.float32),
    }
    x = jax.random.normal(k[7], (b, inc, h, w), jnp.float32)

    out = jax.jit(lambda xx: deform_conv2d_pallas(xx, params))(x)
    out = jax.block_until_ready(out)
    assert out.shape == (b, outc, h, w)

    ref = jax.block_until_ready(deform_conv2d_ref(x, params))
    # bf16 is used only on the gathered-x / final-conv MXU path; coords stay f32.
    np.testing.assert_allclose(np.asarray(out), np.asarray(ref), rtol=2e-2, atol=2e-2)
    print("KERNEL_OK")
</pallas_src>

<mosaic_0001>
module attributes {stable_mosaic.version = 11 : i64} {
  func.func @_fused_coords_kernel(%arg0: i32, %arg1: memref<256x36xf32, #tpu.memory_space<vmem>>, %arg2: memref<256x1xf32, #tpu.memory_space<vmem>>, %arg3: memref<256x1xf32, #tpu.memory_space<vmem>>, %arg4: memref<1x9xf32, #tpu.memory_space<vmem>>, %arg5: memref<1x9xf32, #tpu.memory_space<vmem>>, %arg6: memref<36x9xf32, #tpu.memory_space<vmem>>, %arg7: memref<36x9xf32, #tpu.memory_space<vmem>>, %arg8: memref<36x9xf32, #tpu.memory_space<vmem>>, %arg9: memref<36x9xf32, #tpu.memory_space<vmem>>, %arg10: memref<1x9xf32, #tpu.memory_space<vmem>>, %arg11: memref<1x9xf32, #tpu.memory_space<vmem>>, %arg12: memref<1x9xf32, #tpu.memory_space<vmem>>, %arg13: memref<1x9xf32, #tpu.memory_space<vmem>>, %arg14: memref<256x128xf32, #tpu.memory_space<vmem>>) attributes {dimension_semantics = [#tpu.dimension_semantics<parallel>], iteration_bounds = array<i64: 2>, scalar_prefetch = 0 : i64, scratch_operands = 0 : i64, tpu.core_type = #tpu.core_type<tc>, window_params = [{transform_indices = @transform_0, window_bounds = array<i64: 256, 36>}, {transform_indices = @transform_1, window_bounds = array<i64: 256, 1>}, {transform_indices = @transform_2, window_bounds = array<i64: 256, 1>}, {pipeline_mode = #tpu.pipeline_mode<synchronous>, transform_indices = @transform_3, window_bounds = array<i64: 1, 9>}, {pipeline_mode = #tpu.pipeline_mode<synchronous>, transform_indices = @transform_4, window_bounds = array<i64: 1, 9>}, {pipeline_mode = #tpu.pipeline_mode<synchronous>, transform_indices = @transform_5, window_bounds = array<i64: 36, 9>}, {pipeline_mode = #tpu.pipeline_mode<synchronous>, transform_indices = @transform_6, window_bounds = array<i64: 36, 9>}, {pipeline_mode = #tpu.pipeline_mode<synchronous>, transform_indices = @transform_7, window_bounds = array<i64: 36, 9>}, {pipeline_mode = #tpu.pipeline_mode<synchronous>, transform_indices = @transform_8, window_bounds = array<i64: 36, 9>}, {pipeline_mode = #tpu.pipeline_mode<synchronous>, transform_indices = @transform_9, window_bounds = array<i64: 1, 9>}, {pipeline_mode = #tpu.pipeline_mode<synchronous>, transform_indices = @transform_10, window_bounds = array<i64: 1, 9>}, {pipeline_mode = #tpu.pipeline_mode<synchronous>, transform_indices = @transform_11, window_bounds = array<i64: 1, 9>}, {pipeline_mode = #tpu.pipeline_mode<synchronous>, transform_indices = @transform_12, window_bounds = array<i64: 1, 9>}, {transform_indices = @transform_13, window_bounds = array<i64: 256, 128>}]} {
    %c0 = arith.constant 0 : index
    %c0_0 = arith.constant 0 : index
    %0 = vector.load %arg1[%c0, %c0_0] : memref<256x36xf32, #tpu.memory_space<vmem>>, vector<256x36xf32>
    %c0_1 = arith.constant 0 : index
    %c0_2 = arith.constant 0 : index
    %1 = vector.load %arg6[%c0_1, %c0_2] : memref<36x9xf32, #tpu.memory_space<vmem>>, vector<36x9xf32>
    %cst = arith.constant dense<0.000000e+00> : vector<256x9xf32>
    %2 = tpu.matmul %0, %1, %cst {dimension_numbers = #tpu.dot_dimension_numbers<[1], [0], [0], [1], [0, 0, 1, 1], [], []>} : vector<256x36xf32>, vector<36x9xf32>, vector<256x9xf32> -> vector<256x9xf32>
    %c0_3 = arith.constant 0 : index
    %c0_4 = arith.constant 0 : index
    %3 = vector.load %arg10[%c0_3, %c0_4] : memref<1x9xf32, #tpu.memory_space<vmem>>, vector<1x9xf32>
    %4 = vector.broadcast %3 : vector<1x9xf32> to vector<256x9xf32>
    %5 = arith.addf %2, %4 : vector<256x9xf32>
    %c0_5 = arith.constant 0 : index
    %c0_6 = arith.constant 0 : index
    %6 = vector.load %arg7[%c0_5, %c0_6] : memref<36x9xf32, #tpu.memory_space<vmem>>, vector<36x9xf32>
    %cst_7 = arith.constant dense<0.000000e+00> : vector<256x9xf32>
    %7 = tpu.matmul %0, %6, %cst_7 {dimension_numbers = #tpu.dot_dimension_numbers<[1], [0], [0], [1], [0, 0, 1, 1], [], []>} : vector<256x36xf32>, vector<36x9xf32>, vector<256x9xf32> -> vector<256x9xf32>
    %c0_8 = arith.constant 0 : index
    %c0_9 = arith.constant 0 : index
    %8 = vector.load %arg11[%c0_8, %c0_9] : memref<1x9xf32, #tpu.memory_space<vmem>>, vector<1x9xf32>
    %9 = vector.broadcast %8 : vector<1x9xf32> to vector<256x9xf32>
    %10 = arith.addf %7, %9 : vector<256x9xf32>
    %c0_10 = arith.constant 0 : index
    %c0_11 = arith.constant 0 : index
    %11 = vector.load %arg8[%c0_10, %c0_11] : memref<36x9xf32, #tpu.memory_space<vmem>>, vector<36x9xf32>
    %cst_12 = arith.constant dense<0.000000e+00> : vector<256x9xf32>
    %12 = tpu.matmul %0, %11, %cst_12 {dimension_numbers = #tpu.dot_dimension_numbers<[1], [0], [0], [1], [0, 0, 1, 1], [], []>} : vector<256x36xf32>, vector<36x9xf32>, vector<256x9xf32> -> vector<256x9xf32>
    %c0_13 = arith.constant 0 : index
    %c0_14 = arith.constant 0 : index
    %13 = vector.load %arg12[%c0_13, %c0_14] : memref<1x9xf32, #tpu.memory_space<vmem>>, vector<1x9xf32>
    %14 = vector.broadcast %13 : vector<1x9xf32> to vector<256x9xf32>
    %15 = arith.addf %12, %14 : vector<256x9xf32>
    %c0_15 = arith.constant 0 : index
    %c0_16 = arith.constant 0 : index
    %16 = vector.load %arg9[%c0_15, %c0_16] : memref<36x9xf32, #tpu.memory_space<vmem>>, vector<36x9xf32>
    %cst_17 = arith.constant dense<0.000000e+00> : vector<256x9xf32>
    %17 = tpu.matmul %0, %16, %cst_17 {dimension_numbers = #tpu.dot_dimension_numbers<[1], [0], [0], [1], [0, 0, 1, 1], [], []>} : vector<256x36xf32>, vector<36x9xf32>, vector<256x9xf32> -> vector<256x9xf32>
    %c0_18 = arith.constant 0 : index
    %c0_19 = arith.constant 0 : index
    %18 = vector.load %arg13[%c0_18, %c0_19] : memref<1x9xf32, #tpu.memory_space<vmem>>, vector<1x9xf32>
    %19 = vector.broadcast %18 : vector<1x9xf32> to vector<256x9xf32>
    %20 = arith.addf %17, %19 : vector<256x9xf32>
    %21 = arith.negf %20 : vector<256x9xf32>
    %22 = math.exp %21 : vector<256x9xf32>
    %cst_20 = arith.constant 1.000000e+00 : f32
    %23 = vector.broadcast %cst_20 : f32 to vector<256x9xf32>
    %24 = arith.addf %23, %22 : vector<256x9xf32>
    %25 = arith.divf %23, %24 : vector<256x9xf32>
    %cst_21 = arith.constant 1.000000e+00 : f32
    %26 = vector.broadcast %cst_21 : f32 to vector<256x9xf32>
    %27 = arith.subf %26, %25 : vector<256x9xf32>
    %cst_22 = arith.constant 2.000000e+00 : f32
    %28 = vector.broadcast %cst_22 : f32 to vector<256x9xf32>
    %29 = arith.mulf %27, %28 : vector<256x9xf32>
    %c0_23 = arith.constant 0 : index
    %c0_24 = arith.constant 0 : index
    %30 = vector.load %arg4[%c0_23, %c0_24] : memref<1x9xf32, #tpu.memory_space<vmem>>, vector<1x9xf32>
    %c0_25 = arith.constant 0 : index
    %c0_26 = arith.constant 0 : index
    %31 = vector.load %arg5[%c0_25, %c0_26] : memref<1x9xf32, #tpu.memory_space<vmem>>, vector<1x9xf32>
    %c0_27 = arith.constant 0 : index
    %c0_28 = arith.constant 0 : index
    %32 = vector.load %arg2[%c0_27, %c0_28] : memref<256x1xf32, #tpu.memory_space<vmem>>, vector<256x1xf32>
    %33 = vector.broadcast %32 : vector<256x1xf32> to vector<256x9xf32>
    %34 = vector.broadcast %30 : vector<1x9xf32> to vector<256x9xf32>
    %35 = arith.addf %33, %34 : vector<256x9xf32>
    %36 = arith.addf %35, %5 : vector<256x9xf32>
    %37 = vector.broadcast %30 : vector<1x9xf32> to vector<256x9xf32>
    %38 = arith.mulf %29, %37 : vector<256x9xf32>
    %39 = arith.addf %36, %38 : vector<256x9xf32>
    %c0_29 = arith.constant 0 : index
    %c0_30 = arith.constant 0 : index
    %40 = vector.load %arg3[%c0_29, %c0_30] : memref<256x1xf32, #tpu.memory_space<vmem>>, vector<256x1xf32>
    %41 = vector.broadcast %40 : vector<256x1xf32> to vector<256x9xf32>
    %42 = vector.broadcast %31 : vector<1x9xf32> to vector<256x9xf32>
    %43 = arith.addf %41, %42 : vector<256x9xf32>
    %44 = arith.addf %43, %10 : vector<256x9xf32>
    %45 = vector.broadcast %31 : vector<1x9xf32> to vector<256x9xf32>
    %46 = arith.mulf %29, %45 : vector<256x9xf32>
    %47 = arith.addf %44, %46 : vector<256x9xf32>
    %48 = math.floor %39 : vector<256x9xf32>
    %49 = math.floor %47 : vector<256x9xf32>
    %cst_31 = arith.constant 0.000000e+00 : f32
    %cst_32 = arith.constant 1.700000e+01 : f32
    %50 = vector.broadcast %cst_31 : f32 to vector<256x9xf32>
    %51 = arith.maximumf %50, %48 : vector<256x9xf32>
    %52 = vector.broadcast %cst_32 : f32 to vector<256x9xf32>
    %53 = arith.minimumf %52, %51 : vector<256x9xf32>
    %cst_33 = arith.constant 0.000000e+00 : f32
    %cst_34 = arith.constant 1.700000e+01 : f32
    %54 = vector.broadcast %cst_33 : f32 to vector<256x9xf32>
    %55 = arith.maximumf %54, %49 : vector<256x9xf32>
    %56 = vector.broadcast %cst_34 : f32 to vector<256x9xf32>
    %57 = arith.minimumf %56, %55 : vector<256x9xf32>
    %cst_35 = arith.constant 1.000000e+00 : f32
    %58 = vector.broadcast %cst_35 : f32 to vector<256x9xf32>
    %59 = arith.addf %48, %58 : vector<256x9xf32>
    %cst_36 = arith.constant 0.000000e+00 : f32
    %cst_37 = arith.constant 1.700000e+01 : f32
    %60 = vector.broadcast %cst_36 : f32 to vector<256x9xf32>
    %61 = arith.maximumf %60, %59 : vector<256x9xf32>
    %62 = vector.broadcast %cst_37 : f32 to vector<256x9xf32>
    %63 = arith.minimumf %62, %61 : vector<256x9xf32>
    %cst_38 = arith.constant 1.000000e+00 : f32
    %64 = vector.broadcast %cst_38 : f32 to vector<256x9xf32>
    %65 = arith.addf %49, %64 : vector<256x9xf32>
    %cst_39 = arith.constant 0.000000e+00 : f32
    %cst_40 = arith.constant 1.700000e+01 : f32
    %66 = vector.broadcast %cst_39 : f32 to vector<256x9xf32>
    %67 = arith.maximumf %66, %65 : vector<256x9xf32>
    %68 = vector.broadcast %cst_40 : f32 to vector<256x9xf32>
    %69 = arith.minimumf %68, %67 : vector<256x9xf32>
    %cst_41 = arith.constant 1.000000e+00 : f32
    %70 = vector.broadcast %cst_41 : f32 to vector<256x9xf32>
    %71 = arith.cmpf olt, %39, %70 : vector<256x9xf32>
    %cst_42 = arith.constant 1.600000e+01 : f32
    %72 = vector.broadcast %cst_42 : f32 to vector<256x9xf32>
    %73 = arith.cmpf ogt, %39, %72 : vector<256x9xf32>
    %74 = arith.ori %71, %73 : vector<256x9xi1>
    %cst_43 = arith.constant 1.000000e+00 : f32
    %75 = vector.broadcast %cst_43 : f32 to vector<256x9xf32>
    %76 = arith.cmpf olt, %47, %75 : vector<256x9xf32>
    %cst_44 = arith.constant 1.600000e+01 : f32
    %77 = vector.broadcast %cst_44 : f32 to vector<256x9xf32>
    %78 = arith.cmpf ogt, %47, %77 : vector<256x9xf32>
    %79 = arith.ori %76, %78 : vector<256x9xi1>
    %80 = arith.select %74, %48, %39 : vector<256x9xi1>, vector<256x9xf32>
    %cst_45 = arith.constant 0.000000e+00 : f32
    %cst_46 = arith.constant 1.700000e+01 : f32
    %81 = vector.broadcast %cst_45 : f32 to vector<256x9xf32>
    %82 = arith.maximumf %81, %80 : vector<256x9xf32>
    %83 = vector.broadcast %cst_46 : f32 to vector<256x9xf32>
    %84 = arith.minimumf %83, %82 : vector<256x9xf32>
    %85 = arith.select %79, %49, %47 : vector<256x9xi1>, vector<256x9xf32>
    %cst_47 = arith.constant 0.000000e+00 : f32
    %cst_48 = arith.constant 1.700000e+01 : f32
    %86 = vector.broadcast %cst_47 : f32 to vector<256x9xf32>
    %87 = arith.maximumf %86, %85 : vector<256x9xf32>
    %88 = vector.broadcast %cst_48 : f32 to vector<256x9xf32>
    %89 = arith.minimumf %88, %87 : vector<256x9xf32>
    %90 = arith.negf %15 : vector<256x9xf32>
    %91 = math.exp %90 : vector<256x9xf32>
    %cst_49 = arith.constant 1.000000e+00 : f32
    %92 = vector.broadcast %cst_49 : f32 to vector<256x9xf32>
    %93 = arith.addf %92, %91 : vector<256x9xf32>
    %94 = arith.divf %92, %93 : vector<256x9xf32>
    %cst_50 = arith.constant 5.000000e-01 : f32
    %95 = vector.broadcast %cst_50 : f32 to vector<256x9xf32>
    %96 = arith.subf %27, %95 : vector<256x9xf32>
    %cst_51 = arith.constant 4.000000e+00 : f32
    %97 = vector.broadcast %cst_51 : f32 to vector<256x9xf32>
    %98 = arith.mulf %96, %97 : vector<256x9xf32>
    %99 = arith.mulf %94, %98 : vector<256x9xf32>
    %100 = arith.subf %53, %84 : vector<256x9xf32>
    %cst_52 = arith.constant 1.000000e+00 : f32
    %101 = vector.broadcast %cst_52 : f32 to vector<256x9xf32>
    %102 = arith.addf %101, %100 : vector<256x9xf32>
    %103 = arith.subf %63, %84 : vector<256x9xf32>
    %cst_53 = arith.constant 1.000000e+00 : f32
    %104 = vector.broadcast %cst_53 : f32 to vector<256x9xf32>
    %105 = arith.subf %104, %103 : vector<256x9xf32>
    %106 = arith.subf %57, %89 : vector<256x9xf32>
    %cst_54 = arith.constant 1.000000e+00 : f32
    %107 = vector.broadcast %cst_54 : f32 to vector<256x9xf32>
    %108 = arith.addf %107, %106 : vector<256x9xf32>
    %109 = arith.subf %69, %89 : vector<256x9xf32>
    %cst_55 = arith.constant 1.000000e+00 : f32
    %110 = vector.broadcast %cst_55 : f32 to vector<256x9xf32>
    %111 = arith.subf %110, %109 : vector<256x9xf32>
    %112 = arith.mulf %102, %108 : vector<256x9xf32>
    %113 = arith.mulf %112, %99 : vector<256x9xf32>
    %114 = arith.mulf %105, %111 : vector<256x9xf32>
    %115 = arith.mulf %114, %99 : vector<256x9xf32>
    %116 = arith.mulf %102, %111 : vector<256x9xf32>
    %117 = arith.mulf %116, %99 : vector<256x9xf32>
    %118 = arith.mulf %105, %108 : vector<256x9xf32>
    %119 = arith.mulf %118, %99 : vector<256x9xf32>
    %cst_56 = arith.constant 1.800000e+01 : f32
    %120 = vector.broadcast %cst_56 : f32 to vector<256x9xf32>
    %121 = arith.mulf %53, %120 : vector<256x9xf32>
    %122 = arith.addf %121, %57 : vector<256x9xf32>
    %cst_57 = arith.constant 1.800000e+01 : f32
    %123 = vector.broadcast %cst_57 : f32 to vector<256x9xf32>
    %124 = arith.mulf %63, %123 : vector<256x9xf32>
    %125 = arith.addf %124, %69 : vector<256x9xf32>
    %cst_58 = arith.constant 1.800000e+01 : f32
    %126 = vector.broadcast %cst_58 : f32 to vector<256x9xf32>
    %127 = arith.mulf %53, %126 : vector<256x9xf32>
    %128 = arith.addf %127, %69 : vector<256x9xf32>
    %cst_59 = arith.constant 1.800000e+01 : f32
    %129 = vector.broadcast %cst_59 : f32 to vector<256x9xf32>
    %130 = arith.mulf %63, %129 : vector<256x9xf32>
    %131 = arith.addf %130, %57 : vector<256x9xf32>
    %132 = tpu.iota {dimensions = array<i32: 0>} : vector<9x128xi32>
    %133 = tpu.iota {dimensions = array<i32: 1>} : vector<9x128xi32>
    %cst_60 = arith.constant 0.000000e+00 : f32
    %134 = vector.broadcast %cst_60 : f32 to vector<256x128xf32>
    %c0_i32 = arith.constant 0 : i32
    %135 = vector.broadcast %c0_i32 : i32 to vector<9x128xi32>
    %136 = arith.addi %135, %132 : vector<9x128xi32>
    %137 = arith.cmpi eq, %133, %136 : vector<9x128xi32>
    %138 = arith.extui %137 : vector<9x128xi1> to vector<9x128xi32>
    %139 = arith.sitofp %138 : vector<9x128xi32> to vector<9x128xf32>
    %cst_61 = arith.constant dense<0.000000e+00> : vector<256x128xf32>
    %140 = tpu.matmul %113, %139, %cst_61 {dimension_numbers = #tpu.dot_dimension_numbers<[1], [0], [0], [1], [0, 0, 1, 1], [], []>} : vector<256x9xf32>, vector<9x128xf32>, vector<256x128xf32> -> vector<256x128xf32>
    %141 = arith.addf %134, %140 : vector<256x128xf32>
    %c9_i32 = arith.constant 9 : i32
    %142 = vector.broadcast %c9_i32 : i32 to vector<9x128xi32>
    %143 = arith.addi %142, %132 : vector<9x128xi32>
    %144 = arith.cmpi eq, %133, %143 : vector<9x128xi32>
    %145 = arith.extui %144 : vector<9x128xi1> to vector<9x128xi32>
    %146 = arith.sitofp %145 : vector<9x128xi32> to vector<9x128xf32>
    %cst_62 = arith.constant dense<0.000000e+00> : vector<256x128xf32>
    %147 = tpu.matmul %115, %146, %cst_62 {dimension_numbers = #tpu.dot_dimension_numbers<[1], [0], [0], [1], [0, 0, 1, 1], [], []>} : vector<256x9xf32>, vector<9x128xf32>, vector<256x128xf32> -> vector<256x128xf32>
    %148 = arith.addf %141, %147 : vector<256x128xf32>
    %c18_i32 = arith.constant 18 : i32
    %149 = vector.broadcast %c18_i32 : i32 to vector<9x128xi32>
    %150 = arith.addi %149, %132 : vector<9x128xi32>
    %151 = arith.cmpi eq, %133, %150 : vector<9x128xi32>
    %152 = arith.extui %151 : vector<9x128xi1> to vector<9x128xi32>
    %153 = arith.sitofp %152 : vector<9x128xi32> to vector<9x128xf32>
    %cst_63 = arith.constant dense<0.000000e+00> : vector<256x128xf32>
    %154 = tpu.matmul %117, %153, %cst_63 {dimension_numbers = #tpu.dot_dimension_numbers<[1], [0], [0], [1], [0, 0, 1, 1], [], []>} : vector<256x9xf32>, vector<9x128xf32>, vector<256x128xf32> -> vector<256x128xf32>
    %155 = arith.addf %148, %154 : vector<256x128xf32>
    %c27_i32 = arith.constant 27 : i32
    %156 = vector.broadcast %c27_i32 : i32 to vector<9x128xi32>
    %157 = arith.addi %156, %132 : vector<9x128xi32>
    %158 = arith.cmpi eq, %133, %157 : vector<9x128xi32>
    %159 = arith.extui %158 : vector<9x128xi1> to vector<9x128xi32>
    %160 = arith.sitofp %159 : vector<9x128xi32> to vector<9x128xf32>
    %cst_64 = arith.constant dense<0.000000e+00> : vector<256x128xf32>
    %161 = tpu.matmul %119, %160, %cst_64 {dimension_numbers = #tpu.dot_dimension_numbers<[1], [0], [0], [1], [0, 0, 1, 1], [], []>} : vector<256x9xf32>, vector<9x128xf32>, vector<256x128xf32> -> vector<256x128xf32>
    %162 = arith.addf %155, %161 : vector<256x128xf32>
    %c36_i32 = arith.constant 36 : i32
    %163 = vector.broadcast %c36_i32 : i32 to vector<9x128xi32>
    %164 = arith.addi %163, %132 : vector<9x128xi32>
    %165 = arith.cmpi eq, %133, %164 : vector<9x128xi32>
    %166 = arith.extui %165 : vector<9x128xi1> to vector<9x128xi32>
    %167 = arith.sitofp %166 : vector<9x128xi32> to vector<9x128xf32>
    %cst_65 = arith.constant dense<0.000000e+00> : vector<256x128xf32>
    %168 = tpu.matmul %122, %167, %cst_65 {dimension_numbers = #tpu.dot_dimension_numbers<[1], [0], [0], [1], [0, 0, 1, 1], [], []>} : vector<256x9xf32>, vector<9x128xf32>, vector<256x128xf32> -> vector<256x128xf32>
    %169 = arith.addf %162, %168 : vector<256x128xf32>
    %c45_i32 = arith.constant 45 : i32
    %170 = vector.broadcast %c45_i32 : i32 to vector<9x128xi32>
    %171 = arith.addi %170, %132 : vector<9x128xi32>
    %172 = arith.cmpi eq, %133, %171 : vector<9x128xi32>
    %173 = arith.extui %172 : vector<9x128xi1> to vector<9x128xi32>
    %174 = arith.sitofp %173 : vector<9x128xi32> to vector<9x128xf32>
    %cst_66 = arith.constant dense<0.000000e+00> : vector<256x128xf32>
    %175 = tpu.matmul %125, %174, %cst_66 {dimension_numbers = #tpu.dot_dimension_numbers<[1], [0], [0], [1], [0, 0, 1, 1], [], []>} : vector<256x9xf32>, vector<9x128xf32>, vector<256x128xf32> -> vector<256x128xf32>
    %176 = arith.addf %169, %175 : vector<256x128xf32>
    %c54_i32 = arith.constant 54 : i32
    %177 = vector.broadcast %c54_i32 : i32 to vector<9x128xi32>
    %178 = arith.addi %177, %132 : vector<9x128xi32>
    %179 = arith.cmpi eq, %133, %178 : vector<9x128xi32>
    %180 = arith.extui %179 : vector<9x128xi1> to vector<9x128xi32>
    %181 = arith.sitofp %180 : vector<9x128xi32> to vector<9x128xf32>
    %cst_67 = arith.constant dense<0.000000e+00> : vector<256x128xf32>
    %182 = tpu.matmul %128, %181, %cst_67 {dimension_numbers = #tpu.dot_dimension_numbers<[1], [0], [0], [1], [0, 0, 1, 1], [], []>} : vector<256x9xf32>, vector<9x128xf32>, vector<256x128xf32> -> vector<256x128xf32>
    %183 = arith.addf %176, %182 : vector<256x128xf32>
    %c63_i32 = arith.constant 63 : i32
    %184 = vector.broadcast %c63_i32 : i32 to vector<9x128xi32>
    %185 = arith.addi %184, %132 : vector<9x128xi32>
    %186 = arith.cmpi eq, %133, %185 : vector<9x128xi32>
    %187 = arith.extui %186 : vector<9x128xi1> to vector<9x128xi32>
    %188 = arith.sitofp %187 : vector<9x128xi32> to vector<9x128xf32>
    %cst_68 = arith.constant dense<0.000000e+00> : vector<256x128xf32>
    %189 = tpu.matmul %131, %188, %cst_68 {dimension_numbers = #tpu.dot_dimension_numbers<[1], [0], [0], [1], [0, 0, 1, 1], [], []>} : vector<256x9xf32>, vector<9x128xf32>, vector<256x128xf32> -> vector<256x128xf32>
    %190 = arith.addf %183, %189 : vector<256x128xf32>
    %c0_69 = arith.constant 0 : index
    %c0_70 = arith.constant 0 : index
    %191 = vector.load %arg14[%c0_69, %c0_70] : memref<256x128xf32, #tpu.memory_space<vmem>>, vector<256x128xf32>
    tpu.vector_store %arg14[%c0_69, %c0_70], %190 {strides = array<i32>} : memref<256x128xf32, #tpu.memory_space<vmem>>, vector<256x128xf32>,
    return
  }
  func.func @transform_0(%arg0: i32) -> (i32, i32) {
    %c0_i32 = arith.constant 0 : i32
    %c0_i32_0 = arith.constant 0 : i32
    return %arg0, %c0_i32 : i32, i32
  }
  func.func @transform_1(%arg0: i32) -> (i32, i32) {
    %c0_i32 = arith.constant 0 : i32
    %c0_i32_0 = arith.constant 0 : i32
    return %arg0, %c0_i32 : i32, i32
  }
  func.func @transform_2(%arg0: i32) -> (i32, i32) {
    %c0_i32 = arith.constant 0 : i32
    %c0_i32_0 = arith.constant 0 : i32
    return %arg0, %c0_i32 : i32, i32
  }
  func.func @transform_3(%arg0: i32) -> (i32, i32) {
    %c0_i32 = arith.constant 0 : i32
    %c0_i32_0 = arith.constant 0 : i32
    %c0_i32_1 = arith.constant 0 : i32
    return %c0_i32, %c0_i32_0 : i32, i32
  }
  func.func @transform_4(%arg0: i32) -> (i32, i32) {
    %c0_i32 = arith.constant 0 : i32
    %c0_i32_0 = arith.constant 0 : i32
    %c0_i32_1 = arith.constant 0 : i32
    return %c0_i32, %c0_i32_0 : i32, i32
  }
  func.func @transform_5(%arg0: i32) -> (i32, i32) {
    %c0_i32 = arith.constant 0 : i32
    %c0_i32_0 = arith.constant 0 : i32
    %c0_i32_1 = arith.constant 0 : i32
    return %c0_i32, %c0_i32_0 : i32, i32
  }
  func.func @transform_6(%arg0: i32) -> (i32, i32) {
    %c0_i32 = arith.constant 0 : i32
    %c0_i32_0 = arith.constant 0 : i32
    %c0_i32_1 = arith.constant 0 : i32
    return %c0_i32, %c0_i32_0 : i32, i32
  }
  func.func @transform_7(%arg0: i32) -> (i32, i32) {
    %c0_i32 = arith.constant 0 : i32
    %c0_i32_0 = arith.constant 0 : i32
    %c0_i32_1 = arith.constant 0 : i32
    return %c0_i32, %c0_i32_0 : i32, i32
  }
  func.func @transform_8(%arg0: i32) -> (i32, i32) {
    %c0_i32 = arith.constant 0 : i32
    %c0_i32_0 = arith.constant 0 : i32
    %c0_i32_1 = arith.constant 0 : i32
    return %c0_i32, %c0_i32_0 : i32, i32
  }
  func.func @transform_9(%arg0: i32) -> (i32, i32) {
    %c0_i32 = arith.constant 0 : i32
    %c0_i32_0 = arith.constant 0 : i32
    %c0_i32_1 = arith.constant 0 : i32
    return %c0_i32, %c0_i32_0 : i32, i32
  }
  func.func @transform_10(%arg0: i32) -> (i32, i32) {
    %c0_i32 = arith.constant 0 : i32
    %c0_i32_0 = arith.constant 0 : i32
    %c0_i32_1 = arith.constant 0 : i32
    return %c0_i32, %c0_i32_0 : i32, i32
  }
  func.func @transform_11(%arg0: i32) -> (i32, i32) {
    %c0_i32 = arith.constant 0 : i32
    %c0_i32_0 = arith.constant 0 : i32
    %c0_i32_1 = arith.constant 0 : i32
    return %c0_i32, %c0_i32_0 : i32, i32
  }
  func.func @transform_12(%arg0: i32) -> (i32, i32) {
    %c0_i32 = arith.constant 0 : i32
    %c0_i32_0 = arith.constant 0 : i32
    %c0_i32_1 = arith.constant 0 : i32
    return %c0_i32, %c0_i32_0 : i32, i32
  }
  func.func @transform_13(%arg0: i32) -> (i32, i32) {
    %c0_i32 = arith.constant 0 : i32
    %c0_i32_0 = arith.constant 0 : i32
    return %arg0, %c0_i32 : i32, i32
  }
}

module attributes {stable_mosaic.version = 11 : i64} {
  func.func @_deform_out_kernel(%arg0: i32, %arg1: memref<256x128xf32, #tpu.memory_space<vmem>>, %arg2: memref<256x144xbf16, #tpu.memory_space<vmem>>, %arg3: memref<128x144xf32, #tpu.memory_space<vmem>>, %arg4: memref<144x128xbf16, #tpu.memory_space<vmem>>, %arg5: memref<256x128xf32, #tpu.memory_space<vmem>>) attributes {dimension_semantics = [#tpu.dimension_semantics<parallel>], iteration_bounds = array<i64: 2>, scalar_prefetch = 0 : i64, scratch_operands = 0 : i64, tpu.core_type = #tpu.core_type<tc>, window_params = [{transform_indices = @transform_0, window_bounds = array<i64: 256, 128>}, {transform_indices = @transform_1, window_bounds = array<i64: 256, 144>}, {pipeline_mode = #tpu.pipeline_mode<synchronous>, transform_indices = @transform_2, window_bounds = array<i64: 128, 144>}, {pipeline_mode = #tpu.pipeline_mode<synchronous>, transform_indices = @transform_3, window_bounds = array<i64: 144, 128>}, {transform_indices = @transform_4, window_bounds = array<i64: 256, 128>}]} {
    %c0 = arith.constant 0 : index
    %c0_0 = arith.constant 0 : index
    %0 = vector.load %arg1[%c0, %c0_0] : memref<256x128xf32, #tpu.memory_space<vmem>>, vector<256x128xf32>
    %c0_1 = arith.constant 0 : index
    %c0_2 = arith.constant 0 : index
    %1 = vector.load %arg3[%c0_1, %c0_2] : memref<128x144xf32, #tpu.memory_space<vmem>>, vector<128x144xf32>
    %cst = arith.constant dense<0.000000e+00> : vector<256x144xf32>
    %2 = tpu.matmul %0, %1, %cst {dimension_numbers = #tpu.dot_dimension_numbers<[1], [0], [0], [1], [0, 0, 1, 1], [], []>} : vector<256x128xf32>, vector<128x144xf32>, vector<256x144xf32> -> vector<256x144xf32>
    %c0_3 = arith.constant 0 : index
    %c0_4 = arith.constant 0 : index
    %3 = vector.load %arg2[%c0_3, %c0_4] : memref<256x144xbf16, #tpu.memory_space<vmem>>, vector<256x144xbf16>
    %4 = arith.extf %3 : vector<256x144xbf16> to vector<256x144xf32>
    %5 = arith.mulf %2, %4 : vector<256x144xf32>
    %6 = arith.truncf %5 : vector<256x144xf32> to vector<256x144xbf16>
    %c0_5 = arith.constant 0 : index
    %c0_6 = arith.constant 0 : index
    %7 = vector.load %arg4[%c0_5, %c0_6] : memref<144x128xbf16, #tpu.memory_space<vmem>>, vector<144x128xbf16>
    %cst_7 = arith.constant dense<0.000000e+00> : vector<256x128xf32>
    %8 = tpu.matmul %6, %7, %cst_7 {dimension_numbers = #tpu.dot_dimension_numbers<[1], [0], [0], [1], [0, 0, 1, 1], [], []>} : vector<256x144xbf16>, vector<144x128xbf16>, vector<256x128xf32> -> vector<256x128xf32>
    %c0_8 = arith.constant 0 : index
    %c0_9 = arith.constant 0 : index
    %9 = vector.load %arg5[%c0_8, %c0_9] : memref<256x128xf32, #tpu.memory_space<vmem>>, vector<256x128xf32>
    tpu.vector_store %arg5[%c0_8, %c0_9], %8 {strides = array<i32>} : memref<256x128xf32, #tpu.memory_space<vmem>>, vector<256x128xf32>,
    return
  }
  func.func @transform_0(%arg0: i32) -> (i32, i32) {
    %c0_i32 = arith.constant 0 : i32
    %c0_i32_0 = arith.constant 0 : i32
    return %arg0, %c0_i32 : i32, i32
  }
  func.func @transform_1(%arg0: i32) -> (i32, i32) {
    %c0_i32 = arith.constant 0 : i32
    %c0_i32_0 = arith.constant 0 : i32
    return %arg0, %c0_i32 : i32, i32
  }
  func.func @transform_2(%arg0: i32) -> (i32, i32) {
    %c0_i32 = arith.constant 0 : i32
    %c0_i32_0 = arith.constant 0 : i32
    %c0_i32_1 = arith.constant 0 : i32
    return %c0_i32, %c0_i32_0 : i32, i32
  }
  func.func @transform_3(%arg0: i32) -> (i32, i32) {
    %c0_i32 = arith.constant 0 : i32
    %c0_i32_0 = arith.constant 0 : i32
    %c0_i32_1 = arith.constant 0 : i32
    return %c0_i32, %c0_i32_0 : i32, i32
  }
  func.func @transform_4(%arg0: i32) -> (i32, i32) {
    %c0_i32 = arith.constant 0 : i32
    %c0_i32_0 = arith.constant 0 : i32
    return %arg0, %c0_i32 : i32, i32
  }
}

</mosaic_0001>

<bundles_post_ra>
// kernel: tile.20
= control target key start
LH: loop header
LB: loop body
LE: loop exit
PB: predicated region body
PF: predicated region fallthrough
CT: control target
= control target key end

     0   :  { %s22_s0 = inlined_call_operand.vmem [shape: f32[3], index: 0, kind: input, shape index: {}]   ;;  %s23_s1 = inlined_call_operand.vmem [shape: f32[3,3], index: 1, kind: output, shape index: {}]  }
   0x1   :  { %v4_v0 = vld [vmem:[%s22_s0] ss:$0 sm:$0xff] }
   0x2   :  { %5 = vst [vmem:[%s23_s1] sm:$0xf] %v4_v0 }

// kernel: tile.25
= control target key start
LH: loop header
LB: loop body
LE: loop exit
PB: predicated region body
PF: predicated region fallthrough
CT: control target
= control target key end

     0   :  { %vm16_vm0 = vcmask 293888   ;;  %s61_s0 = inlined_call_operand.vmem [shape: f32[36,3,3], index: 0, kind: input, shape index: {}]   ;;  %s62_s1 = inlined_call_operand.vmem [shape: f32[36,9], index: 1, kind: output, shape index: {}]  }
   0x1   :  { %v29_v0 = vld [vmem:[%s61_s0 + $0x8] sm:$0xf]  ;;  %v30_v1 = vld [vmem:[%s61_s0 + $0x4] sm:$0xf]  ;;  %v13_v2 = vld [vmem:[%s61_s0] sm:$0xf] }
   0x2   :  { %8 = vst [vmem:[#allocation0 + $0x10] sm:$0xf] %v29_v0  ;;  %12 = vst [vmem:[#allocation0 + $0x8] sm:$0xf] %v30_v1 }
   0x3   :  { %14 = vst [vmem:[#allocation0] sm:$0xf] %v13_v2 }
   0x9   :  { %v19_v4 = vld [vmem:[#allocation0 + $0x8] sm:$0x7]   ;;  %v24_v5 = vld [vmem:[#allocation0 + $0x10] sm:$0x7]  }
   0xa   :  { %v15_v3 = vld [vmem:[#allocation0] sm:$0x7]   ;;  %31 = vst.msk [vmem:[%s62_s1 + $0x3] sm:$0x7] %vm16_vm0, %v19_v4   ;;  %32 = vst.msk [vmem:[%s62_s1 + $0x6] sm:$0x7] %vm16_vm0, %v24_v5  }
   0xb   :  { %17 = vst.msk [vmem:[%s62_s1] sm:$0x7] %vm16_vm0, %v15_v3  }

// kernel: tile.28
= control target key start
LH: loop header
LB: loop body
LE: loop exit
PB: predicated region body
PF: predicated region fallthrough
CT: control target
= control target key end

     0   :  { %2 = vsyncpa [#allocation1], 0  ;;  %s44_s6 = smov [#allocation0]   ;;  %s70_s0 = inlined_call_operand.hbm [shape: f32[3], index: 0, kind: input, shape index: {}]   ;;  %s71_s1 = inlined_call_operand.vmem [shape: f32[3,3], index: 1, kind: output, shape index: {}]  }
   0x1   :  { %s9_s7 = sshll.u32 %s44_s6, 4  ;;  %s20_s10 = scalar_lea.hbm %s70_s0, 16  ;;  %s10_s7 = int_to_ptr.vmem [resolvable:$true] %s9_s7 }
   0x2   :  { %p21_p0 = scmp.ne.s32.totalorder %s70_s0, %s20_s10  ;;  %p24_p1 = scmp.lt.u32.totalorder %s20_s10, %s70_s0 }
   0x4   :  { %p26_p2 = pnand %p24_p1, %p21_p0 }
   0x6   :  { %29 = shalt.err (!%p26_p2)
}
   0x7   :  { %s30_s15 = scalar_lea.vmem %s10_s7, 16  ;;  %s34_s16 = scalar_lea.vmem %s10_s7, 32 }
   0x8   :  { %p31_p3 = scmp.ne.s32.totalorder %s10_s7, %s30_s15  ;;  %p35_p4 = scmp.lt.s32.totalorder %s10_s7, %s10_s7 }
   0x9   :  { %p36_p5 = scmp.lt.s32.totalorder %s34_s16, %s30_s15 }
   0xb   :  { %p37_p6 = por %p36_p5, %p35_p4 }
   0xd   :  { %p38_p7 = pnand %p37_p6, %p31_p3 }
   0xf   :  { %41 = shalt.err (!%p38_p7)
}
  0x10   :  { %12 = dma.hbm_to_vmem [thread:$0]  %s70_s0, 16, %s10_s7, [#allocation1]  }
  0x11   :  { %42 = dma.done.wait [#allocation1], 16  }
  0x12   :  { %43 = vsyncadd [#allocation1], 4294967280  ;;  %v16_v0 = vld [vmem:[#allocation0] ss:$0 sm:$0xff] }
  0x13   :  { %17 = vst [vmem:[%s71_s1] sm:$0xf] %v16_v0 }
  0x14   :  { %18 = vsyncpa [#allocation1], 1 }

// kernel: _lambda_.2
= control target key start
LH: loop header
LB: loop body
LE: loop exit
PB: predicated region body
PF: predicated region fallthrough
CT: control target
= control target key end

     0   :  { %s15051_s0 = inlined_call_operand.vmem [shape: f32[512,36], index: 0, kind: input, shape index: {}]   ;;  %s15052_s1 = inlined_call_operand.vmem [shape: f32[512,1], index: 1, kind: input, shape index: {}]   ;;  %s15053_s2 = inlined_call_operand.vmem [shape: f32[512,1], index: 2, kind: input, shape index: {}]   ;;  %s15054_s3 = inlined_call_operand.vmem [shape: f32[1,9], index: 3, kind: input, shape index: {}]   ;;  %s15055_s4 = inlined_call_operand.vmem [shape: f32[1,9], index: 4, kind: input, shape index: {}]   ;;  %s15056_s5 = inlined_call_operand.hbm [shape: f32[36,9], index: 5, kind: input, shape index: {}]   ;;  %s15057_s6 = inlined_call_operand.hbm [shape: f32[36,9], index: 6, kind: input, shape index: {}]   ;;  %s15058_s7 = inlined_call_operand.hbm [shape: f32[36,9], index: 7, kind: input, shape index: {}]   ;;  %s15059_s8 = inlined_call_operand.vmem [shape: f32[36,9], index: 8, kind: input, shape index: {}]   ;;  %s15060_s9 = inlined_call_operand.hbm [shape: f32[1,9], index: 9, kind: input, shape index: {}]   ;;  %s15061_s10 = inlined_call_operand.hbm [shape: f32[1,9], index: 10, kind: input, shape index: {}]   ;;  %s15062_s11 = inlined_call_operand.hbm [shape: f32[1,9], index: 11, kind: input, shape index: {}]   ;;  %s15063_s12 = inlined_call_operand.vmem [shape: f32[1,9], index: 12, kind: input, shape index: {}]   ;;  %s15064_s13 = inlined_call_operand.vmem [shape: f32[512,128], index: 13, kind: output, shape index: {}]  }
   0x1   :  { %15548 = sst [smem:[#allocation227_spill]] %s15055_s4 }
   0x2   :  { %15549 = sst [smem:[#allocation228_spill]] %s15063_s12 }
   0x3   :  { %15550 = sst [smem:[#allocation229_spill]] %s15064_s13 }
   0x4   :  { %18 = vsyncpa [#allocation3], 0 }
   0x5   :  { %19 = vsyncpa [#allocation5], 0 }
   0x6   :  { %20 = vsyncpa [#allocation8], 0 }
   0x7   :  { %21 = vsyncpa [#allocation11], 0  ;;  %s9888_s25 = smov 0  }
   0x8 LB: > { %s15065_s26 = sadd.s32 4294967295, %s9805_s25   ;;  %p7357_p0 = scmp.ge.s32.totalorder %s9805_s25, 1  ;;  %s9805_s25 = sphi %s9888_s25, %s27_s25  }
   0x9   : > { %p346_p1 = scmp.lt.s32.totalorder %s9805_s25, 3  ;;  %p9898_p2 = scmp.eq.s32.totalorder %s15065_s26, 0 }
   0xa   : > { %s9807_s29 = smov [#allocation4]   ;;  %s9808_s14 = smov [#allocation7]  }
   0xb   : > { %s15551_s27 = scalar_select %p9898_p2, 1, 0 }
   0xc   : > { %p9902_p3 = pnand %p7357_p0, %p346_p1  ;;  %s377_s30 = sshll.u32 %s9807_s29, 4  ;;  %s9906_s30 = int_to_ptr.vmem [resolvable:$true] %s377_s30 }
   0xd   : > { %s407_s15 = sshll.u32 %s9808_s14, 4  ;;  %s9809_s17 = smov [#allocation2]   ;;  %s9910_s15 = int_to_ptr.vmem [resolvable:$true] %s407_s15 }
   0xe   : > { %s15552_s28 = scalar_select %p9902_p3, 1, 0 }
   0xf   : > { %p9302_p4 = pneg %p9902_p3  ;;  %s364_s18 = sshll.u32 %s9809_s17, 4  ;;  %s9918_s18 = int_to_ptr.vmem [resolvable:$true] %s364_s18 }
  0x10   : > { %s9810_s19 = smov [#allocation6]   ;;  %s9615_s23 = scalar_lea.hbm %s15057_s6, 640 }
  0x11   : > { %p9914_p5 = pnand %p9898_p2, %p9302_p4  ;;  %s9920_s20 = sshll.u32 %s9810_s19, 4  ;;  %s391_s20 = int_to_ptr.vmem [resolvable:$true] %s9920_s20 }
  0x12   : > { %p9616_p6 = scmp.ne.s32.totalorder %s15057_s6, %s9615_s23  ;;  %p9622_p10 = scmp.lt.u32.totalorder %s9615_s23, %s15057_s6 }
  0x13   : > { %p9930_p7 = pneg %p9914_p5 }
  0x15   : > { %p9618_p8 = pnand %p9930_p7, %p9616_p6 }
  0x17   : > { %p9619_p9 = pneg %p9618_p8 }
  0x19   : > { %p9624_p11 = pnand %p9622_p10, %p9619_p9 }
  0x1b   : > { %9627 = shalt.err (!%p9624_p11)
}
  0x1c   : > { %s9628_s21 = scalar_lea.vmem %s9906_s30, 640  ;;  %p9636_p1 = scmp.lt.s32.totalorder %s9906_s30, %s9906_s30 }
  0x1d   : > { %p9629_p12 = scmp.ne.s32.totalorder %s9906_s30, %s9628_s21  ;;  %p9637_p4 = scmp.lt.s32.totalorder %s9628_s21, %s9628_s21 }
  0x1f   : > { %p9631_p13 = pnand %p9629_p12, %p9930_p7  ;;  %p9638_p6 = por %p9637_p4, %p9636_p1 }
  0x21   : > { %p9632_p0 = pneg %p9631_p13 }
  0x23   : > { %p9639_p8 = pnand %p9638_p6, %p9632_p0 }
  0x25   : > { %9642 = shalt.err (!%p9639_p8)
}
  0x26   : > { %s9811_s22 = smov 128   ;;  %s9812_s23 = smov 8  }
  0x27   : > { %9308 = dma.hbm_to_vmem [thread:$0]  (!%p9914_p5), %s15057_s6, 640, %s9906_s30, [#allocation5], %s9811_s22, %s9811_s22, %s9812_s23  }
  0x28   : > { %s9643_s21 = scalar_lea.hbm %s15060_s9, 16 }
  0x29   : > { %p9644_p9 = scmp.ne.s32.totalorder %s15060_s9, %s9643_s21  ;;  %p9650_p12 = scmp.lt.u32.totalorder %s9643_s21, %s15060_s9 }
  0x2b   : > { %p9646_p10 = pnand %p9644_p9, %p9930_p7 }
  0x2d   : > { %p9647_p11 = pneg %p9646_p10 }
  0x2f   : > { %p9652_p13 = pnand %p9650_p12, %p9647_p11 }
  0x31   : > { %9655 = shalt.err (!%p9652_p13)
}
  0x32   : > { %s9656_s30 = scalar_lea.vmem %s9910_s15, 16  ;;  %s9663_s13 = scalar_lea.vmem %s9910_s15, 32 }
  0x33   : > { %p9657_p0 = scmp.ne.s32.totalorder %s9910_s15, %s9656_s30  ;;  %p9664_p6 = scmp.lt.s32.totalorder %s9910_s15, %s9910_s15 }
  0x34   : > { %p9665_p8 = scmp.lt.s32.totalorder %s9663_s13, %s9656_s30 }
  0x35   : > { %p9659_p1 = pnand %p9657_p0, %p9930_p7 }
  0x36   : > { %p9666_p9 = por %p9665_p8, %p9664_p6 }
  0x37   : > { %p9660_p4 = pneg %p9659_p1 }
  0x39   : > { %p9667_p10 = pnand %p9666_p9, %p9660_p4 }
  0x3b   : > { %9670 = shalt.err (!%p9667_p10)
}
  0x3c   : > { %9314 = dma.hbm_to_vmem [thread:$0]  (!%p9914_p5), %s15060_s9, 16, %s9910_s15, [#allocation8]  }
  0x3d   : > { %s9671_s29 = scalar_lea.hbm %s15056_s5, 640 }
  0x3e   : > { %p9672_p11 = scmp.ne.s32.totalorder %s15056_s5, %s9671_s29  ;;  %p9678_p0 = scmp.lt.u32.totalorder %s9671_s29, %s15056_s5 }
  0x40   : > { %p9674_p12 = pnand %p9672_p11, %p9930_p7 }
  0x42   : > { %p9675_p13 = pneg %p9674_p12 }
  0x44   : > { %p9680_p1 = pnand %p9678_p0, %p9675_p13 }
  0x46   : > { %9683 = shalt.err (!%p9680_p1)
}
  0x47   : > { %s9684_s15 = scalar_lea.vmem %s9918_s18, 640  ;;  %p9692_p9 = scmp.lt.s32.totalorder %s9918_s18, %s9918_s18 }
  0x48   : > { %p9685_p4 = scmp.ne.s32.totalorder %s9918_s18, %s9684_s15  ;;  %p9693_p10 = scmp.lt.s32.totalorder %s9684_s15, %s9684_s15 }
  0x4a   : > { %p9687_p6 = pnand %p9685_p4, %p9930_p7  ;;  %p9694_p11 = por %p9693_p10, %p9692_p9 }
  0x4c   : > { %p9688_p8 = pneg %p9687_p6 }
  0x4e   : > { %p9695_p12 = pnand %p9694_p11, %p9688_p8 }
  0x50   : > { %9698 = shalt.err (!%p9695_p12)
}
  0x51   : > { %9305 = dma.hbm_to_vmem [thread:$0]  (!%p9914_p5), %s15056_s5, 640, %s9918_s18, [#allocation3], %s9811_s22, %s9811_s22, %s9812_s23  }
  0x52   : > { %s9699_s24 = scalar_lea.hbm %s15058_s7, 640 }
  0x53   : > { %p9700_p13 = scmp.ne.s32.totalorder %s15058_s7, %s9699_s24  ;;  %p9706_p4 = scmp.lt.u32.totalorder %s9699_s24, %s15058_s7 }
  0x55   : > { %p9702_p0 = pnand %p9700_p13, %p9930_p7 }
  0x57   : > { %p9703_p1 = pneg %p9702_p0 }
  0x59   : > { %p9708_p6 = pnand %p9706_p4, %p9703_p1 }
  0x5b   : > { %9711 = shalt.err (!%p9708_p6)
}
  0x5c   : > { %s9712_s30 = scalar_lea.vmem %s391_s20, 640  ;;  %p9720_p11 = scmp.lt.s32.totalorder %s391_s20, %s391_s20 }
  0x5d   : > { %p9713_p8 = scmp.ne.s32.totalorder %s391_s20, %s9712_s30  ;;  %p9721_p12 = scmp.lt.s32.totalorder %s9712_s30, %s9712_s30 }
  0x5f   : > { %p9715_p9 = pnand %p9713_p8, %p9930_p7  ;;  %p9722_p2 = por %p9721_p12, %p9720_p11 }
  0x61   : > { %p9716_p10 = pneg %p9715_p9 }
  0x63   : > { %p9723_p3 = pnand %p9722_p2, %p9716_p10 }
  0x65   : > { %9726 = shalt.err (!%p9723_p3)
}
  0x66   : > { %9311 = dma.hbm_to_vmem [thread:$0]  (!%p9914_p5), %s15058_s7, 640, %s391_s20, [#allocation5], %s9811_s22, %s9811_s22, %s9812_s23  }
  0x67   : > { %s9813_s13 = smov [#allocation9]   ;;  %s9814_s12 = smov [#allocation10]  }
  0x68   : > { %s418_s4 = sshll.u32 %s9813_s13, 4  ;;  %s429_s26 = sshll.u32 %s9814_s12, 4  ;;  %s419_s4 = int_to_ptr.vmem [resolvable:$true] %s418_s4  ;;  %s430_s26 = int_to_ptr.vmem [resolvable:$true] %s429_s26 }
  0x69   : > { %s9727_s17 = scalar_lea.hbm %s15061_s10, 16 }
  0x6a   : > { %p9728_p2 = scmp.ne.s32.totalorder %s15061_s10, %s9727_s17  ;;  %p9734_p0 = scmp.lt.u32.totalorder %s9727_s17, %s15061_s10 }
  0x6c   : > { %p9730_p3 = pnand %p9728_p2, %p9930_p7 }
  0x6e   : > { %p9731_p13 = pneg %p9730_p3 }
  0x70   : > { %p9736_p1 = pnand %p9734_p0, %p9731_p13 }
  0x72   : > { %9739 = shalt.err (!%p9736_p1)
}
  0x73   : > { %s9740_s20 = scalar_lea.vmem %s419_s4, 16  ;;  %s9747_s22 = scalar_lea.vmem %s419_s4, 32 }
  0x74   : > { %p9741_p4 = scmp.ne.s32.totalorder %s419_s4, %s9740_s20  ;;  %p9748_p9 = scmp.lt.s32.totalorder %s419_s4, %s419_s4 }
  0x75   : > { %p9749_p10 = scmp.lt.s32.totalorder %s9747_s22, %s9740_s20 }
  0x76   : > { %p9743_p6 = pnand %p9741_p4, %p9930_p7 }
  0x77   : > { %p9750_p11 = por %p9749_p10, %p9748_p9 }
  0x78   : > { %p9744_p8 = pneg %p9743_p6 }
  0x7a   : > { %p9751_p12 = pnand %p9750_p11, %p9744_p8 }
  0x7c   : > { %9754 = shalt.err (!%p9751_p12)
}
  0x7d   : > { %9317 = dma.hbm_to_vmem [thread:$0]  (!%p9914_p5), %s15061_s10, 16, %s419_s4, [#allocation8]  }
  0x7e   : > { %s9755_s24 = scalar_lea.hbm %s15062_s11, 16 }
  0x7f   : > { %p9756_p2 = scmp.ne.s32.totalorder %s15062_s11, %s9755_s24  ;;  %p9762_p0 = scmp.lt.u32.totalorder %s9755_s24, %s15062_s11 }
  0x81   : > { %p9758_p3 = pnand %p9756_p2, %p9930_p7 }
  0x83   : > { %p9759_p13 = pneg %p9758_p3 }
  0x85   : > { %p9764_p1 = pnand %p9762_p0, %p9759_p13 }
  0x87   : > { %9767 = shalt.err (!%p9764_p1)
}
  0x88   : > { %s9768_s30 = scalar_lea.vmem %s430_s26, 16  ;;  %s9775_s4 = scalar_lea.vmem %s430_s26, 32 }
  0x89   : > { %p9769_p4 = scmp.ne.s32.totalorder %s430_s26, %s9768_s30  ;;  %p9776_p9 = scmp.lt.s32.totalorder %s430_s26, %s430_s26 }
  0x8a   : > { %p9777_p10 = scmp.lt.s32.totalorder %s9775_s4, %s9768_s30 }
  0x8b   : > { %p9771_p6 = pnand %p9769_p4, %p9930_p7 }
  0x8c   : > { %p9778_p11 = por %p9777_p10, %p9776_p9 }
  0x8d   : > { %p9772_p8 = pneg %p9771_p6 }
  0x8f   : > { %p9779_p12 = pnand %p9778_p11, %p9772_p8 }
  0x91   : > { %9782 = shalt.err (!%p9779_p12)
}
  0x92   : > { %9320 = dma.hbm_to_vmem [thread:$0]  (!%p9914_p5), %s15062_s11, 16, %s430_s26, [#allocation11]  }
  0x93   : > { %p15555_p2 = scmp.ne.s32.totalorder %s15552_s28, 0 }
  0x95   : > { %472 = sbr.rel (%p15555_p2) target bundleno = 1532 (0x5fc), region = 72 }
  0x9c   : > { %p15556_p3 = scmp.ne.s32.totalorder %s15551_s27, 0 }
  0x9e   : > { %9788 = dma.done.wait (%p15556_p3), [#allocation3], 640  }
  0x9f   : > { %9790 = vsyncadd (%p15556_p3), [#allocation3], 4294966656 }
  0xa0   : > { %9792 = dma.done.wait (%p15556_p3), [#allocation5], 1280  }
  0xa1   : > { %9794 = vsyncadd (%p15556_p3), [#allocation5], 4294966016 }
  0xa2   : > { %9796 = dma.done.wait (%p15556_p3), [#allocation8], 32  }
  0xa3   : > { %9798 = vsyncadd (%p15556_p3), [#allocation8], 4294967264 }
  0xa4   : > { %9800 = dma.done.wait (%p15556_p3), [#allocation11], 16  }
  0xa5   : > { %9802 = vsyncadd (%p15556_p3), [#allocation11], 4294967280  ;;  %s15557_s28 = sadd.s32 4294967295, %s9805_s25   ;;  %v9815_v0 = vmov 0   ;;  %vm614_vm0 = vcmask 293888   ;;  %v602_v1 = vld [vmem:[#allocation2] sm:$0xff] }
  0xa6   : > { %s7372_s16 = sshll.u32 %s15557_s28, 5  ;;  %9353 = vset.pattern.permute.xlu1 %v9815_v0  ;;  %9352 = vset.pattern.permute.xlu0 %v9815_v0  ;;  %v603_v2 = vld [vmem:[#allocation2 + $0x8] sm:$0xff]  ;;  %v604_v3 = vld [vmem:[#allocation2 + $0x10] sm:$0xff]  ;;  %v605_v5 = vld [vmem:[#allocation2 + $0x18] sm:$0xff]  ;;  %vm711_vm1 = vcmask 1043456   ;;  %vm4446_vm4 = vcmask 1040384  }
  0xa7   : > { %p547_p5 = scmp.lt.s32.totalorder %s7372_s16, 63  ;;  %v8972_v4 = vpack.c.bf16 %v603_v2, %v602_v1  ;;  %v8976_v7 = vpack.c.bf16 %v605_v5, %v604_v3  ;;  %v606_v8 = vld [vmem:[#allocation2 + $0x20] sm:$0xf]  ;;  %v940_v9 = vld [vmem:[#allocation4] sm:$0xff]  ;;  %v941_v10 = vld [vmem:[#allocation4 + $0x8] sm:$0xff]  ;;  %s16718_s27 = sld [smem:[#allocation229_spill]] }
  0xa8   : > { %v942_v12 = vld [vmem:[#allocation4 + $0x10] sm:$0xff]  ;;  %v943_v13 = vld [vmem:[#allocation4 + $0x18] sm:$0xff]  ;;  %v8980_v15 = vpack.c.bf16 %v941_v10, %v940_v9  ;;  %v944_v23 = vld [vmem:[#allocation4 + $0x20] sm:$0xf] }
  0xa9   : > { %s16722_s16 = smov (!%p547_p5, %s7372_s16), 63  ;;  %8973 = vmatprep.subr.bf16.mxu1 %v8972_v4  ;;  %v8984_v18 = vpack.c.bf16 %v943_v13, %v942_v12  ;;  %v1180_v24 = vld [vmem:[#allocation6] sm:$0xff]  ;;  %v1181_v26 = vld [vmem:[#allocation6 + $0x8] sm:$0xff] }
  0xaa   : > { %s10082_s14 = sshll.u32 %s16722_s16, 3  ;;  %8975 = vmatpush3.bf16.msra.mxu1 %v8972_v4  ;;  %v10140_v28 = vpack.c.bf16 %v1181_v26, %v1180_v24 }
  0xab   : > { %s10088_s23 = scalar_lea.vmem %s15051_s0, %s10082_s14  ;;  %s10099_s13 = scalar_lea.vmem %s15052_s1, %s10082_s14  ;;  %8977 = vmatprep.subr.bf16.mxu1 %v8976_v7 }
  0xac   : > { %v10091_v6 = vld [vmem:[%s10088_s23] sm:$0xff]  ;;  %s10105_s29 = scalar_lea.vmem %s15053_s2, %s10082_s14  ;;  %v1919_v11 = vld [vmem:[%s10099_s13 + $0x8] sm:$0xff]  ;;  %v10114_v17 = vld [vmem:[%s10088_s23 + $0x10] sm:$0xff] }
  0xad   : > { %8334 = vmatprep.mubr.msk.f32.mxu1 %vm614_vm0, %v10091_v6  ;;  %1957 = vperm.xlu1 %9353, %v1919_v11   ;;  %v2245_v14 = vld [vmem:[%s10105_s29 + $0x8] sm:$0xff]  ;;  %v1920_v19 = vld [vmem:[%s10099_s13 + $0x10] sm:$0xff]  ;;  %v10123_v20 = vld [vmem:[%s10088_s23 + $0x18] sm:$0xff]  ;;  %s14982_s15 = scalar_lea.vmem %s16718_s27, %s10082_s14 }
  0xae   : > { %8979 = vmatpush3.bf16.msra.mxu1 %v8976_v7  ;;  %v10111_v16 = vld [vmem:[%s10088_s23 + $0x8] sm:$0xff]  ;;  %v10126_v21 = vld [vmem:[%s10088_s23 + $0x20] sm:$0xff]  ;;  %v1921_v22 = vld [vmem:[%s10099_s13 + $0x18] sm:$0xff] }
  0xaf   : > { %8332 = vmatprep.subr.msk.mxu1 %vm711_vm1, %v606_v8  ;;  %v10134_v25 = vld [vmem:[%s10088_s23 + $0x28] sm:$0xff]  ;;  %v10137_v27 = vld [vmem:[%s10088_s23 + $0x30] sm:$0xff]  ;;  %v1922_v29 = vld [vmem:[%s10099_s13 + $0x20] sm:$0xff] }
  0xb0   : > { %v1918_v30 = vld [vmem:[%s10099_s13] sm:$0xff]  ;;  %v10149_v31 = vld [vmem:[%s10088_s23 + $0x38] sm:$0xff]  ;;  %v1923_v34 = vld [vmem:[%s10099_s13 + $0x28] sm:$0xff] }
  0xb1   : > { %2283 = vperm.xlu1 %9353, %v2245_v14   ;;  %1952 = vperm.xlu0 %9352, %v1918_v30   ;;  %v2244_v32 = vld [vmem:[%s10105_s29] sm:$0xff]  ;;  %v10163_v35 = vld [vmem:[%s10088_s23 + $0x48] sm:$0xff]  ;;  %v2246_v36 = vld [vmem:[%s10105_s29 + $0x10] sm:$0xff] }
  0xb2   : > { %8333 = vmatpush3.msk.msra.mxu1 %vm711_vm1, %v606_v8  ;;  %v10154_v33 = vld [vmem:[%s10088_s23 + $0x40] sm:$0xff]  ;;  %v10167_v37 = vld [vmem:[%s10088_s23 + $0x50] sm:$0xff]  ;;  %v10175_v39 = vld [vmem:[%s10088_s23 + $0x58] sm:$0xff] }
  0xb3   : > { %8335 = vmatmul.mubr.msk.f32.vlgmr.msra.gmra.mrb[0].mxu1 %vm614_vm0, %v10111_v16  ;;  %8981 = vmatprep.subr.bf16.mxu1 %v8980_v15  ;;  %v1924_v38 = vld [vmem:[%s10099_s13 + $0x30] sm:$0xff]  ;;  %v2247_v40 = vld [vmem:[%s10105_s29 + $0x18] sm:$0xff]  ;;  %v10179_v41 = vld [vmem:[%s10088_s23 + $0x60] sm:$0xff] }
  0xb4   : > { %8983 = vmatpush3.bf16.msra.mxu1 %v8980_v15  ;;  %8337 = vmatprep.mubr.msk.f32.mxu1 %vm614_vm0, %v10114_v17  ;;  %v1925_v42 = vld [vmem:[%s10099_s13 + $0x38] sm:$0xff]  ;;  %v10187_v43 = vld [vmem:[%s10088_s23 + $0x68] sm:$0xff]  ;;  %v2248_v44 = vld [vmem:[%s10105_s29 + $0x20] sm:$0xff] }
  0xb5   : > { %8985 = vmatprep.subr.bf16.mxu1 %v8984_v18  ;;  %1962 = vperm.xlu1 %9353, %v1920_v19   ;;  %v10191_v45 = vld [vmem:[%s10088_s23 + $0x70] sm:$0xff]  ;;  %v1926_v46 = vld [vmem:[%s10099_s13 + $0x40] sm:$0xff]  ;;  %v10199_v47 = vld [vmem:[%s10088_s23 + $0x78] sm:$0xff] }
  0xb6   : > { %2278 = vperm.xlu0 %9352, %v2244_v32   ;;  %v2249_v48 = vld [vmem:[%s10105_s29 + $0x28] sm:$0xff]  ;;  %v10203_v49 = vld [vmem:[%s10088_s23 + $0x80] sm:$0xff]  ;;  %v2250_v52 = vld [vmem:[%s10105_s29 + $0x30] sm:$0xff] }
  0xb7   : > { %8338 = vmatmul.mubr.msk.f32.gmra.mrb[2].mxu1 %vm614_vm0, %v10123_v20  ;;  %v1927_v50 = vld [vmem:[%s10099_s13 + $0x48] sm:$0xff]  ;;  %v10215_v53 = vld [vmem:[%s10088_s23 + $0x90] sm:$0xff]  ;;  %v10223_v55 = vld [vmem:[%s10088_s23 + $0x98] sm:$0xff] }
  0xb8   : > { %8340 = vmatprep.mubr.msk.f32.mxu1 %vm614_vm0, %v10126_v21  ;;  %8987 = vmatpush3.bf16.msra.mxu1 %v8984_v18  ;;  %v10211_v51 = vld [vmem:[%s10088_s23 + $0x88] sm:$0xff]  ;;  %v1928_v54 = vld [vmem:[%s10099_s13 + $0x50] sm:$0xff]  ;;  %v2251_v56 = vld [vmem:[%s10105_s29 + $0x38] sm:$0xff] }
  0xb9   : > { %1967 = vperm.xlu1 %9353, %v1921_v22   ;;  %8390 = vmatprep.subr.msk.mxu1 %vm711_vm1, %v944_v23  ;;  %v10227_v57 = vld [vmem:[%s10088_s23 + $0xa0] sm:$0xff]  ;;  %v1929_v58 = vld [vmem:[%s10099_s13 + $0x58] sm:$0xff]  ;;  %v10235_v59 = vld [vmem:[%s10088_s23 + $0xa8] sm:$0xff] }
  0xba   : > { %2288 = vperm.xlu0 %9352, %v2246_v36   ;;  %v2252_v60 = vld [vmem:[%s10105_s29 + $0x40] sm:$0xff]  ;;  %v10239_v61 = vld [vmem:[%s10088_s23 + $0xb0] sm:$0xff]  ;;  %v10247_v63 = vld [vmem:[%s10088_s23 + $0xb8] sm:$0xff] }
  0xbb   : > { %8341 = vmatmul.mubr.msk.f32.gmra.mrb[4].mxu1 %vm614_vm0, %v10134_v25  ;;  %v1930_v62 = vld [vmem:[%s10099_s13 + $0x60] sm:$0xff]  ;;  %v2253_v0 = vld [vmem:[%s10105_s29 + $0x48] sm:$0xff]  ;;  %v2254_v4 = vld [vmem:[%s10105_s29 + $0x50] sm:$0xff] }
  0xbc   : > { %8343 = vmatprep.mubr.msk.f32.mxu1 %vm614_vm0, %v10137_v27  ;;  %8391 = vmatpush3.msk.msra.mxu1 %vm711_vm1, %v944_v23  ;;  %v10251_v1 = vld [vmem:[%s10088_s23 + $0xc0] sm:$0xff]  ;;  %v1931_v2 = vld [vmem:[%s10099_s13 + $0x68] sm:$0xff]  ;;  %v10263_v5 = vld [vmem:[%s10088_s23 + $0xd0] sm:$0xff] }
  0xbd   : > { %1972 = vperm.xlu1 %9353, %v1922_v29   ;;  %8989 = vmatprep.subr.bf16.mxu1 %v10140_v28  ;;  %v10259_v3 = vld [vmem:[%s10088_s23 + $0xc8] sm:$0xff]  ;;  %v1932_v7 = vld [vmem:[%s10099_s13 + $0x70] sm:$0xff]  ;;  %v10271_v8 = vld [vmem:[%s10088_s23 + $0xd8] sm:$0xff] }
  0xbe   : > { %2293 = vperm.xlu0 %9352, %v2247_v40   ;;  %v2255_v9 = vld [vmem:[%s10105_s29 + $0x58] sm:$0xff]  ;;  %v10275_v10 = vld [vmem:[%s10088_s23 + $0xe0] sm:$0xff]  ;;  %v10283_v12 = vld [vmem:[%s10088_s23 + $0xe8] sm:$0xff] }
  0xbf   : > { %8344 = vmatmul.mubr.msk.f32.gmra.mrb[6].mxu1 %vm614_vm0, %v10149_v31  ;;  %v1933_v11 = vld [vmem:[%s10099_s13 + $0x78] sm:$0xff]  ;;  %v2256_v13 = vld [vmem:[%s10105_s29 + $0x60] sm:$0xff]  ;;  %v10287_v14 = vld [vmem:[%s10088_s23 + $0xf0] sm:$0xff] }
  0xc0   : > { %8346 = vmatprep.mubr.msk.f32.mxu1 %vm614_vm0, %v10154_v33  ;;  %v1934_v15 = vld [vmem:[%s10099_s13 + $0x80] sm:$0xff]  ;;  %v10295_v18 = vld [vmem:[%s10088_s23 + $0xf8] sm:$0xff]  ;;  %v2257_v19 = vld [vmem:[%s10105_s29 + $0x68] sm:$0xff] }
  0xc1   : > { %1977 = vperm.xlu1 %9353, %v1923_v34   ;;  %v1182_v22 = vld [vmem:[#allocation6 + $0x10] sm:$0xff]  ;;  %v1183_v23 = vld [vmem:[#allocation6 + $0x18] sm:$0xff]  ;;  %v2258_v26 = vld [vmem:[%s10105_s29 + $0x70] sm:$0xff] }
  0xc2   : > { %2298 = vperm.xlu0 %9352, %v2248_v44   ;;  %v1935_v24 = vld [vmem:[%s10099_s13 + $0x88] sm:$0xff]  ;;  %v8992_v29 = vpack.c.bf16 %v1183_v23, %v1182_v22  ;;  %v1936_v30 = vld [vmem:[%s10099_s13 + $0x90] sm:$0xff]  ;;  %v2259_v32 = vld [vmem:[%s10105_s29 + $0x78] sm:$0xff] }
  0xc3   : > { %8347 = vmatmul.mubr.msk.f32.gmra.mrb[8].mxu1 %vm614_vm0, %v10163_v35  ;;  %v1937_v34 = vld [vmem:[%s10099_s13 + $0x98] sm:$0xff]  ;;  %v1184_v36 = vld [vmem:[#allocation6 + $0x20] sm:$0xf]  ;;  %v1421_v40 = vld [vmem:[%s15059_s8 + $0x8] sm:$0xff] }
  0xc4   : > { %8349 = vmatprep.mubr.msk.f32.mxu1 %vm614_vm0, %v10167_v37  ;;  %v1938_v44 = vld [vmem:[%s10099_s13 + $0xa0] sm:$0xff]  ;;  %v2270_v22 = vld [vmem:[%s10105_s29 + $0xd0] sm:$0xff] }
  0xc5   : > { %1982 = vperm.xlu1 %9353, %v1924_v38   ;;  %v1420_v38 = vld [vmem:[%s15059_s8] sm:$0xff]  ;;  %v1948_v23 = vld [vmem:[%s10099_s13 + $0xf0] sm:$0xff] }
  0xc6   : > { %2303 = vperm.xlu0 %9352, %v2249_v48   ;;  %v1939_v48 = vld [vmem:[%s10099_s13 + $0xa8] sm:$0xff] }
  0xc7   : > { %8350 = vmatmul.mubr.msk.f32.gmra.mrb[10].mxu1 %vm614_vm0, %v10175_v39 }
  0xc8   : > { %8352 = vmatprep.mubr.msk.f32.mxu1 %vm614_vm0, %v10179_v41 }
  0xc9   : > { %1987 = vperm.xlu1 %9353, %v1925_v42   ;;  %v10324_v42 = vpack.c.bf16 %v1421_v40, %v1420_v38  ;;  %v2275_v40 = vld [vmem:[%s10105_s29 + $0xf8] sm:$0xff] }
  0xca   : > { %2308 = vperm.xlu0 %9352, %v2250_v52   ;;  %v1940_v52 = vld [vmem:[%s10099_s13 + $0xb0] sm:$0xff] }
  0xcb   : > { %8353 = vmatmul.mubr.msk.f32.gmra.mrb[12].mxu1 %vm614_vm0, %v10187_v43 }
  0xcc   : > { %8355 = vmatprep.mubr.msk.f32.mxu1 %vm614_vm0, %v10191_v45 }
  0xcd   : > { %1992 = vperm.xlu1 %9353, %v1926_v46   ;;  %v2261_v46 = vld [vmem:[%s10105_s29 + $0x88] sm:$0xff] }
  0xce   : > { %2313 = vperm.xlu0 %9352, %v2251_v56   ;;  %v1941_v56 = vld [vmem:[%s10099_s13 + $0xb8] sm:$0xff] }
  0xcf   : > { %8356 = vmatmul.mubr.msk.f32.gmra.mrb[14].mxu1 %vm614_vm0, %v10199_v47 }
  0xd0   : > { %8358 = vmatprep.mubr.msk.f32.mxu1 %vm614_vm0, %v10203_v49 }
  0xd1   : > { %1997 = vperm.xlu1 %9353, %v1927_v50   ;;  %v2262_v50 = vld [vmem:[%s10105_s29 + $0x90] sm:$0xff] }
  0xd2   : > { %2318 = vperm.xlu0 %9352, %v2252_v60   ;;  %v1942_v60 = vld [vmem:[%s10099_s13 + $0xc0] sm:$0xff] }
  0xd3   : > { %8359 = vmatmul.mubr.msk.f32.gmra.mrb[16].mxu1 %vm614_vm0, %v10211_v51 }
  0xd4   : > { %8361 = vmatprep.mubr.msk.f32.mxu1 %vm614_vm0, %v10215_v53 }
  0xd5   : > { %2002 = vperm.xlu1 %9353, %v1928_v54   ;;  %v2263_v54 = vld [vmem:[%s10105_s29 + $0x98] sm:$0xff] }
  0xd6   : > { %2323 = vperm.xlu0 %9352, %v2253_v0   ;;  %v1943_v0 = vld [vmem:[%s10099_s13 + $0xc8] sm:$0xff] }
  0xd7   : > { %8362 = vmatmul.mubr.msk.f32.gmra.mrb[18].mxu1 %vm614_vm0, %v10223_v55 }
  0xd8   : > { %8364 = vmatprep.mubr.msk.f32.mxu1 %vm614_vm0, %v10227_v57 }
  0xd9   : > { %2007 = vperm.xlu1 %9353, %v1929_v58   ;;  %v2264_v58 = vld [vmem:[%s10105_s29 + $0xa0] sm:$0xff] }
  0xda   : > { %2328 = vperm.xlu0 %9352, %v2254_v4   ;;  %v1944_v4 = vld [vmem:[%s10099_s13 + $0xd0] sm:$0xff] }
  0xdb   : > { %8365 = vmatmul.mubr.msk.f32.gmra.mrb[20].mxu1 %vm614_vm0, %v10235_v59 }
  0xdc   : > { %8367 = vmatprep.mubr.msk.f32.mxu1 %vm614_vm0, %v10239_v61 }
  0xdd   : > { %2012 = vperm.xlu1 %9353, %v1930_v62   ;;  %v2265_v62 = vld [vmem:[%s10105_s29 + $0xa8] sm:$0xff] }
  0xde   : > { %2333 = vperm.xlu0 %9352, %v2255_v9   ;;  %v1945_v9 = vld [vmem:[%s10099_s13 + $0xd8] sm:$0xff] }
  0xdf   : > { %8368 = vmatmul.mubr.msk.f32.gmra.mrb[22].mxu1 %vm614_vm0, %v10247_v63 }
  0xe0   : > { %8370 = vmatprep.mubr.msk.f32.mxu1 %vm614_vm0, %v10251_v1 }
  0xe1   : > { %2017 = vperm.xlu1 %9353, %v1931_v2   ;;  %v2266_v2 = vld [vmem:[%s10105_s29 + $0xb0] sm:$0xff] }
  0xe2   : > { %2338 = vperm.xlu0 %9352, %v2256_v13   ;;  %v1946_v13 = vld [vmem:[%s10099_s13 + $0xe0] sm:$0xff] }
  0xe3   : > { %8371 = vmatmul.mubr.msk.f32.gmra.mrb[24].mxu1 %vm614_vm0, %v10259_v3 }
  0xe4   : > { %8373 = vmatprep.mubr.msk.f32.mxu1 %vm614_vm0, %v10263_v5 }
  0xe5   : > { %2022 = vperm.xlu1 %9353, %v1932_v7   ;;  %v2267_v7 = vld [vmem:[%s10105_s29 + $0xb8] sm:$0xff] }
  0xe6   : > { %2343 = vperm.xlu0 %9352, %v2257_v19   ;;  %v1947_v19 = vld [vmem:[%s10099_s13 + $0xe8] sm:$0xff] }
  0xe7   : > { %8374 = vmatmul.mubr.msk.f32.gmra.mrb[26].mxu1 %vm614_vm0, %v10271_v8 }
  0xe8   : > { %8376 = vmatprep.mubr.msk.f32.mxu1 %vm614_vm0, %v10275_v10 }
  0xe9   : > { %2027 = vperm.xlu1 %9353, %v1933_v11   ;;  %v2268_v11 = vld [vmem:[%s10105_s29 + $0xc0] sm:$0xff] }
  0xea   : > { %2348 = vperm.xlu0 %9352, %v2258_v26   ;;  %v1949_v26 = vld [vmem:[%s10099_s13 + $0xf8] sm:$0xff]  ;;  %s15615_s13 = sld [smem:[#allocation227_spill]] }
  0xeb   : > { %8377 = vmatmul.mubr.msk.f32.gmra.mrb[28].mxu1 %vm614_vm0, %v10283_v12 }
  0xec   : > { %8379 = vmatprep.mubr.msk.f32.mxu1 %vm614_vm0, %v10287_v14 }
  0xed   : > { %2032 = vperm.xlu1 %9353, %v1934_v15   ;;  %v2269_v15 = vld [vmem:[%s10105_s29 + $0xc8] sm:$0xff] }
  0xee   : > { %2353 = vperm.xlu0 %9352, %v2259_v32   ;;  %v1422_v32 = vld [vmem:[%s15059_s8 + $0x10] sm:$0xff] }
  0xef   : > { %8380 = vmatmul.mubr.msk.f32.gmra.mrb[30].mxu1 %vm614_vm0, %v10295_v18 }
  0xf0   : > { %8392 = vmatprep.mubr.msk.f32.mxu1 %vm614_vm0, %v10091_v6 }
  0xf1   : > { %2037 = vperm.xlu1 %9353, %v1935_v24   ;;  %v2271_v24 = vld [vmem:[%s10105_s29 + $0xd8] sm:$0xff] }
  0xf3   : > { %8393 = vmatmul.mubr.msk.f32.vlgmr.msra.gmra.mrb[32].mxu1 %vm614_vm0, %v10111_v16 }
  0xf4   : > { %8991 = vmatpush3.bf16.msra.mxu1 %v10140_v28  ;;  %8395 = vmatprep.mubr.msk.f32.mxu1 %vm614_vm0, %v10114_v17  ;;  %v2260_v28 = vld [vmem:[%s10105_s29 + $0x80] sm:$0xff] }
  0xf5   : > { %8993 = vmatprep.subr.bf16.mxu1 %v8992_v29  ;;  %2042 = vperm.xlu1 %9353, %v1936_v30   ;;  %v2273_v30 = vld [vmem:[%s10105_s29 + $0xe8] sm:$0xff] }
  0xf6   : > { %2358 = vperm.xlu0 %9352, %v2260_v28   ;;  %v1424_v28 = vld [vmem:[%s15059_s8 + $0x20] sm:$0xf] }
  0xf7   : > { %8396 = vmatmul.mubr.msk.f32.gmra.mrb[34].mxu1 %vm614_vm0, %v10123_v20 }
  0xf8   : > { %8398 = vmatprep.mubr.msk.f32.mxu1 %vm614_vm0, %v10126_v21  ;;  %8995 = vmatpush3.bf16.msra.mxu1 %v8992_v29  ;;  %v2272_v29 = vld [vmem:[%s10105_s29 + $0xe0] sm:$0xff] }
  0xf9   : > { %2047 = vperm.xlu1 %9353, %v1937_v34   ;;  %8448 = vmatprep.subr.msk.mxu1 %vm711_vm1, %v1184_v36  ;;  %v1423_v34 = vld [vmem:[%s15059_s8 + $0x18] sm:$0xff] }
  0xfa   : > { %2363 = vperm.xlu0 %9352, %v2261_v46   ;;  %v9000_v38 = vpack.c.bf16 %v1423_v34, %v1422_v32 }
  0xfb   : > { %8399 = vmatmul.mubr.msk.f32.gmra.mrb[36].mxu1 %vm614_vm0, %v10134_v25 }
  0xfc   : > { %8401 = vmatprep.mubr.msk.f32.mxu1 %vm614_vm0, %v10137_v27  ;;  %8449 = vmatpush3.msk.msra.mxu1 %vm711_vm1, %v1184_v36  ;;  %v2274_v36 = vld [vmem:[%s10105_s29 + $0xf0] sm:$0xff]  ;;  %s15689_s29 = sld [smem:[#allocation228_spill]] }
  0xfd   : > { %2052 = vperm.xlu1 %9353, %v1938_v44   ;;  %8997 = vmatprep.subr.bf16.mxu1 %v10324_v42 }
  0xfe   : > { %2368 = vperm.xlu0 %9352, %v2262_v50  }
  0xff   : > { %8402 = vmatmul.mubr.msk.f32.gmra.mrb[38].mxu1 %vm614_vm0, %v10149_v31 }
 0x100   : > { %8404 = vmatprep.mubr.msk.f32.mxu1 %vm614_vm0, %v10154_v33 }
 0x101   : > { %2057 = vperm.xlu1 %9353, %v1939_v48  }
 0x102   : > { %2373 = vperm.xlu0 %9352, %v2263_v54  }
 0x103   : > { %8405 = vmatmul.mubr.msk.f32.gmra.mrb[40].mxu1 %vm614_vm0, %v10163_v35 }
 0x104   : > { %8407 = vmatprep.mubr.msk.f32.mxu1 %vm614_vm0, %v10167_v37 }
 0x105   : > { %2062 = vperm.xlu1 %9353, %v1940_v52  }
 0x106   : > { %2378 = vperm.xlu0 %9352, %v2264_v58  }
 0x107   : > { %8408 = vmatmul.mubr.msk.f32.gmra.mrb[42].mxu1 %vm614_vm0, %v10175_v39 }
 0x108   : > { %8410 = vmatprep.mubr.msk.f32.mxu1 %vm614_vm0, %v10179_v41 }
 0x109   : > { %2067 = vperm.xlu1 %9353, %v1941_v56  }
 0x10a   : > { %2383 = vperm.xlu0 %9352, %v2265_v62  }
 0x10b   : > { %8411 = vmatmul.mubr.msk.f32.gmra.mrb[44].mxu1 %vm614_vm0, %v10187_v43 }
 0x10c   : > { %8413 = vmatprep.mubr.msk.f32.mxu1 %vm614_vm0, %v10191_v45 }
 0x10d   : > { %2072 = vperm.xlu1 %9353, %v1942_v60  }
 0x10e   : > { %2388 = vperm.xlu0 %9352, %v2266_v2  }
 0x10f   : > { %8414 = vmatmul.mubr.msk.f32.gmra.mrb[46].mxu1 %vm614_vm0, %v10199_v47 }
 0x110   : > { %8416 = vmatprep.mubr.msk.f32.mxu1 %vm614_vm0, %v10203_v49 }
 0x111   : > { %2077 = vperm.xlu1 %9353, %v1943_v0  }
 0x112   : > { %2393 = vperm.xlu0 %9352, %v2267_v7  }
 0x113   : > { %8417 = vmatmul.mubr.msk.f32.gmra.mrb[48].mxu1 %vm614_vm0, %v10211_v51 }
 0x114   : > { %8419 = vmatprep.mubr.msk.f32.mxu1 %vm614_vm0, %v10215_v53 }
 0x115   : > { %2082 = vperm.xlu1 %9353, %v1944_v4  }
 0x116   : > { %2398 = vperm.xlu0 %9352, %v2268_v11  }
 0x117   : > { %8420 = vmatmul.mubr.msk.f32.gmra.mrb[50].mxu1 %vm614_vm0, %v10223_v55 }
 0x118   : > { %8422 = vmatprep.mubr.msk.f32.mxu1 %vm614_vm0, %v10227_v57 }
 0x119   : > { %2087 = vperm.xlu1 %9353, %v1945_v9  }
 0x11a   : > { %2403 = vperm.xlu0 %9352, %v2269_v15  }
 0x11b   : > { %8423 = vmatmul.mubr.msk.f32.gmra.mrb[52].mxu1 %vm614_vm0, %v10235_v59 }
 0x11c   : > { %8425 = vmatprep.mubr.msk.f32.mxu1 %vm614_vm0, %v10239_v61 }
 0x11d   : > { %2092 = vperm.xlu1 %9353, %v1946_v13  }
 0x11e   : > { %2408 = vperm.xlu0 %9352, %v2270_v22  }
 0x11f   : > { %8426 = vmatmul.mubr.msk.f32.gmra.mrb[54].mxu1 %vm614_vm0, %v10247_v63 }
 0x120   : > { %8428 = vmatprep.mubr.msk.f32.mxu1 %vm614_vm0, %v10251_v1 }
 0x121   : > { %2097 = vperm.xlu1 %9353, %v1947_v19  }
 0x122   : > { %2413 = vperm.xlu0 %9352, %v2271_v24  }
 0x123   : > { %8429 = vmatmul.mubr.msk.f32.gmra.mrb[56].mxu1 %vm614_vm0, %v10259_v3 }
 0x124   : > { %8431 = vmatprep.mubr.msk.f32.mxu1 %vm614_vm0, %v10263_v5 }
 0x125   : > { %2102 = vperm.xlu1 %9353, %v1948_v23  }
 0x126   : > { %2418 = vperm.xlu0 %9352, %v2272_v29  }
 0x127   : > { %8432 = vmatmul.mubr.msk.f32.gmra.mrb[58].mxu1 %vm614_vm0, %v10271_v8 }
 0x128   : > { %8434 = vmatprep.mubr.msk.f32.mxu1 %vm614_vm0, %v10275_v10 }
 0x129   : > { %2107 = vperm.xlu1 %9353, %v1949_v26  }
 0x12a   : > { %2423 = vperm.xlu0 %9352, %v2273_v30  }
 0x12b   : > { %8435 = vmatmul.mubr.msk.f32.gmra.mrb[60].mxu1 %vm614_vm0, %v10283_v12 }
 0x12c   : > { %8437 = vmatprep.mubr.msk.f32.mxu1 %vm614_vm0, %v10287_v14 }
 0x12e   : > { %2428 = vperm.xlu0 %9352, %v2274_v36  }
 0x12f   : > { %8438 = vmatmul.mubr.msk.f32.gmra.mrb[62].mxu1 %vm614_vm0, %v10295_v18 }
 0x130   : > { %8450 = vmatprep.mubr.msk.f32.mxu1 %vm614_vm0, %v10091_v6 }
 0x132   : > { %2433 = vperm.xlu0 %9352, %v2275_v40  }
 0x133   : > { %8451 = vmatmul.mubr.msk.f32.vlgmr.msra.gmra.mrb[64].mxu1 %vm614_vm0, %v10111_v16 }
 0x134   : > { %8999 = vmatpush3.bf16.msra.mxu1 %v10324_v42  ;;  %8453 = vmatprep.mubr.msk.f32.mxu1 %vm614_vm0, %v10114_v17  ;;  %v10499_v42 = vpop.permute.xlu1 %1957 }
 0x135   : > { %9001 = vmatprep.subr.bf16.mxu1 %v9000_v38 }
 0x137   : > { %8454 = vmatmul.mubr.msk.f32.gmra.mrb[66].mxu1 %vm614_vm0, %v10123_v20 }
 0x138   : > { %8456 = vmatprep.mubr.msk.f32.mxu1 %vm614_vm0, %v10126_v21  ;;  %9003 = vmatpush3.bf16.msra.mxu1 %v9000_v38 }
 0x139   : > { %8506 = vmatprep.subr.msk.mxu1 %vm711_vm1, %v1424_v28 }
 0x13b   : > { %8457 = vmatmul.mubr.msk.f32.gmra.mrb[68].mxu1 %vm614_vm0, %v10134_v25 }
 0x13c   : > { %8459 = vmatprep.mubr.msk.f32.mxu1 %vm614_vm0, %v10137_v27  ;;  %8507 = vmatpush3.msk.msra.mxu1 %vm711_vm1, %v1424_v28 }
 0x13f   : > { %8460 = vmatmul.mubr.msk.f32.gmra.mrb[70].mxu1 %vm614_vm0, %v10149_v31 }
 0x140   : > { %8462 = vmatprep.mubr.msk.f32.mxu1 %vm614_vm0, %v10154_v33 }
 0x143   : > { %8463 = vmatmul.mubr.msk.f32.gmra.mrb[72].mxu1 %vm614_vm0, %v10163_v35 }
 0x144   : > { %8465 = vmatprep.mubr.msk.f32.mxu1 %vm614_vm0, %v10167_v37 }
 0x147   : > { %8466 = vmatmul.mubr.msk.f32.gmra.mrb[74].mxu1 %vm614_vm0, %v10175_v39 }
 0x148   : > { %8468 = vmatprep.mubr.msk.f32.mxu1 %vm614_vm0, %v10179_v41 }
 0x14b   : > { %8469 = vmatmul.mubr.msk.f32.gmra.mrb[76].mxu1 %vm614_vm0, %v10187_v43 }
 0x14c   : > { %8471 = vmatprep.mubr.msk.f32.mxu1 %vm614_vm0, %v10191_v45 }
 0x14f   : > { %8472 = vmatmul.mubr.msk.f32.gmra.mrb[78].mxu1 %vm614_vm0, %v10199_v47 }
 0x150   : > { %8474 = vmatprep.mubr.msk.f32.mxu1 %vm614_vm0, %v10203_v49 }
 0x153   : > { %8475 = vmatmul.mubr.msk.f32.gmra.mrb[80].mxu1 %vm614_vm0, %v10211_v51 }
 0x154   : > { %8477 = vmatprep.mubr.msk.f32.mxu1 %vm614_vm0, %v10215_v53 }
 0x157   : > { %8478 = vmatmul.mubr.msk.f32.gmra.mrb[82].mxu1 %vm614_vm0, %v10223_v55 }
 0x158   : > { %8480 = vmatprep.mubr.msk.f32.mxu1 %vm614_vm0, %v10227_v57 }
 0x15b   : > { %8481 = vmatmul.mubr.msk.f32.gmra.mrb[84].mxu1 %vm614_vm0, %v10235_v59 }
 0x15c   : > { %8483 = vmatprep.mubr.msk.f32.mxu1 %vm614_vm0, %v10239_v61 }
 0x15f   : > { %8484 = vmatmul.mubr.msk.f32.gmra.mrb[86].mxu1 %vm614_vm0, %v10247_v63 }
 0x160   : > { %8486 = vmatprep.mubr.msk.f32.mxu1 %vm614_vm0, %v10251_v1 }
 0x163   : > { %8487 = vmatmul.mubr.msk.f32.gmra.mrb[88].mxu1 %vm614_vm0, %v10259_v3 }
 0x164   : > { %8489 = vmatprep.mubr.msk.f32.mxu1 %vm614_vm0, %v10263_v5 }
 0x167   : > { %8490 = vmatmul.mubr.msk.f32.gmra.mrb[90].mxu1 %vm614_vm0, %v10271_v8 }
 0x168   : > { %8492 = vmatprep.mubr.msk.f32.mxu1 %vm614_vm0, %v10275_v10 }
 0x16b   : > { %8493 = vmatmul.mubr.msk.f32.gmra.mrb[92].mxu1 %vm614_vm0, %v10283_v12 }
 0x16c   : > { %8495 = vmatprep.mubr.msk.f32.mxu1 %vm614_vm0, %v10287_v14 }
 0x16f   : > { %8496 = vmatmul.mubr.msk.f32.gmra.mrb[94].mxu1 %vm614_vm0, %v10295_v18 }
 0x170   : > { %8508 = vmatprep.mubr.msk.f32.mxu1 %vm614_vm0, %v10091_v6  ;;  %v10509_v6 = vpop.permute.xlu1 %2283 }
 0x173   : > { %8509 = vmatmul.mubr.msk.f32.vlgmr.msra.gmra.mrb[96].mxu1 %vm614_vm0, %v10111_v16 }
 0x174   : > { %8511 = vmatprep.mubr.msk.f32.mxu1 %vm614_vm0, %v10114_v17  ;;  %v10513_v17 = vpop.permute.xlu0 %1952 }
 0x177   : > { %8512 = vmatmul.mubr.msk.f32.gmra.mrb[98].mxu1 %vm614_vm0, %v10123_v20 }
 0x178   : > { %8514 = vmatprep.mubr.msk.f32.mxu1 %vm614_vm0, %v10126_v21 }
 0x17b   : > { %8515 = vmatmul.mubr.msk.f32.gmra.mrb[100].mxu1 %vm614_vm0, %v10134_v25  ;;  %v10523_v25 = vpop.permute.xlu1 %1962 }
 0x17c   : > { %8517 = vmatprep.mubr.msk.f32.mxu1 %vm614_vm0, %v10137_v27 }
 0x17f   : > { %8518 = vmatmul.mubr.msk.f32.gmra.mrb[102].mxu1 %vm614_vm0, %v10149_v31  ;;  %v10531_v31 = vpop.permute.xlu0 %2278 }
 0x180   : > { %8520 = vmatprep.mubr.msk.f32.mxu1 %vm614_vm0, %v10154_v33 }
 0x183   : > { %8521 = vmatmul.mubr.msk.f32.gmra.mrb[104].mxu1 %vm614_vm0, %v10163_v35 }
 0x184   : > { %8523 = vmatprep.mubr.msk.f32.mxu1 %vm614_vm0, %v10167_v37  ;;  %v10541_v37 = vpop.permute.xlu1 %1967 }
 0x186   : > { %v10511_v16 = vpop.f32.mrb[0].mxu1 }
 0x187   : > { %v10515_v20 = vpop.f32.mrb[1].mxu1  ;;  %8524 = vmatmul.mubr.msk.f32.gmra.mrb[106].mxu1 %vm614_vm0, %v10175_v39  ;;  %v10543_v39 = vld [vmem:[#allocation7] ss:$0 sm:$0xff] }
 0x188   : > { %8526 = vmatprep.mubr.msk.f32.mxu1 %vm614_vm0, %v10179_v41 }
 0x18a   : > { %v10521_v21 = vpop.f32.mrb[2].mxu1 }
 0x18b   : > { %v10525_v27 = vpop.f32.mrb[3].mxu1  ;;  %8527 = vmatmul.mubr.msk.f32.gmra.mrb[108].mxu1 %vm614_vm0, %v10187_v43  ;;  %v10545_v43 = vpop.permute.xlu0 %2288 }
 0x18c   : > { %8529 = vmatprep.mubr.msk.f32.mxu1 %vm614_vm0, %v10191_v45 }
 0x18e   : > { %v10533_v33 = vpop.f32.mrb[4].mxu1 }
 0x18f   : > { %v10535_v35 = vpop.f32.mrb[5].mxu1  ;;  %8530 = vmatmul.mubr.msk.f32.gmra.mrb[110].mxu1 %vm614_vm0, %v10199_v47 }
 0x190   : > { %8532 = vmatprep.mubr.msk.f32.mxu1 %vm614_vm0, %v10203_v49  ;;  %v10556_v49 = vpop.permute.xlu1 %1972 }
 0x192   : > { %v8345_v41 = vpop.f32.mrb[6].mxu1 }
 0x193   : > { %v10548_v45 = vadd.f32 %v8345_v41, %v10543_v39  ;;  %v10550_v44 = vpop.f32.mrb[7].mxu1  ;;  %8533 = vmatmul.mubr.msk.f32.gmra.mrb[112].mxu1 %vm614_vm0, %v10211_v51  ;;  %v10568_v51 = vpop.permute.xlu0 %2293 }
 0x194   : > { %8535 = vmatprep.mubr.msk.f32.mxu1 %vm614_vm0, %v10215_v53 }
 0x195   : > { %15558 = vst [vmem:[#allocation16_spill] sm:$0xff] %v10548_v45 }
 0x196   : > { %v8348_v47 = vpop.f32.mrb[8].mxu1 }
 0x197   : > { %v10559_v46 = vadd.f32 %v8348_v47, %v10543_v39  ;;  %v821_v48 = vpop.f32.mrb[9].mxu1  ;;  %8536 = vmatmul.mubr.msk.f32.gmra.mrb[114].mxu1 %vm614_vm0, %v10223_v55  ;;  %v10580_v55 = vpop.permute.xlu1 %1977 }
 0x198   : > { %v10564_v50 = vadd.f32 %v10543_v39, %v821_v48  ;;  %8538 = vmatprep.mubr.msk.f32.mxu1 %vm614_vm0, %v10227_v57  ;;  %v10582_v57 = vpop.permute.xlu0 %2298 }
 0x199   : > { %15559 = vst [vmem:[#allocation17_spill] sm:$0xff] %v10559_v46 }
 0x19a   : > { %15560 = vst [vmem:[#allocation18_spill] sm:$0xff] %v10564_v50  ;;  %v8351_v52 = vpop.f32.mrb[10].mxu1 }
 0x19b   : > { %v10571_v53 = vadd.f32 %v8351_v52, %v10543_v39  ;;  %v831_v54 = vpop.f32.mrb[11].mxu1  ;;  %8539 = vmatmul.mubr.msk.f32.gmra.mrb[116].mxu1 %vm614_vm0, %v10235_v59 }
 0x19c   : > { %v10576_v56 = vadd.f32 %v10543_v39, %v831_v54  ;;  %8541 = vmatprep.mubr.msk.f32.mxu1 %vm614_vm0, %v10239_v61  ;;  %v10594_v61 = vpop.permute.xlu1 %1982 }
 0x19d   : > { %15561 = vst [vmem:[#allocation19_spill] sm:$0xff] %v10571_v53 }
 0x19e   : > { %15562 = vst [vmem:[#allocation20_spill] sm:$0xff] %v10576_v56  ;;  %v8354_v58 = vpop.f32.mrb[12].mxu1 }
 0x19f   : > { %v10585_v60 = vadd.f32 %v8354_v58, %v10543_v39  ;;  %v841_v62 = vpop.f32.mrb[13].mxu1  ;;  %8542 = vmatmul.mubr.msk.f32.gmra.mrb[118].mxu1 %vm614_vm0, %v10247_v63  ;;  %v10606_v63 = vpop.permute.xlu0 %2303 }
 0x1a0   : > { %v10590_v59 = vadd.f32 %v10543_v39, %v841_v62  ;;  %8544 = vmatprep.mubr.msk.f32.mxu1 %vm614_vm0, %v10251_v1 }
 0x1a1   : > { %15563 = vst [vmem:[#allocation21_spill] sm:$0xff] %v10585_v60 }
 0x1a2   : > { %15564 = vst [vmem:[#allocation22_spill] sm:$0xff] %v10590_v59  ;;  %v8357_v0 = vpop.f32.mrb[14].mxu1 }
 0x1a3   : > { %v10597_v2 = vadd.f32 %v8357_v0, %v10543_v39  ;;  %v851_v4 = vpop.f32.mrb[15].mxu1  ;;  %8545 = vmatmul.mubr.msk.f32.gmra.mrb[120].mxu1 %vm614_vm0, %v10259_v3  ;;  %v10618_v3 = vpop.permute.xlu1 %1987 }
 0x1a4   : > { %v10602_v7 = vadd.f32 %v10543_v39, %v851_v4  ;;  %8547 = vmatprep.mubr.msk.f32.mxu1 %vm614_vm0, %v10263_v5  ;;  %v10620_v5 = vpop.permute.xlu0 %2308 }
 0x1a5   : > { %15565 = vst [vmem:[#allocation23_spill] sm:$0xff] %v10597_v2 }
 0x1a6   : > { %15566 = vst [vmem:[#allocation24_spill] sm:$0xff] %v10602_v7  ;;  %v8360_v9 = vpop.f32.mrb[16].mxu1 }
 0x1a7   : > { %v10609_v1 = vadd.f32 %v8360_v9, %v10543_v39  ;;  %v861_v11 = vpop.f32.mrb[17].mxu1  ;;  %8548 = vmatmul.mubr.msk.f32.gmra.mrb[122].mxu1 %vm614_vm0, %v10271_v8 }
 0x1a8   : > { %v10614_v13 = vadd.f32 %v10543_v39, %v861_v11  ;;  %8550 = vmatprep.mubr.msk.f32.mxu1 %vm614_vm0, %v10275_v10  ;;  %v10632_v10 = vpop.permute.xlu1 %1992 }
 0x1a9   : > { %15567 = vst [vmem:[#allocation25_spill] sm:$0xff] %v10609_v1 }
 0x1aa   : > { %15568 = vst [vmem:[#allocation26_spill] sm:$0xff] %v10614_v13  ;;  %v8363_v15 = vpop.f32.mrb[18].mxu1 }
 0x1ab   : > { %v10623_v19 = vadd.f32 %v8363_v15, %v10543_v39  ;;  %v871_v22 = vpop.f32.mrb[19].mxu1  ;;  %8551 = vmatmul.mubr.msk.f32.gmra.mrb[124].mxu1 %vm614_vm0, %v10283_v12  ;;  %v10642_v12 = vpop.permute.xlu0 %2313 }
 0x1ac   : > { %v10628_v8 = vadd.f32 %v10543_v39, %v871_v22  ;;  %8553 = vmatprep.mubr.msk.f32.mxu1 %vm614_vm0, %v10287_v14  ;;  %v10650_v36 = vpop.permute.xlu1 %1997 }
 0x1ad   : > { %15569 = vst [vmem:[#allocation27_spill] sm:$0xff] %v10623_v19 }
 0x1ae   : > { %15570 = vst [vmem:[#allocation28_spill] sm:$0xff] %v10628_v8  ;;  %v8366_v23 = vpop.f32.mrb[20].mxu1 }
 0x1af   : > { %v10635_v24 = vadd.f32 %v8366_v23, %v10543_v39  ;;  %v881_v26 = vpop.f32.mrb[21].mxu1  ;;  %8554 = vmatmul.mubr.msk.f32.gmra.mrb[126].mxu1 %vm614_vm0, %v10295_v18  ;;  %v10652_v40 = vpop.permute.xlu0 %2318 }
 0x1b0   : > { %v10640_v29 = vadd.f32 %v10543_v39, %v881_v26  ;;  %v10660_v48 = vpop.permute.xlu1 %2002 }
 0x1b1   : > { %15571 = vst [vmem:[#allocation29_spill] sm:$0xff] %v10635_v24 }
 0x1b2   : > { %15572 = vst [vmem:[#allocation30_spill] sm:$0xff] %v10640_v29  ;;  %v8369_v30 = vpop.f32.mrb[22].mxu1 }
 0x1b3   : > { %v10645_v32 = vadd.f32 %v8369_v30, %v10543_v39  ;;  %v891_v14 = vpop.f32.mrb[23].mxu1  ;;  %v10668_v62 = vpop.permute.xlu0 %2323 }
 0x1b4   : > { %v10648_v34 = vadd.f32 %v10543_v39, %v891_v14  ;;  %v10676_v15 = vpop.permute.xlu1 %2007 }
 0x1b5   : > { %15573 = vst [vmem:[#allocation31_spill] sm:$0xff] %v10645_v32 }
 0x1b6   : > { %15574 = vst [vmem:[#allocation32_spill] sm:$0xff] %v10648_v34  ;;  %v8372_v38 = vpop.f32.mrb[24].mxu1 }
 0x1b7   : > { %v10655_v18 = vadd.f32 %v8372_v38, %v10543_v39  ;;  %v901_v28 = vpop.f32.mrb[25].mxu1  ;;  %v10678_v23 = vpop.permute.xlu0 %2328 }
 0x1b8   : > { %v10658_v41 = vadd.f32 %v10543_v39, %v901_v28  ;;  %v10688_v28 = vpop.permute.xlu1 %2012 }
 0x1b9   : > { %15575 = vst [vmem:[#allocation33_spill] sm:$0xff] %v10655_v18 }
 0x1ba   : > { %15576 = vst [vmem:[#allocation34_spill] sm:$0xff] %v10658_v41  ;;  %v8375_v47 = vpop.f32.mrb[26].mxu1 }
 0x1bb   : > { %v10663_v52 = vadd.f32 %v8375_v47, %v10543_v39  ;;  %v911_v54 = vpop.f32.mrb[27].mxu1 }
 0x1bc   : > { %v10666_v58 = vadd.f32 %v10543_v39, %v911_v54  ;;  %v10692_v54 = vpop.permute.xlu0 %2333 }
 0x1bd   : > { %15577 = vst [vmem:[#allocation35_spill] sm:$0xff] %v10663_v52 }
 0x1be   : > { %15578 = vst [vmem:[#allocation36_spill] sm:$0xff] %v10666_v58  ;;  %v8378_v0 = vpop.f32.mrb[28].mxu1 }
 0x1bf   : > { %v10671_v4 = vadd.f32 %v8378_v0, %v10543_v39  ;;  %v921_v9 = vpop.f32.mrb[29].mxu1 }
 0x1c0   : > { %v10674_v11 = vadd.f32 %v10543_v39, %v921_v9 }
 0x1c1   : > { %15579 = vst [vmem:[#allocation37_spill] sm:$0xff] %v10671_v4 }
 0x1c2   : > { %15580 = vst [vmem:[#allocation38_spill] sm:$0xff] %v10674_v11  ;;  %v8381_v22 = vpop.f32.mrb[30].mxu1  ;;  %v10698_v11 = vpop.permute.xlu1 %2017 }
 0x1c3   : > { %v10681_v26 = vadd.f32 %v8381_v22, %v10543_v39  ;;  %v931_v30 = vpop.f32.mrb[31].mxu1 }
 0x1c4   : > { %v10684_v14 = vadd.f32 %v10543_v39, %v931_v30 }
 0x1c5   : > { %15581 = vst [vmem:[#allocation39_spill] sm:$0xff] %v10681_v26  ;;  %v10702_v26 = vpop.permute.xlu0 %2338 }
 0x1c6   : > { %15582 = vst [vmem:[#allocation40_spill] sm:$0xff] %v10684_v14  ;;  %v10686_v38 = vpop.f32.mrb[32].mxu1  ;;  %v10706_v14 = vld [vmem:[#allocation9] ss:$0 sm:$0xff]  ;;  %v10708_v4 = vpop.permute.xlu1 %2022 }
 0x1c7   : > { %15583 = vst [vmem:[#allocation41_spill] sm:$0xff] %v10686_v38  ;;  %v10690_v47 = vpop.f32.mrb[33].mxu1  ;;  %15589 = vst [vmem:[#allocation47_spill] sm:$0xff] %v10706_v14 }
 0x1c8   : > { %15584 = vst [vmem:[#allocation42_spill] sm:$0xff] %v10690_v47 }
 0x1ca   : > { %v10694_v0 = vpop.f32.mrb[34].mxu1 }
 0x1cb   : > { %15585 = vst [vmem:[#allocation43_spill] sm:$0xff] %v10694_v0  ;;  %v10696_v9 = vpop.f32.mrb[35].mxu1  ;;  %v10715_v0 = vpop.permute.xlu0 %2343 }
 0x1cc   : > { %15586 = vst [vmem:[#allocation44_spill] sm:$0xff] %v10696_v9 }
 0x1ce   : > { %v10700_v22 = vpop.f32.mrb[36].mxu1 }
 0x1cf   : > { %15587 = vst [vmem:[#allocation45_spill] sm:$0xff] %v10700_v22  ;;  %v10704_v30 = vpop.f32.mrb[37].mxu1  ;;  %v10725_v34 = vpop.permute.xlu0 %2348 }
 0x1d0   : > { %15588 = vst [vmem:[#allocation46_spill] sm:$0xff] %v10704_v30  ;;  %v10723_v30 = vpop.permute.xlu1 %2027 }
 0x1d2   : > { %v8403_v38 = vpop.f32.mrb[38].mxu1 }
 0x1d3   : > { %v10711_v47 = vadd.f32 %v8403_v38, %v10706_v14  ;;  %v10713_v58 = vpop.f32.mrb[39].mxu1 }
 0x1d4   : > { %15591 = vst [vmem:[#allocation49_spill] sm:$0xff] %v10713_v58  ;;  %v10733_v29 = vpop.permute.xlu1 %2032 }
 0x1d5   : > { %15590 = vst [vmem:[#allocation48_spill] sm:$0xff] %v10711_v47 }
 0x1d6   : > { %v8406_v9 = vpop.f32.mrb[40].mxu1 }
 0x1d7   : > { %v10718_v52 = vadd.f32 %v8406_v9, %v10706_v14  ;;  %v1061_v22 = vpop.f32.mrb[41].mxu1 }
 0x1d8   : > { %v10721_v41 = vadd.f32 %v10706_v14, %v1061_v22 }
 0x1d9   : > { %15592 = vst [vmem:[#allocation50_spill] sm:$0xff] %v10718_v52  ;;  %v10741_v52 = vpop.permute.xlu0 %2353 }
 0x1da   : > { %15593 = vst [vmem:[#allocation51_spill] sm:$0xff] %v10721_v41  ;;  %v8409_v18 = vpop.f32.mrb[42].mxu1 }
 0x1db   : > { %v10728_v38 = vadd.f32 %v8409_v18, %v10706_v14  ;;  %v1071_v47 = vpop.f32.mrb[43].mxu1 }
 0x1dc   : > { %v10731_v58 = vadd.f32 %v10706_v14, %v1071_v47 }
 0x1dd   : > { %15594 = vst [vmem:[#allocation52_spill] sm:$0xff] %v10728_v38  ;;  %v10751_v19 = vpop.permute.xlu0 %2358 }
 0x1de   : > { %15595 = vst [vmem:[#allocation53_spill] sm:$0xff] %v10731_v58  ;;  %v8412_v32 = vpop.f32.mrb[44].mxu1  ;;  %v10749_v58 = vpop.permute.xlu1 %2037 }
 0x1df   : > { %v10736_v9 = vadd.f32 %v8412_v32, %v10706_v14  ;;  %v1081_v22 = vpop.f32.mrb[45].mxu1 }
 0x1e0   : > { %v10739_v41 = vadd.f32 %v10706_v14, %v1081_v22 }
 0x1e1   : > { %15596 = vst [vmem:[#allocation54_spill] sm:$0xff] %v10736_v9 }
 0x1e2   : > { %15597 = vst [vmem:[#allocation55_spill] sm:$0xff] %v10739_v41  ;;  %v8415_v24 = vpop.f32.mrb[46].mxu1  ;;  %v10759_v13 = vpop.permute.xlu1 %2042 }
 0x1e3   : > { %v10744_v18 = vadd.f32 %v8415_v24, %v10706_v14  ;;  %v1091_v38 = vpop.f32.mrb[47].mxu1 }
 0x1e4   : > { %v10747_v47 = vadd.f32 %v10706_v14, %v1091_v38 }
 0x1e5   : > { %15598 = vst [vmem:[#allocation56_spill] sm:$0xff] %v10744_v18  ;;  %v10767_v18 = vpop.permute.xlu0 %2363 }
 0x1e6   : > { %15599 = vst [vmem:[#allocation57_spill] sm:$0xff] %v10747_v47  ;;  %v8418_v8 = vpop.f32.mrb[48].mxu1 }
 0x1e7   : > { %v10754_v32 = vadd.f32 %v8418_v8, %v10706_v14  ;;  %v1101_v22 = vpop.f32.mrb[49].mxu1 }
 0x1e8   : > { %v10757_v41 = vadd.f32 %v10706_v14, %v1101_v22 }
 0x1e9   : > { %15600 = vst [vmem:[#allocation58_spill] sm:$0xff] %v10754_v32  ;;  %v10777_v2 = vpop.permute.xlu0 %2368 }
 0x1ea   : > { %15601 = vst [vmem:[#allocation59_spill] sm:$0xff] %v10757_v41  ;;  %v8421_v9 = vpop.f32.mrb[50].mxu1  ;;  %v10775_v41 = vpop.permute.xlu1 %2047 }
 0x1eb   : > { %v10762_v24 = vadd.f32 %v8421_v9, %v10706_v14  ;;  %v1111_v38 = vpop.f32.mrb[51].mxu1 }
 0x1ec   : > { %v10765_v47 = vadd.f32 %v10706_v14, %v1111_v38 }
 0x1ed   : > { %15602 = vst [vmem:[#allocation60_spill] sm:$0xff] %v10762_v24 }
 0x1ee   : > { %15603 = vst [vmem:[#allocation61_spill] sm:$0xff] %v10765_v47  ;;  %v8424_v1 = vpop.f32.mrb[52].mxu1  ;;  %v10785_v59 = vpop.permute.xlu1 %2052 }
 0x1ef   : > { %v10770_v8 = vadd.f32 %v8424_v1, %v10706_v14  ;;  %v1121_v32 = vpop.f32.mrb[53].mxu1 }
 0x1f0   : > { %v10773_v22 = vadd.f32 %v10706_v14, %v1121_v32 }
 0x1f1   : > { %15604 = vst [vmem:[#allocation62_spill] sm:$0xff] %v10770_v8  ;;  %v10793_v8 = vpop.permute.xlu0 %2373 }
 0x1f2   : > { %15605 = vst [vmem:[#allocation63_spill] sm:$0xff] %v10773_v22  ;;  %v8427_v7 = vpop.f32.mrb[54].mxu1 }
 0x1f3   : > { %v10780_v9 = vadd.f32 %v8427_v7, %v10706_v14  ;;  %v1131_v38 = vpop.f32.mrb[55].mxu1 }
 0x1f4   : > { %v10783_v47 = vadd.f32 %v10706_v14, %v1131_v38 }
 0x1f5   : > { %15606 = vst [vmem:[#allocation64_spill] sm:$0xff] %v10780_v9  ;;  %v10803_v53 = vpop.permute.xlu0 %2378 }
 0x1f6   : > { %15607 = vst [vmem:[#allocation65_spill] sm:$0xff] %v10783_v47  ;;  %v8430_v24 = vpop.f32.mrb[56].mxu1  ;;  %v10801_v47 = vpop.permute.xlu1 %2057 }
 0x1f7   : > { %v10788_v1 = vadd.f32 %v8430_v24, %v10706_v14  ;;  %v1141_v32 = vpop.f32.mrb[57].mxu1 }
 0x1f8   : > { %v10791_v22 = vadd.f32 %v10706_v14, %v1141_v32 }
 0x1f9   : > { %15608 = vst [vmem:[#allocation66_spill] sm:$0xff] %v10788_v1 }
 0x1fa   : > { %15609 = vst [vmem:[#allocation67_spill] sm:$0xff] %v10791_v22  ;;  %v8433_v60 = vpop.f32.mrb[58].mxu1  ;;  %v10811_v50 = vpop.permute.xlu1 %2062 }
 0x1fb   : > { %v10796_v7 = vadd.f32 %v8433_v60, %v10706_v14  ;;  %v1151_v9 = vpop.f32.mrb[59].mxu1 }
 0x1fc   : > { %v10799_v38 = vadd.f32 %v10706_v14, %v1151_v9 }
 0x1fd   : > { %15610 = vst [vmem:[#allocation68_spill] sm:$0xff] %v10796_v7 }
 0x1fe   : > { %15611 = vst [vmem:[#allocation69_spill] sm:$0xff] %v10799_v38  ;;  %v8436_v56 = vpop.f32.mrb[60].mxu1  ;;  %v10819_v38 = vld [vmem:[%s15054_s3] ss:$0 sm:$0xff] }
 0x1ff   : > { %v10806_v24 = vadd.f32 %v8436_v56, %v10706_v14  ;;  %v1161_v32 = vpop.f32.mrb[61].mxu1  ;;  %v10824_v56 = vld [vmem:[%s15615_s13] ss:$0 sm:$0xff]  ;;  %v10843_v46 = vadd.f32 %v10819_v38, %v10523_v25  ;;  %v10852_v45 = vadd.f32 %v10819_v38, %v10556_v49  ;;  %v10861_v25 = vadd.f32 %v10819_v38, %v10580_v55  ;;  %v10871_v49 = vpop.permute.xlu1 %2067 }
 0x200   : > { %v10809_v22 = vadd.f32 %v10706_v14, %v1161_v32  ;;  %v10839_v7 = vadd.f32 %v10824_v56, %v10509_v6  ;;  %v10883_v55 = vadd.f32 %v10824_v56, %v10568_v51  ;;  %v10898_v51 = vadd.f32 %v10819_v38, %v10650_v36 }
 0x201   : > { %15612 = vst [vmem:[#allocation70_spill] sm:$0xff] %v10806_v24  ;;  %v10831_v24 = vpop.permute.xlu0 %2383 }
 0x202   : > { %15613 = vst [vmem:[#allocation71_spill] sm:$0xff] %v10809_v22  ;;  %v8439_v1 = vpop.f32.mrb[62].mxu1  ;;  %v10829_v22 = vld [vmem:[#allocation10] ss:$0 sm:$0xff]  ;;  %15617 = vst [vmem:[#allocation74_spill] sm:$0xff] %v10839_v7 }
 0x203   : > { %v10814_v60 = vadd.f32 %v8439_v1, %v10706_v14  ;;  %v1171_v9 = vpop.f32.mrb[63].mxu1  ;;  %15620 = vst [vmem:[#allocation77_spill] sm:$0xff] %v10883_v55 }
 0x204   : > { %v10827_v32 = vadd.f32 %v10706_v14, %v1171_v9  ;;  %v10848_v14 = vadd.f32 %v10819_v38, %v10541_v37  ;;  %v10869_v37 = vadd.f32 %v10824_v56, %v10545_v43  ;;  %v10887_v43 = vadd.f32 %v10819_v38, %v10632_v10 }
 0x205   : > { %15614 = vst [vmem:[#allocation72_spill] sm:$0xff] %v10814_v60  ;;  %v10835_v60 = vadd.f32 %v10819_v38, %v10499_v42  ;;  %v10856_v42 = vadd.f32 %v10819_v38, %v10513_v17  ;;  %v10875_v17 = vadd.f32 %v10819_v38, %v10594_v61  ;;  %v10893_v61 = vpop.permute.xlu0 %2388 }
 0x206   : > { %15616 = vst [vmem:[#allocation73_spill] sm:$0xff] %v10827_v32  ;;  %v8452_v1 = vpop.f32.mrb[64].mxu1  ;;  %15619 = vst [vmem:[#allocation76_spill] sm:$0xff] %v10869_v37 }
 0x207   : > { %v1267_v9 = vadd.f32 %v8452_v1, %v10829_v22  ;;  %v1261_v32 = vpop.f32.mrb[65].mxu1  ;;  %v10865_v1 = vadd.f32 %v10824_v56, %v10531_v31 }
 0x208   : > { %v1262_v6 = vadd.f32 %v10829_v22, %v1261_v32  ;;  %v10879_v32 = vadd.f32 %v10819_v38, %v10618_v3 }
 0x209   : > { %15618 = vst [vmem:[#allocation75_spill] sm:$0xff] %v10865_v1  ;;  %v7551_v7 = vmul.f32 -1.442695, %v1267_v9  ;;  %v10891_v9 = vadd.f32 %v10824_v56, %v10582_v57  ;;  %v10907_v57 = vadd.f32 %v10819_v38, %v10660_v48  ;;  %v10927_v48 = vadd.f32 %v10824_v56, %v10652_v40 }
 0x20a   : > { %v7550_v31 = vmul.f32 -1.442695, %v1262_v6  ;;  %v8455_v1 = vpop.f32.mrb[66].mxu1  ;;  %v10902_v6 = vadd.f32 %v10824_v56, %v10606_v63  ;;  %v10919_v63 = vadd.f32 %v10819_v38, %v10676_v15  ;;  %v10937_v15 = vadd.f32 %v10824_v56, %v10668_v62 }
 0x20b   : > { %15621 = vst [vmem:[#allocation78_spill] sm:$0xff] %v10891_v9  ;;  %9354 = vpow2.f32 %v7551_v7  ;;  %v1277_v3 = vadd.f32 %v8455_v1, %v10829_v22  ;;  %v1271_v37 = vpop.f32.mrb[67].mxu1  ;;  %v10911_v7 = vadd.f32 %v10824_v56, %v10620_v5  ;;  %v10915_v1 = vadd.f32 %v10824_v56, %v10642_v12  ;;  %15625 = vst [vmem:[#allocation82_spill] sm:$0xff] %v10927_v48  ;;  %v10933_v12 = vpop.permute.xlu1 %2072 }
 0x20c   : > { %15622 = vst [vmem:[#allocation79_spill] sm:$0xff] %v10902_v6  ;;  %9356 = vpow2.f32 %v7550_v31  ;;  %v1272_v10 = vadd.f32 %v10829_v22, %v1271_v37  ;;  %v10923_v37 = vadd.f32 %v10819_v38, %v10688_v28  ;;  %15626 = vst [vmem:[#allocation83_spill] sm:$0xff] %v10937_v15  ;;  %v10942_v40 = vadd.f32 %v10819_v38, %v10708_v4  ;;  %v10961_v4 = vpop.permute.xlu0 %2393 }
 0x20d   : > { %15623 = vst [vmem:[#allocation80_spill] sm:$0xff] %v10911_v7  ;;  %15624 = vst [vmem:[#allocation81_spill] sm:$0xff] %v10915_v1  ;;  %v7553_v36 = vmul.f32 -1.442695, %v1277_v3  ;;  %v10931_v7 = vadd.f32 %v10819_v38, %v10698_v11  ;;  %v10951_v48 = vadd.f32 %v10819_v38, %v10723_v30  ;;  %v10955_v62 = vadd.f32 %v10824_v56, %v10692_v54 }
 0x20e   : > { %v7552_v31 = vmul.f32 -1.442695, %v1272_v10  ;;  %v8458_v5 = vpop.f32.mrb[68].mxu1  ;;  %v10946_v10 = vadd.f32 %v10824_v56, %v10678_v23  ;;  %v10965_v23 = vadd.f32 %v10819_v38, %v10733_v29  ;;  %v10973_v30 = vadd.f32 %v10824_v56, %v10715_v0 }
 0x20f   : > { %9358 = vpow2.f32 %v7553_v36  ;;  %v1287_v28 = vadd.f32 %v8458_v5, %v10829_v22  ;;  %v1281_v3 = vpop.f32.mrb[69].mxu1  ;;  %15628 = vst [vmem:[#allocation85_spill] sm:$0xff] %v10955_v62  ;;  %v10959_v36 = vadd.f32 %v10824_v56, %v10702_v26  ;;  %v10977_v26 = vadd.f32 %v10819_v38, %v10759_v13 }
 0x210   : > { %15627 = vst [vmem:[#allocation84_spill] sm:$0xff] %v10946_v10  ;;  %9360 = vpow2.f32 %v7552_v31  ;;  %v1282_v11 = vadd.f32 %v10829_v22, %v1281_v3  ;;  %v10969_v31 = vadd.f32 %v10819_v38, %v10749_v58  ;;  %15630 = vst [vmem:[#allocation87_spill] sm:$0xff] %v10973_v30  ;;  %v10986_v58 = vadd.f32 %v10819_v38, %v10775_v41  ;;  %v11013_v15 = vpop.permute.xlu0 %2398 }
 0x211   : > { %15629 = vst [vmem:[#allocation86_spill] sm:$0xff] %v10959_v36  ;;  %v7555_v5 = vmul.f32 -1.442695, %v1287_v28  ;;  %v10981_v28 = vadd.f32 %v10824_v56, %v10725_v34  ;;  %v10990_v0 = vadd.f32 %v10824_v56, %v10741_v52  ;;  %v4330_v13 = vlaneseq }
 0x212   : > { %v7554_v54 = vmul.f32 -1.442695, %v1282_v11  ;;  %v8461_v3 = vpop.f32.mrb[70].mxu1  ;;  %v10995_v34 = vadd.f32 %v10819_v38, %v10785_v59  ;;  %v11005_v52 = vadd.f32 %v10824_v56, %v10767_v18  ;;  %v11011_v59 = vadd.f32 %v10819_v38, %v10801_v47 }
 0x213   : > { %15631 = vst [vmem:[#allocation88_spill] sm:$0xff] %v10981_v28  ;;  %9362 = vpow2.f32 %v7555_v5  ;;  %v1297_v29 = vadd.f32 %v8461_v3, %v10829_v22  ;;  %v1291_v36 = vpop.f32.mrb[71].mxu1  ;;  %15632 = vst [vmem:[#allocation89_spill] sm:$0xff] %v10990_v0  ;;  %v10997_v5 = vpop.permute.xlu1 %2077  ;;  %v11001_v3 = vadd.f32 %v10824_v56, %v10751_v19  ;;  %v11007_v62 = vshrl.u32 %v4330_v13, 7 }
 0x214   : > { %v1292_v11 = vadd.f32 %v10829_v22, %v1291_v36  ;;  %9364 = vpow2.f32 %v7554_v54  ;;  %15634 = vst [vmem:[#allocation91_spill] sm:$0xff] %v11005_v52  ;;  %v11018_v18 = vadd.f32 %v10824_v56, %v10777_v2  ;;  %v11026_v47 = vadd.f32 %v10819_v38, %v10811_v50 }
 0x215   : > { %v9355_v30 = vpop.eup %9354  ;;  %15633 = vst [vmem:[#allocation90_spill] sm:$0xff] %v11001_v3  ;;  %v7557_v41 = vmul.f32 -1.442695, %v1297_v29  ;;  %15635 = vst [vmem:[#allocation92_spill] sm:$0xff] %v11007_v62  ;;  %v787_v2 = vadd.f32 %v10511_v16, %v10543_v39  ;;  %v11039_v16 = vpop.permute.xlu0 %2403  ;;  %v15075_v6 = vmov 1.0  }
 0x216   : > { %v9357_v28 = vpop.eup %9356  ;;  %v3435_v36 = vadd.f32 1.0, %v9355_v30  ;;  %v7556_v0 = vmul.f32 -1.442695, %v1292_v11  ;;  %v8464_v10 = vpop.f32.mrb[72].mxu1  ;;  %15636 = vst [vmem:[#allocation93_spill] sm:$0xff] %v11018_v18  ;;  %v11022_v11 = vadd.s32 8, %v11007_v62 }
 0x217   : > { %v3434_v19 = vadd.f32 1.0, %v9357_v28  ;;  %9366 = vpow2.f32 %v7557_v41  ;;  %v1307_v54 = vadd.f32 %v8464_v10, %v10829_v22  ;;  %v1301_v29 = vpop.f32.mrb[73].mxu1  ;;  %v11028_v41 = vand.u32 127, %v4330_v13  ;;  %v11032_v52 = vpop.permute.xlu1 %2082 }
 0x218   : > { %9368 = vrcp.f32 %v3435_v36  ;;  %v1302_v30 = vadd.f32 %v10829_v22, %v1301_v29  ;;  %15637 = vst [vmem:[#allocation94_spill] sm:$0xff] %v11022_v11  ;;  %v4342_v50 = vadd.s32 9, %v11022_v11 }
 0x219   : > { %v9359_v3 = vpop.eup %9358  ;;  %9370 = vrcp.f32 %v3434_v19  ;;  %v7559_v28 = vmul.f32 -1.442695, %v1307_v54  ;;  %15638 = vst [vmem:[#allocation95_spill] sm:$0xff] %v11028_v41  ;;  %vm4336_vm2 = vcmp.eq.s32.totalorder %v11028_v41, %v11022_v11  ;;  %vm4335_vm3 = vcmp.eq.s32.totalorder %v11028_v41, %v11007_v62 }
 0x21a   : > { %v9361_v10 = vpop.eup %9360  ;;  %v3437_v18 = vadd.f32 1.0, %v9359_v3  ;;  %9372 = vpow2.f32 %v7556_v0  ;;  %v7558_v36 = vmul.f32 -1.442695, %v1302_v30  ;;  %v8467_v29 = vpop.f32.mrb[74].mxu1  ;;  %v15079_v3 = vmov 0.0   ;;  %vm11058_vm5 = vmpackc.low %vm4446_vm4, %vm4335_vm3 }
 0x21b   : > { %9374 = vpow2.f32 %v7559_v28  ;;  %v1317_v1 = vadd.f32 %v8467_v29, %v10829_v22  ;;  %v1311_v9 = vpop.f32.mrb[75].mxu1  ;;  %v3436_v13 = vadd.f32 1.0, %v9361_v10  ;;  %v7615_v30 = vsel %vm4336_vm2, 1.0, %v15079_v3 }
 0x21c   : > { %v1312_v19 = vadd.f32 %v10829_v22, %v1311_v9  ;;  %9376 = vrcp.f32 %v3437_v18  ;;  %v11046_v28 = vadd.f32 %v10824_v56, %v10793_v8  ;;  %v782_v11 = vadd.f32 %v10543_v39, %v10515_v20 }
 0x21d   : > { %v9363_v54 = vpop.eup %9362  ;;  %v7561_v0 = vmul.f32 -1.442695, %v1317_v1  ;;  %9378 = vpow2.f32 %v7558_v36  ;;  %v11052_v55 = vpack.c.bf16 %v7615_v30, %v15075_v6  ;;  %v15641_v8 = vmov 0  ;;  %v11068_v30 = vpop.permute.xlu1 %2087 }
 0x21e   : > { %15639 = vst [vmem:[#allocation96_spill] sm:$0xff] %v11046_v28  ;;  %v7560_v29 = vmul.f32 -1.442695, %v1312_v19  ;;  %v8470_v10 = vpop.f32.mrb[76].mxu1  ;;  %v9365_v9 = vpop.eup %9364  ;;  %v15642_v8 = vsel %vm11058_vm5, 4294967295, %v15641_v8  ;;  %v3439_v36 = vadd.f32 1.0, %v9363_v54  ;;  %vm4344_vm6 = vcmp.eq.s32.totalorder %v11028_v41, %v4342_v50 }
 0x21f   : > { %9380 = vpow2.f32 %v7561_v0  ;;  %v1327_v1 = vadd.f32 %v8470_v10, %v10829_v22  ;;  %v1321_v18 = vpop.f32.mrb[77].mxu1  ;;  %15640 = vst [vmem:[#allocation97_spill] sm:$0xff] %v11052_v55  ;;  %15643 = vst [vmem:[#allocation98_spill] sm:$0xff] %v15642_v8  ;;  %v4341_v20 = vadd.s32 9, %v11007_v62  ;;  %v11066_v10 = vadd.f32 %v10835_v60, %v787_v2  ;;  %9012 = vmatprep.subr.msk.bf16.mxu0 %vm11058_vm5, %v11052_v55  ;;  %v11082_v2 = vpop.permute.xlu0 %2408 }
 0x220   : > { %v1322_v19 = vadd.f32 %v10829_v22, %v1321_v18  ;;  %9382 = vrcp.f32 %v3436_v13  ;;  %v7617_v54 = vsel %vm4344_vm6, 1.0, %v15079_v3  ;;  %v3438_v18 = vadd.f32 1.0, %v9365_v9  ;;  %9015 = vmatpush3.bf16.msk.msra.mxu0 %vm11058_vm5, %v11052_v55 }
 0x221   : > { %v9367_v0 = vpop.eup %9366  ;;  %15644 = vst [vmem:[#allocation99_spill] sm:$0xff] %v11066_v10  ;;  %v7563_v6 = vmul.f32 -1.442695, %v1327_v1  ;;  %9384 = vpow2.f32 %v7560_v29  ;;  %vm4343_vm7 = vcmp.eq.s32.totalorder %v11028_v41, %v4341_v20  ;;  %v797_v20 = vadd.f32 %v10521_v21, %v10543_v39 }
 0x222   : > { %v11074_v28 = vpop.eup %9368  ;;  %v7562_v62 = vmul.f32 -1.442695, %v1322_v19  ;;  %v8473_v50 = vpop.f32.mrb[78].mxu1  ;;  %v3441_v13 = vadd.f32 1.0, %v9367_v0  ;;  %vm11087_vm8 = vmpackc.low %vm4446_vm4, %vm4343_vm7  ;;  %v792_v21 = vadd.f32 %v10543_v39, %v10525_v27  ;;  %v802_v29 = vadd.f32 %v10543_v39, %v10535_v35 }
 0x223   : > { %15645 = vst [vmem:[#allocation100_spill] sm:$0xff] %v11074_v28  ;;  %v11080_v60 = vpop.eup %9370  ;;  %9386 = vpow2.f32 %v7563_v6  ;;  %v1337_v1 = vadd.f32 %v8473_v50, %v10829_v22  ;;  %v1331_v3 = vpop.f32.mrb[79].mxu1  ;;  %v15647_v28 = vmov 1.0   ;;  %v11099_v50 = vadd.f32 %v10856_v42, %v782_v11 }
 0x224   : > { %15646 = vst [vmem:[#allocation101_spill] sm:$0xff] %v11080_v60  ;;  %v9004_v9 = vpack.c.bf16 %v7617_v54, %v15647_v28  ;;  %v9373_v19 = vpop.eup %9372  ;;  %v11095_v60 = vadd.f32 %v10819_v38, %v10871_v49  ;;  %9388 = vrcp.f32 %v3439_v36  ;;  %v1332_v6 = vadd.f32 %v10829_v22, %v1331_v3  ;;  %v11115_v11 = vpop.permute.xlu1 %2092 }
 0x225   : > { %v9375_v0 = vpop.eup %9374  ;;  %v3440_v54 = vadd.f32 1.0, %v9373_v19  ;;  %9390 = vpow2.f32 %v7562_v62  ;;  %v7565_v10 = vmul.f32 -1.442695, %v1337_v1  ;;  %v11107_v49 = vadd.f32 %v10824_v56, %v10803_v53 }
 0x226   : > { %9006 = vmatprep.subr.msk.bf16.mxu1 %vm11087_vm8, %v9004_v9  ;;  %9392 = vrcp.f32 %v3438_v18  ;;  %v7564_v36 = vmul.f32 -1.442695, %v1332_v6  ;;  %v8476_v3 = vpop.f32.mrb[80].mxu1  ;;  %v11111_v42 = vpop.eup %9376  ;;  %v807_v62 = vadd.f32 %v10533_v33, %v10543_v39  ;;  %v3443_v1 = vadd.f32 1.0, %v9375_v0 }
 0x227   : > { %9009 = vmatpush3.bf16.msk.msra.mxu1 %vm11087_vm8, %v9004_v9  ;;  %9394 = vrcp.f32 %v3441_v13  ;;  %v1347_v27 = vadd.f32 %v8476_v3, %v10829_v22  ;;  %v1341_v19 = vpop.f32.mrb[81].mxu1  ;;  %v9379_v53 = vpop.eup %9378  ;;  %v11122_v18 = vadd.f32 %v10848_v14, %v797_v20  ;;  %v11126_v9 = vadd.f32 %v10819_v38, %v10933_v12 }
 0x228   : > { %9052 = vmatprep.subr.msk.bf16.mxu1 %vm11058_vm5, %v11052_v55  ;;  %9396 = vrcp.f32 %v3440_v54  ;;  %v1342_v33 = vadd.f32 %v10829_v22, %v1341_v19  ;;  %v11131_v6 = vpop.permute.xlu0 %2413  ;;  %v3442_v0 = vadd.f32 1.0, %v9379_v53  ;;  %v11134_v8 = vadd.f32 %v10843_v46, %v792_v21 }
 0x229   : > { %v9381_v13 = vpop.eup %9380  ;;  %9398 = vpow2.f32 %v7565_v10  ;;  %v7567_v3 = vmul.f32 -1.442695, %v1347_v27  ;;  %v11138_v14 = vadd.f32 %v10824_v56, %v10831_v24  ;;  %v11143_v19 = vadd.f32 %v10861_v25, %v807_v62  ;;  %v2098_v62 = vpop.permute.xlu1 %2097 }
 0x22a   : > { %9400 = vpow2.f32 %v7564_v36  ;;  %v7566_v12 = vmul.f32 -1.442695, %v1342_v33  ;;  %v8479_v20 = vpop.f32.mrb[82].mxu1  ;;  %v11140_v54 = vpop.eup %9382  ;;  %v3445_v35 = vadd.f32 1.0, %v9381_v13  ;;  %v812_v46 = vadd.f32 %v10543_v39, %v10550_v44 }
 0x22b   : > { %9402 = vrcp.f32 %v3443_v1  ;;  %v1357_v10 = vadd.f32 %v8479_v20, %v10829_v22  ;;  %v1351_v27 = vpop.f32.mrb[83].mxu1  ;;  %v9385_v53 = vpop.eup %9384  ;;  %v11150_v24 = vadd.f32 %v10819_v38, %v10997_v5  ;;  %v11154_v25 = vadd.f32 %v10852_v45, %v802_v29  ;;  %v15650_v20 = vld [vmem:[#allocation16_spill] sm:$0xff] }
 0x22c   : > { %9404 = vrcp.f32 %v3442_v0  ;;  %v1352_v21 = vadd.f32 %v10829_v22, %v1351_v27  ;;  %v3444_v1 = vadd.f32 1.0, %v9385_v53  ;;  %v11160_v39 = vadd.f32 %v10879_v32, %v15650_v20  ;;  %v11170_v29 = vpop.permute.xlu0 %2418  ;;  %v15653_v20 = vld [vmem:[#allocation17_spill] sm:$0xff] }
 0x22d   : > { %v9387_v36 = vpop.eup %9386  ;;  %9406 = vpow2.f32 %v7567_v3  ;;  %v7569_v33 = vmul.f32 -1.442695, %v1357_v10  ;;  %v11164_v44 = vadd.f32 %v10824_v56, %v10893_v61  ;;  %v11168_v45 = vadd.f32 %v10819_v38, %v11032_v52 }
 0x22e   : > { %v11156_v13 = vpop.eup %9388  ;;  %v3447_v5 = vadd.f32 1.0, %v9387_v36  ;;  %9408 = vpow2.f32 %v7566_v12  ;;  %v8482_v0 = vpop.f32.mrb[84].mxu1  ;;  %v7568_v3 = vmul.f32 -1.442695, %v1352_v21  ;;  %v11176_v61 = vadd.f32 %v10875_v17, %v812_v46 }
 0x22f   : > { %v9391_v27 = vpop.eup %9390  ;;  %9410 = vrcp.f32 %v3445_v35  ;;  %v1367_v10 = vadd.f32 %v8482_v0, %v10829_v22  ;;  %v1361_v32 = vpop.f32.mrb[85].mxu1  ;;  %v11180_v12 = vadd.f32 %v10824_v56, %v10961_v4  ;;  %v11187_v35 = vadd.f32 %v10898_v51, %v15653_v20  ;;  %v15654_v0 = vld [vmem:[#allocation18_spill] sm:$0xff] }
 0x230   : > { %v11173_v53 = vpop.eup %9392  ;;  %15651 = vst [vmem:[#allocation16_spill] sm:$0xff] %v11176_v61  ;;  %9412 = vrcp.f32 %v3444_v1  ;;  %v1362_v52 = vadd.f32 %v10829_v22, %v1361_v32  ;;  %v11191_v21 = vadd.f32 %v10819_v38, %v11068_v30  ;;  %v11197_v4 = vadd.f32 %v10887_v43, %v15654_v0  ;;  %v2103_v20 = vpop.permute.xlu1 %2102 }
 0x231   : > { %v11183_v36 = vpop.eup %9394  ;;  %9414 = vpow2.f32 %v7569_v33  ;;  %v7571_v17 = vmul.f32 -1.442695, %v1367_v10  ;;  %v3446_v1 = vadd.f32 1.0, %v9391_v27  ;;  %v11205_v30 = vadd.f32 %v10824_v56, %v11013_v15 }
 0x232   : > { %15652 = vst [vmem:[#allocation102_spill] sm:$0xff] %v11183_v36  ;;  %v11193_v46 = vpop.eup %9396  ;;  %15655 = vst [vmem:[#allocation17_spill] sm:$0xff] %v11197_v4  ;;  %9416 = vrcp.f32 %v3447_v5  ;;  %v7570_v32 = vmul.f32 -1.442695, %v1362_v52  ;;  %v8485_v55 = vpop.f32.mrb[86].mxu1  ;;  %v15656_v36 = vld [vmem:[#allocation19_spill] sm:$0xff]  ;;  %v11210_v5 = vadd.f32 %v10819_v38, %v11115_v11  ;;  %v11221_v15 = vadd.f32 %v10824_v56, %v11039_v16 }
 0x233   : > { %v9399_v61 = vpop.eup %9398  ;;  %v11201_v51 = vadd.f32 %v10919_v63, %v15656_v36  ;;  %9418 = vpow2.f32 %v7568_v3  ;;  %v1377_v33 = vadd.f32 %v8485_v55, %v10829_v22  ;;  %v1371_v10 = vpop.f32.mrb[87].mxu1  ;;  %v15658_v36 = vld [vmem:[#allocation20_spill] sm:$0xff]  ;;  %v11236_v16 = vadd.f32 %v10819_v38, %v2098_v62 }
 0x234   : > { %v9401_v43 = vpop.eup %9400  ;;  %v3449_v27 = vadd.f32 1.0, %v9399_v61  ;;  %9420 = vpow2.f32 %v7571_v17  ;;  %v1372_v52 = vadd.f32 %v10829_v22, %v1371_v10  ;;  %v11217_v0 = vadd.f32 %v10907_v57, %v15658_v36  ;;  %v11223_v55 = vpop.permute.xlu0 %2423  ;;  %v15661_v61 = vld [vmem:[#allocation21_spill] sm:$0xff]  ;;  %v15663_v36 = vld [vmem:[#allocation22_spill] sm:$0xff] }
 0x235   : > { %15657 = vst [vmem:[#allocation18_spill] sm:$0xff] %v11201_v51  ;;  %v11213_v63 = vpop.eup %9402  ;;  %9422 = vpow2.f32 %v7570_v32  ;;  %v7573_v3 = vmul.f32 -1.442695, %v1377_v33  ;;  %v11229_v17 = vadd.f32 %v10931_v7, %v15661_v61  ;;  %v3448_v10 = vadd.f32 1.0, %v9401_v43 }
 0x236   : > { %15659 = vst [vmem:[#allocation19_spill] sm:$0xff] %v11217_v0  ;;  %v11225_v11 = vpop.eup %9404  ;;  %9424 = vrcp.f32 %v3446_v1  ;;  %v7572_v51 = vmul.f32 -1.442695, %v1372_v52  ;;  %v8488_v4 = vpop.f32.mrb[88].mxu1  ;;  %v11233_v0 = vadd.f32 %v10923_v37, %v15663_v36  ;;  %v11241_v7 = vadd.f32 %v10824_v56, %v11082_v2  ;;  %v15666_v37 = vld [vmem:[#allocation23_spill] sm:$0xff]  ;;  %v15668_v2 = vld [vmem:[#allocation24_spill] sm:$0xff] }
 0x237   : > { %15660 = vst [vmem:[#allocation20_spill] sm:$0xff] %v11225_v11  ;;  %15662 = vst [vmem:[#allocation21_spill] sm:$0xff] %v11229_v17  ;;  %v9407_v57 = vpop.eup %9406  ;;  %9426 = vrcp.f32 %v3449_v27  ;;  %v1387_v32 = vadd.f32 %v8488_v4, %v10829_v22  ;;  %v1381_v33 = vpop.f32.mrb[89].mxu1  ;;  %v11248_v61 = vadd.f32 %v10951_v48, %v15666_v37  ;;  %v11251_v62 = vadd.f32 %v10819_v38, %v2103_v20 }
 0x238   : > { %15664 = vst [vmem:[#allocation22_spill] sm:$0xff] %v11233_v0  ;;  %v9409_v11 = vpop.eup %9408  ;;  %v3451_v1 = vadd.f32 1.0, %v9407_v57  ;;  %9428 = vpow2.f32 %v7573_v3  ;;  %v1382_v43 = vadd.f32 %v10829_v22, %v1381_v33  ;;  %v2108_v4 = vpop.permute.xlu1 %2107  ;;  %v11257_v57 = vadd.f32 %v10942_v40, %v15668_v2 }
 0x239   : > { %v11244_v52 = vpop.eup %9410  ;;  %15667 = vst [vmem:[#allocation23_spill] sm:$0xff] %v11248_v61  ;;  %9430 = vpow2.f32 %v7572_v51  ;;  %v7575_v27 = vmul.f32 -1.442695, %v1387_v32  ;;  %v3450_v3 = vadd.f32 1.0, %v9409_v11  ;;  %v11265_v20 = vadd.f32 %v10824_v56, %v11131_v6  ;;  %v2429_v51 = vpop.permute.xlu0 %2428 }
 0x23a   : > { %15665 = vst [vmem:[#allocation103_spill] sm:$0xff] %v11244_v52  ;;  %v11253_v36 = vpop.eup %9412  ;;  %15669 = vst [vmem:[#allocation24_spill] sm:$0xff] %v11257_v57  ;;  %9432 = vrcp.f32 %v3448_v10  ;;  %v7574_v33 = vmul.f32 -1.442695, %v1382_v43  ;;  %v8491_v0 = vpop.f32.mrb[90].mxu1  ;;  %v15670_v52 = vld [vmem:[#allocation25_spill] sm:$0xff]  ;;  %v11271_v11 = vadd.f32 %v10819_v38, %v2108_v4  ;;  %v11280_v6 = vadd.f32 %v10824_v56, %v11170_v29 }
 0x23b   : > { %v9415_v17 = vpop.eup %9414  ;;  %v11261_v48 = vadd.f32 %v10969_v31, %v15670_v52  ;;  %9434 = vrcp.f32 %v3451_v1  ;;  %v1397_v32 = vadd.f32 %v8491_v0, %v10829_v22  ;;  %v1391_v37 = vpop.f32.mrb[91].mxu1  ;;  %v15672_v52 = vld [vmem:[#allocation26_spill] sm:$0xff]  ;;  %v15679_v57 = vld [vmem:[#allocation29_spill] sm:$0xff]  ;;  %vm4349_vm2 = vcmask 72704  }
 0x23c   : > { %v11268_v40 = vpop.eup %9416  ;;  %v3453_v10 = vadd.f32 1.0, %v9415_v17  ;;  %9436 = vpow2.f32 %v7575_v27  ;;  %v1392_v43 = vadd.f32 %v10829_v22, %v1391_v37  ;;  %v11276_v2 = vadd.f32 %v10965_v23, %v15672_v52  ;;  %v15676_v17 = vld [vmem:[#allocation28_spill] sm:$0xff] }
 0x23d   : > { %15671 = vst [vmem:[#allocation25_spill] sm:$0xff] %v11261_v48  ;;  %v9419_v31 = vpop.eup %9418  ;;  %9438 = vpow2.f32 %v7574_v33  ;;  %v7577_v0 = vmul.f32 -1.442695, %v1397_v32  ;;  %v15674_v48 = vld [vmem:[#allocation27_spill] sm:$0xff]  ;;  %v11288_v4 = vadd.f32 %v10977_v26, %v15676_v17  ;;  %v11299_v26 = vadd.f32 %v10824_v56, %v11223_v55  ;;  %v15686_v55 = vld [vmem:[#allocation32_spill] sm:$0xff] }
 0x23e   : > { %15673 = vst [vmem:[#allocation26_spill] sm:$0xff] %v11276_v2  ;;  %v9421_v1 = vpop.eup %9420  ;;  %v11284_v38 = vadd.f32 %v10986_v58, %v15674_v48  ;;  %9440 = vrcp.f32 %v3450_v3  ;;  %v3452_v27 = vadd.f32 1.0, %v9419_v31  ;;  %v8494_v37 = vpop.f32.mrb[92].mxu1  ;;  %v7576_v2 = vmul.f32 -1.442695, %v1392_v43  ;;  %v15682_v31 = vld [vmem:[#allocation30_spill] sm:$0xff] }
 0x23f   : > { %15677 = vst [vmem:[#allocation28_spill] sm:$0xff] %v11288_v4  ;;  %v9423_v23 = vpop.eup %9422  ;;  %v3455_v52 = vadd.f32 1.0, %v9421_v1  ;;  %9442 = vpow2.f32 %v7577_v0  ;;  %v1407_v29 = vadd.f32 %v8494_v37, %v10829_v22  ;;  %v1401_v33 = vpop.f32.mrb[93].mxu1  ;;  %v11295_v58 = vadd.f32 %v11011_v59, %v15679_v57  ;;  %v15684_v59 = vld [vmem:[#allocation31_spill] sm:$0xff] }
 0x240   : > { %15675 = vst [vmem:[#allocation27_spill] sm:$0xff] %v11284_v38  ;;  %v11291_v32 = vpop.eup %9424  ;;  %9444 = vrcp.f32 %v3453_v10  ;;  %v1402_v3 = vadd.f32 %v10829_v22, %v1401_v33  ;;  %v11306_v43 = vadd.f32 %v10995_v34, %v15682_v31  ;;  %v2434_v0 = vpop.permute.xlu0 %2433  ;;  %v3454_v1 = vadd.f32 1.0, %v9423_v23  ;;  %v15732_v38 = vld [vmem:[#allocation83_spill] sm:$0xff] }
 0x241   : > { %15678 = vst [vmem:[#allocation104_spill] sm:$0xff] %v11291_v32  ;;  %15680 = vst [vmem:[#allocation29_spill] sm:$0xff] %v11295_v58  ;;  %v11302_v48 = vpop.eup %9426  ;;  %9446 = vrcp.f32 %v3452_v27  ;;  %v7579_v17 = vmul.f32 -1.442695, %v1407_v29  ;;  %v11310_v57 = vadd.f32 %v11095_v60, %v15684_v59  ;;  %v11314_v10 = vadd.f32 %v11026_v47, %v15686_v55  ;;  %v15697_v55 = vld [vmem:[#allocation36_spill] sm:$0xff]  ;;  %v15758_v32 = vld [vmem:[#allocation57_spill] sm:$0xff] }
 0x242   : > { %15681 = vst [vmem:[#allocation105_spill] sm:$0xff] %v11302_v48  ;;  %15683 = vst [vmem:[#allocation30_spill] sm:$0xff] %v11306_v43  ;;  %v9429_v37 = vpop.eup %9428  ;;  %v11317_v33 = vadd.f32 %v10824_v56, %v2429_v51  ;;  %9448 = vrcp.f32 %v3455_v52  ;;  %v8497_v58 = vpop.f32.mrb[94].mxu1  ;;  %v7578_v27 = vmul.f32 -1.442695, %v1402_v3  ;;  %v11323_v60 = vadd.f32 %v10824_v56, %v2434_v0  ;;  %v15693_v3 = vld [vmem:[#allocation34_spill] sm:$0xff] }
 0x243   : > { %15685 = vst [vmem:[#allocation31_spill] sm:$0xff] %v11310_v57  ;;  %15687 = vst [vmem:[#allocation32_spill] sm:$0xff] %v11314_v10  ;;  %v9431_v34 = vpop.eup %9430  ;;  %v3457_v31 = vadd.f32 1.0, %v9429_v37  ;;  %9450 = vpow2.f32 %v7576_v2  ;;  %v1417_v23 = vadd.f32 %v8497_v58, %v10829_v22  ;;  %v1411_v29 = vpop.f32.mrb[95].mxu1  ;;  %v11329_v51 = vld [vmem:[%s15689_s29] ss:$0 sm:$0xff]  ;;  %v11339_v37 = vadd.f32 %v11126_v9, %v15693_v3 }
 0x244   : > { %v11320_v43 = vpop.eup %9432  ;;  %v3456_v59 = vadd.f32 1.0, %v9431_v34  ;;  %9452 = vpow2.f32 %v7579_v17  ;;  %v1412_v47 = vadd.f32 %v10829_v22, %v1411_v29  ;;  %v15691_v2 = vld [vmem:[#allocation33_spill] sm:$0xff]  ;;  %v15695_v17 = vld [vmem:[#allocation35_spill] sm:$0xff]  ;;  %v11347_v34 = vadd.f32 %v11168_v45, %v15697_v55  ;;  %v15701_v9 = vld [vmem:[#allocation38_spill] sm:$0xff] }
 0x245   : > { %15688 = vst [vmem:[#allocation106_spill] sm:$0xff] %v11320_v43  ;;  %v11331_v52 = vpop.eup %9434  ;;  %v11335_v58 = vadd.f32 %v11150_v24, %v15691_v2  ;;  %15694 = vst [vmem:[#allocation34_spill] sm:$0xff] %v11339_v37  ;;  %9454 = vrcp.f32 %v3454_v1  ;;  %v7581_v56 = vmul.f32 -1.442695, %v1417_v23  ;;  %v11343_v22 = vadd.f32 %v11191_v21, %v15695_v17  ;;  %v15699_v29 = vld [vmem:[#allocation37_spill] sm:$0xff]  ;;  %v15717_v37 = vld [vmem:[#allocation74_spill] sm:$0xff] }
 0x246   : > { %15690 = vst [vmem:[#allocation107_spill] sm:$0xff] %v11331_v52  ;;  %v9437_v0 = vpop.eup %9436  ;;  %15698 = vst [vmem:[#allocation36_spill] sm:$0xff] %v11347_v34  ;;  %v11351_v10 = vadd.f32 %v11236_v16, %v15699_v29  ;;  %9456 = vrcp.f32 %v3457_v31  ;;  %v8510_v24 = vpop.f32.mrb[96].mxu1  ;;  %v11355_v1 = vadd.f32 %v11210_v5, %v15701_v9  ;;  %v7580_v55 = vmul.f32 -1.442695, %v1412_v47  ;;  %v15704_v31 = vld [vmem:[#allocation39_spill] sm:$0xff] }
 0x247   : > { %15692 = vst [vmem:[#allocation33_spill] sm:$0xff] %v11335_v58  ;;  %15696 = vst [vmem:[#allocation35_spill] sm:$0xff] %v11343_v22  ;;  %v9439_v2 = vpop.eup %9438  ;;  %v3459_v23 = vadd.f32 1.0, %v9437_v0  ;;  %9458 = vpow2.f32 %v7578_v27  ;;  %v1507_v21 = vadd.f32 %v8510_v24, %v11329_v51  ;;  %v1501_v3 = vpop.f32.mrb[97].mxu1  ;;  %v15706_v34 = vld [vmem:[#allocation47_spill] sm:$0xff]  ;;  %v15707_v5 = vld [vmem:[#allocation41_spill] sm:$0xff] }
 0x248   : > { %15700 = vst [vmem:[#allocation37_spill] sm:$0xff] %v11351_v10  ;;  %15702 = vst [vmem:[#allocation38_spill] sm:$0xff] %v11355_v1  ;;  %v11358_v17 = vpop.eup %9440  ;;  %9460 = vrcp.f32 %v3456_v59  ;;  %v3458_v45 = vadd.f32 1.0, %v9439_v2  ;;  %v1502_v16 = vadd.f32 %v11329_v51, %v1501_v3  ;;  %v11363_v10 = vadd.f32 %v11271_v11, %v15704_v31  ;;  %v15709_v24 = vld [vmem:[#allocation40_spill] sm:$0xff]  ;;  %v15711_v59 = vld [vmem:[#allocation42_spill] sm:$0xff] }
 0x249   : > { %15703 = vst [vmem:[#allocation108_spill] sm:$0xff] %v11358_v17  ;;  %v9443_v29 = vpop.eup %9442  ;;  %v1027_v9 = vadd.f32 %v15707_v5, %v15706_v34  ;;  %9462 = vpow2.f32 %v7581_v56  ;;  %v7517_v27 = vmul.f32 -1.442695, %v1507_v21  ;;  %v11371_v1 = vadd.f32 %v11251_v62, %v15709_v24  ;;  %v15713_v11 = vld [vmem:[#allocation43_spill] sm:$0xff]  ;;  %v15714_v5 = vld [vmem:[#allocation44_spill] sm:$0xff]  ;;  %v15716_v24 = vld [vmem:[#allocation45_spill] sm:$0xff] }
 0x24a   : > { %15705 = vst [vmem:[#allocation39_spill] sm:$0xff] %v11363_v10  ;;  %v11367_v0 = vpop.eup %9444  ;;  %v1022_v47 = vadd.f32 %v15706_v34, %v15711_v59  ;;  %9464 = vrcp.f32 %v3459_v23  ;;  %v7516_v2 = vmul.f32 -1.442695, %v1502_v16  ;;  %v8513_v3 = vpop.f32.mrb[98].mxu1  ;;  %v1037_v31 = vadd.f32 %v15713_v11, %v15706_v34  ;;  %v15718_v11 = vld [vmem:[#allocation46_spill] sm:$0xff]  ;;  %v15719_v57 = vld [vmem:[#allocation49_spill] sm:$0xff] }
 0x24b   : > { %15708 = vst [vmem:[#allocation47_spill] sm:$0xff] %v11367_v0  ;;  %15710 = vst [vmem:[#allocation41_spill] sm:$0xff] %v11371_v1  ;;  %v11375_v22 = vpop.eup %9446  ;;  %v1032_v56 = vadd.f32 %v15706_v34, %v15714_v5  ;;  %9466 = vrcp.f32 %v3458_v45  ;;  %v1517_v21 = vadd.f32 %v8513_v3, %v11329_v51  ;;  %v1511_v10 = vpop.f32.mrb[99].mxu1  ;;  %v1047_v59 = vadd.f32 %v15716_v24, %v15706_v34  ;;  %v15724_v0 = vld [vmem:[#allocation76_spill] sm:$0xff] }
 0x24c   : > { %15712 = vst [vmem:[#allocation40_spill] sm:$0xff] %v11375_v22  ;;  %v11382_v62 = vpop.eup %9448  ;;  %v3461_v23 = vadd.f32 1.0, %v9443_v29  ;;  %9468 = vpow2.f32 %v7580_v55  ;;  %v1512_v16 = vadd.f32 %v11329_v51, %v1511_v10  ;;  %v11388_v58 = vadd.f32 %v15717_v37, %v1027_v9  ;;  %v15721_v10 = vld [vmem:[#allocation75_spill] sm:$0xff]  ;;  %v15722_v37 = vld [vmem:[#allocation77_spill] sm:$0xff] }
 0x24d   : > { %15715 = vst [vmem:[#allocation42_spill] sm:$0xff] %v11382_v62  ;;  %v9451_v1 = vpop.eup %9450  ;;  %v1042_v5 = vadd.f32 %v15706_v34, %v15718_v11  ;;  %9470 = vpow2.f32 %v7517_v27  ;;  %v7519_v45 = vmul.f32 -1.442695, %v1517_v21  ;;  %v1052_v62 = vadd.f32 %v15706_v34, %v15719_v57  ;;  %v15725_v34 = vld [vmem:[#allocation79_spill] sm:$0xff] }
 0x24e   : > { %v9453_v3 = vpop.eup %9452  ;;  %v3460_v22 = vadd.f32 1.0, %v9451_v1  ;;  %9472 = vpow2.f32 %v7516_v2  ;;  %v7518_v24 = vmul.f32 -1.442695, %v1512_v16  ;;  %v8516_v29 = vpop.f32.mrb[100].mxu1  ;;  %v11397_v4 = vadd.f32 %v15721_v10, %v1022_v47  ;;  %v15726_v16 = vld [vmem:[#allocation78_spill] sm:$0xff] }
 0x24f   : > { %v11394_v55 = vpop.eup %9454  ;;  %v11400_v9 = vadd.f32 %v15722_v37, %v1037_v31  ;;  %9474 = vpow2.f32 %v7519_v45  ;;  %v1527_v27 = vadd.f32 %v8516_v29, %v11329_v51  ;;  %v1521_v21 = vpop.f32.mrb[101].mxu1  ;;  %v11406_v57 = vadd.f32 %v15724_v0, %v1032_v56  ;;  %v15728_v37 = vld [vmem:[#allocation48_spill] sm:$0xff] }
 0x250   : > { %15720 = vst [vmem:[#allocation43_spill] sm:$0xff] %v11394_v55  ;;  %v11403_v11 = vpop.eup %9456  ;;  %v11409_v1 = vadd.f32 %v15725_v34, %v1047_v59  ;;  %9476 = vrcp.f32 %v3461_v23  ;;  %v1522_v2 = vadd.f32 %v11329_v51, %v1521_v21  ;;  %v11413_v10 = vadd.f32 %v15726_v16, %v1042_v5  ;;  %v15730_v0 = vld [vmem:[#allocation80_spill] sm:$0xff]  ;;  %v15731_v34 = vld [vmem:[#allocation50_spill] sm:$0xff] }
 0x251   : > { %15723 = vst [vmem:[#allocation44_spill] sm:$0xff] %v11403_v11  ;;  %v9459_v47 = vpop.eup %9458  ;;  %9478 = vrcp.f32 %v3460_v22  ;;  %v3463_v31 = vadd.f32 1.0, %v9453_v3  ;;  %v7521_v45 = vmul.f32 -1.442695, %v1527_v27  ;;  %v15729_v11 = vld [vmem:[#allocation81_spill] sm:$0xff]  ;;  %v11422_v56 = vadd.f32 %v15730_v0, %v1052_v62  ;;  %v15733_v22 = vld [vmem:[#allocation51_spill] sm:$0xff] }
 0x252   : > { %v11415_v29 = vpop.eup %9460  ;;  %v11419_v55 = vadd.f32 %v15729_v11, %v15728_v37  ;;  %9480 = vpow2.f32 %v7518_v24  ;;  %v7520_v59 = vmul.f32 -1.442695, %v1522_v2  ;;  %v8519_v23 = vpop.f32.mrb[102].mxu1  ;;  %v11426_v5 = vadd.f32 %v15732_v38, %v15731_v34  ;;  %v15734_v3 = vld [vmem:[#allocation82_spill] sm:$0xff]  ;;  %v15736_v2 = vld [vmem:[#allocation92_spill] sm:$0xff]  ;;  %v15740_v34 = vld [vmem:[#allocation85_spill] sm:$0xff] }
 0x253   : > { %15727 = vst [vmem:[#allocation45_spill] sm:$0xff] %v11415_v29  ;;  %v9463_v21 = vpop.eup %9462  ;;  %v11430_v27 = vadd.f32 %v15734_v3, %v15733_v22  ;;  %9482 = vpow2.f32 %v7521_v45  ;;  %v1537_v16 = vadd.f32 %v8519_v23, %v11329_v51  ;;  %v1531_v11 = vpop.f32.mrb[103].mxu1  ;;  %v3462_v62 = vadd.f32 1.0, %v9459_v47  ;;  %v15737_v29 = vld [vmem:[#allocation94_spill] sm:$0xff]  ;;  %v15739_v38 = vld [vmem:[#allocation52_spill] sm:$0xff]  ;;  %v15741_v22 = vld [vmem:[#allocation53_spill] sm:$0xff] }
 0x254   : > { %v11433_v37 = vpop.eup %9464  ;;  %v1532_v24 = vadd.f32 %v11329_v51, %v1531_v11  ;;  %v4999_v0 = vadd.s32 18, %v15736_v2  ;;  %v5000_v17 = vadd.s32 18, %v15737_v29  ;;  %v11442_v43 = vadd.f32 %v15740_v34, %v15739_v38  ;;  %v15742_v45 = vld [vmem:[#allocation84_spill] sm:$0xff]  ;;  %v15744_v47 = vld [vmem:[#allocation54_spill] sm:$0xff]  ;;  %v15745_v11 = vld [vmem:[#allocation87_spill] sm:$0xff] }
 0x255   : > { %15735 = vst [vmem:[#allocation74_spill] sm:$0xff] %v11433_v37  ;;  %v11438_v52 = vpop.eup %9466  ;;  %v11446_v3 = vadd.f32 %v15742_v45, %v15741_v22  ;;  %9484 = vrcp.f32 %v3463_v31  ;;  %v7523_v23 = vmul.f32 -1.442695, %v1537_v16  ;;  %v11452_v48 = vadd.f32 %v15745_v11, %v15744_v47  ;;  %v15746_v38 = vld [vmem:[#allocation55_spill] sm:$0xff]  ;;  %v15747_v34 = vld [vmem:[#allocation86_spill] sm:$0xff] }
 0x256   : > { %15738 = vst [vmem:[#allocation46_spill] sm:$0xff] %v11438_v52  ;;  %v11448_v37 = vpop.eup %9468  ;;  %9486 = vpow2.f32 %v7520_v59  ;;  %v7522_v29 = vmul.f32 -1.442695, %v1532_v24  ;;  %v8522_v2 = vpop.f32.mrb[104].mxu1  ;;  %vm5001_vm9 = vcmp.eq.s32.totalorder %v11028_v41, %v4999_v0  ;;  %v11457_v61 = vadd.f32 %v15747_v34, %v15746_v38 }
 0x257   : > { %15743 = vst [vmem:[#allocation49_spill] sm:$0xff] %v11448_v37  ;;  %v9471_v52 = vpop.eup %9470  ;;  %9488 = vpow2.f32 %v7523_v23  ;;  %v1547_v31 = vadd.f32 %v8522_v2, %v11329_v51  ;;  %v1541_v16 = vpop.f32.mrb[105].mxu1  ;;  %vm5002_vm10 = vcmp.eq.s32.totalorder %v11028_v41, %v5000_v17  ;;  %v15749_v24 = vmov 0.0   ;;  %vm11464_vm11 = vmpackc.low %vm4446_vm4, %vm5001_vm9 }
 0x258   : > { %15748 = vst [vmem:[#allocation75_spill] sm:$0xff] %v11457_v61  ;;  %v9473_v22 = vpop.eup %9472  ;;  %9490 = vrcp.f32 %v3462_v62  ;;  %v1757_v45 = vadd.f32 1.0, %v9471_v52  ;;  %v1542_v59 = vadd.f32 %v11329_v51, %v1541_v16  ;;  %v7687_v47 = vsel %vm5002_vm10, 1.0, %v15749_v24  ;;  %v15755_v62 = vld [vmem:[#allocation56_spill] sm:$0xff]  ;;  %v15756_v52 = vld [vmem:[#allocation89_spill] sm:$0xff] }
 0x259   : > { %v15750_v0 = vmov 0  ;;  %v9475_v11 = vpop.eup %9474  ;;  %v1756_v38 = vadd.f32 1.0, %v9473_v22  ;;  %9492 = vpow2.f32 %v7522_v29  ;;  %v7525_v23 = vmul.f32 -1.442695, %v1547_v31  ;;  %v15759_v61 = vld [vmem:[#allocation88_spill] sm:$0xff]  ;;  %v15761_v29 = vld [vmem:[#allocation58_spill] sm:$0xff] }
 0x25a   : > { %v15751_v0 = vsel %vm11464_vm11, 4294967295, %v15750_v0  ;;  %v11469_v2 = vpack.c.bf16 %v7687_v47, %v15647_v28  ;;  %v11471_v17 = vpop.eup %9476  ;;  %v11475_v34 = vadd.f32 %v15756_v52, %v15755_v62  ;;  %v3465_v16 = vadd.f32 1.0, %v9463_v21  ;;  %v8525_v41 = vpop.f32.mrb[106].mxu1  ;;  %v15762_v31 = vld [vmem:[#allocation91_spill] sm:$0xff]  ;;  %v15766_v52 = vld [vmem:[#allocation60_spill] sm:$0xff] }
 0x25b   : > { %15752 = vst [vmem:[#allocation77_spill] sm:$0xff] %v15751_v0  ;;  %15754 = vst [vmem:[#allocation79_spill] sm:$0xff] %v11471_v17  ;;  %9494 = vrcp.f32 %v1757_v45  ;;  %v1759_v24 = vadd.f32 1.0, %v9475_v11  ;;  %v11477_v37 = vpop.eup %9478  ;;  %v11481_v22 = vadd.f32 %v15759_v61, %v15758_v32  ;;  %v11485_v47 = vadd.f32 %v15762_v31, %v15761_v29  ;;  %v1551_v17 = vpop.f32.mrb[107].mxu1  ;;  %v15764_v45 = vld [vmem:[#allocation59_spill] sm:$0xff]  ;;  %v15765_v11 = vld [vmem:[#allocation90_spill] sm:$0xff] }
 0x25c   : > { %15753 = vst [vmem:[#allocation76_spill] sm:$0xff] %v11469_v2  ;;  %15757 = vst [vmem:[#allocation78_spill] sm:$0xff] %v11477_v37  ;;  %9496 = vrcp.f32 %v1756_v38  ;;  %v1557_v28 = vadd.f32 %v8525_v41, %v11329_v51  ;;  %9018 = vmatprep.subr.msk.bf16.mxu0 %vm11464_vm11, %v11469_v2  ;;  %v9481_v21 = vpop.eup %9480  ;;  %v11493_v62 = vadd.f32 %v15765_v11, %v15764_v45  ;;  %v15767_v61 = vld [vmem:[#allocation96_spill] sm:$0xff]  ;;  %v15769_v37 = vld [vmem:[#allocation61_spill] sm:$0xff] }
 0x25d   : > { %15760 = vst [vmem:[#allocation48_spill] sm:$0xff] %v11481_v22  ;;  %15763 = vst [vmem:[#allocation81_spill] sm:$0xff] %v11485_v47  ;;  %v11497_v32 = vadd.f32 %v15767_v61, %v15766_v52  ;;  %v15770_v29 = vld [vmem:[#allocation93_spill] sm:$0xff]  ;;  %9498 = vrcp.f32 %v1759_v24  ;;  %v9483_v41 = vpop.eup %9482  ;;  %v1758_v38 = vadd.f32 1.0, %v9481_v21  ;;  %v7524_v47 = vmul.f32 -1.442695, %v1542_v59 }
 0x25e   : > { %v11501_v31 = vadd.f32 %v15770_v29, %v15769_v37  ;;  %9500 = vpow2.f32 %v7525_v23  ;;  %v1552_v0 = vadd.f32 %v11329_v51, %v1551_v17  ;;  %v15771_v2 = vld [vmem:[#allocation62_spill] sm:$0xff]  ;;  %v1761_v45 = vadd.f32 1.0, %v9483_v41  ;;  %v8528_v52 = vpop.f32.mrb[108].mxu1  ;;  %v15774_v24 = vld [vmem:[#allocation64_spill] sm:$0xff]  ;;  %v15780_v29 = vld [vmem:[#allocation67_spill] sm:$0xff] }
 0x25f   : > { %15768 = vst [vmem:[#allocation80_spill] sm:$0xff] %v11497_v32  ;;  %v11506_v22 = vadd.f32 %v11138_v14, %v15771_v2  ;;  %9502 = vrcp.f32 %v3465_v16  ;;  %v7527_v11 = vmul.f32 -1.442695, %v1557_v28  ;;  %v11508_v61 = vpop.eup %9484  ;;  %v15773_v32 = vld [vmem:[#allocation63_spill] sm:$0xff]  ;;  %v11516_v23 = vadd.f32 %v11180_v12, %v15774_v24  ;;  %v1561_v17 = vpop.f32.mrb[109].mxu1  ;;  %v15776_v2 = vld [vmem:[#allocation65_spill] sm:$0xff] }
 0x260   : > { %15772 = vst [vmem:[#allocation50_spill] sm:$0xff] %v11508_v61  ;;  %v11512_v37 = vadd.f32 %v11107_v49, %v15773_v32  ;;  %9504 = vrcp.f32 %v1758_v38  ;;  %v1567_v59 = vadd.f32 %v8528_v52, %v11329_v51  ;;  %v9487_v14 = vpop.eup %9486  ;;  %v11521_v16 = vadd.f32 %v11164_v44, %v15776_v2  ;;  %v15778_v28 = vld [vmem:[#allocation66_spill] sm:$0xff]  ;;  %v15783_v24 = vld [vmem:[#allocation68_spill] sm:$0xff] }
 0x261   : > { %15775 = vst [vmem:[#allocation83_spill] sm:$0xff] %v11516_v23  ;;  %v11525_v21 = vadd.f32 %v11221_v15, %v15778_v28  ;;  %9506 = vrcp.f32 %v1761_v45  ;;  %v1562_v49 = vadd.f32 %v11329_v51, %v1561_v17  ;;  %v9489_v32 = vpop.eup %9488  ;;  %v11530_v12 = vadd.f32 %v11205_v30, %v15780_v29  ;;  %v15785_v17 = vld [vmem:[#allocation69_spill] sm:$0xff]  ;;  %v15787_v30 = vld [vmem:[#allocation70_spill] sm:$0xff] }
 0x262   : > { %15777 = vst [vmem:[#allocation51_spill] sm:$0xff] %v11521_v16  ;;  %v1760_v41 = vadd.f32 1.0, %v9487_v14  ;;  %9508 = vpow2.f32 %v7524_v47  ;;  %v7526_v38 = vmul.f32 -1.442695, %v1552_v0  ;;  %v11532_v52 = vpop.eup %9490  ;;  %v11536_v44 = vadd.f32 %v11265_v20, %v15783_v24  ;;  %v8531_v45 = vpop.f32.mrb[110].mxu1  ;;  %v15789_v24 = vld [vmem:[#allocation71_spill] sm:$0xff] }
 0x263   : > { %15779 = vst [vmem:[#allocation82_spill] sm:$0xff] %v11525_v21  ;;  %15781 = vst [vmem:[#allocation52_spill] sm:$0xff] %v11530_v12  ;;  %v1763_v2 = vadd.f32 1.0, %v9489_v32  ;;  %9510 = vpow2.f32 %v7527_v11  ;;  %v7529_v15 = vmul.f32 -1.442695, %v1567_v59  ;;  %v9493_v28 = vpop.eup %9492  ;;  %v11540_v61 = vadd.f32 %v11241_v7, %v15785_v17  ;;  %v1571_v47 = vpop.f32.mrb[111].mxu1 }
 0x264   : > { %15782 = vst [vmem:[#allocation85_spill] sm:$0xff] %v11532_v52  ;;  %15784 = vst [vmem:[#allocation53_spill] sm:$0xff] %v11536_v44  ;;  %v11544_v14 = vadd.f32 %v11299_v26, %v15787_v30  ;;  %9512 = vrcp.f32 %v1760_v41  ;;  %v1577_v0 = vadd.f32 %v8531_v45, %v11329_v51  ;;  %v1762_v20 = vadd.f32 1.0, %v9493_v28  ;;  %v15791_v17 = vld [vmem:[#allocation72_spill] sm:$0xff]  ;;  %v15793_v30 = vld [vmem:[#allocation73_spill] sm:$0xff] }
 0x265   : > { %15786 = vst [vmem:[#allocation84_spill] sm:$0xff] %v11540_v61  ;;  %v9495_v29 = vpop.eup %9494  ;;  %9514 = vrcp.f32 %v1763_v2  ;;  %v7528_v32 = vmul.f32 -1.442695, %v1562_v49  ;;  %v1572_v11 = vadd.f32 %v11329_v51, %v1571_v47  ;;  %v11552_v7 = vadd.f32 %v11280_v6, %v15789_v24  ;;  %v15799_v12 = vld [vmem:[#allocation100_spill] sm:$0xff] }
 0x266   : > { %15788 = vst [vmem:[#allocation54_spill] sm:$0xff] %v11544_v14  ;;  %v11548_v59 = vpop.eup %9496  ;;  %v11556_v26 = vadd.f32 %v11323_v60, %v15791_v17  ;;  %v1853_v41 = vsub.f32 1.0, %v9495_v29  ;;  %9516 = vpow2.f32 %v7526_v38  ;;  %v11560_v2 = vadd.f32 %v11317_v33, %v15793_v30  ;;  %v11563_v47 = vpop.f32.mrb[112].mxu1  ;;  %v15796_v14 = vld [vmem:[#allocation99_spill] sm:$0xff] }
 0x267   : > { %15790 = vst [vmem:[#allocation87_spill] sm:$0xff] %v11552_v7  ;;  %v9499_v45 = vpop.eup %9498  ;;  %v15088_v49 = vsub.f32 1.0, %v11548_v59  ;;  %9518 = vpow2.f32 %v7529_v15  ;;  %v7531_v28 = vmul.f32 -1.442695, %v1577_v0  ;;  %v11565_v60 = vpop.f32.mrb[113].mxu1 }
 0x268   : > { %15792 = vst [vmem:[#allocation55_spill] sm:$0xff] %v11556_v26  ;;  %15794 = vst [vmem:[#allocation86_spill] sm:$0xff] %v11560_v2  ;;  %v9501_v52 = vpop.eup %9500  ;;  %v1885_v6 = vmul.f32 2.0, %v1853_v41  ;;  %v7583_v24 = vadd.f32 -0.5, %v1853_v41  ;;  %v1855_v7 = vsub.f32 1.0, %v9499_v45  ;;  %9520 = vrcp.f32 %v1762_v20 }
 0x269   : > { %v11567_v29 = vpop.eup %9502  ;;  %v1884_v38 = vmul.f32 2.0, %v15088_v49  ;;  %v1765_v33 = vadd.f32 1.0, %v9501_v52  ;;  %9522 = vpow2.f32 %v7528_v32  ;;  %v11571_v17 = vmul.f32 -1.442695, %v1572_v11  ;;  %v11576_v0 = vld [vmem:[%s15054_s3] ss:$0 sm:$0xff] }
 0x26a   : > { %15795 = vst [vmem:[#allocation56_spill] sm:$0xff] %v11567_v29  ;;  %v9505_v15 = vpop.eup %9504  ;;  %v2181_v41 = vmul.f32 %v11576_v0, %v1885_v6  ;;  %v11582_v20 = vld [vmem:[%s15615_s13] ss:$0 sm:$0xff]  ;;  %v3563_v30 = vmul.f32 4.0, %v7583_v24  ;;  %v1887_v52 = vmul.f32 2.0, %v1855_v7  ;;  %v7585_v2 = vadd.f32 -0.5, %v1855_v7 }
 0x26b   : > { %v2507_v45 = vmul.f32 %v11582_v20, %v1885_v6  ;;  %v9507_v32 = vpop.eup %9506  ;;  %v2180_v11 = vmul.f32 %v11576_v0, %v1884_v38  ;;  %v2506_v49 = vmul.f32 %v11582_v20, %v1884_v38  ;;  %9524 = vpow2.f32 %v7531_v28  ;;  %v11587_v29 = vpop.f32.mrb[114].mxu1 }
 0x26c   : > { %v9509_v26 = vpop.eup %9508  ;;  %v11590_v61 = vadd.f32 %v2181_v41, %v15796_v14  ;;  %v11596_v6 = vmul.f32 %v15799_v12, %v3563_v30  ;;  %v2183_v24 = vmul.f32 %v11576_v0, %v1887_v52  ;;  %v11599_v21 = vpop.f32.mrb[115].mxu1  ;;  %v2509_v14 = vmul.f32 %v11582_v20, %v1887_v52 }
 0x26d   : > { %v11593_v44 = vadd.f32 %v2507_v45, %v11388_v58  ;;  %v9511_v16 = vpop.eup %9510  ;;  %v11602_v7 = vadd.f32 %v2180_v11, %v11099_v50  ;;  %v11605_v28 = vadd.f32 %v2506_v49, %v11397_v4  ;;  %v3565_v38 = vmul.f32 4.0, %v7585_v2 }
 0x26e   : > { %15797 = vst [vmem:[#allocation89_spill] sm:$0xff] %v11590_v61  ;;  %15800 = vst [vmem:[#allocation88_spill] sm:$0xff] %v11596_v6  ;;  %v9513_v41 = vpop.eup %9512  ;;  %v11609_v58 = vadd.f32 %v2183_v24, %v11122_v18  ;;  %v1854_v12 = vsub.f32 1.0, %v9505_v15  ;;  %v1857_v45 = vsub.f32 1.0, %v9507_v32  ;;  %9526 = vrcp.f32 %v1765_v33  ;;  %v11617_v49 = vpop.f32.mrb[116].mxu1 }
 0x26f   : > { %15798 = vst [vmem:[#allocation57_spill] sm:$0xff] %v11593_v44  ;;  %v9515_v30 = vpop.eup %9514  ;;  %v11612_v6 = vadd.f32 %v2509_v14, %v11400_v9  ;;  %v11615_v50 = vmul.f32 %v11111_v42, %v3565_v38  ;;  %v1856_v11 = vsub.f32 1.0, %v9513_v41  ;;  %v1764_v4 = vadd.f32 1.0, %v9509_v26  ;;  %v11619_v24 = vpop.f32.mrb[117].mxu1 }
 0x270   : > { %15801 = vst [vmem:[#allocation58_spill] sm:$0xff] %v11609_v58  ;;  %v9517_v52 = vpop.eup %9516  ;;  %v1886_v2 = vmul.f32 2.0, %v1854_v12  ;;  %v7584_v23 = vadd.f32 -0.5, %v1854_v12  ;;  %v1889_v44 = vmul.f32 2.0, %v1857_v45  ;;  %v7587_v18 = vadd.f32 -0.5, %v1857_v45 }
 0x271   : > { %15802 = vst [vmem:[#allocation91_spill] sm:$0xff] %v11612_v6  ;;  %15803 = vst [vmem:[#allocation59_spill] sm:$0xff] %v11615_v50  ;;  %v9519_v15 = vpop.eup %9518  ;;  %v1888_v33 = vmul.f32 2.0, %v1856_v11  ;;  %v7586_v32 = vadd.f32 -0.5, %v1856_v11  ;;  %v1859_v58 = vsub.f32 1.0, %v9515_v30  ;;  %9528 = vrcp.f32 %v1764_v4 }
 0x272   : > { %v9521_v9 = vpop.eup %9520  ;;  %v2182_v42 = vmul.f32 %v11576_v0, %v1886_v2  ;;  %v2508_v14 = vmul.f32 %v11582_v20, %v1886_v2  ;;  %v3564_v26 = vmul.f32 4.0, %v7584_v23  ;;  %v2185_v38 = vmul.f32 %v11576_v0, %v1889_v44  ;;  %v11627_v61 = vpop.f32.mrb[118].mxu1 }
 0x273   : > { %v9523_v41 = vpop.eup %9522  ;;  %v2511_v12 = vmul.f32 %v11582_v20, %v1889_v44  ;;  %v3567_v50 = vmul.f32 4.0, %v7587_v18  ;;  %v2184_v45 = vmul.f32 %v11576_v0, %v1888_v33  ;;  %v2510_v6 = vmul.f32 %v11582_v20, %v1888_v33  ;;  %v11641_v44 = vpop.f32.mrb[119].mxu1 }
 0x274   : > { %v11630_v30 = vadd.f32 %v2182_v42, %v11134_v8  ;;  %v11633_v11 = vadd.f32 %v2508_v14, %v11406_v57  ;;  %v11636_v23 = vmul.f32 %v11140_v54, %v3564_v26  ;;  %v11639_v4 = vadd.f32 %v2185_v38, %v11143_v19 }
 0x275   : > { %v9525_v2 = vpop.eup %9524  ;;  %v11644_v18 = vadd.f32 %v2511_v12, %v11409_v1  ;;  %v11647_v33 = vmul.f32 %v11156_v13, %v3567_v50  ;;  %v11650_v8 = vadd.f32 %v2184_v45, %v11154_v25  ;;  %v11653_v57 = vadd.f32 %v2510_v6, %v11413_v10 }
 0x276   : > { %15804 = vst [vmem:[#allocation90_spill] sm:$0xff] %v11633_v11  ;;  %15805 = vst [vmem:[#allocation60_spill] sm:$0xff] %v11636_v23  ;;  %v3566_v54 = vmul.f32 4.0, %v7586_v32  ;;  %v1891_v42 = vmul.f32 2.0, %v1859_v58  ;;  %v7589_v14 = vadd.f32 -0.5, %v1859_v58  ;;  %v1858_v19 = vsub.f32 1.0, %v9521_v9 }
 0x277   : > { %15806 = vst [vmem:[#allocation96_spill] sm:$0xff] %v11639_v4  ;;  %v1767_v26 = vadd.f32 1.0, %v9511_v16  ;;  %v1766_v38 = vadd.f32 1.0, %v9517_v52  ;;  %v1769_v4 = vadd.f32 1.0, %v9519_v15  ;;  %v1768_v23 = vadd.f32 1.0, %v9523_v41  ;;  %v11655_v11 = vpop.f32.mrb[120].mxu1 }
 0x278   : > { %v9527_v1 = vpop.eup %9526  ;;  %v11658_v13 = vmul.f32 %v11173_v53, %v3566_v54  ;;  %v2187_v25 = vmul.f32 %v11576_v0, %v1891_v42  ;;  %v2513_v50 = vmul.f32 %v11582_v20, %v1891_v42  ;;  %v3569_v10 = vmul.f32 4.0, %v7589_v14  ;;  %v11662_v6 = vpop.f32.mrb[121].mxu1  ;;  %v15807_v15 = vld [vmem:[#allocation102_spill] sm:$0xff] }
 0x279   : > { %v1890_v32 = vmul.f32 2.0, %v1858_v19  ;;  %v7588_v58 = vadd.f32 -0.5, %v1858_v19  ;;  %v1861_v9 = vsub.f32 1.0, %v9527_v1  ;;  %9530 = vrcp.f32 %v1767_v26 }
 0x27a   : > { %v11665_v16 = vadd.f32 %v2187_v25, %v11160_v39  ;;  %v11668_v52 = vadd.f32 %v2513_v50, %v11419_v55  ;;  %v11671_v53 = vmul.f32 %v15807_v15, %v3569_v10  ;;  %9532 = vrcp.f32 %v1766_v38  ;;  %v11675_v14 = vpop.f32.mrb[122].mxu1  ;;  %v15809_v55 = vld [vmem:[#allocation16_spill] sm:$0xff] }
 0x27b   : > { %v9529_v41 = vpop.eup %9528  ;;  %v2186_v12 = vmul.f32 %v11576_v0, %v1890_v32  ;;  %v2512_v45 = vmul.f32 %v11582_v20, %v1890_v32  ;;  %v3568_v54 = vmul.f32 4.0, %v7588_v58  ;;  %v1893_v42 = vmul.f32 2.0, %v1861_v9  ;;  %v11677_v1 = vpop.f32.mrb[123].mxu1 }
 0x27c   : > { %15808 = vst [vmem:[#allocation61_spill] sm:$0xff] %v11671_v53  ;;  %v7591_v19 = vadd.f32 -0.5, %v1861_v9  ;;  %v1860_v26 = vsub.f32 1.0, %v9529_v41  ;;  %9534 = vrcp.f32 %v1769_v4  ;;  %v1771_v39 = vadd.f32 1.0, %v9525_v2 }
 0x27d   : > { %v11680_v25 = vadd.f32 %v2186_v12, %v15809_v55  ;;  %v11683_v38 = vadd.f32 %v2512_v45, %v11422_v56  ;;  %v11686_v50 = vmul.f32 %v11193_v46, %v3568_v54  ;;  %v2189_v10 = vmul.f32 %v11576_v0, %v1893_v42  ;;  %v15813_v55 = vld [vmem:[#allocation20_spill] sm:$0xff] }
 0x27e   : > { %v2515_v32 = vmul.f32 %v11582_v20, %v1893_v42  ;;  %v3571_v58 = vmul.f32 4.0, %v7591_v19  ;;  %v1892_v9 = vmul.f32 2.0, %v1860_v26  ;;  %v7590_v15 = vadd.f32 -0.5, %v1860_v26  ;;  %v11697_v41 = vpop.f32.mrb[124].mxu1  ;;  %v15812_v19 = vld [vmem:[#allocation17_spill] sm:$0xff] }
 0x27f   : > { %15810 = vst [vmem:[#allocation93_spill] sm:$0xff] %v11686_v50  ;;  %v11691_v4 = vadd.f32 %v2189_v10, %v11187_v35  ;;  %9536 = vrcp.f32 %v1768_v23  ;;  %v1587_v2 = vadd.f32 %v11563_v47, %v11329_v51  ;;  %v1582_v56 = vadd.f32 %v11329_v51, %v11565_v60  ;;  %v11707_v54 = vpop.f32.mrb[125].mxu1 }
 0x280   : > { %v11700_v46 = vadd.f32 %v2515_v32, %v11426_v5  ;;  %v11703_v12 = vmul.f32 %v11213_v63, %v3571_v58  ;;  %v2188_v45 = vmul.f32 %v11576_v0, %v1892_v9  ;;  %v2514_v35 = vmul.f32 %v11582_v20, %v1892_v9 }
 0x281   : > { %v3570_v23 = vmul.f32 4.0, %v7590_v15  ;;  %9538 = vrcp.f32 %v1771_v39  ;;  %v7533_v47 = vmul.f32 -1.442695, %v1587_v2  ;;  %v7532_v42 = vmul.f32 -1.442695, %v1582_v56 }
 0x282   : > { %15811 = vst [vmem:[#allocation62_spill] sm:$0xff] %v11703_v12  ;;  %v11710_v60 = vadd.f32 %v2188_v45, %v15812_v19  ;;  %v11713_v26 = vadd.f32 %v2514_v35, %v11430_v27  ;;  %9540 = vpow2.f32 %v11571_v17  ;;  %v1597_v63 = vadd.f32 %v11587_v29, %v11329_v51  ;;  %v11725_v58 = vpop.f32.mrb[126].mxu1 }
 0x283   : > { %v9531_v5 = vpop.eup %9530  ;;  %v11719_v10 = vmul.f32 %v15813_v55, %v3570_v23  ;;  %9542 = vpow2.f32 %v7533_v47  ;;  %v1592_v39 = vadd.f32 %v11329_v51, %v11599_v21  ;;  %v1607_v32 = vadd.f32 %v11617_v49, %v11329_v51  ;;  %v11729_v15 = vpop.f32.mrb[127].mxu1 }
 0x284   : > { %v9533_v27 = vpop.eup %9532  ;;  %v1863_v9 = vsub.f32 1.0, %v9531_v5  ;;  %9544 = vpow2.f32 %v7532_v42  ;;  %v7535_v17 = vmul.f32 -1.442695, %v1597_v63  ;;  %v1602_v29 = vadd.f32 %v11329_v51, %v11619_v24 }
 0x285   : > { %15814 = vst [vmem:[#allocation63_spill] sm:$0xff] %v11719_v10  ;;  %v1862_v2 = vsub.f32 1.0, %v9533_v27  ;;  %v7534_v56 = vmul.f32 -1.442695, %v1592_v39  ;;  %v7537_v45 = vmul.f32 -1.442695, %v1607_v32  ;;  %v1617_v21 = vadd.f32 %v11627_v61, %v11329_v51 }
 0x286   : > { %v9535_v35 = vpop.eup %9534  ;;  %v1895_v23 = vmul.f32 2.0, %v1863_v9  ;;  %v7593_v49 = vadd.f32 -0.5, %v1863_v9  ;;  %9546 = vpow2.f32 %v7535_v17  ;;  %v7536_v47 = vmul.f32 -1.442695, %v1602_v29  ;;  %v15815_v9 = vld [vmem:[#allocation18_spill] sm:$0xff] }
 0x287   : > { %v1894_v19 = vmul.f32 2.0, %v1862_v2  ;;  %v7592_v5 = vadd.f32 -0.5, %v1862_v2  ;;  %v1865_v42 = vsub.f32 1.0, %v9535_v35  ;;  %9548 = vpow2.f32 %v7534_v56  ;;  %v15818_v2 = vld [vmem:[#allocation103_spill] sm:$0xff] }
 0x288   : > { %v2191_v63 = vmul.f32 %v11576_v0, %v1895_v23  ;;  %v2517_v24 = vmul.f32 %v11582_v20, %v1895_v23  ;;  %v3573_v55 = vmul.f32 4.0, %v7593_v49  ;;  %9550 = vpow2.f32 %v7537_v45  ;;  %v15820_v49 = vld [vmem:[#allocation19_spill] sm:$0xff] }
 0x289   : > { %v9537_v39 = vpop.eup %9536  ;;  %v2190_v32 = vmul.f32 %v11576_v0, %v1894_v19  ;;  %v2516_v61 = vmul.f32 %v11582_v20, %v1894_v19  ;;  %v3572_v27 = vmul.f32 4.0, %v7592_v5  ;;  %v1897_v12 = vmul.f32 2.0, %v1865_v42 }
 0x28a   : > { %v11738_v17 = vadd.f32 %v2191_v63, %v15815_v9  ;;  %v11741_v29 = vadd.f32 %v2517_v24, %v11442_v43  ;;  %v11744_v56 = vmul.f32 %v15818_v2, %v3573_v55  ;;  %v7595_v35 = vadd.f32 -0.5, %v1865_v42  ;;  %v15822_v42 = vld [vmem:[#allocation21_spill] sm:$0xff] }
 0x28b   : > { %v9539_v23 = vpop.eup %9538  ;;  %v11747_v45 = vadd.f32 %v2190_v32, %v15820_v49  ;;  %v11750_v10 = vadd.f32 %v2516_v61, %v11446_v3  ;;  %v11753_v19 = vmul.f32 %v11253_v36, %v3572_v27  ;;  %v2193_v5 = vmul.f32 %v11576_v0, %v1897_v12 }
 0x28c   : > { %15816 = vst [vmem:[#allocation64_spill] sm:$0xff] %v11738_v17  ;;  %15817 = vst [vmem:[#allocation65_spill] sm:$0xff] %v11741_v29  ;;  %v9541_v63 = vpop.eup %9540  ;;  %v2519_v43 = vmul.f32 %v11582_v20, %v1897_v12  ;;  %v3575_v24 = vmul.f32 4.0, %v7595_v35  ;;  %v1864_v9 = vsub.f32 1.0, %v9537_v39  ;;  %v1867_v55 = vsub.f32 1.0, %v9539_v23 }
 0x28d   : > { %15819 = vst [vmem:[#allocation66_spill] sm:$0xff] %v11744_v56  ;;  %15821 = vst [vmem:[#allocation67_spill] sm:$0xff] %v11753_v19  ;;  %v9543_v2 = vpop.eup %9542  ;;  %v11758_v56 = vadd.f32 %v2193_v5, %v15822_v42  ;;  %v1770_v32 = vadd.f32 1.0, %v9541_v63  ;;  %9552 = vpow2.f32 %v7536_v47  ;;  %v7539_v49 = vmul.f32 -1.442695, %v1617_v21 }
 0x28e   : > { %v9545_v3 = vpop.eup %9544  ;;  %v11761_v61 = vadd.f32 %v2519_v43, %v11452_v48  ;;  %v11764_v36 = vmul.f32 %v11268_v40, %v3575_v24  ;;  %v1896_v27 = vmul.f32 2.0, %v1864_v9  ;;  %v7594_v19 = vadd.f32 -0.5, %v1864_v9  ;;  %v15826_v9 = vld [vmem:[#allocation22_spill] sm:$0xff] }
 0x28f   : > { %15823 = vst [vmem:[#allocation68_spill] sm:$0xff] %v11758_v56  ;;  %v1899_v12 = vmul.f32 2.0, %v1867_v55  ;;  %v7597_v35 = vadd.f32 -0.5, %v1867_v55  ;;  %9554 = vrcp.f32 %v1770_v32  ;;  %v1773_v39 = vadd.f32 1.0, %v9543_v2  ;;  %v15828_v55 = vld [vmem:[#allocation75_spill] sm:$0xff]  ;;  %v15830_v32 = vld [vmem:[#allocation104_spill] sm:$0xff] }
 0x290   : > { %15824 = vst [vmem:[#allocation69_spill] sm:$0xff] %v11761_v61  ;;  %15825 = vst [vmem:[#allocation70_spill] sm:$0xff] %v11764_v36  ;;  %v9547_v23 = vpop.eup %9546  ;;  %v2192_v5 = vmul.f32 %v11576_v0, %v1896_v27  ;;  %v2518_v63 = vmul.f32 %v11582_v20, %v1896_v27  ;;  %v3574_v47 = vmul.f32 4.0, %v7594_v19  ;;  %v1772_v21 = vadd.f32 1.0, %v9545_v3  ;;  %v15832_v19 = vld [vmem:[#allocation23_spill] sm:$0xff] }
 0x291   : > { %v9549_v42 = vpop.eup %9548  ;;  %v2195_v48 = vmul.f32 %v11576_v0, %v1899_v12  ;;  %v2521_v43 = vmul.f32 %v11582_v20, %v1899_v12  ;;  %v3577_v40 = vmul.f32 4.0, %v7597_v35  ;;  %9556 = vrcp.f32 %v1773_v39  ;;  %v15835_v12 = vld [vmem:[#allocation105_spill] sm:$0xff] }
 0x292   : > { %v9551_v24 = vpop.eup %9550  ;;  %v11771_v36 = vadd.f32 %v2192_v5, %v15826_v9  ;;  %v11774_v2 = vadd.f32 %v2518_v63, %v15828_v55  ;;  %v11777_v61 = vmul.f32 %v15830_v32, %v3574_v47  ;;  %9558 = vrcp.f32 %v1772_v21  ;;  %v15838_v55 = vld [vmem:[#allocation49_spill] sm:$0xff] }
 0x293   : > { %v11780_v3 = vadd.f32 %v2195_v48, %v15832_v19  ;;  %v11783_v27 = vadd.f32 %v2521_v43, %v11475_v34  ;;  %v11786_v35 = vmul.f32 %v15835_v12, %v3577_v40  ;;  %v1775_v39 = vadd.f32 1.0, %v9547_v23 }
 0x294   : > { %15827 = vst [vmem:[#allocation71_spill] sm:$0xff] %v11771_v36  ;;  %15829 = vst [vmem:[#allocation72_spill] sm:$0xff] %v11774_v2  ;;  %v1774_v56 = vadd.f32 1.0, %v9549_v42  ;;  %v1777_v5 = vadd.f32 1.0, %v9551_v24  ;;  %9560 = vpow2.f32 %v7539_v49  ;;  %v1612_v63 = vadd.f32 %v11329_v51, %v11641_v44  ;;  %v15847_v36 = vld [vmem:[#allocation25_spill] sm:$0xff] }
 0x295   : > { %15831 = vst [vmem:[#allocation73_spill] sm:$0xff] %v11777_v61  ;;  %15833 = vst [vmem:[#allocation99_spill] sm:$0xff] %v11780_v3  ;;  %9562 = vrcp.f32 %v1775_v39  ;;  %v1627_v47 = vadd.f32 %v11655_v11, %v11329_v51  ;;  %v1622_v21 = vadd.f32 %v11329_v51, %v11662_v6  ;;  %v1637_v34 = vadd.f32 %v11675_v14, %v11329_v51 }
 0x296   : > { %15834 = vst [vmem:[#allocation100_spill] sm:$0xff] %v11783_v27  ;;  %15836 = vst [vmem:[#allocation102_spill] sm:$0xff] %v11786_v35  ;;  %9564 = vrcp.f32 %v1774_v56  ;;  %v7538_v48 = vmul.f32 -1.442695, %v1612_v63  ;;  %v1632_v23 = vadd.f32 %v11329_v51, %v11677_v1  ;;  %v11799_v49 = vfloor.f32 %v11602_v7 }
 0x297   : > { %v9553_v42 = vpop.eup %9552  ;;  %v15837_v44 = vsub.f32 1.0, %v11548_v59  ;;  %9566 = vrcp.f32 %v1777_v5  ;;  %v7541_v11 = vmul.f32 -1.442695, %v1627_v47  ;;  %v7540_v40 = vmul.f32 -1.442695, %v1622_v21 }
 0x298   : > { %v1776_v24 = vadd.f32 1.0, %v9553_v42  ;;  %9568 = vpow2.f32 %v7538_v48  ;;  %v7543_v6 = vmul.f32 -1.442695, %v1637_v34  ;;  %v11804_v14 = vfloor.f32 %v11605_v28 }
 0x299   : > { %v7582_v43 = vadd.f32 -0.5, %v15837_v44  ;;  %v9555_v56 = vpop.eup %9554  ;;  %9570 = vpow2.f32 %v7541_v11  ;;  %v7542_v9 = vmul.f32 -1.442695, %v1632_v23  ;;  %v2634_v51 = vmax.f32 %v11799_v49, 0.0  ;;  %v15845_v44 = vld [vmem:[#allocation106_spill] sm:$0xff] }
 0x29a   : > { %v11808_v1 = vadd.f32 1.0, %v11799_v49  ;;  %v11811_v59 = vadd.f32 1.0, %v15838_v55  ;;  %v1866_v32 = vsub.f32 1.0, %v9555_v56  ;;  %9572 = vrcp.f32 %v1776_v24 }
 0x29b   : > { %v2698_v19 = vmax.f32 %v11804_v14, 0.0  ;;  %v9557_v12 = vpop.eup %9556  ;;  %v11814_v39 = vmul.f32 4.0, %v7582_v43  ;;  %9574 = vpow2.f32 %v7540_v40  ;;  %v11816_v5 = vmin.f32 %v2634_v51, 17.0 }
 0x29c   : > { %v11819_v63 = vadd.f32 1.0, %v11804_v14  ;;  %v9559_v47 = vpop.eup %9558  ;;  %v1898_v21 = vmul.f32 2.0, %v1866_v32  ;;  %v7596_v34 = vadd.f32 -0.5, %v1866_v32  ;;  %v1869_v48 = vsub.f32 1.0, %v9557_v12 }
 0x29d   : > { %15839 = vst [vmem:[#allocation16_spill] sm:$0xff] %v11816_v5  ;;  %9576 = vpow2.f32 %v7543_v6  ;;  %v1868_v23 = vsub.f32 1.0, %v9559_v47  ;;  %v11821_v42 = vmin.f32 %v2698_v19, 17.0  ;;  %v15841_v6 = vld [vmem:[#allocation24_spill] sm:$0xff]  ;;  %vm2954_vm12 = vcmp.lt.f32.partialorder %v11602_v7, 1.0 }
 0x29e   : > { %9578 = vpow2.f32 %v7542_v9  ;;  %v9561_v11 = vpop.eup %9560  ;;  %v2194_v43 = vmul.f32 %v11576_v0, %v1898_v21  ;;  %v2520_v40 = vmul.f32 %v11582_v20, %v1898_v21  ;;  %v3576_v24 = vmul.f32 4.0, %v7596_v34  ;;  %v15843_v9 = vld [vmem:[#allocation48_spill] sm:$0xff] }
 0x29f   : > { %15840 = vst [vmem:[#allocation17_spill] sm:$0xff] %v11821_v42  ;;  %v1901_v56 = vmul.f32 2.0, %v1869_v48  ;;  %v9563_v51 = vpop.eup %9562  ;;  %v7599_v55 = vadd.f32 -0.5, %v1869_v48  ;;  %v1900_v35 = vmul.f32 2.0, %v1868_v23  ;;  %v7598_v27 = vadd.f32 -0.5, %v1868_v23 }
 0x2a0   : > { %v1779_v32 = vadd.f32 1.0, %v9561_v11  ;;  %v9565_v12 = vpop.eup %9564  ;;  %v11827_v47 = vadd.f32 %v2194_v43, %v15841_v6  ;;  %v11830_v19 = vadd.f32 %v2520_v40, %v15843_v9  ;;  %v11833_v3 = vmul.f32 %v15845_v44, %v3576_v24  ;;  %v15849_v24 = vld [vmem:[#allocation81_spill] sm:$0xff] }
 0x2a1   : > { %v2197_v61 = vmul.f32 %v11576_v0, %v1901_v56  ;;  %v9567_v21 = vpop.eup %9566  ;;  %v2523_v34 = vmul.f32 %v11582_v20, %v1901_v56  ;;  %v3579_v2 = vmul.f32 4.0, %v7599_v55  ;;  %v2196_v48 = vmul.f32 %v11576_v0, %v1900_v35  ;;  %v15851_v56 = vld [vmem:[#allocation107_spill] sm:$0xff] }
 0x2a2   : > { %15842 = vst [vmem:[#allocation20_spill] sm:$0xff] %v11827_v47  ;;  %15844 = vst [vmem:[#allocation18_spill] sm:$0xff] %v11830_v19  ;;  %v2522_v23 = vmul.f32 %v11582_v20, %v1900_v35  ;;  %v9569_v11 = vpop.eup %9568  ;;  %v3578_v6 = vmul.f32 4.0, %v7598_v27  ;;  %v1871_v40 = vsub.f32 1.0, %v9563_v51  ;;  %v1870_v9 = vsub.f32 1.0, %v9565_v12  ;;  %v15853_v19 = vld [vmem:[#allocation26_spill] sm:$0xff] }
 0x2a3   : > { %15846 = vst [vmem:[#allocation103_spill] sm:$0xff] %v11833_v3  ;;  %v11840_v43 = vadd.f32 %v2197_v61, %v15847_v36  ;;  %vm2986_vm13 = vcmp.gt.f32.partialorder %v11602_v7, 16.0  ;;  %v9571_v44 = vpop.eup %9570  ;;  %v11845_v3 = vadd.f32 %v2523_v34, %v15849_v24  ;;  %v11848_v55 = vmul.f32 %v15851_v56, %v3579_v2  ;;  %v15856_v27 = vld [vmem:[#allocation108_spill] sm:$0xff] }
 0x2a4   : > { %v11851_v35 = vadd.f32 %v2196_v48, %v15853_v19  ;;  %v11854_v61 = vadd.f32 %v2522_v23, %v11493_v62  ;;  %v9573_v36 = vpop.eup %9572  ;;  %v11857_v51 = vmul.f32 %v15856_v27, %v3578_v6  ;;  %v1903_v12 = vmul.f32 2.0, %v1871_v40  ;;  %vm11903_vm14 = vmor %vm2954_vm12, %vm2986_vm13 }
 0x2a5   : > { %15848 = vst [vmem:[#allocation19_spill] sm:$0xff] %v11840_v43  ;;  %15850 = vst [vmem:[#allocation21_spill] sm:$0xff] %v11845_v3  ;;  %v7601_v43 = vadd.f32 -0.5, %v1871_v40  ;;  %v1902_v47 = vmul.f32 2.0, %v1870_v9  ;;  %v9575_v29 = vpop.eup %9574  ;;  %v7600_v17 = vadd.f32 -0.5, %v1870_v9  ;;  %v1873_v34 = vsub.f32 1.0, %v9567_v21 }
 0x2a6   : > { %15852 = vst [vmem:[#allocation22_spill] sm:$0xff] %v11848_v55  ;;  %15854 = vst [vmem:[#allocation75_spill] sm:$0xff] %v11851_v35  ;;  %v1872_v24 = vsub.f32 1.0, %v9573_v36  ;;  %9580 = vrcp.f32 %v1779_v32  ;;  %v2199_v56 = vmul.f32 %v11576_v0, %v1903_v12  ;;  %v2525_v19 = vmul.f32 %v11582_v20, %v1903_v12  ;;  %v15860_v21 = vld [vmem:[#allocation80_spill] sm:$0xff]  ;;  %v15862_v32 = vld [vmem:[#allocation47_spill] sm:$0xff] }
 0x2a7   : > { %15855 = vst [vmem:[#allocation104_spill] sm:$0xff] %v11854_v61  ;;  %15857 = vst [vmem:[#allocation23_spill] sm:$0xff] %v11857_v51  ;;  %v9577_v2 = vpop.eup %9576  ;;  %v3581_v48 = vmul.f32 4.0, %v7601_v43  ;;  %v2198_v62 = vmul.f32 %v11576_v0, %v1902_v47  ;;  %v2524_v6 = vmul.f32 %v11582_v20, %v1902_v47  ;;  %v3580_v27 = vmul.f32 4.0, %v7600_v17  ;;  %v15858_v51 = vld [vmem:[#allocation27_spill] sm:$0xff]  ;;  %v15864_v61 = vld [vmem:[#allocation28_spill] sm:$0xff] }
 0x2a8   : > { %v9579_v23 = vpop.eup %9578  ;;  %v1905_v55 = vmul.f32 2.0, %v1873_v34  ;;  %v7603_v40 = vadd.f32 -0.5, %v1873_v34  ;;  %v11864_v3 = vadd.f32 %v2199_v56, %v15858_v51  ;;  %v11867_v9 = vadd.f32 %v2525_v19, %v15860_v21  ;;  %v15865_v35 = vld [vmem:[#allocation40_spill] sm:$0xff] }
 0x2a9   : > { %v11870_v36 = vmul.f32 %v15862_v32, %v3581_v48  ;;  %v11873_v12 = vadd.f32 %v2198_v62, %v15864_v61  ;;  %v11876_v43 = vadd.f32 %v2524_v6, %v11501_v31  ;;  %v11879_v47 = vmul.f32 %v15865_v35, %v3580_v27  ;;  %v15870_v6 = vld [vmem:[#allocation42_spill] sm:$0xff] }
 0x2aa   : > { %15859 = vst [vmem:[#allocation105_spill] sm:$0xff] %v11864_v3  ;;  %15861 = vst [vmem:[#allocation49_spill] sm:$0xff] %v11867_v9  ;;  %v2201_v17 = vmul.f32 %v11576_v0, %v1905_v55  ;;  %v2527_v51 = vmul.f32 %v11582_v20, %v1905_v55  ;;  %v3583_v34 = vmul.f32 4.0, %v7603_v40  ;;  %v1904_v56 = vmul.f32 2.0, %v1872_v24  ;;  %v15867_v9 = vld [vmem:[#allocation29_spill] sm:$0xff]  ;;  %v15901_v3 = vld [vmem:[#allocation82_spill] sm:$0xff] }
 0x2ab   : > { %15863 = vst [vmem:[#allocation24_spill] sm:$0xff] %v11870_v36  ;;  %15866 = vst [vmem:[#allocation48_spill] sm:$0xff] %v11879_v47  ;;  %v7602_v19 = vadd.f32 -0.5, %v1872_v24  ;;  %v1778_v21 = vadd.f32 1.0, %v9569_v11  ;;  %v1781_v62 = vadd.f32 1.0, %v9571_v44  ;;  %v1780_v31 = vadd.f32 1.0, %v9575_v29 }
 0x2ac   : > { %v11884_v48 = vadd.f32 %v2201_v17, %v15867_v9  ;;  %v11887_v61 = vadd.f32 %v2527_v51, %v11506_v22  ;;  %v11890_v32 = vmul.f32 %v15870_v6, %v3583_v34  ;;  %v2200_v35 = vmul.f32 %v11576_v0, %v1904_v56  ;;  %v15876_v29 = vld [vmem:[#allocation30_spill] sm:$0xff]  ;;  %v15896_v47 = vld [vmem:[#allocation51_spill] sm:$0xff] }
 0x2ad   : > { %v2526_v27 = vmul.f32 %v11582_v20, %v1904_v56  ;;  %v3582_v55 = vmul.f32 4.0, %v7602_v19  ;;  %9582 = vrcp.f32 %v1778_v21  ;;  %v1783_v40 = vadd.f32 1.0, %v9577_v2  ;;  %v15879_v2 = vld [vmem:[#allocation43_spill] sm:$0xff]  ;;  %v15881_v56 = vld [vmem:[#allocation101_spill] sm:$0xff] }
 0x2ae   : > { %15868 = vst [vmem:[#allocation106_spill] sm:$0xff] %v11884_v48  ;;  %15869 = vst [vmem:[#allocation25_spill] sm:$0xff] %v11887_v61  ;;  %v15872_v11 = vmax.f32 %v11808_v1, 0.0  ;;  %v2890_v9 = vmax.f32 %v11819_v63, 0.0  ;;  %v11908_v44 = vadd.f32 %v2200_v35, %v15876_v29  ;;  %9584 = vrcp.f32 %v1781_v62 }
 0x2af   : > { %15871 = vst [vmem:[#allocation81_spill] sm:$0xff] %v11890_v32  ;;  %v11911_v17 = vadd.f32 %v2526_v27, %v11512_v37  ;;  %v11914_v1 = vmul.f32 %v15879_v2, %v3582_v55  ;;  %9586 = vrcp.f32 %v1780_v31  ;;  %v1782_v63 = vadd.f32 1.0, %v9579_v23  ;;  %v15884_v31 = vld [vmem:[#allocation89_spill] sm:$0xff] }
 0x2b0   : > { %v11896_v24 = vmin.f32 %v15872_v11, 17.0  ;;  %15877 = vst [vmem:[#allocation26_spill] sm:$0xff] %v11908_v44  ;;  %v9581_v51 = vpop.eup %9580  ;;  %vm3050_vm15 = vcmp.lt.f32.partialorder %v11605_v28, 1.0  ;;  %vm3082_vm0 = vcmp.gt.f32.partialorder %v11605_v28, 16.0  ;;  %9588 = vrcp.f32 %v1783_v40  ;;  %v15885_v40 = vld [vmem:[#allocation57_spill] sm:$0xff] }
 0x2b1   : > { %15878 = vst [vmem:[#allocation108_spill] sm:$0xff] %v11911_v17  ;;  %15880 = vst [vmem:[#allocation27_spill] sm:$0xff] %v11914_v1  ;;  %v1875_v34 = vsub.f32 1.0, %v9581_v51  ;;  %v3146_v37 = vsel %vm11903_vm14, %v11799_v49, %v11602_v7  ;;  %v11924_v19 = vmul.f32 %v15881_v56, %v11814_v39  ;;  %v11926_v21 = vmin.f32 %v2890_v9, 17.0  ;;  %v15900_v17 = vld [vmem:[#allocation33_spill] sm:$0xff] }
 0x2b2   : > { %15873 = vst [vmem:[#allocation107_spill] sm:$0xff] %v11896_v24  ;;  %vm3114_vm1 = vmor %vm3050_vm15, %vm3082_vm0  ;;  %v3178_v62 = vmax.f32 %v3146_v37, 0.0  ;;  %v11931_v6 = vfloor.f32 %v15884_v31  ;;  %v11934_v11 = vfloor.f32 %v15885_v40  ;;  %9590 = vrcp.f32 %v1782_v63  ;;  %v15886_v63 = vld [vmem:[#allocation31_spill] sm:$0xff] }
 0x2b3   : > { %15882 = vst [vmem:[#allocation80_spill] sm:$0xff] %v11924_v19  ;;  %15883 = vst [vmem:[#allocation47_spill] sm:$0xff] %v11926_v21  ;;  %v3242_v23 = vsel %vm3114_vm1, %v11804_v14, %v11605_v28  ;;  %v1907_v35 = vmul.f32 2.0, %v1875_v34  ;;  %v7605_v27 = vadd.f32 -0.5, %v1875_v34  ;;  %9592 = vrcp.f32 %v11811_v59  ;;  %v15888_v37 = vld [vmem:[#allocation83_spill] sm:$0xff] }
 0x2b4   : > { %v3274_v55 = vmax.f32 %v3242_v23, 0.0  ;;  %v3210_v7 = vmin.f32 %v3178_v62, 17.0  ;;  %v2635_v49 = vmax.f32 %v11931_v6, 0.0  ;;  %v11938_v39 = vadd.f32 1.0, %v11931_v6  ;;  %v15890_v62 = vld [vmem:[#allocation44_spill] sm:$0xff] }
 0x2b5   : > { %v2203_v9 = vmul.f32 %v11576_v0, %v1907_v35  ;;  %v2529_v28 = vmul.f32 %v11582_v20, %v1907_v35  ;;  %v3585_v14 = vmul.f32 4.0, %v7605_v27  ;;  %v2699_v51 = vmax.f32 %v11934_v11, 0.0 }
 0x2b6   : > { %v3306_v22 = vmin.f32 %v3274_v55, 17.0  ;;  %v3626_v29 = vsub.f32 %v11816_v5, %v3210_v7  ;;  %v11945_v2 = vsub.f32 %v11896_v24, %v3210_v7  ;;  %v11960_v24 = vmin.f32 %v2635_v49, 17.0 }
 0x2b7   : > { %v11949_v34 = vadd.f32 %v2203_v9, %v15886_v63  ;;  %v11952_v56 = vadd.f32 %v2529_v28, %v15888_v37  ;;  %v11955_v23 = vmul.f32 %v15890_v62, %v3585_v14  ;;  %v9583_v27 = vpop.eup %9582  ;;  %v11962_v63 = vmin.f32 %v2699_v51, 17.0 }
 0x2b8   : > { %v3754_v35 = vsub.f32 %v11821_v42, %v3306_v22  ;;  %v3658_v59 = vadd.f32 1.0, %v3626_v29  ;;  %v3722_v55 = vsub.f32 1.0, %v11945_v2  ;;  %v3818_v7 = vsub.f32 %v11926_v21, %v3306_v22  ;;  %15892 = vst [vmem:[#allocation42_spill] sm:$0xff] %v11960_v24  ;;  %v9585_v5 = vpop.eup %9584 }
 0x2b9   : > { %15887 = vst [vmem:[#allocation28_spill] sm:$0xff] %v11949_v34  ;;  %15889 = vst [vmem:[#allocation40_spill] sm:$0xff] %v11952_v56  ;;  %v1874_v32 = vsub.f32 1.0, %v9583_v27  ;;  %v2795_v28 = vmax.f32 %v11938_v39, 0.0  ;;  %vm2955_vm3 = vcmp.lt.f32.partialorder %v15884_v31, 1.0  ;;  %v9587_v14 = vpop.eup %9586  ;;  %v1877_v37 = vsub.f32 1.0, %v9585_v5 }
 0x2ba   : > { %15891 = vst [vmem:[#allocation29_spill] sm:$0xff] %v11955_v23  ;;  %v3786_v9 = vadd.f32 1.0, %v3754_v35  ;;  %15893 = vst [vmem:[#allocation30_spill] sm:$0xff] %v11962_v63  ;;  %v3850_v62 = vsub.f32 1.0, %v3818_v7  ;;  %v2859_v29 = vadd.f32 1.0, %v11934_v11  ;;  %vm2987_vm6 = vcmp.gt.f32.partialorder %v15884_v31, 16.0  ;;  %v9589_v22 = vpop.eup %9588 }
 0x2bb   : > { %v1906_v49 = vmul.f32 2.0, %v1874_v32  ;;  %v7604_v2 = vadd.f32 -0.5, %v1874_v32  ;;  %v1876_v21 = vsub.f32 1.0, %v9587_v14  ;;  %v1909_v35 = vmul.f32 2.0, %v1877_v37  ;;  %v15894_v32 = vld [vmem:[#allocation32_spill] sm:$0xff]  ;;  %vm12013_vm7 = vmor %vm2955_vm3, %vm2987_vm6 }
 0x2bc   : > { %v3882_v27 = vmul.f32 %v3786_v9, %v3658_v59  ;;  %v7607_v42 = vadd.f32 -0.5, %v1877_v37  ;;  %v1879_v51 = vsub.f32 1.0, %v9589_v22  ;;  %v4010_v23 = vmul.f32 %v3850_v62, %v3658_v59  ;;  %v9591_v7 = vpop.eup %9590  ;;  %v15898_v59 = vld [vmem:[#allocation45_spill] sm:$0xff] }
 0x2bd   : > { %v2202_v39 = vmul.f32 %v11576_v0, %v1906_v49  ;;  %v2528_v56 = vmul.f32 %v11582_v20, %v1906_v49  ;;  %v3584_v34 = vmul.f32 4.0, %v7604_v2  ;;  %v1908_v5 = vmul.f32 2.0, %v1876_v21  ;;  %v11982_v2 = vpop.eup %9592 }
 0x2be   : > { %v2205_v1 = vmul.f32 %v11576_v0, %v1909_v35  ;;  %v2531_v36 = vmul.f32 %v11582_v20, %v1909_v35  ;;  %v3587_v61 = vmul.f32 4.0, %v7607_v42  ;;  %v7606_v48 = vadd.f32 -0.5, %v1876_v21  ;;  %v15902_v42 = vld [vmem:[#allocation74_spill] sm:$0xff] }
 0x2bf   : > { %v11973_v14 = vadd.f32 %v2202_v39, %v15894_v32  ;;  %v11976_v37 = vadd.f32 %v2528_v56, %v15896_v47  ;;  %v11979_v22 = vmul.f32 %v15898_v59, %v3584_v34  ;;  %v2204_v49 = vmul.f32 %v11576_v0, %v1908_v5  ;;  %v15904_v47 = vld [vmem:[#allocation34_spill] sm:$0xff] }
 0x2c0   : > { %v11985_v44 = vadd.f32 %v2205_v1, %v15900_v17  ;;  %v11988_v35 = vadd.f32 %v2531_v36, %v15901_v3  ;;  %v11991_v21 = vmul.f32 %v15902_v42, %v3587_v61  ;;  %v2530_v39 = vmul.f32 %v11582_v20, %v1908_v5  ;;  %v15907_v3 = vld [vmem:[#allocation46_spill] sm:$0xff] }
 0x2c1   : > { %15895 = vst [vmem:[#allocation43_spill] sm:$0xff] %v11973_v14  ;;  %15897 = vst [vmem:[#allocation101_spill] sm:$0xff] %v11976_v37  ;;  %v11995_v56 = vadd.f32 %v2204_v49, %v15904_v47  ;;  %v3586_v34 = vmul.f32 4.0, %v7606_v48  ;;  %v1911_v32 = vmul.f32 2.0, %v1879_v51  ;;  %v7609_v59 = vadd.f32 -0.5, %v1879_v51 }
 0x2c2   : > { %15899 = vst [vmem:[#allocation89_spill] sm:$0xff] %v11979_v22  ;;  %15903 = vst [vmem:[#allocation57_spill] sm:$0xff] %v11991_v21  ;;  %v15905_v22 = vld [vmem:[#allocation52_spill] sm:$0xff]  ;;  %v1878_v14 = vsub.f32 1.0, %v9591_v7  ;;  %v3914_v17 = vmul.f32 %v3882_v27, %v11924_v19  ;;  %v12001_v1 = vmul.f32 %v3786_v9, %v3722_v55  ;;  %v3946_v51 = vmul.f32 %v3850_v62, %v3722_v55  ;;  %v15911_v27 = vld [vmem:[#allocation35_spill] sm:$0xff] }
 0x2c3   : > { %v11998_v37 = vadd.f32 %v2530_v39, %v15905_v22  ;;  %v12004_v36 = vmul.f32 %v15907_v3, %v3586_v34  ;;  %v2207_v61 = vmul.f32 %v11576_v0, %v1911_v32  ;;  %v2533_v5 = vmul.f32 %v11582_v20, %v1911_v32  ;;  %v15913_v22 = vld [vmem:[#allocation53_spill] sm:$0xff]  ;;  %v15964_v21 = vld [vmem:[#allocation54_spill] sm:$0xff] }
 0x2c4   : > { %15906 = vst [vmem:[#allocation31_spill] sm:$0xff] %v12001_v1  ;;  %v3589_v49 = vmul.f32 4.0, %v7609_v59  ;;  %v1910_v42 = vmul.f32 2.0, %v1878_v14  ;;  %v7608_v48 = vadd.f32 -0.5, %v1878_v14  ;;  %8612 = vmatprep.mubr.msk.f32.mxu0 %vm4349_vm2, %v3914_v17  ;;  %vm3051_vm8 = vcmp.lt.f32.partialorder %v15885_v40, 1.0  ;;  %v15915_v14 = vld [vmem:[#allocation79_spill] sm:$0xff] }
 0x2c5   : > { %15908 = vst [vmem:[#allocation83_spill] sm:$0xff] %v12004_v36  ;;  %v12019_v7 = vadd.f32 %v2207_v61, %v15911_v27  ;;  %v12022_v39 = vadd.f32 %v2533_v5, %v15913_v22  ;;  %v2891_v55 = vmax.f32 %v2859_v29, 0.0  ;;  %v3978_v59 = vmul.f32 %v3946_v51, %v11924_v19  ;;  %v15919_v5 = vld [vmem:[#allocation36_spill] sm:$0xff] }
 0x2c6   : > { %v12025_v47 = vmul.f32 %v15915_v14, %v3589_v49  ;;  %v2206_v62 = vmul.f32 %v11576_v0, %v1910_v42  ;;  %v2532_v34 = vmul.f32 %v11582_v20, %v1910_v42  ;;  %v3588_v32 = vmul.f32 4.0, %v7608_v48  ;;  %v15920_v0 = vld [vmem:[#allocation84_spill] sm:$0xff]  ;;  %v15921_v20 = vld [vmem:[#allocation78_spill] sm:$0xff] }
 0x2c7   : > { %15912 = vst [vmem:[#allocation44_spill] sm:$0xff] %v12019_v7  ;;  %15914 = vst [vmem:[#allocation32_spill] sm:$0xff] %v12022_v39  ;;  %v12030_v17 = vmin.f32 %v2795_v28, 17.0  ;;  %v12032_v3 = vmin.f32 %v2891_v55, 17.0  ;;  %vm3083_vm9 = vcmp.gt.f32.partialorder %v15885_v40, 16.0  ;;  %v3147_v61 = vsel %vm12013_vm7, %v11931_v6, %v15884_v31  ;;  %8560 = vmatprep.mubr.msk.f32.mxu1 %vm4349_vm2, %v3978_v59  ;;  %v15923_v55 = vld [vmem:[#allocation90_spill] sm:$0xff] }
 0x2c8   : > { %15916 = vst [vmem:[#allocation51_spill] sm:$0xff] %v12025_v47  ;;  %v12040_v29 = vadd.f32 %v2206_v62, %v15919_v5  ;;  %v12043_v49 = vadd.f32 %v2532_v34, %v15920_v0  ;;  %v12046_v42 = vmul.f32 %v15921_v20, %v3588_v32  ;;  %vm3115_vm10 = vmor %vm3051_vm8, %vm3083_vm9  ;;  %v3179_v28 = vmax.f32 %v3147_v61, 0.0  ;;  %v12057_v6 = vld [vmem:[%s15689_s29] ss:$0 sm:$0xff]  ;;  %v15966_v7 = vld [vmem:[#allocation50_spill] sm:$0xff] }
 0x2c9   : > { %15917 = vst [vmem:[#allocation45_spill] sm:$0xff] %v12030_v17  ;;  %15918 = vst [vmem:[#allocation33_spill] sm:$0xff] %v12032_v3  ;;  %v3243_v48 = vsel %vm3115_vm10, %v11934_v11, %v15885_v40  ;;  %v4042_v31 = vmul.f32 %v4010_v23, %v11924_v19  ;;  %v1647_v51 = vadd.f32 %v12057_v6, %v11697_v41  ;;  %v12064_v14 = vfloor.f32 %v11630_v30  ;;  %v15954_v19 = vld [vmem:[#allocation59_spill] sm:$0xff] }
 0x2ca   : > { %15922 = vst [vmem:[#allocation82_spill] sm:$0xff] %v12046_v42  ;;  %v1642_v9 = vadd.f32 %v12057_v6, %v11707_v54  ;;  %v3211_v27 = vmin.f32 %v3179_v28, 17.0  ;;  %v3275_v22 = vmax.f32 %v3243_v48, 0.0  ;;  %v12067_v40 = vfloor.f32 %v15923_v55 }
 0x2cb   : > { %v7545_v11 = vmul.f32 -1.442695, %v1647_v51  ;;  %vm2956_vm12 = vcmp.lt.f32.partialorder %v11630_v30, 1.0  ;;  %vm2988_vm13 = vcmp.gt.f32.partialorder %v11630_v30, 16.0  ;;  %v2764_v54 = vadd.f32 1.0, %v12064_v14 }
 0x2cc   : > { %15924 = vst [vmem:[#allocation74_spill] sm:$0xff] %v12067_v40  ;;  %v7544_v23 = vmul.f32 -1.442695, %v1642_v9  ;;  %v3307_v62 = vmin.f32 %v3275_v22, 17.0  ;;  %v3627_v41 = vsub.f32 %v11960_v24, %v3211_v27  ;;  %v3691_v34 = vsub.f32 %v12030_v17, %v3211_v27  ;;  %vm12074_vm14 = vmor %vm2956_vm12, %vm2988_vm13 }
 0x2cd   : > { %9594 = vpow2.f32 %v7545_v11  ;;  %v2860_v59 = vadd.f32 1.0, %v12067_v40  ;;  %vm3052_vm15 = vcmp.lt.f32.partialorder %v15923_v55, 1.0  ;;  %vm3084_vm0 = vcmp.gt.f32.partialorder %v15923_v55, 16.0 }
 0x2ce   : > { %v3659_v61 = vadd.f32 1.0, %v3627_v41  ;;  %v3723_v5 = vsub.f32 1.0, %v3691_v34  ;;  %v3755_v0 = vsub.f32 %v11962_v63, %v3307_v62  ;;  %v3819_v20 = vsub.f32 %v12032_v3, %v3307_v62  ;;  %vm3116_vm1 = vmor %vm3052_vm15, %vm3084_vm0 }
 0x2cf   : > { %9596 = vpow2.f32 %v7544_v23  ;;  %v2796_v28 = vmax.f32 %v2764_v54, 0.0  ;;  %v2892_v48 = vmax.f32 %v2860_v59, 0.0  ;;  %v3148_v51 = vsel %vm12074_vm14, %v12064_v14, %v11630_v30  ;;  %v15930_v23 = vld [vmem:[#allocation58_spill] sm:$0xff] }
 0x2d0   : > { %v3787_v9 = vadd.f32 1.0, %v3755_v0  ;;  %v3851_v27 = vsub.f32 1.0, %v3819_v20  ;;  %v12087_v22 = vmax.f32 %v3148_v51, 0.0  ;;  %v3244_v11 = vsel %vm3116_vm1, %v12067_v40, %v15923_v55  ;;  %v15931_v51 = vld [vmem:[#allocation91_spill] sm:$0xff] }
 0x2d1   : > { %v12091_v41 = vmin.f32 %v2796_v28, 17.0  ;;  %v12093_v34 = vmin.f32 %v2892_v48, 17.0  ;;  %v12095_v62 = vmax.f32 %v3244_v11, 0.0  ;;  %v12098_v54 = vfloor.f32 %v15930_v23  ;;  %v15932_v48 = vld [vmem:[#allocation88_spill] sm:$0xff] }
 0x2d2   : > { %v3883_v59 = vmul.f32 %v3787_v9, %v3659_v61  ;;  %v3947_v3 = vmul.f32 %v3851_v27, %v3723_v5  ;;  %v12100_v32 = vmul.f32 %v3851_v27, %v3659_v61  ;;  %v4075_v30 = vmul.f32 %v3787_v9, %v3723_v5 }
 0x2d3   : > { %15927 = vst [vmem:[#allocation34_spill] sm:$0xff] %v12091_v41  ;;  %15928 = vst [vmem:[#allocation52_spill] sm:$0xff] %v12093_v34  ;;  %v15150_v0 = vmin.f32 %v12087_v22, 17.0  ;;  %v15149_v20 = vmin.f32 %v12095_v62, 17.0  ;;  %v12105_v55 = vfloor.f32 %v15931_v51  ;;  %v2765_v28 = vadd.f32 1.0, %v12098_v54 }
 0x2d4   : > { %15929 = vst [vmem:[#allocation46_spill] sm:$0xff] %v12095_v62  ;;  %v3915_v11 = vmul.f32 %v3883_v59, %v15932_v48  ;;  %v12110_v17 = vmul.f32 %v4075_v30, %v15932_v48  ;;  %v3979_v63 = vmul.f32 %v3947_v3, %v15932_v48  ;;  %vm2957_vm3 = vcmp.lt.f32.partialorder %v15930_v23, 1.0  ;;  %v15935_v30 = vld [vmem:[#allocation76_spill] sm:$0xff] }
 0x2d5   : > { %v12117_v61 = vsub.f32 %v12091_v41, %v15150_v0  ;;  %v12122_v5 = vsub.f32 %v12093_v34, %v15149_v20  ;;  %v2797_v9 = vmax.f32 %v2765_v28, 0.0  ;;  %v2861_v27 = vadd.f32 1.0, %v12105_v55 }
 0x2d6   : > { %15933 = vst [vmem:[#allocation35_spill] sm:$0xff] %v12110_v17  ;;  %8613 = vmatmul.mubr.msk.f32.vlgmr.msra.gmra.mrb[0].mxu0 %vm4349_vm2, %v3915_v11  ;;  %8561 = vmatmul.mubr.msk.f32.vlgmr.msra.gmra.mrb[128].mxu1 %vm4349_vm2, %v3979_v63  ;;  %vm2989_vm6 = vcmp.gt.f32.partialorder %v15930_v23, 16.0  ;;  %vm3053_vm7 = vcmp.lt.f32.partialorder %v15931_v51, 1.0  ;;  %vm3085_vm8 = vcmp.gt.f32.partialorder %v15931_v51, 16.0  ;;  %v1657_v3 = vadd.f32 %v12057_v6, %v11725_v58 }
 0x2d7   : > { %15934 = vst [vmem:[#allocation53_spill] sm:$0xff] %v12117_v61  ;;  %v9595_v59 = vpop.eup %9594  ;;  %9021 = vmatpush3.bf16.msk.msra.mxu0 %vm11464_vm11, %v15935_v30  ;;  %8664 = vmatprep.mubr.msk.f32.mxu0 %vm4349_vm2, %v4042_v31  ;;  %v15155_v28 = vsub.f32 1.0, %v12117_v61  ;;  %v12138_v11 = vmin.f32 %v2797_v9, 17.0  ;;  %v2893_v0 = vmax.f32 %v2861_v27, 0.0  ;;  %vm3021_vm9 = vmor %vm2957_vm3, %vm2989_vm6  ;;  %v1652_v20 = vadd.f32 %v12057_v6, %v11729_v15  ;;  %v15938_v31 = vld [vmem:[#allocation97_spill] sm:$0xff]  ;;  %v15942_v30 = vld [vmem:[#allocation60_spill] sm:$0xff] }
 0x2d8   : > { %v1785_v34 = vadd.f32 1.0, %v9595_v59  ;;  %vm3117_vm10 = vmor %vm3053_vm7, %vm3085_vm8  ;;  %v3149_v58 = vsel %vm3021_vm9, %v12098_v54, %v15930_v23  ;;  %v7547_v41 = vmul.f32 -1.442695, %v1657_v3  ;;  %9053 = vmatpush3.bf16.msk.msra.mxu1 %vm11058_vm5, %v15938_v31  ;;  %v15940_v9 = vsub.f32 1.0, %v12122_v5 }
 0x2d9   : > { %15937 = vst [vmem:[#allocation79_spill] sm:$0xff] %v12138_v11  ;;  %v9597_v63 = vpop.eup %9596  ;;  %v12153_v24 = vmin.f32 %v2893_v0, 17.0  ;;  %v12155_v59 = vmax.f32 %v3149_v58, 0.0  ;;  %v3245_v23 = vsel %vm3117_vm10, %v12105_v55, %v15931_v51  ;;  %v7546_v6 = vmul.f32 -1.442695, %v1652_v20 }
 0x2da   : > { %v3948_v27 = vmul.f32 %v15940_v9, %v15155_v28  ;;  %9598 = vrcp.f32 %v1785_v34  ;;  %v1784_v3 = vadd.f32 1.0, %v9597_v63  ;;  %v12159_v15 = vmax.f32 %v3245_v23, 0.0 }
 0x2db   : > { %15941 = vst [vmem:[#allocation36_spill] sm:$0xff] %v12153_v24  ;;  %v15157_v17 = vmin.f32 %v12155_v59, 17.0  ;;  %9600 = vpow2.f32 %v7547_v41  ;;  %v12164_v1 = vfloor.f32 %v11650_v8  ;;  %v12168_v58 = vfloor.f32 %v11653_v57 }
 0x2dc   : > { %v3980_v31 = vmul.f32 %v3948_v27, %v15942_v30  ;;  %9602 = vrcp.f32 %v1784_v3  ;;  %v15156_v0 = vmin.f32 %v12159_v15, 17.0  ;;  %vm2958_vm5 = vcmp.lt.f32.partialorder %v11650_v8, 1.0 }
 0x2dd   : > { %15943 = vst [vmem:[#allocation84_spill] sm:$0xff] %v12168_v58  ;;  %v12175_v34 = vsub.f32 %v12138_v11, %v15157_v17  ;;  %9604 = vpow2.f32 %v7546_v6  ;;  %v2766_v41 = vadd.f32 1.0, %v12164_v1  ;;  %vm2990_vm11 = vcmp.gt.f32.partialorder %v11650_v8, 16.0  ;;  %v15952_v11 = vld [vmem:[#allocation95_spill] sm:$0xff] }
 0x2de   : > { %8563 = vmatprep.mubr.msk.f32.mxu1 %vm4349_vm2, %v3980_v31  ;;  %v12182_v51 = vsub.f32 %v12153_v24, %v15156_v0  ;;  %v2862_v63 = vadd.f32 1.0, %v12168_v58  ;;  %vm3022_vm12 = vmor %vm2958_vm5, %vm2990_vm11  ;;  %vm3054_vm13 = vcmp.lt.f32.partialorder %v11653_v57, 1.0  ;;  %vm3086_vm14 = vcmp.gt.f32.partialorder %v11653_v57, 16.0 }
 0x2df   : > { %15944 = vst [vmem:[#allocation78_spill] sm:$0xff] %v12175_v34  ;;  %v2798_v9 = vmax.f32 %v2766_v41, 0.0  ;;  %vm3118_vm15 = vmor %vm3054_vm13, %vm3086_vm14  ;;  %v3150_v27 = vsel %vm3022_vm12, %v12164_v1, %v11650_v8  ;;  %v4043_v23 = vmul.f32 %v12100_v32, %v15932_v48  ;;  %v15947_v41 = vld [vmem:[#allocation92_spill] sm:$0xff]  ;;  %v15948_v8 = vld [vmem:[#allocation94_spill] sm:$0xff]  ;;  %v15949_v32 = vsub.f32 1.0, %v12175_v34 }
 0x2e0   : > { %v15164_v3 = vsub.f32 1.0, %v12182_v51  ;;  %v2894_v6 = vmax.f32 %v2862_v63, 0.0  ;;  %v12193_v31 = vmax.f32 %v3150_v27, 0.0  ;;  %v3246_v28 = vsel %vm3118_vm15, %v12168_v58, %v11653_v57  ;;  %v15951_v57 = vld [vmem:[#allocation96_spill] sm:$0xff] }
 0x2e1   : > { %v12197_v0 = vmin.f32 %v2798_v9, 17.0  ;;  %v12199_v17 = vmax.f32 %v3246_v28, 0.0  ;;  %8665 = vmatmul.mubr.msk.f32.vlgmr.msra.gmra.mrb[0].mxu0 %vm4349_vm2, %v4043_v23  ;;  %v5363_v20 = vadd.s32 27, %v15947_v41  ;;  %v5364_v24 = vadd.s32 27, %v15948_v8 }
 0x2e2   : > { %v3949_v48 = vmul.f32 %v15164_v3, %v15949_v32  ;;  %v12208_v63 = vmin.f32 %v2894_v6, 17.0  ;;  %v15167_v27 = vmin.f32 %v12193_v31, 17.0  ;;  %v12212_v9 = vfloor.f32 %v15951_v57 }
 0x2e3   : > { %15945 = vst [vmem:[#allocation90_spill] sm:$0xff] %v12197_v0  ;;  %15946 = vst [vmem:[#allocation58_spill] sm:$0xff] %v12199_v17  ;;  %vm5365_vm0 = vcmp.eq.s32.totalorder %v15952_v11, %v5363_v20  ;;  %vm5366_vm1 = vcmp.eq.s32.totalorder %v15952_v11, %v5364_v24  ;;  %v12218_v23 = vfloor.f32 %v11644_v18  ;;  %v15956_v32 = vmov 0.0  }
 0x2e4   : > { %15950 = vst [vmem:[#allocation91_spill] sm:$0xff] %v12208_v63  ;;  %v9599_v34 = vpop.eup %9598  ;;  %v3981_v61 = vmul.f32 %v3949_v48, %v15954_v19  ;;  %v12224_v6 = vsub.f32 %v12197_v0, %v15167_v27  ;;  %v7723_v3 = vsel %vm5366_vm1, 1.0, %v15956_v32  ;;  %vm12228_vm3 = vmpackc.low %vm4446_vm4, %vm5365_vm0  ;;  %v2767_v24 = vadd.f32 1.0, %v12212_v9 }
 0x2e5   : > { %15953 = vst [vmem:[#allocation88_spill] sm:$0xff] %v12218_v23  ;;  %v9601_v20 = vpop.eup %9600  ;;  %v1881_v11 = vsub.f32 1.0, %v9599_v34  ;;  %v15959_v8 = vmin.f32 %v12199_v17, 17.0  ;;  %v15960_v41 = vmov 1.0   ;;  %v2863_v27 = vadd.f32 1.0, %v12218_v23 }
 0x2e6   : > { %15955 = vst [vmem:[#allocation76_spill] sm:$0xff] %v12224_v6  ;;  %v9022_v62 = vpack.c.bf16 %v7723_v3, %v15960_v41  ;;  %v9603_v0 = vpop.eup %9602  ;;  %8564 = vmatmul.mubr.msk.f32.gmra.mrb[130].mxu1 %vm4349_vm2, %v3981_v61  ;;  %v1787_v32 = vadd.f32 1.0, %v9601_v20  ;;  %v15180_v58 = vsub.f32 1.0, %v12224_v6  ;;  %v2799_v40 = vmax.f32 %v2767_v24, 0.0  ;;  %v12253_v24 = vld [vmem:[%s15054_s3] ss:$0 sm:$0xff] }
 0x2e7   : > { %v12236_v48 = vsub.f32 %v12208_v63, %v15959_v8  ;;  %vm2959_vm6 = vcmp.lt.f32.partialorder %v15951_v57, 1.0  ;;  %v9605_v47 = vpop.eup %9604  ;;  %v1913_v34 = vmul.f32 2.0, %v1881_v11  ;;  %v7611_v42 = vadd.f32 -0.5, %v1881_v11  ;;  %v15963_v20 = vld [vmem:[#allocation37_spill] sm:$0xff] }
 0x2e8   : > { %v1880_v17 = vsub.f32 1.0, %v9603_v0  ;;  %9024 = vmatprep.subr.msk.bf16.mxu0 %vm12228_vm3, %v9022_v62  ;;  %9606 = vrcp.f32 %v1787_v32  ;;  %v1786_v3 = vadd.f32 1.0, %v9605_v47  ;;  %v12246_v63 = vmin.f32 %v2799_v40, 17.0  ;;  %v12259_v0 = vld [vmem:[%s15615_s13] ss:$0 sm:$0xff] }
 0x2e9   : > { %v15181_v8 = vsub.f32 1.0, %v12236_v48  ;;  %v2895_v61 = vmax.f32 %v2863_v27, 0.0  ;;  %9027 = vmatpush3.bf16.msk.msra.mxu0 %vm12228_vm3, %v9022_v62  ;;  %v2209_v11 = vmul.f32 %v12253_v24, %v1913_v34  ;;  %v2535_v47 = vmul.f32 %v12259_v0, %v1913_v34 }
 0x2ea   : > { %15961 = vst [vmem:[#allocation77_spill] sm:$0xff] %v12246_v63  ;;  %v3591_v40 = vmul.f32 4.0, %v7611_v42  ;;  %v1912_v32 = vmul.f32 2.0, %v1880_v17  ;;  %v7610_v27 = vadd.f32 -0.5, %v1880_v17  ;;  %9608 = vrcp.f32 %v1786_v3 }
 0x2eb   : > { %v3950_v62 = vmul.f32 %v15181_v8, %v15180_v58  ;;  %v12266_v28 = vmin.f32 %v2895_v61, 17.0  ;;  %v12269_v41 = vadd.f32 %v2209_v11, %v15963_v20  ;;  %v12272_v39 = vadd.f32 %v2535_v47, %v15964_v21  ;;  %v15968_v61 = vld [vmem:[#allocation38_spill] sm:$0xff]  ;;  %v15970_v47 = vld [vmem:[#allocation85_spill] sm:$0xff] }
 0x2ec   : > { %v12275_v36 = vmul.f32 %v15966_v7, %v3591_v40  ;;  %v2208_v42 = vmul.f32 %v12253_v24, %v1912_v32  ;;  %v2534_v17 = vmul.f32 %v12259_v0, %v1912_v32  ;;  %v3590_v34 = vmul.f32 4.0, %v7610_v27  ;;  %v15969_v7 = vld [vmem:[#allocation87_spill] sm:$0xff] }
 0x2ed   : > { %15962 = vst [vmem:[#allocation97_spill] sm:$0xff] %v12266_v28  ;;  %15965 = vst [vmem:[#allocation98_spill] sm:$0xff] %v12272_v39  ;;  %v3982_v3 = vmul.f32 %v3950_v62, %v11658_v13  ;;  %vm2991_vm7 = vcmp.gt.f32.partialorder %v15951_v57, 16.0  ;;  %vm3055_vm9 = vcmp.lt.f32.partialorder %v11644_v18, 1.0  ;;  %vm3087_vm10 = vcmp.gt.f32.partialorder %v11644_v18, 16.0  ;;  %v15986_v39 = vld [vmem:[#allocation56_spill] sm:$0xff] }
 0x2ee   : > { %15967 = vst [vmem:[#allocation60_spill] sm:$0xff] %v12275_v36  ;;  %v12282_v58 = vadd.f32 %v2208_v42, %v15968_v61  ;;  %vm3023_vm8 = vmor %vm2959_vm6, %vm2991_vm7  ;;  %v2636_v21 = vmax.f32 %v12064_v14, 0.0  ;;  %v12290_v11 = vadd.f32 %v2534_v17, %v15969_v7  ;;  %v12293_v40 = vmul.f32 %v15970_v47, %v3590_v34 }
 0x2ef   : > { %8566 = vmatprep.mubr.msk.f32.mxu1 %vm4349_vm2, %v3982_v3  ;;  %vm3119_vm5 = vmor %vm3055_vm9, %vm3087_vm10  ;;  %v3151_v32 = vsel %vm3023_vm8, %v12212_v9, %v15951_v57  ;;  %v12299_v27 = vfloor.f32 %v11680_v25  ;;  %v12308_v42 = vfloor.f32 %v11683_v38  ;;  %vm2960_vm11 = vcmp.lt.f32.partialorder %v11680_v25, 1.0 }
 0x2f0   : > { %15971 = vst [vmem:[#allocation96_spill] sm:$0xff] %v12293_v40  ;;  %v12301_v62 = vmax.f32 %v3151_v32, 0.0  ;;  %v3247_v14 = vsel %vm3119_vm5, %v12218_v23, %v11644_v18  ;;  %v12305_v20 = vmin.f32 %v2636_v21, 17.0  ;;  %vm2992_vm12 = vcmp.gt.f32.partialorder %v11680_v25, 16.0 }
 0x2f1   : > { %15973 = vst [vmem:[#allocation37_spill] sm:$0xff] %v12308_v42  ;;  %v12310_v17 = vmax.f32 %v3247_v14, 0.0  ;;  %v2768_v34 = vadd.f32 1.0, %v12299_v27  ;;  %v15975_v3 = vmin.f32 %v12087_v22, 17.0  ;;  %v2864_v18 = vadd.f32 1.0, %v12308_v42  ;;  %vm3024_vm13 = vmor %vm2960_vm11, %vm2992_vm12 }
 0x2f2   : > { %15972 = vst [vmem:[#allocation59_spill] sm:$0xff] %v12305_v20  ;;  %v15184_v57 = vmin.f32 %v12301_v62, 17.0  ;;  %vm3056_vm14 = vcmp.lt.f32.partialorder %v11683_v38, 1.0  ;;  %v9607_v21 = vpop.eup %9606  ;;  %vm3088_vm15 = vcmp.gt.f32.partialorder %v11683_v38, 16.0  ;;  %v3152_v32 = vsel %vm3024_vm13, %v12299_v27, %v11680_v25 }
 0x2f3   : > { %15974 = vst [vmem:[#allocation54_spill] sm:$0xff] %v12310_v17  ;;  %v3628_v61 = vsub.f32 %v12305_v20, %v15975_v3  ;;  %v2800_v47 = vmax.f32 %v2768_v34, 0.0  ;;  %v1883_v14 = vsub.f32 1.0, %v9607_v21  ;;  %v2896_v8 = vmax.f32 %v2864_v18, 0.0  ;;  %vm12332_vm0 = vmor %vm3056_vm14, %vm3088_vm15 }
 0x2f4   : > { %v12328_v22 = vsub.f32 %v12246_v63, %v15184_v57  ;;  %v9609_v7 = vpop.eup %9608  ;;  %v15980_v34 = vmin.f32 %v12310_v17, 17.0  ;;  %v12343_v21 = vmax.f32 %v3152_v32, 0.0  ;;  %v15985_v32 = vld [vmem:[#allocation55_spill] sm:$0xff]  ;;  %vm2961_vm1 = vcmp.lt.f32.partialorder %v11665_v16, 1.0 }
 0x2f5   : > { %v12330_v3 = vadd.f32 1.0, %v3628_v61  ;;  %v12341_v25 = vmin.f32 %v2800_v47, 17.0  ;;  %v3248_v61 = vsel %vm12332_vm0, %v12308_v42, %v11683_v38  ;;  %v1915_v18 = vmul.f32 2.0, %v1883_v14 }
 0x2f6   : > { %15976 = vst [vmem:[#allocation50_spill] sm:$0xff] %v12328_v22  ;;  %v12339_v6 = vsub.f32 %v12266_v28, %v15980_v34  ;;  %v7613_v57 = vadd.f32 -0.5, %v1883_v14  ;;  %v1882_v63 = vsub.f32 1.0, %v9609_v7  ;;  %v15196_v23 = vsub.f32 1.0, %v12328_v22 }
 0x2f7   : > { %15977 = vst [vmem:[#allocation38_spill] sm:$0xff] %v12330_v3  ;;  %15981 = vst [vmem:[#allocation87_spill] sm:$0xff] %v12341_v25  ;;  %v15982_v34 = vsub.f32 1.0, %v12122_v5  ;;  %v12354_v47 = vmin.f32 %v2896_v8, 17.0  ;;  %v2211_v17 = vmul.f32 %v12253_v24, %v1915_v18  ;;  %v2537_v20 = vmul.f32 %v12259_v0, %v1915_v18  ;;  %v15984_v8 = vld [vmem:[#allocation39_spill] sm:$0xff] }
 0x2f8   : > { %v15198_v36 = vsub.f32 1.0, %v12339_v6  ;;  %v3593_v38 = vmul.f32 4.0, %v7613_v57  ;;  %v1914_v42 = vmul.f32 2.0, %v1882_v63  ;;  %v7612_v14 = vadd.f32 -0.5, %v1882_v63 }
 0x2f9   : > { %v4012_v28 = vmul.f32 %v15982_v34, %v12330_v3  ;;  %15983 = vst [vmem:[#allocation85_spill] sm:$0xff] %v12354_v47  ;;  %v12364_v5 = vmax.f32 %v3248_v61, 0.0  ;;  %v12367_v34 = vadd.f32 %v2211_v17, %v15984_v8  ;;  %v12370_v3 = vadd.f32 %v2537_v20, %v15985_v32  ;;  %v15987_v61 = vld [vmem:[#allocation41_spill] sm:$0xff] }
 0x2fa   : > { %v3951_v7 = vmul.f32 %v15198_v36, %v15196_v23  ;;  %v12373_v18 = vmul.f32 %v15986_v39, %v3593_v38  ;;  %v2210_v63 = vmul.f32 %v12253_v24, %v1914_v42  ;;  %v2536_v57 = vmul.f32 %v12259_v0, %v1914_v42  ;;  %v15990_v0 = vld [vmem:[#allocation86_spill] sm:$0xff] }
 0x2fb   : > { %v4044_v40 = vmul.f32 %v4012_v28, %v15942_v30  ;;  %v3592_v22 = vmul.f32 4.0, %v7612_v14  ;;  %v15197_v28 = vmin.f32 %v12364_v5, 17.0  ;;  %v15988_v32 = vmin.f32 %v12343_v21, 17.0 }
 0x2fc   : > { %v3983_v23 = vmul.f32 %v3951_v7, %v11647_v33  ;;  %v12381_v17 = vadd.f32 %v2210_v63, %v15987_v61  ;;  %v2637_v39 = vmax.f32 %v12098_v54, 0.0  ;;  %v2701_v24 = vmax.f32 %v12105_v55, 0.0 }
 0x2fd   : > { %8667 = vmatprep.mubr.msk.f32.mxu0 %vm4349_vm2, %v4044_v40  ;;  %v12386_v20 = vsub.f32 %v12341_v25, %v15988_v32  ;;  %v12391_v42 = vadd.f32 %v2536_v57, %v15990_v0  ;;  %v12394_v38 = vmul.f32 %v11982_v2, %v3592_v22  ;;  %v12400_v40 = vsub.f32 %v12354_v47, %v15197_v28 }
 0x2fe   : > { %8567 = vmatmul.mubr.msk.f32.gmra.mrb[132].mxu1 %vm4349_vm2, %v3983_v23  ;;  %v12403_v14 = vfloor.f32 %v11665_v16  ;;  %v12406_v7 = vmin.f32 %v2637_v39, 17.0  ;;  %v12408_v55 = vmin.f32 %v2701_v24, 17.0  ;;  %v12411_v8 = vfloor.f32 %v11668_v52 }
 0x2ff   : > { %15989 = vst [vmem:[#allocation39_spill] sm:$0xff] %v12386_v20  ;;  %v15199_v54 = vsub.f32 1.0, %v12386_v20  ;;  %v15200_v2 = vsub.f32 1.0, %v12400_v40  ;;  %vm2993_vm3 = vcmp.gt.f32.partialorder %v11665_v16, 16.0  ;;  %v15993_v22 = vmin.f32 %v12155_v59, 17.0 }
 0x300   : > { %15991 = vst [vmem:[#allocation55_spill] sm:$0xff] %v12406_v7  ;;  %15992 = vst [vmem:[#allocation56_spill] sm:$0xff] %v12408_v55  ;;  %v2769_v23 = vadd.f32 1.0, %v12403_v14  ;;  %v15994_v57 = vmin.f32 %v12159_v15, 17.0  ;;  %v2865_v32 = vadd.f32 1.0, %v12411_v8  ;;  %vm3057_vm7 = vcmp.lt.f32.partialorder %v11668_v52, 1.0 }
 0x301   : > { %v3629_v63 = vsub.f32 %v12406_v7, %v15993_v22  ;;  %vm3025_vm6 = vmor %vm2961_vm1, %vm2993_vm3  ;;  %v3952_v39 = vmul.f32 %v15200_v2, %v15199_v54  ;;  %vm3089_vm8 = vcmp.gt.f32.partialorder %v11668_v52, 16.0  ;;  %vm2962_vm10 = vcmp.lt.f32.partialorder %v11710_v60, 1.0 }
 0x302   : > { %v3757_v61 = vsub.f32 %v12408_v55, %v15994_v57  ;;  %v2801_v24 = vmax.f32 %v2769_v23, 0.0  ;;  %v3153_v59 = vsel %vm3025_vm6, %v12403_v14, %v11665_v16  ;;  %v2897_v22 = vmax.f32 %v2865_v32, 0.0  ;;  %vm3121_vm9 = vmor %vm3057_vm7, %vm3089_vm8 }
 0x303   : > { %v3661_v0 = vadd.f32 1.0, %v3629_v63  ;;  %v12434_v57 = vmax.f32 %v3153_v59, 0.0  ;;  %v3984_v28 = vmul.f32 %v3952_v39, %v11686_v50  ;;  %v3249_v54 = vsel %vm3121_vm9, %v12411_v8, %v11668_v52 }
 0x304   : > { %v12432_v15 = vadd.f32 1.0, %v3757_v61  ;;  %v12437_v36 = vmin.f32 %v2801_v24, 17.0  ;;  %v2638_v23 = vmax.f32 %v12164_v1, 0.0  ;;  %v15996_v16 = vsub.f32 1.0, %v12182_v51 }
 0x305   : > { %v12447_v61 = vmin.f32 %v2897_v22, 17.0  ;;  %v15201_v32 = vmin.f32 %v12434_v57, 17.0  ;;  %8569 = vmatprep.mubr.msk.f32.mxu1 %vm4349_vm2, %v3984_v28  ;;  %v12451_v39 = vmax.f32 %v3249_v54, 0.0  ;;  %v12456_v52 = vfloor.f32 %v11710_v60 }
 0x306   : > { %15995 = vst [vmem:[#allocation41_spill] sm:$0xff] %v12437_v36  ;;  %v12443_v2 = vmul.f32 %v12432_v15, %v3661_v0  ;;  %v4013_v63 = vmul.f32 %v15996_v16, %v3661_v0  ;;  %v12453_v24 = vmin.f32 %v2638_v23, 17.0  ;;  %v12459_v1 = vfloor.f32 %v11713_v26 }
 0x307   : > { %15997 = vst [vmem:[#allocation86_spill] sm:$0xff] %v12447_v61  ;;  %v12465_v51 = vsub.f32 %v12437_v36, %v15201_v32  ;;  %v15205_v28 = vmin.f32 %v12451_v39, 17.0  ;;  %v16000_v54 = vmin.f32 %v12193_v31, 17.0  ;;  %v2770_v22 = vadd.f32 1.0, %v12456_v52 }
 0x308   : > { %15998 = vst [vmem:[#allocation109_spill] sm:$0xff] %v12453_v24  ;;  %v4045_v59 = vmul.f32 %v4013_v63, %v15954_v19  ;;  %v2866_v23 = vadd.f32 1.0, %v12459_v1  ;;  %vm2994_vm5 = vcmp.gt.f32.partialorder %v11710_v60, 16.0  ;;  %vm3058_vm11 = vcmp.lt.f32.partialorder %v11713_v26, 1.0 }
 0x309   : > { %15999 = vst [vmem:[#allocation110_spill] sm:$0xff] %v12465_v51  ;;  %v3630_v0 = vsub.f32 %v12453_v24, %v16000_v54  ;;  %vm3090_vm12 = vcmp.gt.f32.partialorder %v11713_v26, 16.0  ;;  %v12482_v31 = vsub.f32 %v12447_v61, %v15205_v28  ;;  %v2802_v54 = vmax.f32 %v2770_v22, 0.0  ;;  %vm3026_vm13 = vmor %vm2962_vm10, %vm2994_vm5 }
 0x30a   : > { %8668 = vmatmul.mubr.msk.f32.gmra.mrb[2].mxu0 %vm4349_vm2, %v4045_v59  ;;  %v2898_v32 = vmax.f32 %v2866_v23, 0.0  ;;  %vm3122_vm14 = vmor %vm3058_vm11, %vm3090_vm12  ;;  %v3154_v59 = vsel %vm3026_vm13, %v12456_v52, %v11710_v60  ;;  %v2639_v16 = vmax.f32 %v12212_v9, 0.0  ;;  %v12490_v47 = vfloor.f32 %v11691_v4 }
 0x30b   : > { %v12484_v63 = vadd.f32 1.0, %v3630_v0  ;;  %v12493_v36 = vfloor.f32 %v11700_v46  ;;  %v15216_v28 = vsub.f32 1.0, %v12482_v31  ;;  %v16001_v0 = vsub.f32 1.0, %v12236_v48 }
 0x30c   : > { %v12499_v23 = vmin.f32 %v2802_v54, 17.0  ;;  %v12501_v61 = vmin.f32 %v2898_v32, 17.0  ;;  %v12503_v25 = vmax.f32 %v3154_v59, 0.0  ;;  %v3250_v60 = vsel %vm3122_vm14, %v12459_v1, %v11713_v26 }
 0x30d   : > { %v4014_v22 = vmul.f32 %v16001_v0, %v12484_v63  ;;  %v12507_v9 = vmin.f32 %v2639_v16, 17.0  ;;  %v2771_v55 = vadd.f32 1.0, %v12490_v47  ;;  %v16005_v24 = vsub.f32 1.0, %v12465_v51 }
 0x30e   : > { %16002 = vst [vmem:[#allocation111_spill] sm:$0xff] %v12499_v23  ;;  %16003 = vst [vmem:[#allocation112_spill] sm:$0xff] %v12501_v61  ;;  %v12515_v54 = vmax.f32 %v3250_v60, 0.0  ;;  %v2867_v32 = vadd.f32 1.0, %v12493_v36  ;;  %v15214_v59 = vmin.f32 %v12503_v25, 17.0  ;;  %v16007_v0 = vmin.f32 %v12301_v62, 17.0 }
 0x30f   : > { %16004 = vst [vmem:[#allocation113_spill] sm:$0xff] %v12507_v9  ;;  %v3953_v7 = vmul.f32 %v15216_v28, %v16005_v24  ;;  %v4046_v48 = vmul.f32 %v4014_v22, %v11658_v13  ;;  %v2803_v16 = vmax.f32 %v2771_v55, 0.0  ;;  %vm2963_vm15 = vcmp.lt.f32.partialorder %v11691_v4, 1.0 }
 0x310   : > { %16006 = vst [vmem:[#allocation114_spill] sm:$0xff] %v12515_v54  ;;  %v3631_v26 = vsub.f32 %v12507_v9, %v16007_v0  ;;  %v15215_v24 = vmin.f32 %v12515_v54, 17.0  ;;  %v2899_v22 = vmax.f32 %v2867_v32, 0.0  ;;  %vm2995_vm0 = vcmp.gt.f32.partialorder %v11691_v4, 16.0 }
 0x311   : > { %v3985_v51 = vmul.f32 %v3953_v7, %v11671_v53  ;;  %8670 = vmatprep.mubr.msk.f32.mxu0 %vm4349_vm2, %v4046_v48  ;;  %v12530_v60 = vsub.f32 %v12499_v23, %v15214_v59  ;;  %v12534_v0 = vmin.f32 %v2803_v16, 17.0  ;;  %vm3027_vm1 = vmor %vm2963_vm15, %vm2995_vm0  ;;  %vm3059_vm3 = vcmp.lt.f32.partialorder %v11700_v46, 1.0 }
 0x312   : > { %v12532_v62 = vadd.f32 1.0, %v3631_v26  ;;  %v12541_v7 = vsub.f32 %v12501_v61, %v15215_v24  ;;  %v12543_v55 = vmin.f32 %v2899_v22, 17.0  ;;  %vm3091_vm6 = vcmp.gt.f32.partialorder %v11700_v46, 16.0 }
 0x313   : > { %16008 = vst [vmem:[#allocation115_spill] sm:$0xff] %v12530_v60  ;;  %16009 = vst [vmem:[#allocation116_spill] sm:$0xff] %v12534_v0  ;;  %8570 = vmatmul.mubr.msk.f32.gmra.mrb[134].mxu1 %vm4349_vm2, %v3985_v51  ;;  %v3155_v48 = vsel %vm3027_vm1, %v12490_v47, %v11691_v4  ;;  %v16011_v26 = vsub.f32 1.0, %v12339_v6  ;;  %v2640_v59 = vmax.f32 %v12299_v27, 0.0  ;;  %v12559_v28 = vfloor.f32 %v11747_v45 }
 0x314   : > { %16010 = vst [vmem:[#allocation117_spill] sm:$0xff] %v12543_v55  ;;  %vm3123_vm7 = vmor %vm3059_vm3, %vm3091_vm6  ;;  %v12552_v51 = vmax.f32 %v3155_v48, 0.0  ;;  %v15221_v24 = vsub.f32 1.0, %v12541_v7  ;;  %v12562_v4 = vfloor.f32 %v11750_v10  ;;  %v16015_v27 = vsub.f32 1.0, %v12530_v60 }
 0x315   : > { %v4015_v16 = vmul.f32 %v16011_v26, %v12532_v62  ;;  %v3251_v22 = vsel %vm3123_vm7, %v12493_v36, %v11700_v46  ;;  %v12568_v48 = vmin.f32 %v2640_v59, 17.0  ;;  %v2772_v46 = vadd.f32 1.0, %v12559_v28 }
 0x316   : > { %16012 = vst [vmem:[#allocation118_spill] sm:$0xff] %v12562_v4  ;;  %v15224_v6 = vmin.f32 %v12552_v51, 17.0  ;;  %v12566_v26 = vmax.f32 %v3251_v22, 0.0  ;;  %v3954_v61 = vmul.f32 %v15221_v24, %v16015_v27  ;;  %v2868_v23 = vadd.f32 1.0, %v12562_v4  ;;  %v16018_v27 = vld [vmem:[#allocation63_spill] sm:$0xff] }
 0x317   : > { %v4047_v32 = vmul.f32 %v4015_v16, %v11647_v33  ;;  %16014 = vst [vmem:[#allocation120_spill] sm:$0xff] %v12568_v48  ;;  %vm2964_vm8 = vcmp.lt.f32.partialorder %v11747_v45, 1.0  ;;  %v16017_v22 = vmin.f32 %v12343_v21, 17.0  ;;  %vm2996_vm9 = vcmp.gt.f32.partialorder %v11747_v45, 16.0 }
 0x318   : > { %16013 = vst [vmem:[#allocation119_spill] sm:$0xff] %v12566_v26  ;;  %v15226_v16 = vmin.f32 %v12566_v26, 17.0  ;;  %v12582_v59 = vsub.f32 %v12534_v0, %v15224_v6  ;;  %v3986_v24 = vmul.f32 %v3954_v61, %v16018_v27  ;;  %v2804_v60 = vmax.f32 %v2772_v46, 0.0  ;;  %vm3028_vm10 = vmor %vm2964_vm8, %vm2996_vm9 }
 0x319   : > { %8671 = vmatmul.mubr.msk.f32.gmra.mrb[4].mxu0 %vm4349_vm2, %v4047_v32  ;;  %v3632_v9 = vsub.f32 %v12568_v48, %v16017_v22  ;;  %v2900_v20 = vmax.f32 %v2868_v23, 0.0  ;;  %vm3060_vm5 = vcmp.lt.f32.partialorder %v11750_v10, 1.0  ;;  %vm3092_vm11 = vcmp.gt.f32.partialorder %v11750_v10, 16.0 }
 0x31a   : > { %16016 = vst [vmem:[#allocation121_spill] sm:$0xff] %v12582_v59  ;;  %v12594_v6 = vsub.f32 %v12543_v55, %v15226_v16  ;;  %8572 = vmatprep.mubr.msk.f32.mxu1 %vm4349_vm2, %v3986_v24  ;;  %v12600_v21 = vmin.f32 %v2804_v60, 17.0  ;;  %vm3124_vm12 = vmor %vm3060_vm5, %vm3092_vm11  ;;  %v3156_v23 = vsel %vm3028_vm10, %v12559_v28, %v11747_v45  ;;  %v2641_v46 = vmax.f32 %v12403_v14, 0.0  ;;  %v16025_v55 = vld [vmem:[#allocation64_spill] sm:$0xff]  ;;  %v16026_v45 = vld [vmem:[#allocation65_spill] sm:$0xff] }
 0x31b   : > { %v12596_v0 = vadd.f32 1.0, %v3632_v9  ;;  %v12602_v61 = vmin.f32 %v2900_v20, 17.0  ;;  %v16022_v9 = vsub.f32 1.0, %v12400_v40  ;;  %v12611_v32 = vmax.f32 %v3156_v23, 0.0 }
 0x31c   : > { %16020 = vst [vmem:[#allocation123_spill] sm:$0xff] %v12600_v21  ;;  %v3252_v24 = vsel %vm3124_vm12, %v12562_v4, %v11750_v10  ;;  %v12617_v20 = vmin.f32 %v2641_v46, 17.0  ;;  %v12620_v48 = vfloor.f32 %v16025_v55  ;;  %v12623_v14 = vfloor.f32 %v16026_v45 }
 0x31d   : > { %16019 = vst [vmem:[#allocation122_spill] sm:$0xff] %v12596_v0  ;;  %16021 = vst [vmem:[#allocation124_spill] sm:$0xff] %v12602_v61  ;;  %v4016_v16 = vmul.f32 %v16022_v9, %v12596_v0  ;;  %v12615_v60 = vmax.f32 %v3252_v24, 0.0  ;;  %v16028_v22 = vsub.f32 1.0, %v12582_v59  ;;  %v16029_v40 = vsub.f32 1.0, %v12594_v6  ;;  %v16031_v59 = vld [vmem:[#allocation62_spill] sm:$0xff] }
 0x31e   : > { %16024 = vst [vmem:[#allocation126_spill] sm:$0xff] %v12617_v20  ;;  %16027 = vst [vmem:[#allocation64_spill] sm:$0xff] %v12623_v14  ;;  %v15235_v26 = vmin.f32 %v12611_v32, 17.0  ;;  %vm2965_vm13 = vcmp.lt.f32.partialorder %v16025_v55, 1.0  ;;  %v16030_v46 = vmin.f32 %v12434_v57, 17.0  ;;  %v2773_v0 = vadd.f32 1.0, %v12620_v48 }
 0x31f   : > { %16023 = vst [vmem:[#allocation125_spill] sm:$0xff] %v12615_v60  ;;  %v3955_v9 = vmul.f32 %v16029_v40, %v16028_v22  ;;  %v4048_v23 = vmul.f32 %v4016_v16, %v11686_v50  ;;  %v15237_v10 = vmin.f32 %v12615_v60, 17.0  ;;  %v2869_v4 = vadd.f32 1.0, %v12623_v14 }
 0x320   : > { %v3633_v24 = vsub.f32 %v12617_v20, %v16030_v46  ;;  %v12643_v16 = vsub.f32 %v12600_v21, %v15235_v26  ;;  %vm2997_vm14 = vcmp.gt.f32.partialorder %v16025_v55, 16.0  ;;  %vm3061_vm15 = vcmp.lt.f32.partialorder %v16026_v45, 1.0  ;;  %v16042_v20 = vld [vmem:[#allocation72_spill] sm:$0xff] }
 0x321   : > { %v3987_v54 = vmul.f32 %v3955_v9, %v16031_v59  ;;  %8673 = vmatprep.mubr.msk.f32.mxu0 %vm4349_vm2, %v4048_v23  ;;  %v12650_v57 = vsub.f32 %v12602_v61, %v15237_v10  ;;  %v2805_v40 = vmax.f32 %v2773_v0, 0.0  ;;  %v2901_v9 = vmax.f32 %v2869_v4, 0.0  ;;  %vm3029_vm0 = vmor %vm2965_vm13, %vm2997_vm14 }
 0x322   : > { %16032 = vst [vmem:[#allocation65_spill] sm:$0xff] %v12643_v16  ;;  %v12652_v22 = vadd.f32 1.0, %v3633_v24  ;;  %vm3093_vm1 = vcmp.gt.f32.partialorder %v16026_v45, 16.0  ;;  %v3157_v46 = vsel %vm3029_vm0, %v12620_v48, %v16025_v55  ;;  %v2642_v26 = vmax.f32 %v12456_v52, 0.0  ;;  %v16038_v52 = vld [vmem:[#allocation71_spill] sm:$0xff] }
 0x323   : > { %8573 = vmatmul.mubr.msk.f32.gmra.mrb[136].mxu1 %vm4349_vm2, %v3987_v54  ;;  %v16034_v24 = vsub.f32 1.0, %v12482_v31  ;;  %v12664_v0 = vmin.f32 %v2805_v40, 17.0  ;;  %v12666_v4 = vmin.f32 %v2901_v9, 17.0  ;;  %vm3125_vm3 = vmor %vm3061_vm15, %vm3093_vm1  ;;  %v12670_v54 = vmax.f32 %v3157_v46, 0.0 }
 0x324   : > { %16033 = vst [vmem:[#allocation127_spill] sm:$0xff] %v12652_v22  ;;  %v3253_v55 = vsel %vm3125_vm3, %v12623_v14, %v16026_v45  ;;  %v12674_v23 = vmin.f32 %v2642_v26, 17.0  ;;  %v12677_v21 = vfloor.f32 %v16038_v52  ;;  %v16039_v31 = vsub.f32 1.0, %v12643_v16  ;;  %v16045_v16 = vld [vmem:[#allocation67_spill] sm:$0xff] }
 0x325   : > { %v4017_v10 = vmul.f32 %v16034_v24, %v12652_v22  ;;  %16035 = vst [vmem:[#allocation128_spill] sm:$0xff] %v12664_v0  ;;  %16036 = vst [vmem:[#allocation129_spill] sm:$0xff] %v12666_v4  ;;  %v16040_v40 = vsub.f32 1.0, %v12650_v57  ;;  %v12684_v61 = vmax.f32 %v3253_v55, 0.0  ;;  %v12687_v46 = vfloor.f32 %v16042_v20 }
 0x326   : > { %16037 = vst [vmem:[#allocation130_spill] sm:$0xff] %v12674_v23  ;;  %v15246_v60 = vmin.f32 %v12670_v54, 17.0  ;;  %v16044_v26 = vmin.f32 %v12503_v25, 17.0  ;;  %v2774_v22 = vadd.f32 1.0, %v12677_v21  ;;  %vm2966_vm6 = vcmp.lt.f32.partialorder %v16038_v52, 1.0 }
 0x327   : > { %v3956_v24 = vmul.f32 %v16040_v40, %v16039_v31  ;;  %v4049_v9 = vmul.f32 %v4017_v10, %v11671_v53  ;;  %16041 = vst [vmem:[#allocation71_spill] sm:$0xff] %v12684_v61  ;;  %16043 = vst [vmem:[#allocation72_spill] sm:$0xff] %v12687_v46  ;;  %v15248_v10 = vmin.f32 %v12684_v61, 17.0  ;;  %v2870_v55 = vadd.f32 1.0, %v12687_v46  ;;  %v16055_v53 = vld [vmem:[#allocation69_spill] sm:$0xff] }
 0x328   : > { %v3634_v45 = vsub.f32 %v12674_v23, %v16044_v26  ;;  %vm2998_vm7 = vcmp.gt.f32.partialorder %v16038_v52, 16.0  ;;  %v12703_v25 = vsub.f32 %v12664_v0, %v15246_v60  ;;  %v2806_v40 = vmax.f32 %v2774_v22, 0.0 }
 0x329   : > { %v3988_v50 = vmul.f32 %v3956_v24, %v16045_v16  ;;  %8674 = vmatmul.mubr.msk.f32.gmra.mrb[6].mxu0 %vm4349_vm2, %v4049_v9  ;;  %vm3030_vm8 = vmor %vm2966_vm6, %vm2998_vm7  ;;  %vm3062_vm9 = vcmp.lt.f32.partialorder %v16042_v20, 1.0  ;;  %v12712_v24 = vsub.f32 %v12666_v4, %v15248_v10  ;;  %v2902_v9 = vmax.f32 %v2870_v55, 0.0 }
 0x32a   : > { %16046 = vst [vmem:[#allocation131_spill] sm:$0xff] %v12703_v25  ;;  %v12705_v31 = vadd.f32 1.0, %v3634_v45  ;;  %vm3094_vm10 = vcmp.gt.f32.partialorder %v16042_v20, 16.0  ;;  %v3158_v26 = vsel %vm3030_vm8, %v12677_v21, %v16038_v52  ;;  %v16048_v22 = vsub.f32 1.0, %v12541_v7 }
 0x32b   : > { %8575 = vmatprep.mubr.msk.f32.mxu1 %vm4349_vm2, %v3988_v50  ;;  %v12721_v0 = vmin.f32 %v2806_v40, 17.0  ;;  %vm3126_vm5 = vmor %vm3062_vm9, %vm3094_vm10  ;;  %v12723_v50 = vmax.f32 %v3158_v26, 0.0  ;;  %v15255_v10 = vsub.f32 1.0, %v12712_v24  ;;  %v12726_v4 = vmin.f32 %v2902_v9, 17.0  ;;  %v16052_v40 = vld [vmem:[#allocation68_spill] sm:$0xff] }
 0x32c   : > { %16047 = vst [vmem:[#allocation132_spill] sm:$0xff] %v12705_v31  ;;  %v4018_v60 = vmul.f32 %v16048_v22, %v12705_v31  ;;  %v3254_v55 = vsel %vm3126_vm5, %v12687_v46, %v16042_v20  ;;  %v2643_v52 = vmax.f32 %v12490_v47, 0.0  ;;  %v12736_v22 = vfloor.f32 %v16052_v40  ;;  %v16067_v46 = vld [vmem:[#allocation20_spill] sm:$0xff] }
 0x32d   : > { %16049 = vst [vmem:[#allocation133_spill] sm:$0xff] %v12721_v0  ;;  %16050 = vst [vmem:[#allocation134_spill] sm:$0xff] %v12726_v4  ;;  %v15258_v23 = vmin.f32 %v12723_v50, 17.0  ;;  %v12733_v7 = vmax.f32 %v3254_v55, 0.0  ;;  %v16053_v26 = vsub.f32 1.0, %v12703_v25  ;;  %v12745_v20 = vfloor.f32 %v16055_v53 }
 0x32e   : > { %v4050_v45 = vmul.f32 %v4018_v60, %v16018_v27  ;;  %v12742_v61 = vmin.f32 %v2643_v52, 17.0  ;;  %vm2967_vm11 = vcmp.lt.f32.partialorder %v16052_v40, 1.0  ;;  %v2775_v55 = vadd.f32 1.0, %v12736_v22  ;;  %v16058_v52 = vld [vmem:[#allocation66_spill] sm:$0xff] }
 0x32f   : > { %16051 = vst [vmem:[#allocation135_spill] sm:$0xff] %v12733_v7  ;;  %v3957_v9 = vmul.f32 %v15255_v10, %v16053_v26  ;;  %16056 = vst [vmem:[#allocation69_spill] sm:$0xff] %v12745_v20  ;;  %v15262_v47 = vmin.f32 %v12733_v7, 17.0  ;;  %v12753_v60 = vsub.f32 %v12721_v0, %v15258_v23  ;;  %vm2999_vm12 = vcmp.gt.f32.partialorder %v16052_v40, 16.0 }
 0x330   : > { %16054 = vst [vmem:[#allocation68_spill] sm:$0xff] %v12742_v61  ;;  %8676 = vmatprep.mubr.msk.f32.mxu0 %vm4349_vm2, %v4050_v45  ;;  %v16059_v10 = vmin.f32 %v12552_v51, 17.0  ;;  %v2871_v27 = vadd.f32 1.0, %v12745_v20  ;;  %vm3031_vm13 = vmor %vm2967_vm11, %vm2999_vm12  ;;  %vm3063_vm14 = vcmp.lt.f32.partialorder %v16055_v53, 1.0  ;;  %v2807_v0 = vmax.f32 %v2775_v55, 0.0 }
 0x331   : > { %16057 = vst [vmem:[#allocation136_spill] sm:$0xff] %v12753_v60  ;;  %v3989_v26 = vmul.f32 %v3957_v9, %v16058_v52  ;;  %v12767_v23 = vsub.f32 %v12726_v4, %v15262_v47  ;;  %vm3095_vm15 = vcmp.gt.f32.partialorder %v16055_v53, 16.0  ;;  %v3159_v9 = vsel %vm3031_vm13, %v12736_v22, %v16052_v40 }
 0x332   : > { %v3635_v25 = vsub.f32 %v12742_v61, %v16059_v10  ;;  %v2903_v10 = vmax.f32 %v2871_v27, 0.0  ;;  %vm3127_vm0 = vmor %vm3063_vm14, %vm3095_vm15  ;;  %v2644_v61 = vmax.f32 %v12559_v28, 0.0  ;;  %v12777_v7 = vmin.f32 %v2807_v0, 17.0 }
 0x333   : > { %8576 = vmatmul.mubr.msk.f32.gmra.mrb[138].mxu1 %vm4349_vm2, %v3989_v26  ;;  %v15268_v45 = vsub.f32 1.0, %v12767_v23  ;;  %v12779_v47 = vmax.f32 %v3159_v9, 0.0  ;;  %v3255_v55 = vsel %vm3127_vm0, %v12745_v20, %v16055_v53  ;;  %v16066_v28 = vsub.f32 1.0, %v12753_v60  ;;  %v16068_v53 = vld [vmem:[#allocation18_spill] sm:$0xff] }
 0x334   : > { %v12771_v51 = vadd.f32 1.0, %v3635_v25  ;;  %16061 = vst [vmem:[#allocation138_spill] sm:$0xff] %v12777_v7  ;;  %v16062_v25 = vsub.f32 1.0, %v12594_v6  ;;  %v12786_v27 = vmin.f32 %v2903_v10, 17.0  ;;  %v12788_v4 = vmax.f32 %v3255_v55, 0.0 }
 0x335   : > { %v12790_v40 = vmin.f32 %v2644_v61, 17.0  ;;  %v3958_v0 = vmul.f32 %v15268_v45, %v16066_v28  ;;  %v15271_v9 = vmin.f32 %v12779_v47, 17.0  ;;  %v12798_v31 = vfloor.f32 %v16067_v46 }
 0x336   : > { %16060 = vst [vmem:[#allocation137_spill] sm:$0xff] %v12771_v51  ;;  %v4019_v26 = vmul.f32 %v16062_v25, %v12771_v51  ;;  %16063 = vst [vmem:[#allocation139_spill] sm:$0xff] %v12786_v27  ;;  %v12801_v20 = vfloor.f32 %v16068_v53  ;;  %v15272_v10 = vmin.f32 %v12788_v4, 17.0  ;;  %v16070_v61 = vmin.f32 %v12611_v32, 17.0  ;;  %v16071_v25 = vld [vmem:[#allocation73_spill] sm:$0xff] }
 0x337   : > { %16064 = vst [vmem:[#allocation140_spill] sm:$0xff] %v12788_v4  ;;  %16065 = vst [vmem:[#allocation141_spill] sm:$0xff] %v12790_v40  ;;  %vm2968_vm1 = vcmp.lt.f32.partialorder %v16067_v46, 1.0  ;;  %v3990_v28 = vmul.f32 %v3958_v0, %v16071_v25  ;;  %v12813_v45 = vsub.f32 %v12777_v7, %v15271_v9  ;;  %v2776_v60 = vadd.f32 1.0, %v12798_v31 }
 0x338   : > { %16069 = vst [vmem:[#allocation20_spill] sm:$0xff] %v12801_v20  ;;  %v4051_v6 = vmul.f32 %v4019_v26, %v16031_v59  ;;  %v3636_v55 = vsub.f32 %v12790_v40, %v16070_v61  ;;  %v2872_v51 = vadd.f32 1.0, %v12801_v20  ;;  %v12821_v32 = vsub.f32 %v12786_v27, %v15272_v10 }
 0x339   : > { %16072 = vst [vmem:[#allocation18_spill] sm:$0xff] %v12813_v45  ;;  %vm3000_vm3 = vcmp.gt.f32.partialorder %v16067_v46, 16.0  ;;  %vm3064_vm6 = vcmp.lt.f32.partialorder %v16068_v53, 1.0  ;;  %8578 = vmatprep.mubr.msk.f32.mxu1 %vm4349_vm2, %v3990_v28  ;;  %v2808_v61 = vmax.f32 %v2776_v60, 0.0  ;;  %vm3096_vm8 = vcmp.gt.f32.partialorder %v16068_v53, 16.0 }
 0x33a   : > { %8677 = vmatmul.mubr.msk.f32.gmra.mrb[8].mxu0 %vm4349_vm2, %v4051_v6  ;;  %v12823_v26 = vadd.f32 1.0, %v3636_v55  ;;  %v2904_v9 = vmax.f32 %v2872_v51, 0.0  ;;  %vm3032_vm7 = vmor %vm2968_vm1, %vm3000_vm3  ;;  %v16074_v10 = vsub.f32 1.0, %v12650_v57  ;;  %v2645_v7 = vmax.f32 %v12620_v48, 0.0 }
 0x33b   : > { %vm3128_vm9 = vmor %vm3064_vm6, %vm3096_vm8  ;;  %v3160_v27 = vsel %vm3032_vm7, %v12798_v31, %v16067_v46  ;;  %v12837_v28 = vmin.f32 %v2808_v61, 17.0  ;;  %v16077_v6 = vsub.f32 1.0, %v12813_v45  ;;  %v16078_v57 = vsub.f32 1.0, %v12821_v32 }
 0x33c   : > { %16073 = vst [vmem:[#allocation73_spill] sm:$0xff] %v12823_v26  ;;  %v4020_v55 = vmul.f32 %v16074_v10, %v12823_v26  ;;  %v12839_v0 = vmin.f32 %v2904_v9, 17.0  ;;  %v12841_v60 = vmax.f32 %v3160_v27, 0.0  ;;  %v3256_v51 = vsel %vm3128_vm9, %v12801_v20, %v16068_v53  ;;  %v16081_v9 = vld [vmem:[#allocation99_spill] sm:$0xff]  ;;  %v16082_v27 = vld [vmem:[#allocation100_spill] sm:$0xff]  ;;  %v16084_v53 = vld [vmem:[#allocation70_spill] sm:$0xff] }
 0x33d   : > { %16075 = vst [vmem:[#allocation142_spill] sm:$0xff] %v12837_v28  ;;  %v3959_v10 = vmul.f32 %v16078_v57, %v16077_v6  ;;  %v12850_v4 = vmax.f32 %v3256_v51, 0.0  ;;  %v12852_v46 = vmin.f32 %v2645_v7, 17.0  ;;  %v12856_v61 = vfloor.f32 %v16081_v9 }
 0x33e   : > { %16076 = vst [vmem:[#allocation143_spill] sm:$0xff] %v12839_v0  ;;  %v4052_v40 = vmul.f32 %v4020_v55, %v16045_v16  ;;  %v15281_v48 = vmin.f32 %v12841_v60, 17.0  ;;  %v12859_v59 = vfloor.f32 %v16082_v27  ;;  %vm2969_vm10 = vcmp.lt.f32.partialorder %v16081_v9, 1.0 }
 0x33f   : > { %16079 = vst [vmem:[#allocation144_spill] sm:$0xff] %v12850_v4  ;;  %16080 = vst [vmem:[#allocation145_spill] sm:$0xff] %v12852_v46  ;;  %v3991_v45 = vmul.f32 %v3959_v10, %v16084_v53  ;;  %v15284_v6 = vmin.f32 %v12850_v4, 17.0  ;;  %v16085_v55 = vmin.f32 %v12670_v54, 17.0  ;;  %vm3001_vm5 = vcmp.gt.f32.partialorder %v16081_v9, 16.0 }
 0x340   : > { %16083 = vst [vmem:[#allocation99_spill] sm:$0xff] %v12859_v59  ;;  %8679 = vmatprep.mubr.msk.f32.mxu0 %vm4349_vm2, %v4052_v40  ;;  %v12872_v51 = vsub.f32 %v12837_v28, %v15281_v48  ;;  %v2777_v57 = vadd.f32 1.0, %v12856_v61  ;;  %v2873_v16 = vadd.f32 1.0, %v12859_v59  ;;  %vm3033_vm11 = vmor %vm2969_vm10, %vm3001_vm5  ;;  %vm3065_vm12 = vcmp.lt.f32.partialorder %v16082_v27, 1.0 }
 0x341   : > { %v3637_v7 = vsub.f32 %v12852_v46, %v16085_v55  ;;  %8579 = vmatmul.mubr.msk.f32.gmra.mrb[140].mxu1 %vm4349_vm2, %v3991_v45  ;;  %v12881_v54 = vsub.f32 %v12839_v0, %v15284_v6  ;;  %vm3097_vm13 = vcmp.gt.f32.partialorder %v16082_v27, 16.0  ;;  %v3161_v10 = vsel %vm3033_vm11, %v12856_v61, %v16081_v9 }
 0x342   : > { %16086 = vst [vmem:[#allocation100_spill] sm:$0xff] %v12872_v51  ;;  %v15290_v55 = vsub.f32 1.0, %v12872_v51  ;;  %v2809_v48 = vmax.f32 %v2777_v57, 0.0  ;;  %v2905_v28 = vmax.f32 %v2873_v16, 0.0  ;;  %vm3129_vm14 = vmor %vm3065_vm12, %vm3097_vm13  ;;  %v12889_v46 = vmax.f32 %v3161_v10, 0.0 }
 0x343   : > { %v12883_v40 = vadd.f32 1.0, %v3637_v7  ;;  %v15291_v45 = vsub.f32 1.0, %v12881_v54  ;;  %v16088_v6 = vsub.f32 1.0, %v12712_v24  ;;  %v3257_v7 = vsel %vm3129_vm14, %v12859_v59, %v16082_v27  ;;  %v16093_v27 = vld [vmem:[#allocation75_spill] sm:$0xff] }
 0x344   : > { %v2646_v4 = vmax.f32 %v12677_v21, 0.0  ;;  %v12898_v20 = vmin.f32 %v2809_v48, 17.0  ;;  %v12900_v9 = vmin.f32 %v2905_v28, 17.0  ;;  %v15292_v16 = vmin.f32 %v12889_v46, 17.0  ;;  %v16095_v48 = vld [vmem:[#allocation104_spill] sm:$0xff] }
 0x345   : > { %16087 = vst [vmem:[#allocation146_spill] sm:$0xff] %v12883_v40  ;;  %v4021_v0 = vmul.f32 %v16088_v6, %v12883_v40  ;;  %v12903_v57 = vmax.f32 %v3257_v7, 0.0  ;;  %v3960_v10 = vmul.f32 %v15291_v45, %v15290_v55  ;;  %v12913_v59 = vfloor.f32 %v16093_v27  ;;  %v16097_v55 = vld [vmem:[#allocation103_spill] sm:$0xff] }
 0x346   : > { %16089 = vst [vmem:[#allocation147_spill] sm:$0xff] %v12898_v20  ;;  %16090 = vst [vmem:[#allocation148_spill] sm:$0xff] %v12900_v9  ;;  %v12910_v6 = vmin.f32 %v2646_v4, 17.0  ;;  %v12919_v28 = vsub.f32 %v12898_v20, %v15292_v16  ;;  %v12922_v7 = vfloor.f32 %v16095_v48  ;;  %vm2970_vm15 = vcmp.lt.f32.partialorder %v16093_v27, 1.0 }
 0x347   : > { %16091 = vst [vmem:[#allocation149_spill] sm:$0xff] %v12903_v57  ;;  %v4053_v24 = vmul.f32 %v4021_v0, %v16058_v52  ;;  %v3992_v45 = vmul.f32 %v3960_v10, %v16097_v55  ;;  %v16098_v4 = vmin.f32 %v12723_v50, 17.0  ;;  %v2778_v21 = vadd.f32 1.0, %v12913_v59 }
 0x348   : > { %16092 = vst [vmem:[#allocation150_spill] sm:$0xff] %v12910_v6  ;;  %16094 = vst [vmem:[#allocation75_spill] sm:$0xff] %v12919_v28  ;;  %vm3002_vm0 = vcmp.gt.f32.partialorder %v16093_v27, 16.0  ;;  %v16099_v20 = vmin.f32 %v12903_v57, 17.0  ;;  %v2874_v52 = vadd.f32 1.0, %v12922_v7  ;;  %vm3066_vm3 = vcmp.lt.f32.partialorder %v16095_v48, 1.0 }
 0x349   : > { %16096 = vst [vmem:[#allocation104_spill] sm:$0xff] %v12922_v7  ;;  %8680 = vmatmul.mubr.msk.f32.gmra.mrb[10].mxu0 %vm4349_vm2, %v4053_v24  ;;  %v3638_v0 = vsub.f32 %v12910_v6, %v16098_v4  ;;  %vm3034_vm1 = vmor %vm2970_vm15, %vm3002_vm0  ;;  %8581 = vmatprep.mubr.msk.f32.mxu1 %vm4349_vm2, %v3992_v45  ;;  %v2810_v10 = vmax.f32 %v2778_v21, 0.0  ;;  %vm3098_vm6 = vcmp.gt.f32.partialorder %v16095_v48, 16.0  ;;  %v16101_v6 = vsub.f32 1.0, %v12767_v23  ;;  %v16103_v57 = vld [vmem:[#allocation19_spill] sm:$0xff] }
 0x34a   : > { %v12936_v51 = vsub.f32 %v12900_v9, %v16099_v20  ;;  %v3162_v24 = vsel %vm3034_vm1, %v12913_v59, %v16093_v27  ;;  %v2906_v16 = vmax.f32 %v2874_v52, 0.0  ;;  %vm3130_vm7 = vmor %vm3066_vm3, %vm3098_vm6  ;;  %v2647_v9 = vmax.f32 %v12736_v22, 0.0 }
 0x34b   : > { %v12941_v50 = vadd.f32 1.0, %v3638_v0  ;;  %v12947_v20 = vmax.f32 %v3162_v24, 0.0  ;;  %v12953_v0 = vmin.f32 %v2810_v10, 17.0  ;;  %v3258_v21 = vsel %vm3130_vm7, %v12922_v7, %v16095_v48  ;;  %v16108_v10 = vld [vmem:[#allocation21_spill] sm:$0xff] }
 0x34c   : > { %v15307_v4 = vsub.f32 1.0, %v12936_v51  ;;  %v12958_v40 = vfloor.f32 %v16103_v57  ;;  %v16104_v27 = vsub.f32 1.0, %v12919_v28  ;;  %v12964_v24 = vmin.f32 %v2906_v16, 17.0 }
 0x34d   : > { %16100 = vst [vmem:[#allocation151_spill] sm:$0xff] %v12941_v50  ;;  %v4022_v45 = vmul.f32 %v16101_v6, %v12941_v50  ;;  %16102 = vst [vmem:[#allocation152_spill] sm:$0xff] %v12953_v0  ;;  %v15306_v22 = vmin.f32 %v12947_v20, 17.0  ;;  %v12967_v26 = vmax.f32 %v3258_v21, 0.0  ;;  %v12970_v6 = vmin.f32 %v2647_v9, 17.0  ;;  %v16109_v50 = vld [vmem:[#allocation102_spill] sm:$0xff] }
 0x34e   : > { %v3961_v52 = vmul.f32 %v15307_v4, %v16104_v27  ;;  %16105 = vst [vmem:[#allocation19_spill] sm:$0xff] %v12964_v24  ;;  %v12973_v48 = vfloor.f32 %v16108_v10  ;;  %v2779_v7 = vadd.f32 1.0, %v12958_v40  ;;  %vm2971_vm8 = vcmp.lt.f32.partialorder %v16103_v57, 1.0 }
 0x34f   : > { %16106 = vst [vmem:[#allocation153_spill] sm:$0xff] %v12967_v26  ;;  %v4054_v23 = vmul.f32 %v4022_v45, %v16071_v25  ;;  %16107 = vst [vmem:[#allocation154_spill] sm:$0xff] %v12970_v6  ;;  %v15308_v14 = vmin.f32 %v12967_v26, 17.0  ;;  %v12981_v16 = vsub.f32 %v12953_v0, %v15306_v22  ;;  %v16111_v9 = vmin.f32 %v12779_v47, 17.0 }
 0x350   : > { %v3993_v28 = vmul.f32 %v3961_v52, %v16109_v50  ;;  %v2811_v21 = vmax.f32 %v2779_v7, 0.0  ;;  %v2875_v27 = vadd.f32 1.0, %v12973_v48  ;;  %vm3003_vm9 = vcmp.gt.f32.partialorder %v16103_v57, 16.0 }
 0x351   : > { %16110 = vst [vmem:[#allocation21_spill] sm:$0xff] %v12981_v16  ;;  %8682 = vmatprep.mubr.msk.f32.mxu0 %vm4349_vm2, %v4054_v23  ;;  %v3639_v45 = vsub.f32 %v12970_v6, %v16111_v9  ;;  %v12995_v22 = vsub.f32 %v12964_v24, %v15308_v14  ;;  %vm3035_vm10 = vmor %vm2971_vm8, %vm3003_vm9  ;;  %vm3067_vm5 = vcmp.lt.f32.partialorder %v16108_v10, 1.0  ;;  %vm3099_vm11 = vcmp.gt.f32.partialorder %v16108_v10, 16.0 }
 0x352   : > { %8582 = vmatmul.mubr.msk.f32.gmra.mrb[142].mxu1 %vm4349_vm2, %v3993_v28  ;;  %v13001_v7 = vmin.f32 %v2811_v21, 17.0  ;;  %v2907_v23 = vmax.f32 %v2875_v27, 0.0  ;;  %vm3131_vm12 = vmor %vm3067_vm5, %vm3099_vm11  ;;  %v3163_v28 = vsel %vm3035_vm10, %v12958_v40, %v16103_v57  ;;  %v2648_v52 = vmax.f32 %v12798_v31, 0.0 }
 0x353   : > { %v12999_v47 = vadd.f32 1.0, %v3639_v45  ;;  %v15314_v9 = vsub.f32 1.0, %v12995_v22  ;;  %v13006_v4 = vmax.f32 %v3163_v28, 0.0  ;;  %v3259_v14 = vsel %vm3131_vm12, %v12973_v48, %v16108_v10 }
 0x354   : > { %16112 = vst [vmem:[#allocation155_spill] sm:$0xff] %v13001_v7  ;;  %v16113_v45 = vsub.f32 1.0, %v12821_v32  ;;  %v13014_v21 = vmin.f32 %v2907_v23, 17.0  ;;  %v13016_v27 = vmax.f32 %v3259_v14, 0.0  ;;  %v13019_v0 = vfloor.f32 %v11873_v12 }
 0x355   : > { %v16116_v57 = vsub.f32 1.0, %v12981_v16  ;;  %v15317_v10 = vmin.f32 %v13006_v4, 17.0  ;;  %v13026_v6 = vmin.f32 %v2648_v52, 17.0  ;;  %v13029_v31 = vfloor.f32 %v11876_v43 }
 0x356   : > { %v4023_v24 = vmul.f32 %v16113_v45, %v12999_v47  ;;  %16114 = vst [vmem:[#allocation156_spill] sm:$0xff] %v13014_v21  ;;  %16115 = vst [vmem:[#allocation157_spill] sm:$0xff] %v13016_v27  ;;  %v15318_v14 = vmin.f32 %v13016_v27, 17.0  ;;  %v2780_v23 = vadd.f32 1.0, %v13019_v0  ;;  %vm2972_vm13 = vcmp.lt.f32.partialorder %v11873_v12, 1.0  ;;  %v16119_v45 = vld [vmem:[#allocation23_spill] sm:$0xff] }
 0x357   : > { %v3962_v28 = vmul.f32 %v15314_v9, %v16116_v57  ;;  %16117 = vst [vmem:[#allocation158_spill] sm:$0xff] %v13026_v6  ;;  %16118 = vst [vmem:[#allocation159_spill] sm:$0xff] %v13029_v31  ;;  %v13039_v57 = vsub.f32 %v13001_v7, %v15317_v10  ;;  %v16121_v52 = vmin.f32 %v12841_v60, 17.0  ;;  %v2876_v26 = vadd.f32 1.0, %v13029_v31 }
 0x358   : > { %v4055_v32 = vmul.f32 %v4023_v24, %v16084_v53  ;;  %v13049_v24 = vsub.f32 %v13014_v21, %v15318_v14  ;;  %v2812_v53 = vmax.f32 %v2780_v23, 0.0  ;;  %vm3004_vm14 = vcmp.gt.f32.partialorder %v11873_v12, 16.0 }
 0x359   : > { %v3994_v16 = vmul.f32 %v3962_v28, %v16119_v45  ;;  %16120 = vst [vmem:[#allocation160_spill] sm:$0xff] %v13039_v57  ;;  %v3640_v9 = vsub.f32 %v13026_v6, %v16121_v52  ;;  %vm3068_vm15 = vcmp.lt.f32.partialorder %v11876_v43, 1.0  ;;  %v2908_v52 = vmax.f32 %v2876_v26, 0.0  ;;  %vm3036_vm0 = vmor %vm2972_vm13, %vm3004_vm14 }
 0x35a   : > { %8683 = vmatmul.mubr.msk.f32.gmra.mrb[12].mxu0 %vm4349_vm2, %v4055_v32  ;;  %vm3100_vm1 = vcmp.gt.f32.partialorder %v11876_v43, 16.0  ;;  %v15325_v32 = vsub.f32 1.0, %v13049_v24  ;;  %v13059_v10 = vmin.f32 %v2812_v53, 17.0  ;;  %v3164_v23 = vsel %vm3036_vm0, %v13019_v0, %v11873_v12 }
 0x35b   : > { %8584 = vmatprep.mubr.msk.f32.mxu1 %vm4349_vm2, %v3994_v16  ;;  %v13055_v28 = vadd.f32 1.0, %v3640_v9  ;;  %vm3132_vm3 = vmor %vm3068_vm15, %vm3100_vm1  ;;  %v2649_v14 = vmax.f32 %v12856_v61, 0.0  ;;  %v16124_v16 = vsub.f32 1.0, %v12881_v54  ;;  %v13067_v9 = vmin.f32 %v2908_v52, 17.0  ;;  %v16129_v61 = vld [vmem:[#allocation105_spill] sm:$0xff] }
 0x35c   : > { %16123 = vst [vmem:[#allocation162_spill] sm:$0xff] %v13059_v10  ;;  %v13069_v26 = vmax.f32 %v3164_v23, 0.0  ;;  %v3260_v21 = vsel %vm3132_vm3, %v13029_v31, %v11876_v43  ;;  %v16126_v53 = vsub.f32 1.0, %v13039_v57  ;;  %v13082_v27 = vfloor.f32 %v16129_v61  ;;  %v16130_v23 = vld [vmem:[#allocation49_spill] sm:$0xff]  ;;  %v16132_v43 = vld [vmem:[#allocation22_spill] sm:$0xff] }
 0x35d   : > { %16122 = vst [vmem:[#allocation161_spill] sm:$0xff] %v13055_v28  ;;  %v4024_v60 = vmul.f32 %v16124_v16, %v13055_v28  ;;  %16125 = vst [vmem:[#allocation163_spill] sm:$0xff] %v13067_v9  ;;  %v13077_v6 = vmax.f32 %v3260_v21, 0.0  ;;  %v13079_v12 = vmin.f32 %v2649_v14, 17.0  ;;  %v13087_v16 = vfloor.f32 %v16130_v23 }
 0x35e   : > { %v3963_v7 = vmul.f32 %v15325_v32, %v16126_v53  ;;  %v15327_v52 = vmin.f32 %v13069_v26, 17.0  ;;  %vm2973_vm6 = vcmp.lt.f32.partialorder %v16129_v61, 1.0  ;;  %v16133_v21 = vmin.f32 %v12889_v46, 17.0 }
 0x35f   : > { %16127 = vst [vmem:[#allocation164_spill] sm:$0xff] %v13077_v6  ;;  %16128 = vst [vmem:[#allocation165_spill] sm:$0xff] %v13079_v12  ;;  %v4056_v54 = vmul.f32 %v4024_v60, %v16097_v55  ;;  %v15330_v53 = vmin.f32 %v13077_v6, 17.0  ;;  %v2781_v32 = vadd.f32 1.0, %v13082_v27  ;;  %v2877_v55 = vadd.f32 1.0, %v13087_v16 }
 0x360   : > { %16131 = vst [vmem:[#allocation105_spill] sm:$0xff] %v13087_v16  ;;  %v3995_v57 = vmul.f32 %v3963_v7, %v16132_v43  ;;  %v3641_v14 = vsub.f32 %v13079_v12, %v16133_v21  ;;  %v13100_v60 = vsub.f32 %v13059_v10, %v15327_v52  ;;  %vm3005_vm7 = vcmp.gt.f32.partialorder %v16129_v61, 16.0 }
 0x361   : > { %8685 = vmatprep.mubr.msk.f32.mxu0 %vm4349_vm2, %v4056_v54  ;;  %vm3069_vm8 = vcmp.lt.f32.partialorder %v16130_v23, 1.0  ;;  %v13109_v46 = vsub.f32 %v13067_v9, %v15330_v53  ;;  %v2813_v54 = vmax.f32 %v2781_v32, 0.0  ;;  %vm3037_vm9 = vmor %vm2973_vm6, %vm3005_vm7  ;;  %vm3101_vm10 = vcmp.gt.f32.partialorder %v16130_v23, 16.0 }
 0x362   : > { %16134 = vst [vmem:[#allocation49_spill] sm:$0xff] %v13100_v60  ;;  %8585 = vmatmul.mubr.msk.f32.gmra.mrb[144].mxu1 %vm4349_vm2, %v3995_v57  ;;  %v13111_v7 = vadd.f32 1.0, %v3641_v14  ;;  %v2909_v52 = vmax.f32 %v2877_v55, 0.0  ;;  %vm3133_vm5 = vmor %vm3069_vm8, %vm3101_vm10  ;;  %v3165_v10 = vsel %vm3037_vm9, %v13082_v27, %v16129_v61  ;;  %v2650_v57 = vmax.f32 %v12913_v59, 0.0  ;;  %v16140_v61 = vld [vmem:[#allocation26_spill] sm:$0xff] }
 0x363   : > { %v15340_v12 = vsub.f32 1.0, %v13109_v46  ;;  %v16136_v53 = vsub.f32 1.0, %v12936_v51  ;;  %v13122_v9 = vmin.f32 %v2813_v54, 17.0  ;;  %v13124_v32 = vmax.f32 %v3165_v10, 0.0 }
 0x364   : > { %16135 = vst [vmem:[#allocation166_spill] sm:$0xff] %v13111_v7  ;;  %v13126_v6 = vmin.f32 %v2909_v52, 17.0  ;;  %v3261_v55 = vsel %vm3133_vm5, %v13087_v16, %v16130_v23  ;;  %v13130_v21 = vmin.f32 %v2650_v57, 17.0  ;;  %v13133_v28 = vfloor.f32 %v16140_v61  ;;  %v16144_v57 = vld [vmem:[#allocation108_spill] sm:$0xff] }
 0x365   : > { %v4025_v14 = vmul.f32 %v16136_v53, %v13111_v7  ;;  %16137 = vst [vmem:[#allocation167_spill] sm:$0xff] %v13122_v9  ;;  %v16141_v59 = vsub.f32 1.0, %v13100_v60  ;;  %v15339_v10 = vmin.f32 %v13124_v32, 17.0  ;;  %v13141_v54 = vmax.f32 %v3261_v55, 0.0  ;;  %v16146_v60 = vld [vmem:[#allocation48_spill] sm:$0xff] }
 0x366   : > { %16138 = vst [vmem:[#allocation168_spill] sm:$0xff] %v13126_v6  ;;  %16139 = vst [vmem:[#allocation169_spill] sm:$0xff] %v13130_v21  ;;  %v16143_v52 = vmin.f32 %v12947_v20, 17.0  ;;  %v13147_v16 = vfloor.f32 %v16144_v57  ;;  %v2782_v7 = vadd.f32 1.0, %v13133_v28  ;;  %vm2974_vm11 = vcmp.lt.f32.partialorder %v16140_v61, 1.0 }
 0x367   : > { %v3964_v51 = vmul.f32 %v15340_v12, %v16141_v59  ;;  %v4057_v53 = vmul.f32 %v4025_v14, %v16109_v50  ;;  %16142 = vst [vmem:[#allocation26_spill] sm:$0xff] %v13141_v54  ;;  %v15342_v14 = vmin.f32 %v13141_v54, 17.0  ;;  %v13157_v55 = vsub.f32 %v13122_v9, %v15339_v10 }
 0x368   : > { %v3642_v23 = vsub.f32 %v13130_v21, %v16143_v52  ;;  %16145 = vst [vmem:[#allocation108_spill] sm:$0xff] %v13147_v16  ;;  %vm3006_vm12 = vcmp.gt.f32.partialorder %v16140_v61, 16.0  ;;  %v2814_v59 = vmax.f32 %v2782_v7, 0.0  ;;  %v2878_v52 = vadd.f32 1.0, %v13147_v16  ;;  %v16151_v21 = vld [vmem:[#allocation106_spill] sm:$0xff] }
 0x369   : > { %v3996_v31 = vmul.f32 %v3964_v51, %v16146_v60  ;;  %8686 = vmatmul.mubr.msk.f32.gmra.mrb[14].mxu0 %vm4349_vm2, %v4057_v53  ;;  %16147 = vst [vmem:[#allocation170_spill] sm:$0xff] %v13157_v55  ;;  %vm3038_vm13 = vmor %vm2974_vm11, %vm3006_vm12  ;;  %vm3070_vm14 = vcmp.lt.f32.partialorder %v16144_v57, 1.0  ;;  %v13169_v53 = vsub.f32 %v13126_v6, %v15342_v14  ;;  %vm3102_vm15 = vcmp.gt.f32.partialorder %v16144_v57, 16.0 }
 0x36a   : > { %v13160_v20 = vadd.f32 1.0, %v3642_v23  ;;  %v3166_v23 = vsel %vm3038_vm13, %v13133_v28, %v16140_v61  ;;  %v16149_v7 = vsub.f32 1.0, %v12995_v22  ;;  %v13177_v12 = vmin.f32 %v2814_v59, 17.0  ;;  %vm3134_vm0 = vmor %vm3070_vm14, %vm3102_vm15 }
 0x36b   : > { %8587 = vmatprep.mubr.msk.f32.mxu1 %vm4349_vm2, %v3996_v31  ;;  %v2910_v9 = vmax.f32 %v2878_v52, 0.0  ;;  %v13179_v31 = vmax.f32 %v3166_v23, 0.0  ;;  %v15349_v51 = vsub.f32 1.0, %v13169_v53  ;;  %v3262_v14 = vsel %vm3134_vm0, %v13147_v16, %v16144_v57  ;;  %v16156_v57 = vld [vmem:[#allocation25_spill] sm:$0xff] }
 0x36c   : > { %16148 = vst [vmem:[#allocation171_spill] sm:$0xff] %v13160_v20  ;;  %v4026_v10 = vmul.f32 %v16149_v7, %v13160_v20  ;;  %16150 = vst [vmem:[#allocation172_spill] sm:$0xff] %v13177_v12  ;;  %v2651_v6 = vmax.f32 %v12958_v40, 0.0  ;;  %v13186_v54 = vfloor.f32 %v16151_v21  ;;  %v13192_v52 = vmax.f32 %v3262_v14, 0.0 }
 0x36d   : > { %v13189_v22 = vmin.f32 %v2910_v9, 17.0  ;;  %v15352_v59 = vmin.f32 %v13179_v31, 17.0  ;;  %v16154_v23 = vsub.f32 1.0, %v13157_v55  ;;  %v13201_v40 = vfloor.f32 %v16156_v57 }
 0x36e   : > { %v4058_v61 = vmul.f32 %v4026_v10, %v16119_v45  ;;  %16153 = vst [vmem:[#allocation173_spill] sm:$0xff] %v13192_v52  ;;  %v13198_v50 = vmin.f32 %v2651_v6, 17.0  ;;  %v2783_v16 = vadd.f32 1.0, %v13186_v54  ;;  %vm2975_vm1 = vcmp.lt.f32.partialorder %v16151_v21, 1.0  ;;  %v16159_v6 = vld [vmem:[#allocation24_spill] sm:$0xff] }
 0x36f   : > { %16152 = vst [vmem:[#allocation106_spill] sm:$0xff] %v13189_v22  ;;  %v3965_v7 = vmul.f32 %v15349_v51, %v16154_v23  ;;  %16157 = vst [vmem:[#allocation25_spill] sm:$0xff] %v13201_v40  ;;  %v13209_v10 = vsub.f32 %v13177_v12, %v15352_v59  ;;  %vm3007_vm3 = vcmp.gt.f32.partialorder %v16151_v21, 16.0  ;;  %v16160_v23 = vmin.f32 %v13006_v4, 17.0 }
 0x370   : > { %16155 = vst [vmem:[#allocation174_spill] sm:$0xff] %v13198_v50  ;;  %8688 = vmatprep.mubr.msk.f32.mxu0 %vm4349_vm2, %v4058_v61  ;;  %v2815_v55 = vmax.f32 %v2783_v16, 0.0  ;;  %v2879_v61 = vadd.f32 1.0, %v13201_v40  ;;  %vm3039_vm6 = vmor %vm2975_vm1, %vm3007_vm3  ;;  %v16161_v45 = vmin.f32 %v13192_v52, 17.0  ;;  %vm3071_vm7 = vcmp.lt.f32.partialorder %v16156_v57, 1.0 }
 0x371   : > { %16158 = vst [vmem:[#allocation175_spill] sm:$0xff] %v13209_v10  ;;  %v3997_v14 = vmul.f32 %v3965_v7, %v16159_v6  ;;  %v3643_v51 = vsub.f32 %v13198_v50, %v16160_v23  ;;  %vm3103_vm8 = vcmp.gt.f32.partialorder %v16156_v57, 16.0  ;;  %v3167_v23 = vsel %vm3039_vm6, %v13186_v54, %v16151_v21  ;;  %v16167_v50 = vld [vmem:[#allocation43_spill] sm:$0xff] }
 0x372   : > { %v13222_v59 = vsub.f32 %v13189_v22, %v16161_v45  ;;  %v13229_v7 = vmin.f32 %v2815_v55, 17.0  ;;  %v2911_v16 = vmax.f32 %v2879_v61, 0.0  ;;  %vm3135_vm9 = vmor %vm3071_vm7, %vm3103_vm8  ;;  %v13234_v12 = vmax.f32 %v3167_v23, 0.0 }
 0x373   : > { %8588 = vmatmul.mubr.msk.f32.gmra.mrb[146].mxu1 %vm4349_vm2, %v3997_v14  ;;  %v13227_v4 = vadd.f32 1.0, %v3643_v51  ;;  %v3263_v45 = vsel %vm3135_vm9, %v13201_v40, %v16156_v57  ;;  %v2652_v22 = vmax.f32 %v13019_v0, 0.0  ;;  %v16164_v51 = vsub.f32 1.0, %v13049_v24  ;;  %v16170_v0 = vld [vmem:[#allocation101_spill] sm:$0xff] }
 0x374   : > { %16163 = vst [vmem:[#allocation176_spill] sm:$0xff] %v13229_v7  ;;  %v15361_v9 = vsub.f32 1.0, %v13222_v59  ;;  %v13242_v55 = vmin.f32 %v2911_v16, 17.0  ;;  %v13244_v61 = vmax.f32 %v3263_v45, 0.0  ;;  %v13247_v52 = vfloor.f32 %v16167_v50 }
 0x375   : > { %16162 = vst [vmem:[#allocation24_spill] sm:$0xff] %v13227_v4  ;;  %v4027_v14 = vmul.f32 %v16164_v51, %v13227_v4  ;;  %v16168_v21 = vsub.f32 1.0, %v13209_v10  ;;  %v15364_v57 = vmin.f32 %v13234_v12, 17.0  ;;  %v13254_v40 = vmin.f32 %v2652_v22, 17.0  ;;  %v16171_v51 = vld [vmem:[#allocation27_spill] sm:$0xff] }
 0x376   : > { %16165 = vst [vmem:[#allocation177_spill] sm:$0xff] %v13242_v55  ;;  %16166 = vst [vmem:[#allocation178_spill] sm:$0xff] %v13244_v61  ;;  %v13257_v20 = vfloor.f32 %v16170_v0  ;;  %v15365_v16 = vmin.f32 %v13244_v61, 17.0  ;;  %v2784_v45 = vadd.f32 1.0, %v13247_v52  ;;  %vm2976_vm10 = vcmp.lt.f32.partialorder %v16167_v50, 1.0 }
 0x377   : > { %v3966_v23 = vmul.f32 %v15361_v9, %v16168_v21  ;;  %16169 = vst [vmem:[#allocation43_spill] sm:$0xff] %v13254_v40  ;;  %v4059_v24 = vmul.f32 %v4027_v14, %v16132_v43  ;;  %v13267_v21 = vsub.f32 %v13229_v7, %v15364_v57  ;;  %v16173_v22 = vmin.f32 %v13069_v26, 17.0 }
 0x378   : > { %v2880_v4 = vadd.f32 1.0, %v13257_v20  ;;  %v13277_v14 = vsub.f32 %v13242_v55, %v15365_v16  ;;  %v2816_v43 = vmax.f32 %v2784_v45, 0.0  ;;  %vm3008_vm5 = vcmp.gt.f32.partialorder %v16167_v50, 16.0 }
 0x379   : > { %v3998_v10 = vmul.f32 %v3966_v23, %v16171_v51  ;;  %16172 = vst [vmem:[#allocation101_spill] sm:$0xff] %v13267_v21  ;;  %v3644_v9 = vsub.f32 %v13254_v40, %v16173_v22  ;;  %8689 = vmatmul.mubr.msk.f32.gmra.mrb[16].mxu0 %vm4349_vm2, %v4059_v24  ;;  %vm3072_vm11 = vcmp.lt.f32.partialorder %v16170_v0, 1.0  ;;  %vm3040_vm12 = vmor %vm2976_vm10, %vm3008_vm5  ;;  %vm3104_vm13 = vcmp.gt.f32.partialorder %v16170_v0, 16.0 }
 0x37a   : > { %v2912_v22 = vmax.f32 %v2880_v4, 0.0  ;;  %v15372_v24 = vsub.f32 1.0, %v13277_v14  ;;  %v13287_v57 = vmin.f32 %v2816_v43, 17.0  ;;  %vm3136_vm14 = vmor %vm3072_vm11, %vm3104_vm13  ;;  %v3168_v45 = vsel %vm3040_vm12, %v13247_v52, %v16167_v50 }
 0x37b   : > { %8590 = vmatprep.mubr.msk.f32.mxu1 %vm4349_vm2, %v3998_v10  ;;  %v13283_v23 = vadd.f32 1.0, %v3644_v9  ;;  %v2653_v16 = vmax.f32 %v13082_v27, 0.0  ;;  %v16175_v10 = vsub.f32 1.0, %v13109_v46  ;;  %v13297_v4 = vmax.f32 %v3168_v45, 0.0  ;;  %v16180_v27 = vld [vmem:[#allocation28_spill] sm:$0xff] }
 0x37c   : > { %16174 = vst [vmem:[#allocation179_spill] sm:$0xff] %v13287_v57  ;;  %v13295_v9 = vmin.f32 %v2912_v22, 17.0  ;;  %v3264_v55 = vsel %vm3136_vm14, %v13257_v20, %v16170_v0  ;;  %v16177_v43 = vsub.f32 1.0, %v13267_v21  ;;  %v13310_v61 = vfloor.f32 %v16180_v27  ;;  %v16181_v45 = vld [vmem:[#allocation40_spill] sm:$0xff]  ;;  %v16183_v0 = vld [vmem:[#allocation81_spill] sm:$0xff] }
 0x37d   : > { %v4028_v26 = vmul.f32 %v16175_v10, %v13283_v23  ;;  %v13305_v40 = vmax.f32 %v3264_v55, 0.0  ;;  %v13307_v50 = vmin.f32 %v2653_v16, 17.0  ;;  %v15374_v22 = vmin.f32 %v13297_v4, 17.0 }
 0x37e   : > { %16176 = vst [vmem:[#allocation180_spill] sm:$0xff] %v13295_v9  ;;  %v3967_v7 = vmul.f32 %v15372_v24, %v16177_v43  ;;  %v13315_v10 = vfloor.f32 %v16181_v45  ;;  %vm2977_vm15 = vcmp.lt.f32.partialorder %v16180_v27, 1.0  ;;  %v16184_v55 = vmin.f32 %v13124_v32, 17.0 }
 0x37f   : > { %16178 = vst [vmem:[#allocation181_spill] sm:$0xff] %v13305_v40  ;;  %16179 = vst [vmem:[#allocation182_spill] sm:$0xff] %v13307_v50  ;;  %v4060_v46 = vmul.f32 %v4028_v26, %v16146_v60  ;;  %v15377_v43 = vmin.f32 %v13305_v40, 17.0  ;;  %v2785_v24 = vadd.f32 1.0, %v13310_v61  ;;  %v13328_v26 = vsub.f32 %v13287_v57, %v15374_v22 }
 0x380   : > { %16182 = vst [vmem:[#allocation28_spill] sm:$0xff] %v13315_v10  ;;  %v3999_v21 = vmul.f32 %v3967_v7, %v16183_v0  ;;  %v3645_v16 = vsub.f32 %v13307_v50, %v16184_v55  ;;  %v2881_v60 = vadd.f32 1.0, %v13315_v10  ;;  %vm3009_vm0 = vcmp.gt.f32.partialorder %v16180_v27, 16.0 }
 0x381   : > { %8691 = vmatprep.mubr.msk.f32.mxu0 %vm4349_vm2, %v4060_v46  ;;  %16185 = vst [vmem:[#allocation40_spill] sm:$0xff] %v13328_v26  ;;  %vm3073_vm1 = vcmp.lt.f32.partialorder %v16181_v45, 1.0  ;;  %v13337_v32 = vsub.f32 %v13295_v9, %v15377_v43  ;;  %v2817_v46 = vmax.f32 %v2785_v24, 0.0  ;;  %vm3041_vm3 = vmor %vm2977_vm15, %vm3009_vm0  ;;  %vm3105_vm6 = vcmp.gt.f32.partialorder %v16181_v45, 16.0 }
 0x382   : > { %8591 = vmatmul.mubr.msk.f32.gmra.mrb[148].mxu1 %vm4349_vm2, %v3999_v21  ;;  %v13339_v7 = vadd.f32 1.0, %v3645_v16  ;;  %v2913_v22 = vmax.f32 %v2881_v60, 0.0  ;;  %vm3137_vm7 = vmor %vm3073_vm1, %vm3105_vm6  ;;  %v3169_v57 = vsel %vm3041_vm3, %v13310_v61, %v16180_v27  ;;  %v2654_v21 = vmax.f32 %v13133_v28, 0.0 }
 0x383   : > { %v15385_v50 = vsub.f32 1.0, %v13337_v32  ;;  %v16187_v43 = vsub.f32 1.0, %v13169_v53  ;;  %v13350_v9 = vmin.f32 %v2817_v46, 17.0  ;;  %v13352_v24 = vmax.f32 %v3169_v57, 0.0 }
 0x384   : > { %16186 = vst [vmem:[#allocation183_spill] sm:$0xff] %v13339_v7  ;;  %v13354_v40 = vmin.f32 %v2913_v22, 17.0  ;;  %v3265_v60 = vsel %vm3137_vm7, %v13315_v10, %v16181_v45  ;;  %v13358_v55 = vmin.f32 %v2654_v21, 17.0  ;;  %v13361_v27 = vfloor.f32 %v11995_v56 }
 0x385   : > { %v4029_v16 = vmul.f32 %v16187_v43, %v13339_v7  ;;  %16188 = vst [vmem:[#allocation184_spill] sm:$0xff] %v13350_v9  ;;  %v16191_v28 = vsub.f32 1.0, %v13328_v26  ;;  %v15384_v57 = vmin.f32 %v13352_v24, 17.0  ;;  %v13369_v46 = vmax.f32 %v3265_v60, 0.0  ;;  %v16194_v26 = vld [vmem:[#allocation89_spill] sm:$0xff] }
 0x386   : > { %16189 = vst [vmem:[#allocation185_spill] sm:$0xff] %v13354_v40  ;;  %16190 = vst [vmem:[#allocation186_spill] sm:$0xff] %v13358_v55  ;;  %v16193_v22 = vmin.f32 %v13179_v31, 17.0  ;;  %v13375_v21 = vfloor.f32 %v11998_v37  ;;  %v2786_v7 = vadd.f32 1.0, %v13361_v27  ;;  %vm2978_vm8 = vcmp.lt.f32.partialorder %v11995_v56, 1.0 }
 0x387   : > { %v3968_v53 = vmul.f32 %v15385_v50, %v16191_v28  ;;  %v4061_v43 = vmul.f32 %v4029_v16, %v16159_v6  ;;  %16192 = vst [vmem:[#allocation187_spill] sm:$0xff] %v13369_v46  ;;  %v15387_v16 = vmin.f32 %v13369_v46, 17.0  ;;  %v13385_v60 = vsub.f32 %v13350_v9, %v15384_v57 }
 0x388   : > { %v3646_v45 = vsub.f32 %v13358_v55, %v16193_v22  ;;  %vm3010_vm9 = vcmp.gt.f32.partialorder %v11995_v56, 16.0  ;;  %v2818_v28 = vmax.f32 %v2786_v7, 0.0  ;;  %v2882_v22 = vadd.f32 1.0, %v13375_v21 }
 0x389   : > { %v4000_v10 = vmul.f32 %v3968_v53, %v16194_v26  ;;  %8692 = vmatmul.mubr.msk.f32.gmra.mrb[18].mxu0 %vm4349_vm2, %v4061_v43  ;;  %16195 = vst [vmem:[#allocation188_spill] sm:$0xff] %v13385_v60  ;;  %vm3042_vm10 = vmor %vm2978_vm8, %vm3010_vm9  ;;  %vm3074_vm5 = vcmp.lt.f32.partialorder %v11998_v37, 1.0  ;;  %v13397_v43 = vsub.f32 %v13354_v40, %v15387_v16  ;;  %vm3106_vm11 = vcmp.gt.f32.partialorder %v11998_v37, 16.0 }
 0x38a   : > { %v13388_v31 = vadd.f32 1.0, %v3646_v45  ;;  %v3170_v45 = vsel %vm3042_vm10, %v13361_v27, %v11995_v56  ;;  %v16196_v7 = vsub.f32 1.0, %v13222_v59  ;;  %v13405_v50 = vmin.f32 %v2818_v28, 17.0  ;;  %vm3138_vm12 = vmor %vm3074_vm5, %vm3106_vm11 }
 0x38b   : > { %8593 = vmatprep.mubr.msk.f32.mxu1 %vm4349_vm2, %v4000_v10  ;;  %v2914_v9 = vmax.f32 %v2882_v22, 0.0  ;;  %v13407_v10 = vmax.f32 %v3170_v45, 0.0  ;;  %v15392_v53 = vsub.f32 1.0, %v13397_v43  ;;  %v3266_v16 = vsel %vm3138_vm12, %v13375_v21, %v11998_v37 }
 0x38c   : > { %v4030_v57 = vmul.f32 %v16196_v7, %v13388_v31  ;;  %16197 = vst [vmem:[#allocation189_spill] sm:$0xff] %v13405_v50  ;;  %v2655_v40 = vmax.f32 %v13186_v54, 0.0  ;;  %v13414_v55 = vfloor.f32 %v11985_v44  ;;  %v13420_v22 = vmax.f32 %v3266_v16, 0.0 }
 0x38d   : > { %v13417_v59 = vmin.f32 %v2914_v9, 17.0  ;;  %v15395_v28 = vmin.f32 %v13407_v10, 17.0  ;;  %v16200_v45 = vsub.f32 1.0, %v13385_v60  ;;  %v13429_v37 = vfloor.f32 %v11988_v35 }
 0x38e   : > { %v4062_v56 = vmul.f32 %v4030_v57, %v16171_v51  ;;  %16199 = vst [vmem:[#allocation191_spill] sm:$0xff] %v13420_v22  ;;  %v13426_v46 = vmin.f32 %v2655_v40, 17.0  ;;  %v2787_v54 = vadd.f32 1.0, %v13414_v55  ;;  %vm2979_vm13 = vcmp.lt.f32.partialorder %v11985_v44, 1.0  ;;  %v16204_v40 = vld [vmem:[#allocation29_spill] sm:$0xff] }
 0x38f   : > { %16198 = vst [vmem:[#allocation190_spill] sm:$0xff] %v13417_v59  ;;  %v3969_v7 = vmul.f32 %v15392_v53, %v16200_v45  ;;  %16202 = vst [vmem:[#allocation193_spill] sm:$0xff] %v13429_v37  ;;  %v13437_v57 = vsub.f32 %v13405_v50, %v15395_v28  ;;  %vm3011_vm14 = vcmp.gt.f32.partialorder %v11985_v44, 16.0  ;;  %v16205_v45 = vmin.f32 %v13234_v12, 17.0 }
 0x390   : > { %16201 = vst [vmem:[#allocation192_spill] sm:$0xff] %v13426_v46  ;;  %8694 = vmatprep.mubr.msk.f32.mxu0 %vm4349_vm2, %v4062_v56  ;;  %v2819_v60 = vmax.f32 %v2787_v54, 0.0  ;;  %v2883_v56 = vadd.f32 1.0, %v13429_v37  ;;  %vm3043_vm15 = vmor %vm2979_vm13, %vm3011_vm14  ;;  %v16206_v51 = vmin.f32 %v13420_v22, 17.0  ;;  %vm3075_vm0 = vcmp.lt.f32.partialorder %v11988_v35, 1.0 }
 0x391   : > { %16203 = vst [vmem:[#allocation194_spill] sm:$0xff] %v13437_v57  ;;  %v4001_v16 = vmul.f32 %v3969_v7, %v16204_v40  ;;  %v3647_v53 = vsub.f32 %v13426_v46, %v16205_v45  ;;  %vm3107_vm1 = vcmp.gt.f32.partialorder %v11988_v35, 16.0  ;;  %v3171_v45 = vsel %vm3043_vm15, %v13414_v55, %v11985_v44 }
 0x392   : > { %v13450_v28 = vsub.f32 %v13417_v59, %v16206_v51  ;;  %v13457_v7 = vmin.f32 %v2819_v60, 17.0  ;;  %v2915_v54 = vmax.f32 %v2883_v56, 0.0  ;;  %vm3139_vm3 = vmor %vm3075_vm0, %vm3107_vm1  ;;  %v13462_v50 = vmax.f32 %v3171_v45, 0.0 }
 0x393   : > { %8594 = vmatmul.mubr.msk.f32.gmra.mrb[150].mxu1 %vm4349_vm2, %v4001_v16  ;;  %v13455_v12 = vadd.f32 1.0, %v3647_v53  ;;  %v3267_v51 = vsel %vm3139_vm3, %v13429_v37, %v11988_v35  ;;  %v2656_v59 = vmax.f32 %v13247_v52, 0.0  ;;  %v16208_v53 = vsub.f32 1.0, %v13277_v14 }
 0x394   : > { %16207 = vst [vmem:[#allocation195_spill] sm:$0xff] %v13457_v7  ;;  %v15402_v9 = vsub.f32 1.0, %v13450_v28  ;;  %v13470_v60 = vmin.f32 %v2915_v54, 17.0  ;;  %v13472_v56 = vmax.f32 %v3267_v51, 0.0  ;;  %v13475_v46 = vfloor.f32 %v12040_v29 }
 0x395   : > { %v4031_v16 = vmul.f32 %v16208_v53, %v13455_v12  ;;  %v16211_v44 = vsub.f32 1.0, %v13437_v57  ;;  %v15405_v35 = vmin.f32 %v13462_v50, 17.0  ;;  %v13482_v37 = vmin.f32 %v2656_v59, 17.0  ;;  %v16213_v53 = vld [vmem:[#allocation83_spill] sm:$0xff] }
 0x396   : > { %16209 = vst [vmem:[#allocation196_spill] sm:$0xff] %v13470_v60  ;;  %16210 = vst [vmem:[#allocation197_spill] sm:$0xff] %v13472_v56  ;;  %v13485_v52 = vfloor.f32 %v12043_v49  ;;  %v15406_v54 = vmin.f32 %v13472_v56, 17.0  ;;  %v2788_v51 = vadd.f32 1.0, %v13475_v46  ;;  %vm2980_vm6 = vcmp.lt.f32.partialorder %v12040_v29, 1.0 }
 0x397   : > { %v3970_v45 = vmul.f32 %v15402_v9, %v16211_v44  ;;  %16212 = vst [vmem:[#allocation198_spill] sm:$0xff] %v13482_v37  ;;  %v4063_v14 = vmul.f32 %v4031_v16, %v16183_v0  ;;  %v13495_v44 = vsub.f32 %v13457_v7, %v15405_v35  ;;  %v16215_v59 = vmin.f32 %v13297_v4, 17.0 }
 0x398   : > { %v2884_v22 = vadd.f32 1.0, %v13485_v52  ;;  %v13505_v16 = vsub.f32 %v13470_v60, %v15406_v54  ;;  %v2820_v0 = vmax.f32 %v2788_v51, 0.0  ;;  %vm3012_vm7 = vcmp.gt.f32.partialorder %v12040_v29, 16.0 }
 0x399   : > { %v4002_v57 = vmul.f32 %v3970_v45, %v16213_v53  ;;  %16214 = vst [vmem:[#allocation199_spill] sm:$0xff] %v13495_v44  ;;  %v3648_v9 = vsub.f32 %v13482_v37, %v16215_v59  ;;  %8695 = vmatmul.mubr.msk.f32.gmra.mrb[20].mxu0 %vm4349_vm2, %v4063_v14  ;;  %vm3076_vm8 = vcmp.lt.f32.partialorder %v12043_v49, 1.0  ;;  %vm3044_vm9 = vmor %vm2980_vm6, %vm3012_vm7  ;;  %vm3108_vm10 = vcmp.gt.f32.partialorder %v12043_v49, 16.0 }
 0x39a   : > { %v2916_v59 = vmax.f32 %v2884_v22, 0.0  ;;  %v15413_v14 = vsub.f32 1.0, %v13505_v16  ;;  %v13515_v35 = vmin.f32 %v2820_v0, 17.0  ;;  %vm3140_vm5 = vmor %vm3076_vm8, %vm3108_vm10  ;;  %v3172_v51 = vsel %vm3044_vm9, %v13475_v46, %v12040_v29 }
 0x39b   : > { %8596 = vmatprep.mubr.msk.f32.mxu1 %vm4349_vm2, %v4002_v57  ;;  %v13511_v45 = vadd.f32 1.0, %v3648_v9  ;;  %v2657_v54 = vmax.f32 %v13310_v61, 0.0  ;;  %v16217_v57 = vsub.f32 1.0, %v13337_v32  ;;  %v13525_v22 = vmax.f32 %v3172_v51, 0.0  ;;  %v16222_v61 = vld [vmem:[#allocation44_spill] sm:$0xff] }
 0x39c   : > { %16216 = vst [vmem:[#allocation200_spill] sm:$0xff] %v13515_v35  ;;  %v13523_v9 = vmin.f32 %v2916_v59, 17.0  ;;  %v3268_v60 = vsel %vm3140_vm5, %v13485_v52, %v12043_v49  ;;  %v16219_v0 = vsub.f32 1.0, %v13495_v44  ;;  %v13538_v56 = vfloor.f32 %v16222_v61  ;;  %v16223_v51 = vld [vmem:[#allocation32_spill] sm:$0xff]  ;;  %v16225_v49 = vld [vmem:[#allocation57_spill] sm:$0xff] }
 0x39d   : > { %v4032_v4 = vmul.f32 %v16217_v57, %v13511_v45  ;;  %v13533_v37 = vmax.f32 %v3268_v60, 0.0  ;;  %v13535_v29 = vmin.f32 %v2657_v54, 17.0  ;;  %v15415_v59 = vmin.f32 %v13525_v22, 17.0 }
 0x39e   : > { %16218 = vst [vmem:[#allocation201_spill] sm:$0xff] %v13523_v9  ;;  %v3971_v7 = vmul.f32 %v15413_v14, %v16219_v0  ;;  %v13543_v57 = vfloor.f32 %v16223_v51  ;;  %vm2981_vm11 = vcmp.lt.f32.partialorder %v16222_v61, 1.0  ;;  %v16226_v60 = vmin.f32 %v13352_v24, 17.0 }
 0x39f   : > { %16220 = vst [vmem:[#allocation202_spill] sm:$0xff] %v13533_v37  ;;  %16221 = vst [vmem:[#allocation203_spill] sm:$0xff] %v13535_v29  ;;  %v4064_v32 = vmul.f32 %v4032_v4, %v16194_v26  ;;  %v15418_v0 = vmin.f32 %v13533_v37, 17.0  ;;  %v2789_v14 = vadd.f32 1.0, %v13538_v56  ;;  %v13556_v4 = vsub.f32 %v13515_v35, %v15415_v59 }
 0x3a0   : > { %16224 = vst [vmem:[#allocation44_spill] sm:$0xff] %v13543_v57  ;;  %v4003_v44 = vmul.f32 %v3971_v7, %v16225_v49  ;;  %v3649_v54 = vsub.f32 %v13535_v29, %v16226_v60  ;;  %v2885_v26 = vadd.f32 1.0, %v13543_v57  ;;  %vm3013_vm12 = vcmp.gt.f32.partialorder %v16222_v61, 16.0 }
 0x3a1   : > { %8697 = vmatprep.mubr.msk.f32.mxu0 %vm4349_vm2, %v4064_v32  ;;  %16227 = vst [vmem:[#allocation32_spill] sm:$0xff] %v13556_v4  ;;  %vm3077_vm13 = vcmp.lt.f32.partialorder %v16223_v51, 1.0  ;;  %v13565_v24 = vsub.f32 %v13523_v9, %v15418_v0  ;;  %v2821_v32 = vmax.f32 %v2789_v14, 0.0  ;;  %vm3045_vm14 = vmor %vm2981_vm11, %vm3013_vm12  ;;  %vm3109_vm15 = vcmp.gt.f32.partialorder %v16223_v51, 16.0 }
 0x3a2   : > { %8597 = vmatmul.mubr.msk.f32.gmra.mrb[152].mxu1 %vm4349_vm2, %v4003_v44  ;;  %v13567_v7 = vadd.f32 1.0, %v3649_v54  ;;  %v2917_v59 = vmax.f32 %v2885_v26, 0.0  ;;  %vm3141_vm0 = vmor %vm3077_vm13, %vm3109_vm15  ;;  %v3173_v35 = vsel %vm3045_vm14, %v13538_v56, %v16222_v61  ;;  %v2658_v44 = vmax.f32 %v13361_v27, 0.0 }
 0x3a3   : > { %v15426_v29 = vsub.f32 1.0, %v13565_v24  ;;  %v16229_v0 = vsub.f32 1.0, %v13397_v43  ;;  %v13578_v9 = vmin.f32 %v2821_v32, 17.0  ;;  %v13580_v14 = vmax.f32 %v3173_v35, 0.0 }
 0x3a4   : > { %16228 = vst [vmem:[#allocation204_spill] sm:$0xff] %v13567_v7  ;;  %v13582_v37 = vmin.f32 %v2917_v59, 17.0  ;;  %v3269_v26 = vsel %vm3141_vm0, %v13543_v57, %v16223_v51  ;;  %v13586_v60 = vmin.f32 %v2658_v44, 17.0  ;;  %v13589_v61 = vfloor.f32 %v12282_v58 }
 0x3a5   : > { %v4033_v54 = vmul.f32 %v16229_v0, %v13567_v7  ;;  %16230 = vst [vmem:[#allocation205_spill] sm:$0xff] %v13578_v9  ;;  %v16233_v27 = vsub.f32 1.0, %v13556_v4  ;;  %v15425_v35 = vmin.f32 %v13580_v14, 17.0  ;;  %v13597_v32 = vmax.f32 %v3269_v26, 0.0  ;;  %v16236_v4 = vld [vmem:[#allocation82_spill] sm:$0xff] }
 0x3a6   : > { %16231 = vst [vmem:[#allocation206_spill] sm:$0xff] %v13582_v37  ;;  %16232 = vst [vmem:[#allocation207_spill] sm:$0xff] %v13586_v60  ;;  %v16235_v59 = vmin.f32 %v13407_v10, 17.0  ;;  %v13603_v44 = vfloor.f32 %v12290_v11  ;;  %v2790_v57 = vadd.f32 1.0, %v13589_v61  ;;  %vm2982_vm1 = vcmp.lt.f32.partialorder %v12282_v58, 1.0 }
 0x3a7   : > { %v3972_v43 = vmul.f32 %v15426_v29, %v16233_v27  ;;  %v4065_v0 = vmul.f32 %v4033_v54, %v16204_v40  ;;  %16234 = vst [vmem:[#allocation208_spill] sm:$0xff] %v13597_v32  ;;  %v15428_v54 = vmin.f32 %v13597_v32, 17.0  ;;  %v13613_v26 = vsub.f32 %v13578_v9, %v15425_v35 }
 0x3a8   : > { %v3650_v51 = vsub.f32 %v13586_v60, %v16235_v59  ;;  %vm3014_vm3 = vcmp.gt.f32.partialorder %v12282_v58, 16.0  ;;  %v2822_v27 = vmax.f32 %v2790_v57, 0.0  ;;  %v2886_v59 = vadd.f32 1.0, %v13603_v44 }
 0x3a9   : > { %v4004_v7 = vmul.f32 %v3972_v43, %v16236_v4  ;;  %8698 = vmatmul.mubr.msk.f32.gmra.mrb[22].mxu0 %vm4349_vm2, %v4065_v0  ;;  %16237 = vst [vmem:[#allocation209_spill] sm:$0xff] %v13613_v26  ;;  %vm3046_vm6 = vmor %vm2982_vm1, %vm3014_vm3  ;;  %vm3078_vm7 = vcmp.lt.f32.partialorder %v12290_v11, 1.0  ;;  %v13625_v0 = vsub.f32 %v13582_v37, %v15428_v54  ;;  %vm3110_vm8 = vcmp.gt.f32.partialorder %v12290_v11, 16.0 }
 0x3aa   : > { %v13616_v10 = vadd.f32 1.0, %v3650_v51  ;;  %v3174_v51 = vsel %vm3046_vm6, %v13589_v61, %v12282_v58  ;;  %v16238_v57 = vsub.f32 1.0, %v13450_v28  ;;  %v13633_v29 = vmin.f32 %v2822_v27, 17.0  ;;  %vm3142_vm9 = vmor %vm3078_vm7, %vm3110_vm8 }
 0x3ab   : > { %8599 = vmatprep.mubr.msk.f32.mxu1 %vm4349_vm2, %v4004_v7  ;;  %v2918_v60 = vmax.f32 %v2886_v59, 0.0  ;;  %v13635_v7 = vmax.f32 %v3174_v51, 0.0  ;;  %v15434_v43 = vsub.f32 1.0, %v13625_v0  ;;  %v3270_v54 = vsel %vm3142_vm9, %v13603_v44, %v12290_v11  ;;  %v16244_v11 = vld [vmem:[#allocation98_spill] sm:$0xff] }
 0x3ac   : > { %v4034_v35 = vmul.f32 %v16238_v57, %v13616_v10  ;;  %16239 = vst [vmem:[#allocation210_spill] sm:$0xff] %v13633_v29  ;;  %v2659_v37 = vmax.f32 %v13414_v55, 0.0  ;;  %v13642_v9 = vfloor.f32 %v12269_v41  ;;  %v13648_v59 = vmax.f32 %v3270_v54, 0.0 }
 0x3ad   : > { %v13645_v28 = vmin.f32 %v2918_v60, 17.0  ;;  %v15437_v27 = vmin.f32 %v13635_v7, 17.0  ;;  %v16242_v51 = vsub.f32 1.0, %v13613_v26  ;;  %v13657_v55 = vfloor.f32 %v16244_v11 }
 0x3ae   : > { %v4066_v58 = vmul.f32 %v4034_v35, %v16213_v53  ;;  %16241 = vst [vmem:[#allocation212_spill] sm:$0xff] %v13648_v59  ;;  %v13654_v32 = vmin.f32 %v2659_v37, 17.0  ;;  %v2791_v40 = vadd.f32 1.0, %v13642_v9  ;;  %vm2983_vm10 = vcmp.lt.f32.partialorder %v12269_v41, 1.0  ;;  %v16246_v37 = vld [vmem:[#allocation51_spill] sm:$0xff] }
 0x3af   : > { %16240 = vst [vmem:[#allocation211_spill] sm:$0xff] %v13645_v28  ;;  %v3973_v57 = vmul.f32 %v15434_v43, %v16242_v51  ;;  %v13665_v35 = vsub.f32 %v13633_v29, %v15437_v27  ;;  %vm3015_vm5 = vcmp.gt.f32.partialorder %v12269_v41, 16.0  ;;  %v16247_v51 = vmin.f32 %v13462_v50, 17.0 }
 0x3b0   : > { %16243 = vst [vmem:[#allocation213_spill] sm:$0xff] %v13654_v32  ;;  %8700 = vmatprep.mubr.msk.f32.mxu0 %vm4349_vm2, %v4066_v58  ;;  %v2823_v26 = vmax.f32 %v2791_v40, 0.0  ;;  %v2887_v58 = vadd.f32 1.0, %v13657_v55  ;;  %vm3047_vm11 = vmor %vm2983_vm10, %vm3015_vm5  ;;  %v16248_v53 = vmin.f32 %v13648_v59, 17.0  ;;  %vm3079_vm12 = vcmp.lt.f32.partialorder %v16244_v11, 1.0 }
 0x3b1   : > { %16245 = vst [vmem:[#allocation98_spill] sm:$0xff] %v13665_v35  ;;  %v4005_v54 = vmul.f32 %v3973_v57, %v16246_v37  ;;  %v3651_v43 = vsub.f32 %v13654_v32, %v16247_v51  ;;  %vm3111_vm13 = vcmp.gt.f32.partialorder %v16244_v11, 16.0  ;;  %v3175_v51 = vsel %vm3047_vm11, %v13642_v9, %v12269_v41 }
 0x3b2   : > { %v13678_v27 = vsub.f32 %v13645_v28, %v16248_v53  ;;  %v13685_v57 = vmin.f32 %v2823_v26, 17.0  ;;  %v2919_v40 = vmax.f32 %v2887_v58, 0.0  ;;  %vm3143_vm14 = vmor %vm3079_vm12, %vm3111_vm13  ;;  %v13690_v32 = vmax.f32 %v3175_v51, 0.0 }
 0x3b3   : > { %8600 = vmatmul.mubr.msk.f32.gmra.mrb[154].mxu1 %vm4349_vm2, %v4005_v54  ;;  %v13683_v50 = vadd.f32 1.0, %v3651_v43  ;;  %v3271_v53 = vsel %vm3143_vm14, %v13657_v55, %v16244_v11  ;;  %v2660_v28 = vmax.f32 %v13475_v46, 0.0  ;;  %v16251_v43 = vsub.f32 1.0, %v13505_v16 }
 0x3b4   : > { %16250 = vst [vmem:[#allocation214_spill] sm:$0xff] %v13685_v57  ;;  %v15444_v60 = vsub.f32 1.0, %v13678_v27  ;;  %v13698_v26 = vmin.f32 %v2919_v40, 17.0  ;;  %v13700_v58 = vmax.f32 %v3271_v53, 0.0  ;;  %v13703_v29 = vfloor.f32 %v12381_v17 }
 0x3b5   : > { %16249 = vst [vmem:[#allocation51_spill] sm:$0xff] %v13683_v50  ;;  %v4035_v54 = vmul.f32 %v16251_v43, %v13683_v50  ;;  %v16254_v41 = vsub.f32 1.0, %v13665_v35  ;;  %v15447_v11 = vmin.f32 %v13690_v32, 17.0  ;;  %v13710_v59 = vmin.f32 %v2660_v28, 17.0  ;;  %v16256_v43 = vld [vmem:[#allocation96_spill] sm:$0xff] }
 0x3b6   : > { %16252 = vst [vmem:[#allocation215_spill] sm:$0xff] %v13698_v26  ;;  %16253 = vst [vmem:[#allocation216_spill] sm:$0xff] %v13700_v58  ;;  %v13713_v46 = vfloor.f32 %v12391_v42  ;;  %v15448_v40 = vmin.f32 %v13700_v58, 17.0  ;;  %v2792_v53 = vadd.f32 1.0, %v13703_v29  ;;  %vm2984_vm15 = vcmp.lt.f32.partialorder %v12381_v17, 1.0 }
 0x3b7   : > { %v3974_v51 = vmul.f32 %v15444_v60, %v16254_v41  ;;  %16255 = vst [vmem:[#allocation217_spill] sm:$0xff] %v13710_v59  ;;  %v4067_v16 = vmul.f32 %v4035_v54, %v16225_v49  ;;  %v13723_v41 = vsub.f32 %v13685_v57, %v15447_v11  ;;  %v16258_v28 = vmin.f32 %v13525_v22, 17.0 }
 0x3b8   : > { %v2888_v50 = vadd.f32 1.0, %v13713_v46  ;;  %v13733_v54 = vsub.f32 %v13698_v26, %v15448_v40  ;;  %v2824_v49 = vmax.f32 %v2792_v53, 0.0  ;;  %vm3016_vm0 = vcmp.gt.f32.partialorder %v12381_v17, 16.0 }
 0x3b9   : > { %v4006_v35 = vmul.f32 %v3974_v51, %v16256_v43  ;;  %16257 = vst [vmem:[#allocation96_spill] sm:$0xff] %v13723_v41  ;;  %v3652_v60 = vsub.f32 %v13710_v59, %v16258_v28  ;;  %8701 = vmatmul.mubr.msk.f32.gmra.mrb[24].mxu0 %vm4349_vm2, %v4067_v16  ;;  %vm3080_vm1 = vcmp.lt.f32.partialorder %v12391_v42, 1.0  ;;  %vm3048_vm3 = vmor %vm2984_vm15, %vm3016_vm0  ;;  %vm3112_vm6 = vcmp.gt.f32.partialorder %v12391_v42, 16.0 }
 0x3ba   : > { %v2920_v28 = vmax.f32 %v2888_v50, 0.0  ;;  %v15454_v16 = vsub.f32 1.0, %v13733_v54  ;;  %v13743_v11 = vmin.f32 %v2824_v49, 17.0  ;;  %vm3144_vm7 = vmor %vm3080_vm1, %vm3112_vm6  ;;  %v3176_v53 = vsel %vm3048_vm3, %v13703_v29, %v12381_v17 }
 0x3bb   : > { %8602 = vmatprep.mubr.msk.f32.mxu1 %vm4349_vm2, %v4006_v35  ;;  %v13739_v51 = vadd.f32 1.0, %v3652_v60  ;;  %v2661_v40 = vmax.f32 %v13538_v56, 0.0  ;;  %v16261_v35 = vsub.f32 1.0, %v13565_v24  ;;  %v13753_v50 = vmax.f32 %v3176_v53, 0.0 }
 0x3bc   : > { %16260 = vst [vmem:[#allocation219_spill] sm:$0xff] %v13743_v11  ;;  %v13751_v60 = vmin.f32 %v2920_v28, 17.0  ;;  %v3272_v26 = vsel %vm3144_vm7, %v13713_v46, %v12391_v42  ;;  %v16263_v49 = vsub.f32 1.0, %v13723_v41  ;;  %v2601_v56 = vfloor.f32 %v12367_v34  ;;  %v16266_v42 = vld [vmem:[#allocation60_spill] sm:$0xff] }
 0x3bd   : > { %16259 = vst [vmem:[#allocation218_spill] sm:$0xff] %v13739_v51  ;;  %v4036_v22 = vmul.f32 %v16261_v35, %v13739_v51  ;;  %v13761_v57 = vmax.f32 %v3272_v26, 0.0  ;;  %v13763_v17 = vmin.f32 %v2661_v40, 17.0  ;;  %v3240_v28 = vmin.f32 %v13753_v50, 17.0 }
 0x3be   : > { %16262 = vst [vmem:[#allocation220_spill] sm:$0xff] %v13751_v60  ;;  %v3975_v59 = vmul.f32 %v15454_v16, %v16263_v49  ;;  %v13769_v53 = vfloor.f32 %v12370_v3  ;;  %vm2985_vm8 = vcmp.lt.f32.partialorder %v12367_v34, 1.0  ;;  %v16267_v26 = vmin.f32 %v13580_v14, 17.0 }
 0x3bf   : > { %16264 = vst [vmem:[#allocation221_spill] sm:$0xff] %v13761_v57  ;;  %16265 = vst [vmem:[#allocation222_spill] sm:$0xff] %v13763_v17  ;;  %v4068_v24 = vmul.f32 %v4036_v22, %v16236_v4  ;;  %v15459_v41 = vmin.f32 %v13761_v57, 17.0  ;;  %v2793_v49 = vadd.f32 1.0, %v2601_v56  ;;  %v13779_v22 = vsub.f32 %v13743_v11, %v3240_v28 }
 0x3c0   : > { %v4007_v35 = vmul.f32 %v3975_v59, %v16266_v42  ;;  %v3653_v40 = vsub.f32 %v13763_v17, %v16267_v26  ;;  %v2889_v50 = vadd.f32 1.0, %v13769_v53  ;;  %vm3017_vm9 = vcmp.gt.f32.partialorder %v12367_v34, 16.0 }
 0x3c1   : > { %8703 = vmatprep.mubr.msk.f32.mxu0 %vm4349_vm2, %v4068_v24  ;;  %16268 = vst [vmem:[#allocation60_spill] sm:$0xff] %v13779_v22  ;;  %vm3081_vm10 = vcmp.lt.f32.partialorder %v12370_v3, 1.0  ;;  %v3848_v14 = vsub.f32 %v13751_v60, %v15459_v41  ;;  %v2825_v26 = vmax.f32 %v2793_v49, 0.0  ;;  %vm3049_vm5 = vmor %vm2985_vm8, %vm3017_vm9  ;;  %vm3113_vm11 = vcmp.gt.f32.partialorder %v12370_v3, 16.0 }
 0x3c2   : > { %8603 = vmatmul.mubr.msk.f32.gmra.mrb[156].mxu1 %vm4349_vm2, %v4007_v35  ;;  %v13788_v59 = vadd.f32 1.0, %v3653_v40  ;;  %v2921_v16 = vmax.f32 %v2889_v50, 0.0  ;;  %vm3145_vm12 = vmor %vm3081_vm10, %vm3113_vm11  ;;  %v3177_v17 = vsel %vm3049_vm5, %v2601_v56, %v12367_v34  ;;  %v2662_v11 = vmax.f32 %v13589_v61, 0.0  ;;  %v16273_v50 = vld [vmem:[#allocation74_spill] sm:$0xff] }
 0x3c3   : > { %v3880_v58 = vsub.f32 1.0, %v3848_v14  ;;  %v16269_v35 = vsub.f32 1.0, %v13625_v0  ;;  %v13797_v41 = vmin.f32 %v2825_v26, 17.0  ;;  %v3209_v40 = vmax.f32 %v3177_v17, 0.0 }
 0x3c4   : > { %v13799_v49 = vmin.f32 %v2921_v16, 17.0  ;;  %v3273_v60 = vsel %vm3145_vm12, %v13769_v53, %v12370_v3  ;;  %v13803_v24 = vmin.f32 %v2662_v11, 17.0  ;;  %v2700_v4 = vmax.f32 %v16273_v50, 0.0 }
 0x3c5   : > { %v4037_v57 = vmul.f32 %v16269_v35, %v13788_v59  ;;  %16270 = vst [vmem:[#allocation223_spill] sm:$0xff] %v13797_v41  ;;  %v16274_v34 = vsub.f32 1.0, %v13779_v22  ;;  %v3241_v51 = vmin.f32 %v3209_v40, 17.0  ;;  %v13809_v0 = vmax.f32 %v3273_v60, 0.0  ;;  %v16277_v60 = vld [vmem:[#allocation84_spill] sm:$0xff] }
 0x3c6   : > { %16271 = vst [vmem:[#allocation224_spill] sm:$0xff] %v13799_v49  ;;  %16272 = vst [vmem:[#allocation225_spill] sm:$0xff] %v13803_v24  ;;  %v16275_v26 = vmin.f32 %v13635_v7, 17.0  ;;  %v13814_v17 = vmin.f32 %v2700_v4, 17.0  ;;  %v2663_v3 = vmax.f32 %v13642_v9, 0.0  ;;  %v2664_v11 = vmax.f32 %v13703_v29, 0.0 }
 0x3c7   : > { %v3976_v61 = vmul.f32 %v3880_v58, %v16274_v34  ;;  %v4069_v14 = vmul.f32 %v4037_v57, %v16246_v37  ;;  %v15469_v50 = vmin.f32 %v13809_v0, 17.0  ;;  %v13822_v57 = vsub.f32 %v13797_v41, %v3241_v51  ;;  %v16278_v34 = vld [vmem:[#allocation46_spill] sm:$0xff] }
 0x3c8   : > { %v3654_v16 = vsub.f32 %v13803_v24, %v16275_v26  ;;  %16276 = vst [vmem:[#allocation74_spill] sm:$0xff] %v13814_v17  ;;  %v2702_v40 = vmax.f32 %v16277_v60, 0.0  ;;  %v16279_v4 = vmin.f32 %v16278_v34, 17.0  ;;  %v13830_v9 = vmin.f32 %v2663_v3, 17.0 }
 0x3c9   : > { %v4008_v35 = vmul.f32 %v3976_v61, %v12394_v38  ;;  %8704 = vmatmul.mubr.msk.f32.gmra.mrb[26].mxu0 %vm4349_vm2, %v4069_v14  ;;  %v13832_v29 = vmin.f32 %v2664_v11, 17.0  ;;  %v3849_v14 = vsub.f32 %v13799_v49, %v15469_v50  ;;  %v16283_v60 = vsub.f32 1.0, %v13678_v27  ;;  %v16285_v61 = vld [vmem:[#allocation58_spill] sm:$0xff] }
 0x3ca   : > { %v13825_v7 = vadd.f32 1.0, %v3654_v16  ;;  %v3756_v26 = vsub.f32 %v13814_v17, %v16279_v4  ;;  %16280 = vst [vmem:[#allocation84_spill] sm:$0xff] %v13830_v9  ;;  %v13839_v24 = vmin.f32 %v2702_v40, 17.0  ;;  %v2665_v16 = vmax.f32 %v2601_v56, 0.0  ;;  %v16288_v40 = vld [vmem:[#allocation88_spill] sm:$0xff]  ;;  %v16289_v27 = vld [vmem:[#allocation38_spill] sm:$0xff] }
 0x3cb   : > { %16281 = vst [vmem:[#allocation46_spill] sm:$0xff] %v13832_v29  ;;  %8605 = vmatprep.mubr.msk.f32.mxu1 %vm4349_vm2, %v4008_v35  ;;  %v16284_v3 = vmin.f32 %v13690_v32, 17.0  ;;  %v3656_v35 = vsub.f32 %v13832_v29, %v3240_v28  ;;  %v3881_v41 = vsub.f32 1.0, %v3849_v14  ;;  %v16286_v17 = vmin.f32 %v16285_v61, 17.0 }
 0x3cc   : > { %16282 = vst [vmem:[#allocation226_spill] sm:$0xff] %v13839_v24  ;;  %v4038_v34 = vmul.f32 %v16283_v60, %v13825_v7  ;;  %v3788_v4 = vadd.f32 1.0, %v3756_v26  ;;  %v13851_v50 = vmin.f32 %v2665_v16, 17.0  ;;  %v2703_v56 = vmax.f32 %v16288_v40, 0.0 }
 0x3cd   : > { %v3655_v11 = vsub.f32 %v13830_v9, %v16284_v3  ;;  %v3758_v22 = vsub.f32 %v13839_v24, %v16286_v17  ;;  %v13858_v32 = vadd.f32 1.0, %v3656_v35  ;;  %v16290_v3 = vsub.f32 1.0, %v13822_v57 }
 0x3ce   : > { %16287 = vst [vmem:[#allocation58_spill] sm:$0xff] %v13851_v50  ;;  %v4070_v49 = vmul.f32 %v4038_v34, %v16256_v43  ;;  %v3884_v60 = vmul.f32 %v3788_v4, %v16289_v27  ;;  %v3657_v61 = vsub.f32 %v13851_v50, %v3241_v51  ;;  %v13863_v29 = vmin.f32 %v2703_v56, 17.0  ;;  %v16293_v51 = vld [vmem:[#allocation54_spill] sm:$0xff] }
 0x3cf   : > { %v13856_v26 = vadd.f32 1.0, %v3655_v11  ;;  %v3977_v28 = vmul.f32 %v3881_v41, %v16290_v3  ;;  %v3790_v14 = vadd.f32 1.0, %v3758_v22  ;;  %v3917_v17 = vmul.f32 %v12443_v2, %v15954_v19  ;;  %v16295_v3 = vld [vmem:[#allocation37_spill] sm:$0xff] }
 0x3d0   : > { %16291 = vst [vmem:[#allocation88_spill] sm:$0xff] %v13863_v29  ;;  %8706 = vmatprep.mubr.msk.f32.mxu0 %vm4349_vm2, %v4070_v49  ;;  %v16292_v16 = vsub.f32 1.0, %v13733_v54  ;;  %v4040_v11 = vmul.f32 %v3880_v58, %v13858_v32  ;;  %v3916_v40 = vmul.f32 %v3884_v60, %v15942_v30  ;;  %v13874_v22 = vadd.f32 1.0, %v3657_v61  ;;  %v16296_v54 = vld [vmem:[#allocation92_spill] sm:$0xff]  ;;  %v16297_v61 = vld [vmem:[#allocation94_spill] sm:$0xff] }
 0x3d1   : > { %v4009_v35 = vmul.f32 %v3977_v28, %v12373_v18  ;;  %v16294_v56 = vmin.f32 %v16293_v51, 17.0  ;;  %v3886_v49 = vmul.f32 %v3790_v14, %v12484_v63  ;;  %v2704_v50 = vmax.f32 %v16295_v3, 0.0  ;;  %v16299_v63 = vld [vmem:[#allocation95_spill] sm:$0xff] }
 0x3d2   : > { %v4039_v34 = vmul.f32 %v16292_v16, %v13856_v26  ;;  %v5727_v16 = vadd.s32 36, %v16296_v54  ;;  %v4072_v58 = vmul.f32 %v4040_v11, %v12394_v38  ;;  %v4041_v60 = vmul.f32 %v3881_v41, %v13874_v22 }
 0x3d3   : > { %v3759_v27 = vsub.f32 %v13863_v29, %v16294_v56  ;;  %8606 = vmatmul.mubr.msk.f32.gmra.mrb[158].mxu1 %vm4349_vm2, %v4009_v35  ;;  %v5728_v9 = vadd.s32 36, %v16297_v61  ;;  %v2705_v51 = vmax.f32 %v12411_v8, 0.0  ;;  %v16300_v56 = vld [vmem:[#allocation53_spill] sm:$0xff]  ;;  %v16303_v8 = vmov 0.0  }
 0x3d4   : > { %v4071_v2 = vmul.f32 %v4039_v34, %v16266_v42  ;;  %8615 = vmatprep.mubr.msk.f32.mxu1 %vm4349_vm2, %v3916_v40  ;;  %v13889_v34 = vmin.f32 %v2704_v50, 17.0  ;;  %vm5729_vm13 = vcmp.eq.s32.totalorder %v16299_v63, %v5727_v16  ;;  %v16301_v3 = vsub.f32 1.0, %v16300_v56 }
 0x3d5   : > { %v3791_v28 = vadd.f32 1.0, %v3759_v27  ;;  %v4073_v41 = vmul.f32 %v4041_v60, %v12373_v18  ;;  %vm5730_vm14 = vcmp.eq.s32.totalorder %v16299_v63, %v5728_v9  ;;  %v2706_v40 = vmax.f32 %v12459_v1, 0.0  ;;  %vm13906_vm15 = vmpackc.low %vm4446_vm4, %vm5729_vm13  ;;  %v16308_v9 = vld [vmem:[#allocation31_spill] sm:$0xff] }
 0x3d6   : > { %8707 = vmatmul.mubr.msk.f32.gmra.mrb[28].mxu0 %vm4349_vm2, %v4071_v2  ;;  %16298 = vst [vmem:[#allocation38_spill] sm:$0xff] %v13889_v34  ;;  %v4076_v35 = vmul.f32 %v3788_v4, %v16301_v3  ;;  %v3918_v50 = vmul.f32 %v3886_v49, %v11658_v13  ;;  %v16302_v27 = vmin.f32 %v12364_v5, 17.0  ;;  %v7759_v16 = vsel %vm5730_vm14, 1.0, %v16303_v8  ;;  %v16311_v5 = vld [vmem:[#allocation78_spill] sm:$0xff] }
 0x3d7   : > { %8709 = vmatprep.mubr.msk.f32.mxu0 %vm4349_vm2, %v4072_v58  ;;  %v3887_v11 = vmul.f32 %v3791_v28, %v12532_v62  ;;  %v13910_v58 = vmin.f32 %v2705_v51, 17.0  ;;  %8616 = vmatmul.mubr.msk.f32.vlgmr.msra.gmra.mrb[130].mxu1 %vm4349_vm2, %v3917_v17  ;;  %v16307_v62 = vld [vmem:[#allocation80_spill] sm:$0xff]  ;;  %v16309_v60 = vmov 1.0   ;;  %v13916_v56 = vmin.f32 %v2706_v40, 17.0  ;;  %v16314_v40 = vld [vmem:[#allocation114_spill] sm:$0xff] }
 0x3d8   : > { %v3760_v2 = vsub.f32 %v13889_v34, %v16302_v27  ;;  %v4106_v1 = vmul.f32 %v16308_v9, %v16307_v62  ;;  %v9028_v49 = vpack.c.bf16 %v7759_v16, %v16309_v60  ;;  %v16312_v3 = vsub.f32 1.0, %v16311_v5  ;;  %8618 = vmatprep.mubr.msk.f32.mxu1 %vm4349_vm2, %v3918_v50 }
 0x3d9   : > { %16306 = vst [vmem:[#allocation54_spill] sm:$0xff] %v13910_v58  ;;  %16310 = vst [vmem:[#allocation37_spill] sm:$0xff] %v13916_v56  ;;  %v16313_v51 = vmin.f32 %v12451_v39, 17.0  ;;  %v2707_v29 = vmax.f32 %v12493_v36, 0.0  ;;  %v3919_v62 = vmul.f32 %v3887_v11, %v11647_v33  ;;  %v16315_v50 = vmin.f32 %v16314_v40, 17.0  ;;  %v16317_v39 = vld [vmem:[#allocation122_spill] sm:$0xff] }
 0x3da   : > { %v4077_v27 = vmul.f32 %v12432_v15, %v16312_v3  ;;  %8710 = vmatmul.mubr.msk.f32.gmra.mrb[30].mxu0 %vm4349_vm2, %v4073_v41  ;;  %v3792_v34 = vadd.f32 1.0, %v3760_v2  ;;  %9030 = vmatprep.subr.msk.bf16.mxu0 %vm13906_vm15, %v9028_v49  ;;  %v4108_v15 = vmul.f32 %v4076_v35, %v15942_v30  ;;  %v16316_v2 = vld [vmem:[#allocation118_spill] sm:$0xff]  ;;  %v16319_v36 = vld [vmem:[#allocation76_spill] sm:$0xff] }
 0x3db   : > { %v3761_v17 = vsub.f32 %v13910_v58, %v16313_v51  ;;  %8716 = vmatprep.mubr.msk.f32.mxu0 %vm4349_vm2, %v4106_v1  ;;  %v3762_v41 = vsub.f32 %v13916_v56, %v16315_v50  ;;  %v2708_v16 = vmax.f32 %v16316_v2, 0.0  ;;  %v13937_v3 = vmin.f32 %v2707_v29, 17.0  ;;  %8619 = vmatmul.mubr.msk.f32.gmra.mrb[132].mxu1 %vm4349_vm2, %v3919_v62  ;;  %v16322_v35 = vld [vmem:[#allocation64_spill] sm:$0xff]  ;;  %v16323_v50 = vld [vmem:[#allocation93_spill] sm:$0xff]  ;;  %v16324_v2 = vld [vmem:[#allocation35_spill] sm:$0xff] }
 0x3dc   : > { %v3888_v9 = vmul.f32 %v3792_v34, %v16317_v39  ;;  %v16320_v11 = vsub.f32 1.0, %v16319_v36  ;;  %v4109_v58 = vmul.f32 %v4077_v27, %v15954_v19  ;;  %v2709_v40 = vmax.f32 %v16322_v35, 0.0  ;;  %v16326_v39 = vld [vmem:[#allocation119_spill] sm:$0xff]  ;;  %v16328_v36 = vld [vmem:[#allocation50_spill] sm:$0xff]  ;;  %v16330_v19 = vld [vmem:[#allocation132_spill] sm:$0xff] }
 0x3dd   : > { %v3793_v5 = vadd.f32 1.0, %v3761_v17  ;;  %16318 = vst [vmem:[#allocation92_spill] sm:$0xff] %v13937_v3  ;;  %v3794_v1 = vadd.f32 1.0, %v3762_v41  ;;  %v13943_v30 = vmin.f32 %v2708_v16, 17.0  ;;  %v16325_v17 = vld [vmem:[#allocation127_spill] sm:$0xff]  ;;  %v16327_v24 = vmin.f32 %v16326_v39, 17.0 }
 0x3de   : > { %v4078_v51 = vmul.f32 %v3790_v14, %v16320_v11  ;;  %v3920_v56 = vmul.f32 %v3888_v9, %v16323_v50  ;;  %8717 = vmatmul.mubr.msk.f32.vlgmr.msra.gmra.mrb[0].mxu0 %vm4349_vm2, %v16324_v2  ;;  %v16329_v62 = vsub.f32 1.0, %v16328_v36  ;;  %v16331_v16 = vld [vmem:[#allocation125_spill] sm:$0xff]  ;;  %v13962_v35 = vmin.f32 %v2709_v40, 17.0  ;;  %v16334_v2 = vld [vmem:[#allocation72_spill] sm:$0xff]  ;;  %v16336_v36 = vld [vmem:[#allocation39_spill] sm:$0xff] }
 0x3df   : > { %16321 = vst [vmem:[#allocation94_spill] sm:$0xff] %v13943_v30  ;;  %v3889_v29 = vmul.f32 %v3793_v5, %v16325_v17  ;;  %v3763_v14 = vsub.f32 %v13937_v3, %v16327_v24  ;;  %8719 = vmatprep.mubr.msk.f32.mxu0 %vm4349_vm2, %v4108_v15  ;;  %9033 = vmatpush3.bf16.msk.msra.mxu0 %vm13906_vm15, %v9028_v49  ;;  %v16332_v9 = vmin.f32 %v16331_v16, 17.0  ;;  %v2710_v17 = vmax.f32 %v16334_v2, 0.0  ;;  %v16335_v24 = vld [vmem:[#allocation61_spill] sm:$0xff]  ;;  %v16339_v16 = vld [vmem:[#allocation71_spill] sm:$0xff] }
 0x3e0   : > { %v4079_v41 = vmul.f32 %v3791_v28, %v16329_v62  ;;  %v3890_v27 = vmul.f32 %v3794_v1, %v16330_v19  ;;  %16333 = vst [vmem:[#allocation95_spill] sm:$0xff] %v13962_v35  ;;  %8621 = vmatprep.mubr.msk.f32.mxu1 %vm4349_vm2, %v3920_v56  ;;  %v4110_v15 = vmul.f32 %v4078_v51, %v11658_v13  ;;  %v16337_v4 = vsub.f32 1.0, %v16336_v36  ;;  %v16338_v62 = vld [vmem:[#allocation63_spill] sm:$0xff]  ;;  %v16342_v56 = vld [vmem:[#allocation137_spill] sm:$0xff]  ;;  %v16343_v51 = vld [vmem:[#allocation110_spill] sm:$0xff] }
 0x3e1   : > { %v3764_v11 = vsub.f32 %v13943_v30, %v16332_v9  ;;  %v3921_v39 = vmul.f32 %v3889_v29, %v16335_v24  ;;  %v3795_v28 = vadd.f32 1.0, %v3763_v14  ;;  %v16340_v60 = vmin.f32 %v16339_v16, 17.0  ;;  %v16345_v2 = vld [vmem:[#allocation69_spill] sm:$0xff]  ;;  %v16347_v36 = vld [vmem:[#allocation135_spill] sm:$0xff] }
 0x3e2   : > { %v4080_v49 = vmul.f32 %v3792_v34, %v16337_v4  ;;  %v3922_v19 = vmul.f32 %v3890_v27, %v16338_v62  ;;  %v13974_v9 = vmin.f32 %v2710_v17, 17.0  ;;  %8720 = vmatmul.mubr.msk.f32.gmra.mrb[2].mxu0 %vm4349_vm2, %v4109_v58  ;;  %v4111_v13 = vmul.f32 %v4079_v41, %v11647_v33  ;;  %v16349_v4 = vld [vmem:[#allocation20_spill] sm:$0xff] }
 0x3e3   : > { %v3796_v3 = vadd.f32 1.0, %v3764_v11  ;;  %v3765_v40 = vsub.f32 %v13962_v35, %v16340_v60  ;;  %8622 = vmatmul.mubr.msk.f32.gmra.mrb[134].mxu1 %vm4349_vm2, %v3921_v39  ;;  %v3891_v29 = vmul.f32 %v3795_v28, %v16342_v56  ;;  %v16344_v14 = vsub.f32 1.0, %v16343_v51  ;;  %8722 = vmatprep.mubr.msk.f32.mxu0 %vm4349_vm2, %v4110_v15  ;;  %v16346_v60 = vld [vmem:[#allocation73_spill] sm:$0xff]  ;;  %v16350_v56 = vld [vmem:[#allocation62_spill] sm:$0xff]  ;;  %v16352_v51 = vld [vmem:[#allocation115_spill] sm:$0xff] }
 0x3e4   : > { %16341 = vst [vmem:[#allocation53_spill] sm:$0xff] %v13974_v9  ;;  %v2711_v27 = vmax.f32 %v16345_v2, 0.0  ;;  %8624 = vmatprep.mubr.msk.f32.mxu1 %vm4349_vm2, %v3922_v19  ;;  %v16348_v39 = vmin.f32 %v16347_v36, 17.0  ;;  %v2712_v16 = vmax.f32 %v16349_v4, 0.0  ;;  %v4112_v41 = vmul.f32 %v4080_v49, %v16323_v50  ;;  %v16354_v2 = vld [vmem:[#allocation67_spill] sm:$0xff]  ;;  %v16355_v35 = vld [vmem:[#allocation146_spill] sm:$0xff] }
 0x3e5   : > { %v4081_v34 = vmul.f32 %v3793_v5, %v16344_v14  ;;  %v3892_v11 = vmul.f32 %v3796_v3, %v16346_v60  ;;  %v3797_v17 = vadd.f32 1.0, %v3765_v40  ;;  %v3923_v33 = vmul.f32 %v3891_v29, %v16350_v56  ;;  %v16357_v36 = vld [vmem:[#allocation140_spill] sm:$0xff]  ;;  %v16361_v4 = vld [vmem:[#allocation99_spill] sm:$0xff] }
 0x3e6   : > { %v3766_v58 = vsub.f32 %v13974_v9, %v16348_v39  ;;  %v13992_v5 = vmin.f32 %v2711_v27, 17.0  ;;  %v16353_v14 = vsub.f32 1.0, %v16352_v51  ;;  %v13998_v30 = vmin.f32 %v2712_v16, 17.0  ;;  %8723 = vmatmul.mubr.msk.f32.gmra.mrb[4].mxu0 %vm4349_vm2, %v4111_v13  ;;  %v16359_v27 = vld [vmem:[#allocation121_spill] sm:$0xff]  ;;  %v16363_v16 = vld [vmem:[#allocation144_spill] sm:$0xff] }
 0x3e7   : > { %v3924_v15 = vmul.f32 %v3892_v11, %v16354_v2  ;;  %v3893_v60 = vmul.f32 %v3797_v17, %v16355_v35  ;;  %8625 = vmatmul.mubr.msk.f32.gmra.mrb[136].mxu1 %vm4349_vm2, %v3923_v33  ;;  %v4113_v29 = vmul.f32 %v4081_v34, %v16335_v24  ;;  %v16358_v50 = vmin.f32 %v16357_v36, 17.0  ;;  %8725 = vmatprep.mubr.msk.f32.mxu0 %vm4349_vm2, %v4112_v41  ;;  %v16362_v35 = vld [vmem:[#allocation151_spill] sm:$0xff]  ;;  %v16365_v24 = vld [vmem:[#allocation65_spill] sm:$0xff] }
 0x3e8   : > { %16351 = vst [vmem:[#allocation80_spill] sm:$0xff] %v13992_v5  ;;  %v4082_v19 = vmul.f32 %v3794_v1, %v16353_v14  ;;  %v3798_v40 = vadd.f32 1.0, %v3766_v58  ;;  %16356 = vst [vmem:[#allocation31_spill] sm:$0xff] %v13998_v30  ;;  %v16360_v39 = vsub.f32 1.0, %v16359_v27  ;;  %v2713_v11 = vmax.f32 %v16361_v4, 0.0  ;;  %v16367_v14 = vld [vmem:[#allocation104_spill] sm:$0xff] }
 0x3e9   : > { %v3767_v49 = vsub.f32 %v13992_v5, %v16358_v50  ;;  %8627 = vmatprep.mubr.msk.f32.mxu1 %vm4349_vm2, %v3924_v15  ;;  %v16364_v33 = vmin.f32 %v16363_v16, 17.0  ;;  %v16366_v34 = vsub.f32 1.0, %v16365_v24  ;;  %v2714_v36 = vmax.f32 %v16367_v14, 0.0  ;;  %v14018_v50 = vpop.f32.mrb[128].mxu1  ;;  %v16380_v14 = vld [vmem:[#allocation70_spill] sm:$0xff] }
 0x3ea   : > { %v4083_v1 = vmul.f32 %v3795_v28, %v16360_v39  ;;  %v3894_v58 = vmul.f32 %v3798_v40, %v16362_v35  ;;  %16368 = vst [vmem:[#allocation78_spill] sm:$0xff] %v14018_v50  ;;  %v16369_v28 = vld [vmem:[#allocation66_spill] sm:$0xff]  ;;  %v4114_v15 = vmul.f32 %v4082_v19, %v16338_v62  ;;  %v14022_v4 = vmin.f32 %v2713_v11, 17.0  ;;  %8726 = vmatmul.mubr.msk.f32.gmra.mrb[6].mxu0 %vm4349_vm2, %v4113_v29  ;;  %v16374_v19 = vld [vmem:[#allocation159_spill] sm:$0xff] }
 0x3eb   : > { %v3768_v13 = vsub.f32 %v13998_v30, %v16364_v33  ;;  %v4084_v51 = vmul.f32 %v3796_v3, %v16366_v34  ;;  %v3925_v27 = vmul.f32 %v3893_v60, %v16369_v28  ;;  %v3799_v39 = vadd.f32 1.0, %v3767_v49  ;;  %v16372_v49 = vld [vmem:[#allocation149_spill] sm:$0xff] }
 0x3ec   : > { %16370 = vst [vmem:[#allocation114_spill] sm:$0xff] %v14022_v4  ;;  %v3926_v41 = vmul.f32 %v3894_v58, %v16071_v25  ;;  %v14025_v16 = vmin.f32 %v2714_v36, 17.0  ;;  %v2715_v33 = vmax.f32 %v12973_v48, 0.0  ;;  %v4115_v60 = vmul.f32 %v4083_v1, %v16350_v56  ;;  %v14036_v58 = vpop.f32.mrb[129].mxu1  ;;  %8728 = vmatprep.mubr.msk.f32.mxu0 %vm4349_vm2, %v4114_v15  ;;  %v16376_v48 = vld [vmem:[#allocation161_spill] sm:$0xff] }
 0x3ed   : > { %v3800_v35 = vadd.f32 1.0, %v3768_v13  ;;  %8628 = vmatmul.mubr.msk.f32.gmra.mrb[138].mxu1 %vm4349_vm2, %v3925_v27  ;;  %v3895_v3 = vmul.f32 %v3799_v39, %v12999_v47  ;;  %v16373_v24 = vmin.f32 %v16372_v49, 17.0  ;;  %v2716_v11 = vmax.f32 %v16374_v19, 0.0  ;;  %16375 = vst [vmem:[#allocation122_spill] sm:$0xff] %v14036_v58  ;;  %v16377_v34 = vld [vmem:[#allocation153_spill] sm:$0xff]  ;;  %v16381_v49 = vld [vmem:[#allocation131_spill] sm:$0xff] }
 0x3ee   : > { %16371 = vst [vmem:[#allocation118_spill] sm:$0xff] %v14025_v16  ;;  %8630 = vmatprep.mubr.msk.f32.mxu1 %vm4349_vm2, %v3926_v41  ;;  %v4116_v29 = vmul.f32 %v4084_v51, %v16354_v2  ;;  %v16378_v47 = vmin.f32 %v16377_v34, 17.0  ;;  %v14045_v1 = vmin.f32 %v2715_v33, 17.0  ;;  %v16384_v41 = vld [vmem:[#allocation103_spill] sm:$0xff]  ;;  %v16387_v51 = vld [vmem:[#allocation136_spill] sm:$0xff]  ;;  %8729 = vmatmul.mubr.msk.f32.gmra.mrb[8].mxu0 %vm4349_vm2, %v4115_v60  ;;  %v16389_v33 = vld [vmem:[#allocation166_spill] sm:$0xff] }
 0x3ef   : > { %v3769_v62 = vsub.f32 %v14022_v4, %v16373_v24  ;;  %v3896_v13 = vmul.f32 %v3800_v35, %v16376_v48  ;;  %v3927_v36 = vmul.f32 %v3895_v3, %v16380_v14  ;;  %v16382_v24 = vsub.f32 1.0, %v16381_v49  ;;  %v16385_v48 = vld [vmem:[#allocation157_spill] sm:$0xff]  ;;  %v16392_v49 = vld [vmem:[#allocation18_spill] sm:$0xff] }
 0x3f0   : > { %v3770_v56 = vsub.f32 %v14025_v16, %v16378_v47  ;;  %16379 = vst [vmem:[#allocation76_spill] sm:$0xff] %v14045_v1  ;;  %v14050_v58 = vmin.f32 %v2716_v11, 17.0  ;;  %v16386_v4 = vmin.f32 %v16385_v48, 17.0  ;;  %v16388_v34 = vsub.f32 1.0, %v16387_v51  ;;  %8731 = vmatprep.mubr.msk.f32.mxu0 %vm4349_vm2, %v4116_v29  ;;  %v16396_v51 = vld [vmem:[#allocation100_spill] sm:$0xff] }
 0x3f1   : > { %v3801_v27 = vadd.f32 1.0, %v3769_v62  ;;  %v4085_v19 = vmul.f32 %v3797_v17, %v16382_v24  ;;  %v3928_v15 = vmul.f32 %v3896_v13, %v16384_v41  ;;  %8631 = vmatmul.mubr.msk.f32.gmra.mrb[140].mxu1 %vm4349_vm2, %v3927_v36  ;;  %v16390_v62 = vld [vmem:[#allocation164_spill] sm:$0xff]  ;;  %v16393_v13 = vsub.f32 1.0, %v16392_v49  ;;  %v16394_v24 = vld [vmem:[#allocation105_spill] sm:$0xff] }
 0x3f2   : > { %16383 = vst [vmem:[#allocation64_spill] sm:$0xff] %v14050_v58  ;;  %v3802_v50 = vadd.f32 1.0, %v3770_v56  ;;  %v3771_v2 = vsub.f32 %v14045_v1, %v16386_v4  ;;  %v4086_v47 = vmul.f32 %v3798_v40, %v16388_v34  ;;  %v16391_v17 = vmin.f32 %v16390_v62, 17.0  ;;  %v16395_v40 = vld [vmem:[#allocation171_spill] sm:$0xff]  ;;  %v16399_v62 = vld [vmem:[#allocation102_spill] sm:$0xff] }
 0x3f3   : > { %v3897_v3 = vmul.f32 %v3801_v27, %v16389_v33  ;;  %v4087_v56 = vmul.f32 %v3799_v39, %v16393_v13  ;;  %v2717_v48 = vmax.f32 %v16394_v24, 0.0  ;;  %8633 = vmatprep.mubr.msk.f32.mxu1 %vm4349_vm2, %v3928_v15  ;;  %v16397_v60 = vsub.f32 1.0, %v16396_v51  ;;  %v16398_v33 = vld [vmem:[#allocation108_spill] sm:$0xff]  ;;  %v16401_v13 = vld [vmem:[#allocation23_spill] sm:$0xff] }
 0x3f4   : > { %v3772_v11 = vsub.f32 %v14050_v58, %v16391_v17  ;;  %v3898_v4 = vmul.f32 %v3802_v50, %v16395_v40  ;;  %v3803_v36 = vadd.f32 1.0, %v3771_v2  ;;  %v2718_v1 = vmax.f32 %v16398_v33, 0.0  ;;  %v16402_v15 = vld [vmem:[#allocation24_spill] sm:$0xff]  ;;  %v16404_v2 = vld [vmem:[#allocation26_spill] sm:$0xff] }
 0x3f5   : > { %v4088_v34 = vmul.f32 %v3800_v35, %v16397_v60  ;;  %v3929_v16 = vmul.f32 %v3897_v3, %v16399_v62  ;;  %v4117_v17 = vmul.f32 %v4085_v19, %v16369_v28  ;;  %v14075_v39 = vmin.f32 %v2717_v48, 17.0  ;;  %v16406_v19 = vld [vmem:[#allocation75_spill] sm:$0xff]  ;;  %v16411_v33 = vld [vmem:[#allocation22_spill] sm:$0xff] }
 0x3f6   : > { %v3804_v49 = vadd.f32 1.0, %v3772_v11  ;;  %v3930_v24 = vmul.f32 %v3898_v4, %v16401_v13  ;;  %v3899_v58 = vmul.f32 %v3803_v36, %v16402_v15  ;;  %v4118_v29 = vmul.f32 %v4086_v47, %v16071_v25  ;;  %v16408_v4 = vld [vmem:[#allocation25_spill] sm:$0xff] }
 0x3f7   : > { %16400 = vst [vmem:[#allocation93_spill] sm:$0xff] %v14075_v39  ;;  %v14080_v40 = vmin.f32 %v2718_v1, 17.0  ;;  %8634 = vmatmul.mubr.msk.f32.gmra.mrb[142].mxu1 %vm4349_vm2, %v3929_v16  ;;  %8732 = vmatmul.mubr.msk.f32.gmra.mrb[10].mxu0 %vm4349_vm2, %v4117_v17  ;;  %v16405_v3 = vmin.f32 %v16404_v2, 17.0  ;;  %v16407_v11 = vsub.f32 1.0, %v16406_v19  ;;  %v2719_v51 = vmax.f32 %v16408_v4, 0.0  ;;  %v16409_v1 = vld [vmem:[#allocation173_spill] sm:$0xff] }
 0x3f8   : > { %v3900_v35 = vmul.f32 %v3804_v49, %v13283_v23  ;;  %8636 = vmatprep.mubr.msk.f32.mxu1 %vm4349_vm2, %v3930_v24  ;;  %8734 = vmatprep.mubr.msk.f32.mxu0 %vm4349_vm2, %v4118_v29  ;;  %v4119_v25 = vmul.f32 %v4087_v56, %v16380_v14  ;;  %v4120_v16 = vmul.f32 %v4088_v34, %v16384_v41  ;;  %v16410_v47 = vmin.f32 %v16409_v1, 17.0  ;;  %v16413_v2 = vld [vmem:[#allocation21_spill] sm:$0xff]  ;;  %v16415_v19 = vld [vmem:[#allocation48_spill] sm:$0xff] }
 0x3f9   : > { %16403 = vst [vmem:[#allocation35_spill] sm:$0xff] %v14080_v40  ;;  %v3773_v28 = vsub.f32 %v14075_v39, %v16405_v3  ;;  %v4089_v48 = vmul.f32 %v3801_v27, %v16407_v11  ;;  %v2720_v60 = vmax.f32 %v13257_v20, 0.0  ;;  %v3931_v17 = vmul.f32 %v3899_v58, %v16411_v33  ;;  %v16417_v41 = vld [vmem:[#allocation28_spill] sm:$0xff]  ;;  %v16418_v20 = vld [vmem:[#allocation183_spill] sm:$0xff]  ;;  %v16421_v1 = vld [vmem:[#allocation181_spill] sm:$0xff] }
 0x3fa   : > { %v3774_v23 = vsub.f32 %v14080_v40, %v16410_v47  ;;  %v14100_v27 = vmin.f32 %v2719_v51, 17.0  ;;  %v16414_v3 = vsub.f32 1.0, %v16413_v2  ;;  %v3932_v29 = vmul.f32 %v3900_v35, %v16415_v19 }
 0x3fb   : > { %v3805_v15 = vadd.f32 1.0, %v3773_v28  ;;  %v14105_v14 = vmin.f32 %v2720_v60, 17.0  ;;  %v2721_v56 = vmax.f32 %v16417_v41, 0.0  ;;  %8637 = vmatmul.mubr.msk.f32.gmra.mrb[144].mxu1 %vm4349_vm2, %v3931_v17  ;;  %8735 = vmatmul.mubr.msk.f32.gmra.mrb[12].mxu0 %vm4349_vm2, %v4119_v25  ;;  %v4121_v58 = vmul.f32 %v4089_v48, %v16399_v62  ;;  %v16419_v28 = vld [vmem:[#allocation178_spill] sm:$0xff] }
 0x3fc   : > { %16412 = vst [vmem:[#allocation127_spill] sm:$0xff] %v14100_v27  ;;  %v4090_v24 = vmul.f32 %v3802_v50, %v16414_v3  ;;  %v3806_v11 = vadd.f32 1.0, %v3774_v23  ;;  %v16420_v4 = vmin.f32 %v16419_v28, 17.0  ;;  %v2722_v50 = vmax.f32 %v13375_v21, 0.0  ;;  %8639 = vmatprep.mubr.msk.f32.mxu1 %vm4349_vm2, %v3932_v29  ;;  %8737 = vmatprep.mubr.msk.f32.mxu0 %vm4349_vm2, %v4120_v16  ;;  %v16423_v23 = vld [vmem:[#allocation160_spill] sm:$0xff]  ;;  %v16427_v29 = vld [vmem:[#allocation27_spill] sm:$0xff] }
 0x3fd   : > { %16416 = vst [vmem:[#allocation119_spill] sm:$0xff] %v14105_v14  ;;  %v3901_v34 = vmul.f32 %v3805_v15, %v16418_v20  ;;  %v16422_v47 = vmin.f32 %v16421_v1, 17.0  ;;  %v16424_v60 = vsub.f32 1.0, %v16423_v23  ;;  %v14124_v62 = vmin.f32 %v2721_v56, 17.0  ;;  %v16432_v56 = vld [vmem:[#allocation191_spill] sm:$0xff] }
 0x3fe   : > { %v3775_v51 = vsub.f32 %v14100_v27, %v16420_v4  ;;  %v3902_v35 = vmul.f32 %v3806_v11, %v13388_v31  ;;  %v4122_v21 = vmul.f32 %v4090_v24, %v16401_v13  ;;  %v14128_v3 = vmin.f32 %v2722_v50, 17.0  ;;  %v16428_v31 = vld [vmem:[#allocation187_spill] sm:$0xff]  ;;  %v16430_v4 = vld [vmem:[#allocation49_spill] sm:$0xff] }
 0x3ff   : > { %v3776_v25 = vsub.f32 %v14105_v14, %v16422_v47  ;;  %v4091_v17 = vmul.f32 %v3803_v36, %v16424_v60  ;;  %16425 = vst [vmem:[#allocation50_spill] sm:$0xff] %v14124_v62  ;;  %v3933_v48 = vmul.f32 %v3901_v34, %v16159_v6  ;;  %v16429_v20 = vmin.f32 %v16428_v31, 17.0  ;;  %8738 = vmatmul.mubr.msk.f32.gmra.mrb[14].mxu0 %vm4349_vm2, %v4121_v58  ;;  %v16434_v34 = vld [vmem:[#allocation170_spill] sm:$0xff]  ;;  %v16437_v60 = vld [vmem:[#allocation175_spill] sm:$0xff]  ;;  %v16439_v31 = vld [vmem:[#allocation81_spill] sm:$0xff] }
 0x400   : > { %v3807_v2 = vadd.f32 1.0, %v3775_v51  ;;  %16426 = vst [vmem:[#allocation132_spill] sm:$0xff] %v14128_v3  ;;  %v3934_v16 = vmul.f32 %v3902_v35, %v16427_v29  ;;  %v16431_v1 = vsub.f32 1.0, %v16430_v4  ;;  %v16433_v13 = vmin.f32 %v16432_v56, 17.0  ;;  %v16436_v35 = vld [vmem:[#allocation193_spill] sm:$0xff]  ;;  %8740 = vmatprep.mubr.msk.f32.mxu0 %vm4349_vm2, %v4122_v21 }
 0x401   : > { %v3808_v41 = vadd.f32 1.0, %v3776_v25  ;;  %v3777_v28 = vsub.f32 %v14124_v62, %v16429_v20  ;;  %8640 = vmatmul.mubr.msk.f32.gmra.mrb[146].mxu1 %vm4349_vm2, %v3933_v48  ;;  %v16435_v51 = vsub.f32 1.0, %v16434_v34  ;;  %v2723_v25 = vmax.f32 %v16436_v35, 0.0  ;;  %v16441_v56 = vld [vmem:[#allocation89_spill] sm:$0xff] }
 0x402   : > { %v4092_v47 = vmul.f32 %v3804_v49, %v16431_v1  ;;  %v3903_v36 = vmul.f32 %v3807_v2, %v13455_v12  ;;  %v3778_v24 = vsub.f32 %v14128_v3, %v16433_v13  ;;  %8642 = vmatprep.mubr.msk.f32.mxu1 %vm4349_vm2, %v3934_v16  ;;  %v16438_v58 = vsub.f32 1.0, %v16437_v60  ;;  %v16442_v16 = vld [vmem:[#allocation204_spill] sm:$0xff] }
 0x403   : > { %v4093_v50 = vmul.f32 %v3805_v15, %v16435_v51  ;;  %v3904_v49 = vmul.f32 %v3808_v41, %v13511_v45  ;;  %v3809_v23 = vadd.f32 1.0, %v3777_v28  ;;  %v2724_v12 = vmax.f32 %v13485_v52, 0.0  ;;  %v16448_v51 = vld [vmem:[#allocation44_spill] sm:$0xff] }
 0x404   : > { %v4094_v48 = vmul.f32 %v3806_v11, %v16438_v58  ;;  %v3935_v20 = vmul.f32 %v3903_v36, %v16439_v31  ;;  %v4123_v4 = vmul.f32 %v4091_v17, %v16411_v33  ;;  %v3810_v1 = vadd.f32 1.0, %v3778_v24  ;;  %v16444_v11 = vld [vmem:[#allocation197_spill] sm:$0xff] }
 0x405   : > { %v14153_v15 = vmin.f32 %v2723_v25, 17.0  ;;  %v3936_v13 = vmul.f32 %v3904_v49, %v16441_v56  ;;  %v3905_v34 = vmul.f32 %v3809_v23, %v16442_v16  ;;  %v4124_v21 = vmul.f32 %v4092_v47, %v16415_v19  ;;  %v16446_v17 = vld [vmem:[#allocation101_spill] sm:$0xff]  ;;  %v16449_v25 = vld [vmem:[#allocation202_spill] sm:$0xff] }
 0x406   : > { %v14158_v45 = vmin.f32 %v2724_v12, 17.0  ;;  %8643 = vmatmul.mubr.msk.f32.gmra.mrb[148].mxu1 %vm4349_vm2, %v3935_v20  ;;  %8741 = vmatmul.mubr.msk.f32.gmra.mrb[16].mxu0 %vm4349_vm2, %v4123_v4  ;;  %v3906_v52 = vmul.f32 %v3810_v1, %v13616_v10  ;;  %v16445_v28 = vmin.f32 %v16444_v11, 17.0  ;;  %v16447_v36 = vsub.f32 1.0, %v16446_v17  ;;  %v16451_v58 = vld [vmem:[#allocation29_spill] sm:$0xff]  ;;  %v16452_v4 = vld [vmem:[#allocation40_spill] sm:$0xff]  ;;  %v16454_v11 = vld [vmem:[#allocation83_spill] sm:$0xff] }
 0x407   : > { %16440 = vst [vmem:[#allocation125_spill] sm:$0xff] %v14153_v15  ;;  %v2725_v35 = vmax.f32 %v16448_v51, 0.0  ;;  %8645 = vmatprep.mubr.msk.f32.mxu1 %vm4349_vm2, %v3936_v13  ;;  %8743 = vmatprep.mubr.msk.f32.mxu0 %vm4349_vm2, %v4124_v21  ;;  %v4125_v19 = vmul.f32 %v4093_v50, %v16159_v6  ;;  %v4126_v47 = vmul.f32 %v4094_v48, %v16427_v29  ;;  %v16450_v49 = vmin.f32 %v16449_v25, 17.0 }
 0x408   : > { %16443 = vst [vmem:[#allocation72_spill] sm:$0xff] %v14158_v45  ;;  %v3779_v33 = vsub.f32 %v14153_v15, %v16445_v28  ;;  %v4095_v24 = vmul.f32 %v3807_v2, %v16447_v36  ;;  %v2726_v60 = vmax.f32 %v13603_v44, 0.0  ;;  %v3937_v12 = vmul.f32 %v3905_v34, %v16451_v58  ;;  %v16455_v44 = vld [vmem:[#allocation51_spill] sm:$0xff]  ;;  %v16456_v34 = vld [vmem:[#allocation208_spill] sm:$0xff] }
 0x409   : > { %v3780_v10 = vsub.f32 %v14158_v45, %v16450_v49  ;;  %v14178_v2 = vmin.f32 %v2725_v35, 17.0  ;;  %v16453_v16 = vsub.f32 1.0, %v16452_v4  ;;  %v3938_v21 = vmul.f32 %v3906_v52, %v16454_v11  ;;  %v16458_v52 = vld [vmem:[#allocation218_spill] sm:$0xff]  ;;  %v16459_v36 = vld [vmem:[#allocation212_spill] sm:$0xff] }
 0x40a   : > { %v3811_v20 = vadd.f32 1.0, %v3779_v33  ;;  %v14183_v6 = vmin.f32 %v2726_v60, 17.0  ;;  %v2727_v29 = vmax.f32 %v13657_v55, 0.0  ;;  %8646 = vmatmul.mubr.msk.f32.gmra.mrb[150].mxu1 %vm4349_vm2, %v3937_v12  ;;  %8744 = vmatmul.mubr.msk.f32.gmra.mrb[18].mxu0 %vm4349_vm2, %v4125_v19  ;;  %v4127_v48 = vmul.f32 %v4095_v24, %v16439_v31  ;;  %v16461_v19 = vld [vmem:[#allocation188_spill] sm:$0xff]  ;;  %v16463_v24 = vld [vmem:[#allocation57_spill] sm:$0xff]  ;;  %v16464_v4 = vld [vmem:[#allocation82_spill] sm:$0xff] }
 0x40b   : > { %v4096_v13 = vmul.f32 %v3808_v41, %v16453_v16  ;;  %v3812_v28 = vadd.f32 1.0, %v3780_v10  ;;  %v16457_v33 = vmin.f32 %v16456_v34, 17.0  ;;  %v2728_v41 = vmax.f32 %v13713_v46, 0.0  ;;  %8648 = vmatprep.mubr.msk.f32.mxu1 %vm4349_vm2, %v3938_v21  ;;  %8746 = vmatprep.mubr.msk.f32.mxu0 %vm4349_vm2, %v4126_v47  ;;  %v16465_v21 = vld [vmem:[#allocation216_spill] sm:$0xff] }
 0x40c   : > { %v3907_v50 = vmul.f32 %v3811_v20, %v16455_v44  ;;  %v16460_v51 = vmin.f32 %v16459_v36, 17.0  ;;  %v16462_v25 = vsub.f32 1.0, %v16461_v19  ;;  %v14202_v31 = vmin.f32 %v2727_v29, 17.0  ;;  %v16469_v29 = vld [vmem:[#allocation221_spill] sm:$0xff] }
 0x40d   : > { %v3781_v17 = vsub.f32 %v14178_v2, %v16457_v33  ;;  %v3908_v55 = vmul.f32 %v3812_v28, %v16458_v52  ;;  %v4128_v46 = vmul.f32 %v4096_v13, %v16441_v56  ;;  %v14206_v12 = vmin.f32 %v2728_v41, 17.0  ;;  %v16467_v33 = vld [vmem:[#allocation194_spill] sm:$0xff] }
 0x40e   : > { %v3782_v35 = vsub.f32 %v14183_v6, %v16460_v51  ;;  %v4097_v49 = vmul.f32 %v3809_v23, %v16462_v25  ;;  %v3939_v10 = vmul.f32 %v3907_v50, %v16463_v24  ;;  %v16466_v44 = vmin.f32 %v16465_v21, 17.0  ;;  %8747 = vmatmul.mubr.msk.f32.gmra.mrb[20].mxu0 %vm4349_vm2, %v4127_v48  ;;  %v16471_v51 = vld [vmem:[#allocation199_spill] sm:$0xff] }
 0x40f   : > { %v3813_v60 = vadd.f32 1.0, %v3781_v17  ;;  %v3940_v47 = vmul.f32 %v3908_v55, %v16464_v4  ;;  %v16468_v52 = vsub.f32 1.0, %v16467_v33  ;;  %v16470_v56 = vmin.f32 %v16469_v29, 17.0  ;;  %8749 = vmatprep.mubr.msk.f32.mxu0 %vm4349_vm2, %v4128_v46  ;;  %v16473_v46 = vld [vmem:[#allocation32_spill] sm:$0xff] }
 0x410   : > { %v3814_v16 = vadd.f32 1.0, %v3782_v35  ;;  %v3783_v34 = vsub.f32 %v14202_v31, %v16466_v44  ;;  %8649 = vmatmul.mubr.msk.f32.gmra.mrb[152].mxu1 %vm4349_vm2, %v3939_v10  ;;  %v2729_v50 = vmax.f32 %v13769_v53, 0.0  ;;  %v6091_v44 = vadd.s32 45, %v16296_v54 }
 0x411   : > { %v4098_v36 = vmul.f32 %v3810_v1, %v16468_v52  ;;  %v3909_v23 = vmul.f32 %v3813_v60, %v13788_v59  ;;  %v3784_v13 = vsub.f32 %v14206_v12, %v16470_v56  ;;  %8651 = vmatprep.mubr.msk.f32.mxu1 %vm4349_vm2, %v3940_v47  ;;  %v4129_v1 = vmul.f32 %v4097_v49, %v16451_v58  ;;  %v16478_v52 = vld [vmem:[#allocation98_spill] sm:$0xff] }
 0x412   : > { %v3910_v17 = vmul.f32 %v3814_v16, %v13825_v7  ;;  %v3815_v41 = vadd.f32 1.0, %v3783_v34  ;;  %v16472_v59 = vsub.f32 1.0, %v16471_v51  ;;  %v14228_v19 = vmin.f32 %v2729_v50, 17.0  ;;  %v16485_v51 = vld [vmem:[#allocation60_spill] sm:$0xff] }
 0x413   : > { %v3941_v55 = vmul.f32 %v3909_v23, %v16246_v37  ;;  %v3816_v48 = vadd.f32 1.0, %v3784_v13  ;;  %v4130_v10 = vmul.f32 %v4098_v36, %v16454_v11  ;;  %v16474_v47 = vsub.f32 1.0, %v16473_v46  ;;  %8750 = vmatmul.mubr.msk.f32.gmra.mrb[22].mxu0 %vm4349_vm2, %v4129_v1  ;;  %v16481_v13 = vld [vmem:[#allocation96_spill] sm:$0xff]  ;;  %v16490_v46 = vld [vmem:[#allocation17_spill] sm:$0xff] }
 0x414   : > { %v4099_v35 = vmul.f32 %v3811_v20, %v16472_v59  ;;  %v3942_v25 = vmul.f32 %v3910_v17, %v16256_v43  ;;  %v3911_v53 = vmul.f32 %v3815_v41, %v13856_v26  ;;  %v16475_v49 = vmin.f32 %v13809_v0, 17.0  ;;  %v16476_v26 = vld [vmem:[#allocation209_spill] sm:$0xff] }
 0x415   : > { %v4100_v7 = vmul.f32 %v3812_v28, %v16474_v47  ;;  %8652 = vmatmul.mubr.msk.f32.gmra.mrb[154].mxu1 %vm4349_vm2, %v3941_v55  ;;  %v3912_v58 = vmul.f32 %v3816_v48, %v13858_v32  ;;  %8752 = vmatprep.mubr.msk.f32.mxu0 %vm4349_vm2, %v4130_v10  ;;  %v16477_v21 = vsub.f32 1.0, %v16476_v26  ;;  %v16479_v32 = vsub.f32 1.0, %v16478_v52  ;;  %v16494_v26 = vld [vmem:[#allocation74_spill] sm:$0xff] }
 0x416   : > { %v3785_v20 = vsub.f32 %v14228_v19, %v16475_v49  ;;  %8654 = vmatprep.mubr.msk.f32.mxu1 %vm4349_vm2, %v3942_v25  ;;  %v3943_v28 = vmul.f32 %v3911_v53, %v16266_v42  ;;  %v4131_v34 = vmul.f32 %v4099_v35, %v16463_v24  ;;  %v6092_v29 = vadd.s32 45, %v16297_v61  ;;  %v16488_v53 = vld [vmem:[#allocation16_spill] sm:$0xff]  ;;  %v16493_v49 = vld [vmem:[#allocation55_spill] sm:$0xff] }
 0x417   : > { %v4101_v11 = vmul.f32 %v3813_v60, %v16477_v21  ;;  %v4102_v36 = vmul.f32 %v3814_v16, %v16479_v32  ;;  %v3944_v0 = vmul.f32 %v3912_v58, %v12394_v38  ;;  %v4132_v23 = vmul.f32 %v4100_v7, %v16464_v4  ;;  %v16491_v7 = vld [vmem:[#allocation59_spill] sm:$0xff]  ;;  %v16497_v32 = vld [vmem:[#allocation113_spill] sm:$0xff] }
 0x418   : > { %v3817_v33 = vadd.f32 1.0, %v3785_v20  ;;  %vm6093_vm0 = vcmp.eq.s32.totalorder %v16299_v63, %v6091_v44  ;;  %8753 = vmatmul.mubr.msk.f32.gmra.mrb[24].mxu0 %vm4349_vm2, %v4131_v34  ;;  %v16480_v24 = vsub.f32 1.0, %v13822_v57  ;;  %vm6094_vm1 = vcmp.eq.s32.totalorder %v16299_v63, %v6092_v29  ;;  %v16499_v29 = vld [vmem:[#allocation120_spill] sm:$0xff]  ;;  %v16505_v57 = vld [vmem:[#allocation130_spill] sm:$0xff] }
 0x419   : > { %8655 = vmatmul.mubr.msk.f32.gmra.mrb[156].mxu1 %vm4349_vm2, %v3943_v28  ;;  %8755 = vmatprep.mubr.msk.f32.mxu0 %vm4349_vm2, %v4132_v23  ;;  %v4133_v16 = vmul.f32 %v4101_v11, %v16246_v37  ;;  %v16482_v50 = vsub.f32 1.0, %v16481_v13  ;;  %vm14269_vm3 = vmpackc.low %vm4446_vm4, %vm6093_vm0  ;;  %v4134_v55 = vmul.f32 %v4102_v36, %v16256_v43  ;;  %v16486_v37 = vsub.f32 1.0, %v16485_v51  ;;  %v16495_v11 = vld [vmem:[#allocation109_spill] sm:$0xff]  ;;  %v16506_v51 = vld [vmem:[#allocation54_spill] sm:$0xff] }
 0x41a   : > { %v3913_v60 = vmul.f32 %v3817_v33, %v13874_v22  ;;  %v4105_v56 = vmul.f32 %v3817_v33, %v16480_v24  ;;  %8657 = vmatprep.mubr.msk.f32.mxu1 %vm4349_vm2, %v3944_v0  ;;  %v7795_v22 = vsel %vm6094_vm1, 1.0, %v16303_v8  ;;  %v16487_v35 = vmov 1.0   ;;  %v16496_v33 = vld [vmem:[#allocation56_spill] sm:$0xff]  ;;  %v16498_v0 = vld [vmem:[#allocation226_spill] sm:$0xff] }
 0x41b   : > { %v4103_v17 = vmul.f32 %v3815_v41, %v16482_v50  ;;  %v4104_v59 = vmul.f32 %v3816_v48, %v16486_v37  ;;  %v9034_v25 = vpack.c.bf16 %v7795_v22, %v16487_v35  ;;  %v14285_v43 = vmul.f32 18.0, %v16488_v53  ;;  %v16489_v48 = vld [vmem:[#allocation42_spill] sm:$0xff]  ;;  %v16509_v53 = vld [vmem:[#allocation141_spill] sm:$0xff] }
 0x41c   : > { %v3945_v4 = vmul.f32 %v3913_v60, %v12373_v18  ;;  %v4137_v1 = vmul.f32 %v4105_v56, %v12373_v18  ;;  %8756 = vmatmul.mubr.msk.f32.gmra.mrb[26].mxu0 %vm4349_vm2, %v4133_v16  ;;  %v14290_v10 = vmul.f32 18.0, %v16489_v48  ;;  %v14295_v58 = vmul.f32 18.0, %v16491_v7  ;;  %v16503_v50 = vld [vmem:[#allocation126_spill] sm:$0xff]  ;;  %v16580_v56 = vld [vmem:[#allocation97_spill] sm:$0xff] }
 0x41d   : > { %8758 = vmatprep.mubr.msk.f32.mxu0 %vm4349_vm2, %v4134_v55  ;;  %9036 = vmatprep.subr.msk.bf16.mxu0 %vm14269_vm3, %v9034_v25  ;;  %v4135_v18 = vmul.f32 %v4103_v17, %v16266_v42  ;;  %v4136_v41 = vmul.f32 %v4104_v59, %v12394_v38  ;;  %v4170_v47 = vadd.f32 %v14285_v43, %v16490_v46  ;;  %v16492_v38 = vld [vmem:[#allocation30_spill] sm:$0xff]  ;;  %v14302_v20 = vmul.f32 18.0, %v16493_v49  ;;  %v16507_v59 = vld [vmem:[#allocation68_spill] sm:$0xff] }
 0x41e   : > { %8658 = vmatmul.mubr.msk.f32.gmra.mrb[158].mxu1 %vm4349_vm2, %v3945_v4  ;;  %v4171_v42 = vadd.f32 %v14290_v10, %v16492_v38  ;;  %v4172_v21 = vadd.f32 %v14295_v58, %v16494_v26  ;;  %v14307_v44 = vmul.f32 18.0, %v16495_v11  ;;  %v6455_v28 = vadd.s32 54, %v16296_v54  ;;  %v16502_v4 = vld [vmem:[#allocation88_spill] sm:$0xff] }
 0x41f   : > { %v6456_v34 = vadd.s32 54, %v16297_v61  ;;  %v4173_v52 = vadd.f32 %v14302_v20, %v16496_v33  ;;  %v14318_v36 = vmul.f32 18.0, %v16497_v32  ;;  %v14323_v60 = vmul.f32 18.0, %v16499_v29 }
 0x420   : > { %8759 = vmatmul.mubr.msk.f32.gmra.mrb[28].mxu0 %vm4349_vm2, %v4135_v18  ;;  %v4174_v23 = vadd.f32 %v14307_v44, %v16498_v0  ;;  %vm6457_vm6 = vcmp.eq.s32.totalorder %v16299_v63, %v6455_v28  ;;  %v14341_v17 = vmul.f32 18.0, %v16503_v50  ;;  %v14346_v55 = vmul.f32 18.0, %v16505_v57  ;;  %v16508_v18 = vld [vmem:[#allocation37_spill] sm:$0xff]  ;;  %v16513_v28 = vld [vmem:[#allocation150_spill] sm:$0xff] }
 0x421   : > { %8761 = vmatprep.mubr.msk.f32.mxu0 %vm4349_vm2, %v4136_v41  ;;  %vm6458_vm7 = vcmp.eq.s32.totalorder %v16299_v63, %v6456_v34  ;;  %vm14330_vm8 = vmpackc.low %vm4446_vm4, %vm6457_vm6  ;;  %v4175_v13 = vadd.f32 %v14318_v36, %v16502_v4  ;;  %v14361_v48 = vmul.f32 18.0, %v16509_v53  ;;  %v14373_v34 = vmul.f32 18.0, %v16513_v28  ;;  %v16517_v57 = vld [vmem:[#allocation165_spill] sm:$0xff] }
 0x422   : > { %v7831_v24 = vsel %vm6458_vm7, 1.0, %v16303_v8  ;;  %v4177_v37 = vadd.f32 %v14341_v17, %v16506_v51  ;;  %v4178_v41 = vadd.f32 %v14346_v55, %v16508_v18  ;;  %v16569_v51 = vld [vmem:[#allocation52_spill] sm:$0xff]  ;;  %v16583_v4 = vld [vmem:[#allocation85_spill] sm:$0xff] }
 0x423   : > { %v14336_v16 = vpack.c.bf16 %v7831_v24, %v16487_v35  ;;  %v4182_v24 = vadd.f32 %v14373_v34, %v13974_v9 }
 0x424   : > { %8762 = vmatmul.mubr.msk.f32.gmra.mrb[30].mxu0 %vm4349_vm2, %v4137_v1  ;;  %v16504_v1 = vld [vmem:[#allocation38_spill] sm:$0xff] }
 0x425   : > { %8768 = vmatprep.mubr.msk.f32.mxu0 %vm4349_vm2, %v4170_v47  ;;  %v4176_v22 = vadd.f32 %v14323_v60, %v16504_v1  ;;  %v16510_v47 = vld [vmem:[#allocation92_spill] sm:$0xff]  ;;  %v16570_v1 = vld [vmem:[#allocation90_spill] sm:$0xff] }
 0x428   : > { %8769 = vmatmul.mubr.msk.f32.vlgmr.msra.gmra.mrb[0].mxu0 %vm4349_vm2, %v4171_v42  ;;  %v16511_v42 = vld [vmem:[#allocation145_spill] sm:$0xff] }
 0x429   : > { %8771 = vmatprep.mubr.msk.f32.mxu0 %vm4349_vm2, %v4172_v21  ;;  %9039 = vmatpush3.bf16.msk.msra.mxu0 %vm14269_vm3, %v9034_v25  ;;  %v14356_v25 = vmul.f32 18.0, %v16507_v59  ;;  %v14368_v49 = vmul.f32 18.0, %v16511_v42  ;;  %v16512_v21 = vld [vmem:[#allocation94_spill] sm:$0xff] }
 0x42a   : > { %9042 = vmatprep.subr.msk.bf16.mxu0 %vm14330_vm8, %v14336_v16  ;;  %v4180_v11 = vadd.f32 %v14361_v48, %v16512_v21 }
 0x42b   : > { %v4179_v7 = vadd.f32 %v14356_v25, %v16510_v47  ;;  %v16531_v47 = vld [vmem:[#allocation223_spill] sm:$0xff] }
 0x42c   : > { %8772 = vmatmul.mubr.msk.f32.gmra.mrb[2].mxu0 %vm4349_vm2, %v4173_v52  ;;  %v16514_v52 = vld [vmem:[#allocation95_spill] sm:$0xff] }
 0x42d   : > { %8774 = vmatprep.mubr.msk.f32.mxu0 %vm4349_vm2, %v4174_v23  ;;  %v4181_v32 = vadd.f32 %v14368_v49, %v16514_v52  ;;  %v16515_v23 = vld [vmem:[#allocation154_spill] sm:$0xff] }
 0x42e   : > { %v14380_v29 = vmul.f32 18.0, %v16515_v23  ;;  %v16529_v52 = vld [vmem:[#allocation214_spill] sm:$0xff] }
 0x430   : > { %8775 = vmatmul.mubr.msk.f32.gmra.mrb[4].mxu0 %vm4349_vm2, %v4175_v13  ;;  %v16516_v13 = vld [vmem:[#allocation158_spill] sm:$0xff] }
 0x431   : > { %8777 = vmatprep.mubr.msk.f32.mxu0 %vm4349_vm2, %v4176_v22  ;;  %v14385_v50 = vmul.f32 18.0, %v16516_v13  ;;  %v4183_v22 = vadd.f32 %v14380_v29, %v13992_v5 }
 0x433   : > { %v4184_v59 = vadd.f32 %v14385_v50, %v13998_v30 }
 0x434   : > { %8778 = vmatmul.mubr.msk.f32.gmra.mrb[6].mxu0 %vm4349_vm2, %v4177_v37  ;;  %v14392_v37 = vmul.f32 18.0, %v16517_v57  ;;  %v16523_v57 = vld [vmem:[#allocation182_spill] sm:$0xff] }
 0x435   : > { %8780 = vmatprep.mubr.msk.f32.mxu0 %vm4349_vm2, %v4178_v41  ;;  %v16518_v41 = vld [vmem:[#allocation169_spill] sm:$0xff] }
 0x436   : > { %v14397_v53 = vmul.f32 18.0, %v16518_v41 }
 0x438   : > { %8781 = vmatmul.mubr.msk.f32.gmra.mrb[8].mxu0 %vm4349_vm2, %v4179_v7  ;;  %v16519_v7 = vld [vmem:[#allocation114_spill] sm:$0xff] }
 0x439   : > { %8783 = vmatprep.mubr.msk.f32.mxu0 %vm4349_vm2, %v4180_v11  ;;  %v4185_v42 = vadd.f32 %v14392_v37, %v16519_v7  ;;  %v16520_v11 = vld [vmem:[#allocation174_spill] sm:$0xff] }
 0x43a   : > { %v14404_v28 = vmul.f32 18.0, %v16520_v11  ;;  %v16525_v7 = vld [vmem:[#allocation186_spill] sm:$0xff]  ;;  %v16526_v11 = vld [vmem:[#allocation205_spill] sm:$0xff] }
 0x43b   : > { %v14419_v30 = vmul.f32 18.0, %v16525_v7  ;;  %v14422_v5 = vmul.f32 18.0, %v16526_v11  ;;  %v16532_v7 = vld [vmem:[#allocation192_spill] sm:$0xff] }
 0x43c   : > { %8784 = vmatmul.mubr.msk.f32.gmra.mrb[10].mxu0 %vm4349_vm2, %v4181_v32  ;;  %v16521_v32 = vld [vmem:[#allocation118_spill] sm:$0xff]  ;;  %v14441_v11 = vmul.f32 18.0, %v16532_v7 }
 0x43d   : > { %8786 = vmatprep.mubr.msk.f32.mxu0 %vm4349_vm2, %v4182_v24  ;;  %v4186_v23 = vadd.f32 %v14397_v53, %v16521_v32  ;;  %v16522_v24 = vld [vmem:[#allocation43_spill] sm:$0xff]  ;;  %v16527_v32 = vld [vmem:[#allocation210_spill] sm:$0xff] }
 0x43e   : > { %v14409_v13 = vmul.f32 18.0, %v16522_v24  ;;  %v14425_v9 = vmul.f32 18.0, %v16527_v32  ;;  %v16528_v24 = vld [vmem:[#allocation64_spill] sm:$0xff]  ;;  %16533 = vst [vmem:[#allocation61_spill] sm:$0xff] %v14441_v11  ;;  %v4191_v7 = vadd.f32 %v14441_v11, %v14100_v27 }
 0x43f   : > { %v16638_v11 = vld [vmem:[#allocation200_spill] sm:$0xff] }
 0x440   : > { %8787 = vmatmul.mubr.msk.f32.gmra.mrb[12].mxu0 %vm4349_vm2, %v4183_v22  ;;  %v14414_v22 = vmul.f32 18.0, %v16523_v57  ;;  %v16530_v57 = vld [vmem:[#allocation219_spill] sm:$0xff] }
 0x441   : > { %8789 = vmatprep.mubr.msk.f32.mxu0 %vm4349_vm2, %v4184_v59  ;;  %v16524_v59 = vld [vmem:[#allocation76_spill] sm:$0xff]  ;;  %v14433_v21 = vmul.f32 18.0, %v16530_v57 }
 0x442   : > { %v4187_v41 = vadd.f32 %v14404_v28, %v16524_v59  ;;  %v14436_v59 = vmul.f32 18.0, %v16531_v47  ;;  %v4189_v32 = vadd.f32 %v14414_v22, %v14075_v39  ;;  %v14454_v47 = vadd.f32 %v14425_v9, %v14183_v6 }
 0x443   : > { %v14464_v57 = vadd.f32 %v14433_v21, %v14206_v12 }
 0x444   : > { %8790 = vmatmul.mubr.msk.f32.gmra.mrb[14].mxu0 %vm4349_vm2, %v4185_v42  ;;  %v4188_v42 = vadd.f32 %v14409_v13, %v16528_v24  ;;  %v16534_v24 = vld [vmem:[#allocation198_spill] sm:$0xff]  ;;  %16537 = vst [vmem:[#allocation71_spill] sm:$0xff] %v14454_v47  ;;  %v16541_v47 = vld [vmem:[#allocation203_spill] sm:$0xff] }
 0x445   : > { %8792 = vmatprep.mubr.msk.f32.mxu0 %vm4349_vm2, %v4186_v23  ;;  %v14430_v23 = vmul.f32 18.0, %v16529_v52  ;;  %v14446_v18 = vmul.f32 18.0, %v16534_v24  ;;  %v14450_v52 = vadd.f32 %v14422_v5, %v14178_v2  ;;  %16539 = vst [vmem:[#allocation110_spill] sm:$0xff] %v14464_v57  ;;  %v14468_v24 = vadd.f32 %v14436_v59, %v14228_v19  ;;  %v16547_v57 = vld [vmem:[#allocation217_spill] sm:$0xff] }
 0x446   : > { %v14492_v27 = vmul.f32 18.0, %v16547_v57 }
 0x447   : > { %16535 = vst [vmem:[#allocation39_spill] sm:$0xff] %v14446_v18  ;;  %16536 = vst [vmem:[#allocation63_spill] sm:$0xff] %v14450_v52  ;;  %v14475_v52 = vmul.f32 18.0, %v16541_v47 }
 0x448   : > { %8793 = vmatmul.mubr.msk.f32.gmra.mrb[16].mxu0 %vm4349_vm2, %v4187_v41  ;;  %v4190_v41 = vadd.f32 %v14419_v30, %v14080_v40  ;;  %16540 = vst [vmem:[#allocation69_spill] sm:$0xff] %v14468_v24  ;;  %v16543_v40 = vld [vmem:[#allocation207_spill] sm:$0xff]  ;;  %16548 = vst [vmem:[#allocation62_spill] sm:$0xff] %v14492_v27 }
 0x449   : > { %8795 = vmatprep.mubr.msk.f32.mxu0 %vm4349_vm2, %v4188_v42  ;;  %v14460_v42 = vadd.f32 %v14430_v23, %v14202_v31  ;;  %16542 = vst [vmem:[#allocation73_spill] sm:$0xff] %v14475_v52  ;;  %v14480_v39 = vmul.f32 18.0, %v16543_v40 }
 0x44b   : > { %16538 = vst [vmem:[#allocation137_spill] sm:$0xff] %v14460_v42  ;;  %v4192_v42 = vadd.f32 %v14446_v18, %v14105_v14  ;;  %16544 = vst [vmem:[#allocation135_spill] sm:$0xff] %v14480_v39  ;;  %v4194_v47 = vadd.f32 %v14480_v39, %v14128_v3 }
 0x44c   : > { %8796 = vmatmul.mubr.msk.f32.gmra.mrb[18].mxu0 %vm4349_vm2, %v4189_v32  ;;  %v4193_v32 = vadd.f32 %v14475_v52, %v14124_v62  ;;  %v16551_v62 = vld [vmem:[#allocation225_spill] sm:$0xff] }
 0x44d   : > { %8798 = vmatprep.mubr.msk.f32.mxu0 %vm4349_vm2, %v4190_v41  ;;  %v16545_v41 = vld [vmem:[#allocation213_spill] sm:$0xff]  ;;  %v14504_v14 = vmul.f32 18.0, %v16551_v62  ;;  %v6820_v62 = vadd.s32 63, %v16297_v61 }
 0x44e   : > { %v14487_v24 = vmul.f32 18.0, %v16545_v41  ;;  %v4196_v41 = vadd.f32 %v14492_v27, %v14158_v45  ;;  %v16559_v45 = vld [vmem:[#allocation107_spill] sm:$0xff]  ;;  %v16632_v52 = vld [vmem:[#allocation189_spill] sm:$0xff] }
 0x44f   : > { %16552 = vst [vmem:[#allocation67_spill] sm:$0xff] %v14504_v14  ;;  %vm6822_vm9 = vcmp.eq.s32.totalorder %v16299_v63, %v6820_v62  ;;  %v16567_v62 = vld [vmem:[#allocation79_spill] sm:$0xff]  ;;  %v14691_v18 = vmul.f32 18.0, %v16632_v52  ;;  %v16640_v52 = vld [vmem:[#allocation196_spill] sm:$0xff] }
 0x450   : > { %8799 = vmatmul.mubr.msk.f32.gmra.mrb[20].mxu0 %vm4349_vm2, %v4191_v7  ;;  %16546 = vst [vmem:[#allocation20_spill] sm:$0xff] %v14487_v24  ;;  %v4195_v40 = vadd.f32 %v14487_v24, %v14153_v15  ;;  %v16555_v15 = vld [vmem:[#allocation46_spill] sm:$0xff]  ;;  %v16626_v24 = vld [vmem:[#allocation179_spill] sm:$0xff] }
 0x451   : > { %8801 = vmatprep.mubr.msk.f32.mxu0 %vm4349_vm2, %v4192_v42  ;;  %v16549_v42 = vld [vmem:[#allocation222_spill] sm:$0xff]  ;;  %v14516_v3 = vmul.f32 18.0, %v16555_v15  ;;  %v6819_v15 = vadd.s32 63, %v16296_v54  ;;  %v16566_v54 = vld [vmem:[#allocation33_spill] sm:$0xff]  ;;  %v14679_v39 = vmul.f32 18.0, %v16626_v24  ;;  %16633 = vst [vmem:[#allocation24_spill] sm:$0xff] %v14691_v18 }
 0x452   : > { %v14499_v7 = vmul.f32 18.0, %v16549_v42  ;;  %v4198_v42 = vadd.f32 %v14504_v14, %v14183_v6  ;;  %v14529_v6 = vmul.f32 18.0, %v16559_v45  ;;  %v16634_v24 = vld [vmem:[#allocation185_spill] sm:$0xff] }
 0x453   : > { %16556 = vst [vmem:[#allocation140_spill] sm:$0xff] %v14516_v3  ;;  %vm6821_vm10 = vcmp.eq.s32.totalorder %v16299_v63, %v6819_v15  ;;  %16627 = vst [vmem:[#allocation102_spill] sm:$0xff] %v14679_v39 }
 0x454   : > { %8802 = vmatmul.mubr.msk.f32.gmra.mrb[22].mxu0 %vm4349_vm2, %v4193_v32  ;;  %16550 = vst [vmem:[#allocation115_spill] sm:$0xff] %v14499_v7  ;;  %v4197_v57 = vadd.f32 %v14499_v7, %v14178_v2  ;;  %v16553_v32 = vld [vmem:[#allocation84_spill] sm:$0xff]  ;;  %16560 = vst [vmem:[#allocation99_spill] sm:$0xff] %v14529_v6 }
 0x455   : > { %8804 = vmatprep.mubr.msk.f32.mxu0 %vm4349_vm2, %v4194_v47  ;;  %v14511_v47 = vmul.f32 18.0, %v16553_v32  ;;  %v4200_v32 = vadd.f32 %v14516_v3, %v14206_v12  ;;  %vm14563_vm5 = vmpackc.low %vm4446_vm4, %vm6821_vm10  ;;  %v16620_v7 = vld [vmem:[#allocation172_spill] sm:$0xff] }
 0x456   : > { %v14667_v27 = vmul.f32 18.0, %v16620_v7  ;;  %v16628_v7 = vld [vmem:[#allocation177_spill] sm:$0xff] }
 0x457   : > { %16554 = vst [vmem:[#allocation146_spill] sm:$0xff] %v14511_v47 }
 0x458   : > { %8805 = vmatmul.mubr.msk.f32.gmra.mrb[24].mxu0 %vm4349_vm2, %v4195_v40  ;;  %v4199_v40 = vadd.f32 %v14511_v47, %v14202_v31  ;;  %v16561_v31 = vld [vmem:[#allocation45_spill] sm:$0xff]  ;;  %v16614_v47 = vld [vmem:[#allocation162_spill] sm:$0xff]  ;;  %16621 = vst [vmem:[#allocation100_spill] sm:$0xff] %v14667_v27 }
 0x459   : > { %8807 = vmatprep.mubr.msk.f32.mxu0 %vm4349_vm2, %v4196_v41  ;;  %v16557_v41 = vld [vmem:[#allocation58_spill] sm:$0xff]  ;;  %v14655_v14 = vmul.f32 18.0, %v16614_v47  ;;  %v16622_v47 = vld [vmem:[#allocation168_spill] sm:$0xff] }
 0x45a   : > { %v14524_v2 = vmul.f32 18.0, %v16557_v41  ;;  %v16564_v41 = vld [vmem:[#allocation34_spill] sm:$0xff] }
 0x45b   : > { %v14543_v45 = vmul.f32 18.0, %v16564_v41  ;;  %16615 = vst [vmem:[#allocation105_spill] sm:$0xff] %v14655_v14 }
 0x45c   : > { %8808 = vmatmul.mubr.msk.f32.gmra.mrb[26].mxu0 %vm4349_vm2, %v4197_v57  ;;  %16558 = vst [vmem:[#allocation121_spill] sm:$0xff] %v14524_v2  ;;  %v4201_v61 = vadd.f32 %v14524_v2, %v14228_v19  ;;  %v14538_v57 = vmul.f32 18.0, %v16561_v31  ;;  %v16608_v2 = vld [vmem:[#allocation152_spill] sm:$0xff] }
 0x45d   : > { %8810 = vmatprep.mubr.msk.f32.mxu0 %vm4349_vm2, %v4198_v42  ;;  %v16563_v42 = vld [vmem:[#allocation47_spill] sm:$0xff]  ;;  %16565 = vst [vmem:[#allocation144_spill] sm:$0xff] %v14543_v45  ;;  %v4236_v41 = vadd.f32 %v14543_v45, %v16569_v51  ;;  %v14643_v3 = vmul.f32 18.0, %v16608_v2  ;;  %v16616_v2 = vld [vmem:[#allocation156_spill] sm:$0xff] }
 0x45e   : > { %16562 = vst [vmem:[#allocation151_spill] sm:$0xff] %v14538_v57  ;;  %v4234_v12 = vadd.f32 %v14529_v6, %v16563_v42  ;;  %v4235_v19 = vadd.f32 %v14538_v57, %v16566_v54  ;;  %v16590_v45 = vld [vmem:[#allocation123_spill] sm:$0xff]  ;;  %v16596_v57 = vld [vmem:[#allocation133_spill] sm:$0xff]  ;;  %v16602_v6 = vld [vmem:[#allocation142_spill] sm:$0xff] }
 0x45f   : > { %v14607_v26 = vmul.f32 18.0, %v16590_v45  ;;  %v14619_v38 = vmul.f32 18.0, %v16596_v57  ;;  %v16598_v45 = vld [vmem:[#allocation129_spill] sm:$0xff]  ;;  %v14631_v46 = vmul.f32 18.0, %v16602_v6  ;;  %v16604_v57 = vld [vmem:[#allocation139_spill] sm:$0xff]  ;;  %16609 = vst [vmem:[#allocation164_spill] sm:$0xff] %v14643_v3 }
 0x460   : > { %8811 = vmatmul.mubr.msk.f32.gmra.mrb[28].mxu0 %vm4349_vm2, %v4199_v40  ;;  %v7867_v40 = vsel %vm6822_vm9, 1.0, %v16303_v8  ;;  %v14560_v8 = vmul.f32 18.0, %v16570_v1  ;;  %v16577_v1 = vld [vmem:[#allocation91_spill] sm:$0xff]  ;;  %v16610_v6 = vld [vmem:[#allocation148_spill] sm:$0xff] }
 0x461   : > { %8813 = vmatprep.mubr.msk.f32.mxu0 %vm4349_vm2, %v4200_v32  ;;  %v14552_v32 = vmul.f32 18.0, %v16567_v62  ;;  %v14555_v31 = vpack.c.bf16 %v7867_v40, %v16487_v35  ;;  %v16574_v35 = vld [vmem:[#allocation36_spill] sm:$0xff]  ;;  %16591 = vst [vmem:[#allocation70_spill] sm:$0xff] %v14607_v26  ;;  %16597 = vst [vmem:[#allocation103_spill] sm:$0xff] %v14619_v38 }
 0x462   : > { %16571 = vst [vmem:[#allocation104_spill] sm:$0xff] %v14560_v8  ;;  %v4238_v40 = vadd.f32 %v14560_v8, %v16577_v1  ;;  %16603 = vst [vmem:[#allocation136_spill] sm:$0xff] %v14631_v46 }
 0x463   : > { %16568 = vst [vmem:[#allocation65_spill] sm:$0xff] %v14552_v32  ;;  %v4237_v15 = vadd.f32 %v14552_v32, %v16574_v35  ;;  %v16584_v32 = vld [vmem:[#allocation111_spill] sm:$0xff] }
 0x464   : > { %8814 = vmatmul.mubr.msk.f32.gmra.mrb[30].mxu0 %vm4349_vm2, %v4201_v61  ;;  %v16575_v61 = vld [vmem:[#allocation77_spill] sm:$0xff]  ;;  %v14595_v33 = vmul.f32 18.0, %v16584_v32 }
 0x465   : > { %8820 = vmatprep.mubr.msk.f32.mxu0 %vm4349_vm2, %v4234_v12  ;;  %v14575_v12 = vmul.f32 18.0, %v16575_v61  ;;  %v16592_v32 = vld [vmem:[#allocation117_spill] sm:$0xff] }
 0x466   : > { %16585 = vst [vmem:[#allocation161_spill] sm:$0xff] %v14595_v33 }
 0x467   : > { %16576 = vst [vmem:[#allocation66_spill] sm:$0xff] %v14575_v12 }
 0x468   : > { %8821 = vmatmul.mubr.msk.f32.vlgmr.msra.gmra.mrb[0].mxu0 %vm4349_vm2, %v4235_v19  ;;  %v16578_v19 = vld [vmem:[#allocation87_spill] sm:$0xff] }
 0x469   : > { %8823 = vmatprep.mubr.msk.f32.mxu0 %vm4349_vm2, %v4236_v41  ;;  %9045 = vmatpush3.bf16.msk.msra.mxu0 %vm14330_vm8, %v14336_v16  ;;  %v14583_v62 = vmul.f32 18.0, %v16578_v19  ;;  %v4239_v16 = vadd.f32 %v14575_v12, %v16580_v56  ;;  %v16581_v41 = vld [vmem:[#allocation41_spill] sm:$0xff]  ;;  %v16586_v19 = vld [vmem:[#allocation86_spill] sm:$0xff]  ;;  %v16589_v12 = vld [vmem:[#allocation112_spill] sm:$0xff] }
 0x46a   : > { %9048 = vmatprep.subr.msk.bf16.mxu0 %vm14563_vm5, %v14555_v31  ;;  %v14590_v61 = vmul.f32 18.0, %v16581_v41  ;;  %v4242_v41 = vadd.f32 %v14595_v33, %v16589_v12 }
 0x46b   : > { %16579 = vst [vmem:[#allocation149_spill] sm:$0xff] %v14583_v62  ;;  %v4240_v0 = vadd.f32 %v14583_v62, %v16583_v4 }
 0x46c   : > { %8824 = vmatmul.mubr.msk.f32.gmra.mrb[2].mxu0 %vm4349_vm2, %v4237_v15  ;;  %16582 = vst [vmem:[#allocation159_spill] sm:$0xff] %v14590_v61  ;;  %v4241_v15 = vadd.f32 %v14590_v61, %v16586_v19  ;;  %v16595_v61 = vld [vmem:[#allocation124_spill] sm:$0xff] }
 0x46d   : > { %8826 = vmatprep.mubr.msk.f32.mxu0 %vm4349_vm2, %v4238_v40  ;;  %v16587_v40 = vld [vmem:[#allocation116_spill] sm:$0xff] }
 0x46e   : > { %v14602_v8 = vmul.f32 18.0, %v16587_v40  ;;  %v4244_v40 = vadd.f32 %v14607_v26, %v16595_v61 }
 0x470   : > { %8827 = vmatmul.mubr.msk.f32.gmra.mrb[4].mxu0 %vm4349_vm2, %v4239_v16  ;;  %16588 = vst [vmem:[#allocation153_spill] sm:$0xff] %v14602_v8  ;;  %v4243_v16 = vadd.f32 %v14602_v8, %v16592_v32  ;;  %v16601_v8 = vld [vmem:[#allocation134_spill] sm:$0xff] }
 0x471   : > { %8829 = vmatprep.mubr.msk.f32.mxu0 %vm4349_vm2, %v4240_v0  ;;  %v16593_v0 = vld [vmem:[#allocation128_spill] sm:$0xff] }
 0x472   : > { %v14614_v62 = vmul.f32 18.0, %v16593_v0  ;;  %v4246_v0 = vadd.f32 %v14619_v38, %v16601_v8 }
 0x474   : > { %8830 = vmatmul.mubr.msk.f32.gmra.mrb[6].mxu0 %vm4349_vm2, %v4241_v15  ;;  %16594 = vst [vmem:[#allocation131_spill] sm:$0xff] %v14614_v62  ;;  %v4245_v15 = vadd.f32 %v14614_v62, %v16598_v45  ;;  %v16607_v62 = vld [vmem:[#allocation143_spill] sm:$0xff] }
 0x475   : > { %8832 = vmatprep.mubr.msk.f32.mxu0 %vm4349_vm2, %v4242_v41  ;;  %v16599_v41 = vld [vmem:[#allocation138_spill] sm:$0xff] }
 0x476   : > { %v14626_v33 = vmul.f32 18.0, %v16599_v41  ;;  %v4248_v41 = vadd.f32 %v14631_v46, %v16607_v62 }
 0x478   : > { %8833 = vmatmul.mubr.msk.f32.gmra.mrb[8].mxu0 %vm4349_vm2, %v4243_v16  ;;  %16600 = vst [vmem:[#allocation157_spill] sm:$0xff] %v14626_v33  ;;  %v4247_v16 = vadd.f32 %v14626_v33, %v16604_v57  ;;  %v16613_v33 = vld [vmem:[#allocation19_spill] sm:$0xff] }
 0x479   : > { %8835 = vmatprep.mubr.msk.f32.mxu0 %vm4349_vm2, %v4244_v40  ;;  %v16605_v40 = vld [vmem:[#allocation147_spill] sm:$0xff] }
 0x47a   : > { %v14638_v26 = vmul.f32 18.0, %v16605_v40  ;;  %v4250_v40 = vadd.f32 %v14643_v3, %v16613_v33 }
 0x47c   : > { %8836 = vmatmul.mubr.msk.f32.gmra.mrb[10].mxu0 %vm4349_vm2, %v4245_v15  ;;  %16606 = vst [vmem:[#allocation166_spill] sm:$0xff] %v14638_v26  ;;  %v4249_v15 = vadd.f32 %v14638_v26, %v16610_v6  ;;  %v16619_v26 = vld [vmem:[#allocation163_spill] sm:$0xff] }
 0x47d   : > { %8838 = vmatprep.mubr.msk.f32.mxu0 %vm4349_vm2, %v4246_v0  ;;  %v16611_v0 = vld [vmem:[#allocation155_spill] sm:$0xff] }
 0x47e   : > { %v14650_v38 = vmul.f32 18.0, %v16611_v0  ;;  %v4252_v0 = vadd.f32 %v14655_v14, %v16619_v26 }
 0x480   : > { %8839 = vmatmul.mubr.msk.f32.gmra.mrb[12].mxu0 %vm4349_vm2, %v4247_v16  ;;  %16612 = vst [vmem:[#allocation18_spill] sm:$0xff] %v14650_v38  ;;  %v4251_v16 = vadd.f32 %v14650_v38, %v16616_v2  ;;  %v16625_v38 = vld [vmem:[#allocation106_spill] sm:$0xff] }
 0x481   : > { %8841 = vmatprep.mubr.msk.f32.mxu0 %vm4349_vm2, %v4248_v41  ;;  %v16617_v41 = vld [vmem:[#allocation167_spill] sm:$0xff] }
 0x482   : > { %v14662_v46 = vmul.f32 18.0, %v16617_v41  ;;  %v4254_v41 = vadd.f32 %v14667_v27, %v16625_v38 }
 0x484   : > { %8842 = vmatmul.mubr.msk.f32.gmra.mrb[14].mxu0 %vm4349_vm2, %v4249_v15  ;;  %16618 = vst [vmem:[#allocation171_spill] sm:$0xff] %v14662_v46  ;;  %v4253_v15 = vadd.f32 %v14662_v46, %v16622_v47  ;;  %v16631_v46 = vld [vmem:[#allocation180_spill] sm:$0xff] }
 0x485   : > { %8844 = vmatprep.mubr.msk.f32.mxu0 %vm4349_vm2, %v4250_v40  ;;  %v16623_v40 = vld [vmem:[#allocation176_spill] sm:$0xff] }
 0x486   : > { %v14674_v3 = vmul.f32 18.0, %v16623_v40  ;;  %v4256_v40 = vadd.f32 %v14679_v39, %v16631_v46 }
 0x488   : > { %8845 = vmatmul.mubr.msk.f32.gmra.mrb[16].mxu0 %vm4349_vm2, %v4251_v16  ;;  %16624 = vst [vmem:[#allocation108_spill] sm:$0xff] %v14674_v3  ;;  %v4255_v16 = vadd.f32 %v14674_v3, %v16628_v7  ;;  %v16637_v3 = vld [vmem:[#allocation190_spill] sm:$0xff]  ;;  %v14703_v7 = vmul.f32 18.0, %v16638_v11 }
 0x489   : > { %8847 = vmatprep.mubr.msk.f32.mxu0 %vm4349_vm2, %v4252_v0  ;;  %v16629_v0 = vld [vmem:[#allocation184_spill] sm:$0xff] }
 0x48a   : > { %v14686_v14 = vmul.f32 18.0, %v16629_v0  ;;  %v4258_v0 = vadd.f32 %v14691_v18, %v16637_v3  ;;  %16639 = vst [vmem:[#allocation75_spill] sm:$0xff] %v14703_v7 }
 0x48c   : > { %8848 = vmatmul.mubr.msk.f32.gmra.mrb[18].mxu0 %vm4349_vm2, %v4253_v15  ;;  %16630 = vst [vmem:[#allocation23_spill] sm:$0xff] %v14686_v14  ;;  %v4257_v15 = vadd.f32 %v14686_v14, %v16634_v24  ;;  %v16643_v14 = vld [vmem:[#allocation211_spill] sm:$0xff] }
 0x48d   : > { %8850 = vmatprep.mubr.msk.f32.mxu0 %vm4349_vm2, %v4254_v41  ;;  %v16635_v41 = vld [vmem:[#allocation195_spill] sm:$0xff]  ;;  %v4262_v11 = vadd.f32 %v14425_v9, %v16643_v14  ;;  %v4266_v9 = vadd.f32 %v14285_v43, %v16563_v42  ;;  %v4269_v43 = vadd.f32 %v14302_v20, %v16574_v35  ;;  %v4273_v20 = vadd.f32 %v14341_v17, %v16586_v19 }
 0x48e   : > { %v14698_v27 = vmul.f32 18.0, %v16635_v41  ;;  %v16642_v41 = vld [vmem:[#allocation206_spill] sm:$0xff]  ;;  %v4278_v42 = vadd.f32 %v14373_v34, %v16601_v8  ;;  %v4282_v8 = vadd.f32 %v14397_v53, %v16613_v33  ;;  %v4284_v35 = vadd.f32 %v14409_v13, %v16619_v26  ;;  %v16647_v26 = vld [vmem:[#allocation177_spill] sm:$0xff] }
 0x48f   : > { %v4261_v18 = vadd.f32 %v14422_v5, %v16642_v41  ;;  %v4285_v33 = vadd.f32 %v14414_v22, %v16622_v47  ;;  %v16648_v13 = vld [vmem:[#allocation61_spill] sm:$0xff]  ;;  %v16653_v47 = vld [vmem:[#allocation62_spill] sm:$0xff] }
 0x490   : > { %8851 = vmatmul.mubr.msk.f32.gmra.mrb[20].mxu0 %vm4349_vm2, %v4255_v16  ;;  %16636 = vst [vmem:[#allocation26_spill] sm:$0xff] %v14698_v27  ;;  %v4259_v16 = vadd.f32 %v14698_v27, %v16640_v52  ;;  %v16645_v27 = vld [vmem:[#allocation220_spill] sm:$0xff] }
 0x491   : > { %8853 = vmatprep.mubr.msk.f32.mxu0 %vm4349_vm2, %v4256_v40  ;;  %v16641_v40 = vld [vmem:[#allocation201_spill] sm:$0xff] }
 0x492   : > { %v4260_v39 = vadd.f32 %v14703_v7, %v16641_v40  ;;  %v4264_v7 = vadd.f32 %v14433_v21, %v16645_v27  ;;  %v4268_v21 = vadd.f32 %v14295_v58, %v16569_v51  ;;  %v4272_v58 = vadd.f32 %v14323_v60, %v16583_v4 }
 0x493   : > { %v4276_v4 = vadd.f32 %v14361_v48, %v16595_v61 }
 0x494   : > { %8854 = vmatmul.mubr.msk.f32.gmra.mrb[22].mxu0 %vm4349_vm2, %v4257_v15  ;;  %v16644_v15 = vld [vmem:[#allocation215_spill] sm:$0xff] }
 0x495   : > { %8856 = vmatprep.mubr.msk.f32.mxu0 %vm4349_vm2, %v4258_v0  ;;  %v4263_v0 = vadd.f32 %v14430_v23, %v16644_v15 }
 0x498   : > { %8857 = vmatmul.mubr.msk.f32.gmra.mrb[24].mxu0 %vm4349_vm2, %v4259_v16 }
 0x499   : > { %8859 = vmatprep.mubr.msk.f32.mxu0 %vm4349_vm2, %v4260_v39  ;;  %v16646_v39 = vld [vmem:[#allocation224_spill] sm:$0xff] }
 0x49a   : > { %v4265_v5 = vadd.f32 %v14436_v59, %v16646_v39  ;;  %v4270_v59 = vadd.f32 %v14307_v44, %v16577_v1  ;;  %v4274_v44 = vadd.f32 %v14346_v55, %v16589_v12  ;;  %v4277_v55 = vadd.f32 %v14368_v49, %v16598_v45 }
 0x49b   : > { %v4281_v49 = vadd.f32 %v14392_v37, %v16610_v6  ;;  %v4286_v12 = vadd.f32 %v14419_v30, %v16625_v38  ;;  %v4287_v1 = vadd.f32 %v16648_v13, %v16647_v26  ;;  %v16650_v30 = vld [vmem:[#allocation73_spill] sm:$0xff] }
 0x49c   : > { %8860 = vmatmul.mubr.msk.f32.gmra.mrb[26].mxu0 %vm4349_vm2, %v4261_v18  ;;  %v4267_v18 = vadd.f32 %v14290_v10, %v16566_v54  ;;  %v4271_v10 = vadd.f32 %v14318_v36, %v16580_v56  ;;  %v4275_v36 = vadd.f32 %v14356_v25, %v16592_v32  ;;  %v4279_v25 = vadd.f32 %v14380_v29, %v16604_v57  ;;  %v16649_v56 = vld [vmem:[#allocation39_spill] sm:$0xff] }
 0x49d   : > { %8862 = vmatprep.mubr.msk.f32.mxu0 %vm4349_vm2, %v4262_v11  ;;  %v4280_v54 = vadd.f32 %v14385_v50, %v16607_v62  ;;  %v4283_v50 = vadd.f32 %v14404_v28, %v16616_v2  ;;  %v4288_v61 = vadd.f32 %v16649_v56, %v16631_v46  ;;  %v4289_v38 = vadd.f32 %v16650_v30, %v16634_v24  ;;  %v16651_v32 = vld [vmem:[#allocation135_spill] sm:$0xff]  ;;  %v16652_v46 = vld [vmem:[#allocation20_spill] sm:$0xff]  ;;  %v16670_v56 = vld [vmem:[#allocation66_spill] sm:$0xff] }
 0x49e   : > { %v4290_v45 = vadd.f32 %v16651_v32, %v16637_v3  ;;  %v4291_v6 = vadd.f32 %v16652_v46, %v16640_v52  ;;  %v16654_v3 = vld [vmem:[#allocation115_spill] sm:$0xff]  ;;  %v16672_v32 = vld [vmem:[#allocation149_spill] sm:$0xff] }
 0x49f   : > { %v4293_v16 = vadd.f32 %v16654_v3, %v16642_v41  ;;  %v16675_v3 = vld [vmem:[#allocation37_spill] sm:$0xff] }
 0x4a0   : > { %8863 = vmatmul.mubr.msk.f32.gmra.mrb[28].mxu0 %vm4349_vm2, %v4263_v0  ;;  %v16655_v0 = vld [vmem:[#allocation67_spill] sm:$0xff] }
 0x4a1   : > { %8865 = vmatprep.mubr.msk.f32.mxu0 %vm4349_vm2, %v4264_v7  ;;  %v4292_v7 = vadd.f32 %v16653_v47, %v16641_v40  ;;  %v16656_v40 = vld [vmem:[#allocation146_spill] sm:$0xff]  ;;  %v16674_v47 = vld [vmem:[#allocation159_spill] sm:$0xff] }
 0x4a4   : > { %8866 = vmatmul.mubr.msk.f32.gmra.mrb[30].mxu0 %vm4349_vm2, %v4265_v5  ;;  %v4294_v5 = vadd.f32 %v16655_v0, %v16643_v14  ;;  %v16658_v14 = vld [vmem:[#allocation121_spill] sm:$0xff] }
 0x4a5   : > { %8872 = vmatprep.mubr.msk.f32.mxu0 %vm4349_vm2, %v4266_v9  ;;  %v4295_v9 = vadd.f32 %v16656_v40, %v16644_v15  ;;  %v16678_v40 = vld [vmem:[#allocation153_spill] sm:$0xff] }
 0x4a8   : > { %8873 = vmatmul.mubr.msk.f32.vlgmr.msra.gmra.mrb[0].mxu0 %vm4349_vm2, %v4267_v18 }
 0x4a9   : > { %8875 = vmatprep.mubr.msk.f32.mxu0 %vm4349_vm2, %v4268_v21  ;;  %9051 = vmatpush3.bf16.msk.msra.mxu0 %vm14563_vm5, %v14555_v31  ;;  %v16657_v21 = vld [vmem:[#allocation140_spill] sm:$0xff] }
 0x4aa   : > { %v14758_v51 = vpop.f32.mrb[130].mxu1 }
 0x4ab   : > { %v14762_v60 = vpop.f32.mrb[131].mxu1 }
 0x4ac   : > { %8876 = vmatmul.mubr.msk.f32.gmra.mrb[2].mxu0 %vm4349_vm2, %v4269_v43  ;;  %v4296_v43 = vadd.f32 %v16657_v21, %v16645_v27  ;;  %v16661_v27 = vld [vmem:[#allocation30_spill] sm:$0xff] }
 0x4ad   : > { %8878 = vmatprep.mubr.msk.f32.mxu0 %vm4349_vm2, %v4270_v59  ;;  %v4297_v59 = vadd.f32 %v16658_v14, %v16646_v39  ;;  %v16679_v21 = vld [vmem:[#allocation94_spill] sm:$0xff] }
 0x4ae   : > { %v14768_v17 = vpop.f32.mrb[132].mxu1 }
 0x4af   : > { %v14772_v23 = vpop.f32.mrb[133].mxu1 }
 0x4b0   : > { %8879 = vmatmul.mubr.msk.f32.gmra.mrb[4].mxu0 %vm4349_vm2, %v4271_v10 }
 0x4b1   : > { %8881 = vmatprep.mubr.msk.f32.mxu0 %vm4349_vm2, %v4272_v58  ;;  %v16659_v58 = vld [vmem:[#allocation17_spill] sm:$0xff] }
 0x4b4   : > { %8882 = vmatmul.mubr.msk.f32.gmra.mrb[6].mxu0 %vm4349_vm2, %v4273_v20  ;;  %v16660_v20 = vld [vmem:[#allocation99_spill] sm:$0xff] }
 0x4b5   : > { %8884 = vmatprep.mubr.msk.f32.mxu0 %vm4349_vm2, %v4274_v44  ;;  %v4298_v44 = vadd.f32 %v16660_v20, %v16659_v58  ;;  %v16682_v58 = vld [vmem:[#allocation131_spill] sm:$0xff] }
 0x4b6   : > { %v14780_v48 = vpop.f32.mrb[134].mxu1 }
 0x4b7   : > { %v14784_v31 = vpop.f32.mrb[135].mxu1 }
 0x4b8   : > { %8885 = vmatmul.mubr.msk.f32.gmra.mrb[8].mxu0 %vm4349_vm2, %v4275_v36  ;;  %v16662_v36 = vld [vmem:[#allocation151_spill] sm:$0xff] }
 0x4b9   : > { %8887 = vmatprep.mubr.msk.f32.mxu0 %vm4349_vm2, %v4276_v4  ;;  %v4299_v4 = vadd.f32 %v16662_v36, %v16661_v27  ;;  %v16684_v27 = vld [vmem:[#allocation103_spill] sm:$0xff] }
 0x4ba   : > { %v14790_v34 = vpop.f32.mrb[136].mxu1 }
 0x4bb   : > { %v14794_v29 = vpop.f32.mrb[137].mxu1 }
 0x4bc   : > { %8888 = vmatmul.mubr.msk.f32.gmra.mrb[10].mxu0 %vm4349_vm2, %v4277_v55 }
 0x4bd   : > { %8890 = vmatprep.mubr.msk.f32.mxu0 %vm4349_vm2, %v4278_v42  ;;  %v16663_v42 = vld [vmem:[#allocation74_spill] sm:$0xff] }
 0x4c0   : > { %8891 = vmatmul.mubr.msk.f32.gmra.mrb[12].mxu0 %vm4349_vm2, %v4279_v25  ;;  %v14800_v63 = vpop.f32.mrb[138].mxu1  ;;  %v16664_v25 = vld [vmem:[#allocation144_spill] sm:$0xff] }
 0x4c1   : > { %8893 = vmatprep.mubr.msk.f32.mxu0 %vm4349_vm2, %v4280_v54  ;;  %v14804_v37 = vpop.f32.mrb[139].mxu1  ;;  %v4300_v54 = vadd.f32 %v16664_v25, %v16663_v42  ;;  %v16686_v42 = vld [vmem:[#allocation157_spill] sm:$0xff] }
 0x4c4   : > { %8894 = vmatmul.mubr.msk.f32.gmra.mrb[14].mxu0 %vm4349_vm2, %v4281_v49  ;;  %v14810_v53 = vpop.f32.mrb[140].mxu1  ;;  %v16665_v49 = vld [vmem:[#allocation56_spill] sm:$0xff] }
 0x4c5   : > { %8896 = vmatprep.mubr.msk.f32.mxu0 %vm4349_vm2, %v4282_v8  ;;  %v14814_v28 = vpop.f32.mrb[141].mxu1  ;;  %v16666_v8 = vld [vmem:[#allocation65_spill] sm:$0xff] }
 0x4c8   : > { %8897 = vmatmul.mubr.msk.f32.gmra.mrb[16].mxu0 %vm4349_vm2, %v4283_v50  ;;  %v4301_v50 = vadd.f32 %v16666_v8, %v16665_v49  ;;  %v16688_v49 = vld [vmem:[#allocation136_spill] sm:$0xff] }
 0x4c9   : > { %8899 = vmatprep.mubr.msk.f32.mxu0 %vm4349_vm2, %v4284_v35 }
 0x4ca   : > { %v14820_v62 = vpop.f32.mrb[142].mxu1 }
 0x4cb   : > { %v14824_v22 = vpop.f32.mrb[143].mxu1 }
 0x4cc   : > { %8900 = vmatmul.mubr.msk.f32.gmra.mrb[18].mxu0 %vm4349_vm2, %v4285_v33  ;;  %v16667_v33 = vld [vmem:[#allocation226_spill] sm:$0xff] }
 0x4cd   : > { %8902 = vmatprep.mubr.msk.f32.mxu0 %vm4349_vm2, %v4286_v12  ;;  %v16668_v12 = vld [vmem:[#allocation104_spill] sm:$0xff] }
 0x4ce   : > { %v14830_v19 = vpop.f32.mrb[144].mxu1  ;;  %v4302_v26 = vadd.f32 %v16668_v12, %v16667_v33  ;;  %v16690_v33 = vld [vmem:[#allocation166_spill] sm:$0xff] }
 0x4cf   : > { %v14834_v57 = vpop.f32.mrb[145].mxu1 }
 0x4d0   : > { %8903 = vmatmul.mubr.msk.f32.gmra.mrb[20].mxu0 %vm4349_vm2, %v4287_v1  ;;  %v16669_v1 = vld [vmem:[#allocation88_spill] sm:$0xff] }
 0x4d1   : > { %8905 = vmatprep.mubr.msk.f32.mxu0 %vm4349_vm2, %v4288_v61  ;;  %v4303_v61 = vadd.f32 %v16670_v56, %v16669_v1  ;;  %v16692_v1 = vld [vmem:[#allocation164_spill] sm:$0xff] }
 0x4d4   : > { %8906 = vmatmul.mubr.msk.f32.gmra.mrb[22].mxu0 %vm4349_vm2, %v4289_v38  ;;  %v14840_v2 = vpop.f32.mrb[146].mxu1  ;;  %v16671_v38 = vld [vmem:[#allocation38_spill] sm:$0xff] }
 0x4d5   : > { %8908 = vmatprep.mubr.msk.f32.mxu0 %vm4349_vm2, %v4290_v45  ;;  %v14844_v24 = vpop.f32.mrb[147].mxu1  ;;  %v4304_v45 = vadd.f32 %v16672_v32, %v16671_v38  ;;  %v16694_v38 = vld [vmem:[#allocation18_spill] sm:$0xff] }
 0x4d8   : > { %8909 = vmatmul.mubr.msk.f32.gmra.mrb[24].mxu0 %vm4349_vm2, %v4291_v6  ;;  %v16673_v6 = vld [vmem:[#allocation54_spill] sm:$0xff] }
 0x4d9   : > { %8911 = vmatprep.mubr.msk.f32.mxu0 %vm4349_vm2, %v4292_v7  ;;  %v14850_v11 = vpop.f32.mrb[148].mxu1  ;;  %v4305_v7 = vadd.f32 %v16674_v47, %v16673_v6  ;;  %v16696_v6 = vld [vmem:[#allocation105_spill] sm:$0xff] }
 0x4da   : > { %v14854_v52 = vpop.f32.mrb[149].mxu1 }
 0x4dc   : > { %8912 = vmatmul.mubr.msk.f32.gmra.mrb[26].mxu0 %vm4349_vm2, %v4293_v16  ;;  %v16676_v16 = vld [vmem:[#allocation161_spill] sm:$0xff] }
 0x4dd   : > { %8914 = vmatprep.mubr.msk.f32.mxu0 %vm4349_vm2, %v4294_v5  ;;  %v14860_v18 = vpop.f32.mrb[150].mxu1  ;;  %v4306_v0 = vadd.f32 %v16676_v16, %v16675_v3  ;;  %v16677_v5 = vld [vmem:[#allocation92_spill] sm:$0xff]  ;;  %v16698_v3 = vld [vmem:[#allocation171_spill] sm:$0xff] }
 0x4de   : > { %v14864_v41 = vpop.f32.mrb[151].mxu1 }
 0x4e0   : > { %8915 = vmatmul.mubr.msk.f32.gmra.mrb[28].mxu0 %vm4349_vm2, %v4295_v9  ;;  %v4307_v9 = vadd.f32 %v16678_v40, %v16677_v5  ;;  %v16700_v5 = vld [vmem:[#allocation100_spill] sm:$0xff] }
 0x4e1   : > { %8917 = vmatprep.mubr.msk.f32.mxu0 %vm4349_vm2, %v4296_v43  ;;  %v16680_v43 = vld [vmem:[#allocation70_spill] sm:$0xff] }
 0x4e2   : > { %v4308_v14 = vadd.f32 %v16680_v43, %v16679_v21  ;;  %v16702_v21 = vld [vmem:[#allocation108_spill] sm:$0xff] }
 0x4e3   : > { %v14870_v10 = vpop.f32.mrb[152].mxu1 }
 0x4e4   : > { %v14874_v15 = vpop.f32.mrb[153].mxu1  ;;  %8918 = vmatmul.mubr.msk.f32.gmra.mrb[30].mxu0 %vm4349_vm2, %v4297_v59  ;;  %v16681_v59 = vld [vmem:[#allocation95_spill] sm:$0xff] }
 0x4e5   : > { %8924 = vmatprep.mubr.msk.f32.mxu0 %vm4349_vm2, %v4298_v44  ;;  %v4309_v20 = vadd.f32 %v16682_v58, %v16681_v59  ;;  %v16683_v44 = vld [vmem:[#allocation53_spill] sm:$0xff]  ;;  %v16704_v59 = vld [vmem:[#allocation102_spill] sm:$0xff] }
 0x4e6   : > { %v4310_v36 = vadd.f32 %v16684_v27, %v16683_v44  ;;  %v16706_v44 = vld [vmem:[#allocation23_spill] sm:$0xff] }
 0x4e8   : > { %v14880_v55 = vpop.f32.mrb[154].mxu1  ;;  %8925 = vmatmul.mubr.msk.f32.vlgmr.msra.gmra.mrb[0].mxu0 %vm4349_vm2, %v4299_v4  ;;  %v16685_v4 = vld [vmem:[#allocation80_spill] sm:$0xff] }
 0x4e9   : > { %v14884_v39 = vpop.f32.mrb[155].mxu1  ;;  %8927 = vmatprep.mubr.msk.f32.mxu0 %vm4349_vm2, %v4300_v54  ;;  %v4311_v25 = vadd.f32 %v16686_v42, %v16685_v4  ;;  %v16687_v54 = vld [vmem:[#allocation31_spill] sm:$0xff]  ;;  %v16708_v4 = vld [vmem:[#allocation24_spill] sm:$0xff] }
 0x4ea   : > { %v4312_v8 = vadd.f32 %v16688_v49, %v16687_v54  ;;  %v16710_v54 = vld [vmem:[#allocation26_spill] sm:$0xff] }
 0x4ec   : > { %v14890_v35 = vpop.f32.mrb[156].mxu1  ;;  %8928 = vmatmul.mubr.msk.f32.gmra.mrb[2].mxu0 %vm4349_vm2, %v4301_v50  ;;  %v16689_v50 = vld [vmem:[#allocation114_spill] sm:$0xff] }
 0x4ed   : > { %v14894_v13 = vpop.f32.mrb[157].mxu1  ;;  %8930 = vmatprep.mubr.msk.f32.mxu0 %vm4349_vm2, %v4302_v26  ;;  %v4313_v12 = vadd.f32 %v16690_v33, %v16689_v50  ;;  %v16691_v26 = vld [vmem:[#allocation118_spill] sm:$0xff]  ;;  %v16712_v50 = vld [vmem:[#allocation75_spill] sm:$0xff] }
 0x4ee   : > { %v4314_v56 = vadd.f32 %v16692_v1, %v16691_v26  ;;  %v16714_v26 = vld [vmem:[#allocation71_spill] sm:$0xff]  ;;  %v16715_v1 = vld [vmem:[#allocation137_spill] sm:$0xff] }
 0x4f0   : > { %8931 = vmatmul.mubr.msk.f32.gmra.mrb[4].mxu0 %vm4349_vm2, %v4303_v61  ;;  %v16693_v61 = vld [vmem:[#allocation76_spill] sm:$0xff] }
 0x4f1   : > { %v14900_v30 = vpop.f32.mrb[158].mxu1  ;;  %8933 = vmatprep.mubr.msk.f32.mxu0 %vm4349_vm2, %v4304_v45  ;;  %v4315_v32 = vadd.f32 %v16694_v38, %v16693_v61  ;;  %v16695_v45 = vld [vmem:[#allocation64_spill] sm:$0xff]  ;;  %v16717_v61 = vld [vmem:[#allocation69_spill] sm:$0xff] }
 0x4f2   : > { %v14904_v46 = vpop.f32.mrb[159].mxu1  ;;  %v4316_v47 = vadd.f32 %v16696_v6, %v16695_v45 }
 0x4f4   : > { %8934 = vmatmul.mubr.msk.f32.gmra.mrb[6].mxu0 %vm4349_vm2, %v4305_v7  ;;  %v16697_v7 = vld [vmem:[#allocation93_spill] sm:$0xff] }
 0x4f5   : > { %8936 = vmatprep.mubr.msk.f32.mxu0 %vm4349_vm2, %v4306_v0  ;;  %v4317_v16 = vadd.f32 %v16698_v3, %v16697_v7  ;;  %v16699_v0 = vld [vmem:[#allocation35_spill] sm:$0xff] }
 0x4f6   : > { %v4318_v40 = vadd.f32 %v16700_v5, %v16699_v0 }
 0x4f8   : > { %8937 = vmatmul.mubr.msk.f32.gmra.mrb[8].mxu0 %vm4349_vm2, %v4307_v9  ;;  %v16701_v9 = vld [vmem:[#allocation127_spill] sm:$0xff] }
 0x4f9   : > { %8939 = vmatprep.mubr.msk.f32.mxu0 %vm4349_vm2, %v4308_v14  ;;  %v4319_v43 = vadd.f32 %v16702_v21, %v16701_v9  ;;  %v16703_v14 = vld [vmem:[#allocation119_spill] sm:$0xff] }
 0x4fa   : > { %v4320_v58 = vadd.f32 %v16704_v59, %v16703_v14 }
 0x4fc   : > { %8940 = vmatmul.mubr.msk.f32.gmra.mrb[10].mxu0 %vm4349_vm2, %v4309_v20  ;;  %v16705_v20 = vld [vmem:[#allocation50_spill] sm:$0xff] }
 0x4fd   : > { %8942 = vmatprep.mubr.msk.f32.mxu0 %vm4349_vm2, %v4310_v36  ;;  %v4321_v27 = vadd.f32 %v16706_v44, %v16705_v20  ;;  %v16707_v36 = vld [vmem:[#allocation132_spill] sm:$0xff] }
 0x4fe   : > { %v4322_v42 = vadd.f32 %v16708_v4, %v16707_v36 }
 0x500   : > { %8943 = vmatmul.mubr.msk.f32.gmra.mrb[12].mxu0 %vm4349_vm2, %v4311_v25  ;;  %v16709_v25 = vld [vmem:[#allocation125_spill] sm:$0xff] }
 0x501   : > { %8945 = vmatprep.mubr.msk.f32.mxu0 %vm4349_vm2, %v4312_v8  ;;  %v4323_v49 = vadd.f32 %v16710_v54, %v16709_v25  ;;  %v16711_v8 = vld [vmem:[#allocation72_spill] sm:$0xff] }
 0x502   : > { %v4324_v33 = vadd.f32 %v16712_v50, %v16711_v8 }
 0x504   : > { %8946 = vmatmul.mubr.msk.f32.gmra.mrb[14].mxu0 %vm4349_vm2, %v4313_v12  ;;  %v16713_v12 = vld [vmem:[#allocation63_spill] sm:$0xff] }
 0x505   : > { %8948 = vmatprep.mubr.msk.f32.mxu0 %vm4349_vm2, %v4314_v56  ;;  %v16716_v56 = vld [vmem:[#allocation110_spill] sm:$0xff] }
 0x508   : > { %8949 = vmatmul.mubr.msk.f32.gmra.mrb[16].mxu0 %vm4349_vm2, %v4315_v32  ;;  %v16719_v32 = vld [vmem:[#allocation78_spill] sm:$0xff] }
 0x509   : > { %8951 = vmatprep.mubr.msk.f32.mxu0 %vm4349_vm2, %v4316_v47  ;;  %v16720_v47 = vld [vmem:[#allocation122_spill] sm:$0xff] }
 0x50c   : > { %8952 = vmatmul.mubr.msk.f32.gmra.mrb[18].mxu0 %vm4349_vm2, %v4317_v16 }
 0x50d   : > { %8954 = vmatprep.mubr.msk.f32.mxu0 %vm4349_vm2, %v4318_v40 }
 0x510   : > { %8955 = vmatmul.mubr.msk.f32.gmra.mrb[20].mxu0 %vm4349_vm2, %v4319_v43 }
 0x511   : > { %8957 = vmatprep.mubr.msk.f32.mxu0 %vm4349_vm2, %v4320_v58 }
 0x514   : > { %8958 = vmatmul.mubr.msk.f32.gmra.mrb[22].mxu0 %vm4349_vm2, %v4321_v27 }
 0x515   : > { %8960 = vmatprep.mubr.msk.f32.mxu0 %vm4349_vm2, %v4322_v42 }
 0x518   : > { %8961 = vmatmul.mubr.msk.f32.gmra.mrb[24].mxu0 %vm4349_vm2, %v4323_v49 }
 0x519   : > { %8963 = vmatprep.mubr.msk.f32.mxu0 %vm4349_vm2, %v4324_v33 }
 0x51c   : > { %8964 = vmatmul.mubr.msk.f32.gmra.mrb[26].mxu0 %vm4349_vm2, %v16713_v12 }
 0x51d   : > { %8966 = vmatprep.mubr.msk.f32.mxu0 %vm4349_vm2, %v16714_v26 }
 0x520   : > { %8967 = vmatmul.mubr.msk.f32.gmra.mrb[28].mxu0 %vm4349_vm2, %v16715_v1 }
 0x521   : > { %8969 = vmatprep.mubr.msk.f32.mxu0 %vm4349_vm2, %v16716_v56 }
 0x524   : > { %8970 = vmatmul.mubr.msk.f32.gmra.mrb[30].mxu0 %vm4349_vm2, %v16717_v61 }
 0x5bb   : > { %v8926_v38 = vpop.f32.mrb[0].mxu0 }
 0x5bc   : > { %v9054_v45 = vadd.f32 %v8926_v38, %v16719_v32  ;;  %v6992_v6 = vpop.f32.mrb[1].mxu0 }
 0x5bd   : > { %v9055_v7 = vadd.f32 %v6992_v6, %v16720_v47 }
 0x5be   : > { %7184 = vst [vmem:[%s14982_s15 + $0x8] sm:$0xff] %v9054_v45 }
 0x5bf   : > { %7183 = vst [vmem:[%s14982_s15] sm:$0xff] %v9055_v7  ;;  %v8929_v3 = vpop.f32.mrb[2].mxu0 }
 0x5c0   : > { %v9056_v16 = vadd.f32 %v8929_v3, %v14758_v51  ;;  %v7002_v0 = vpop.f32.mrb[3].mxu0 }
 0x5c1   : > { %v9057_v5 = vadd.f32 %v7002_v0, %v14762_v60 }
 0x5c2   : > { %7186 = vst [vmem:[%s14982_s15 + $0x18] sm:$0xff] %v9056_v16 }
 0x5c3   : > { %7185 = vst [vmem:[%s14982_s15 + $0x10] sm:$0xff] %v9057_v5  ;;  %v8932_v40 = vpop.f32.mrb[4].mxu0 }
 0x5c4   : > { %v9058_v9 = vadd.f32 %v8932_v40, %v14768_v17  ;;  %v7012_v21 = vpop.f32.mrb[5].mxu0 }
 0x5c5   : > { %v9059_v43 = vadd.f32 %v7012_v21, %v14772_v23 }
 0x5c6   : > { %7188 = vst [vmem:[%s14982_s15 + $0x28] sm:$0xff] %v9058_v9 }
 0x5c7   : > { %7187 = vst [vmem:[%s14982_s15 + $0x20] sm:$0xff] %v9059_v43  ;;  %v8935_v14 = vpop.f32.mrb[6].mxu0 }
 0x5c8   : > { %v9060_v51 = vadd.f32 %v8935_v14, %v14780_v48  ;;  %v7022_v59 = vpop.f32.mrb[7].mxu0 }
 0x5c9   : > { %v9061_v60 = vadd.f32 %v7022_v59, %v14784_v31 }
 0x5ca   : > { %7190 = vst [vmem:[%s14982_s15 + $0x38] sm:$0xff] %v9060_v51 }
 0x5cb   : > { %7189 = vst [vmem:[%s14982_s15 + $0x30] sm:$0xff] %v9061_v60  ;;  %v8938_v58 = vpop.f32.mrb[8].mxu0 }
 0x5cc   : > { %v9062_v17 = vadd.f32 %v8938_v58, %v14790_v34  ;;  %v7032_v20 = vpop.f32.mrb[9].mxu0 }
 0x5cd   : > { %v9063_v23 = vadd.f32 %v7032_v20, %v14794_v29 }
 0x5ce   : > { %7192 = vst [vmem:[%s14982_s15 + $0x48] sm:$0xff] %v9062_v17 }
 0x5cf   : > { %7191 = vst [vmem:[%s14982_s15 + $0x40] sm:$0xff] %v9063_v23  ;;  %v8941_v44 = vpop.f32.mrb[10].mxu0 }
 0x5d0   : > { %v9064_v48 = vadd.f32 %v8941_v44, %v14800_v63  ;;  %v7042_v27 = vpop.f32.mrb[11].mxu0 }
 0x5d1   : > { %v9065_v31 = vadd.f32 %v7042_v27, %v14804_v37 }
 0x5d2   : > { %7194 = vst [vmem:[%s14982_s15 + $0x58] sm:$0xff] %v9064_v48 }
 0x5d3   : > { %7193 = vst [vmem:[%s14982_s15 + $0x50] sm:$0xff] %v9065_v31  ;;  %v8944_v36 = vpop.f32.mrb[12].mxu0 }
 0x5d4   : > { %v9066_v34 = vadd.f32 %v8944_v36, %v14810_v53  ;;  %v7052_v4 = vpop.f32.mrb[13].mxu0 }
 0x5d5   : > { %v9067_v29 = vadd.f32 %v7052_v4, %v14814_v28 }
 0x5d6   : > { %7196 = vst [vmem:[%s14982_s15 + $0x68] sm:$0xff] %v9066_v34 }
 0x5d7   : > { %7195 = vst [vmem:[%s14982_s15 + $0x60] sm:$0xff] %v9067_v29  ;;  %v8947_v42 = vpop.f32.mrb[14].mxu0 }
 0x5d8   : > { %v9068_v63 = vadd.f32 %v8947_v42, %v14820_v62  ;;  %v7062_v25 = vpop.f32.mrb[15].mxu0 }
 0x5d9   : > { %v9069_v37 = vadd.f32 %v7062_v25, %v14824_v22 }
 0x5da   : > { %7198 = vst [vmem:[%s14982_s15 + $0x78] sm:$0xff] %v9068_v63 }
 0x5db   : > { %7197 = vst [vmem:[%s14982_s15 + $0x70] sm:$0xff] %v9069_v37  ;;  %v8950_v54 = vpop.f32.mrb[16].mxu0 }
 0x5dc   : > { %v9070_v53 = vadd.f32 %v8950_v54, %v14830_v19  ;;  %v7072_v49 = vpop.f32.mrb[17].mxu0 }
 0x5dd   : > { %v9071_v28 = vadd.f32 %v7072_v49, %v14834_v57 }
 0x5de   : > { %7200 = vst [vmem:[%s14982_s15 + $0x88] sm:$0xff] %v9070_v53 }
 0x5df   : > { %7199 = vst [vmem:[%s14982_s15 + $0x80] sm:$0xff] %v9071_v28  ;;  %v8953_v8 = vpop.f32.mrb[18].mxu0 }
 0x5e0   : > { %v9072_v62 = vadd.f32 %v8953_v8, %v14840_v2  ;;  %v7082_v50 = vpop.f32.mrb[19].mxu0 }
 0x5e1   : > { %v9073_v22 = vadd.f32 %v7082_v50, %v14844_v24 }
 0x5e2   : > { %7202 = vst [vmem:[%s14982_s15 + $0x98] sm:$0xff] %v9072_v62 }
 0x5e3   : > { %7201 = vst [vmem:[%s14982_s15 + $0x90] sm:$0xff] %v9073_v22  ;;  %v8956_v33 = vpop.f32.mrb[20].mxu0 }
 0x5e4   : > { %v9074_v19 = vadd.f32 %v8956_v33, %v14850_v11  ;;  %v7092_v12 = vpop.f32.mrb[21].mxu0 }
 0x5e5   : > { %v9075_v57 = vadd.f32 %v7092_v12, %v14854_v52 }
 0x5e6   : > { %7204 = vst [vmem:[%s14982_s15 + $0xa8] sm:$0xff] %v9074_v19 }
 0x5e7   : > { %7203 = vst [vmem:[%s14982_s15 + $0xa0] sm:$0xff] %v9075_v57  ;;  %v8959_v26 = vpop.f32.mrb[22].mxu0 }
 0x5e8   : > { %v9076_v2 = vadd.f32 %v8959_v26, %v14860_v18  ;;  %v7102_v1 = vpop.f32.mrb[23].mxu0 }
 0x5e9   : > { %v9077_v24 = vadd.f32 %v7102_v1, %v14864_v41 }
 0x5ea   : > { %7206 = vst [vmem:[%s14982_s15 + $0xb8] sm:$0xff] %v9076_v2 }
 0x5eb   : > { %7205 = vst [vmem:[%s14982_s15 + $0xb0] sm:$0xff] %v9077_v24  ;;  %v8962_v56 = vpop.f32.mrb[24].mxu0 }
 0x5ec   : > { %v9078_v11 = vadd.f32 %v8962_v56, %v14870_v10  ;;  %v7112_v61 = vpop.f32.mrb[25].mxu0 }
 0x5ed   : > { %v9079_v52 = vadd.f32 %v7112_v61, %v14874_v15 }
 0x5ee   : > { %7208 = vst [vmem:[%s14982_s15 + $0xc8] sm:$0xff] %v9078_v11 }
 0x5ef   : > { %7207 = vst [vmem:[%s14982_s15 + $0xc0] sm:$0xff] %v9079_v52  ;;  %v8965_v38 = vpop.f32.mrb[26].mxu0 }
 0x5f0   : > { %v9080_v18 = vadd.f32 %v8965_v38, %v14880_v55  ;;  %v7122_v32 = vpop.f32.mrb[27].mxu0 }
 0x5f1   : > { %v9081_v41 = vadd.f32 %v7122_v32, %v14884_v39 }
 0x5f2   : > { %7210 = vst [vmem:[%s14982_s15 + $0xd8] sm:$0xff] %v9080_v18 }
 0x5f3   : > { %7209 = vst [vmem:[%s14982_s15 + $0xd0] sm:$0xff] %v9081_v41  ;;  %v8968_v45 = vpop.f32.mrb[28].mxu0 }
 0x5f4   : > { %v9082_v6 = vadd.f32 %v8968_v45, %v14890_v35  ;;  %v7132_v10 = vpop.f32.mrb[29].mxu0 }
 0x5f5   : > { %v9083_v47 = vadd.f32 %v7132_v10, %v14894_v13 }
 0x5f6   : > { %7212 = vst [vmem:[%s14982_s15 + $0xe8] sm:$0xff] %v9082_v6 }
 0x5f7   : > { %7211 = vst [vmem:[%s14982_s15 + $0xe0] sm:$0xff] %v9083_v47  ;;  %v8971_v15 = vpop.f32.mrb[30].mxu0 }
 0x5f8   : > { %v9084_v7 = vadd.f32 %v8971_v15, %v14900_v30  ;;  %v7142_v3 = vpop.f32.mrb[31].mxu0 }
 0x5f9   : > { %v9085_v55 = vadd.f32 %v7142_v3, %v14904_v46 }
 0x5fa   : > { %7214 = vst [vmem:[%s14982_s15 + $0xf8] sm:$0xff] %v9084_v7 }
 0x5fb   : > { %7213 = vst [vmem:[%s14982_s15 + $0xf0] sm:$0xff] %v9085_v55 }
 0x5fc PF: > { %s27_s25 = sadd.s32 1, %s9805_s25  }
 0x5fd   : > { %p24_p7 = scmp.ge.s32.totalorder %s27_s25, 4  }
 0x5ff   :  { %26 = sbr.rel (!%p24_p7) target bundleno = 8 (0x8), region = 133 }
 0x606   :  { %7237 = vsyncpa [#allocation3], 1 }
 0x607   :  { %7239 = vsyncpa [#allocation3 + $0x1], 1 }
 0x608   :  { %7240 = vsyncpa [#allocation5], 1 }
 0x609   :  { %7241 = vsyncpa [#allocation8], 1 }
 0x60a   :  { %7242 = vsyncpa [#allocation11], 1 }

// kernel: tile.0
= control target key start
LH: loop header
LB: loop body
LE: loop exit
PB: predicated region body
PF: predicated region fallthrough
CT: control target
= control target key end

     0   :  { %vm131_vm0 = vcmask 1047556   ;;  %vm147_vm1 = vcmask 162816   ;;  %vm133_vm2 = vcmask 293888   ;;  %s213_s10 = smov 36   ;;  %s214_s11 = smov 72   ;;  %vm151_vm3 = vcmask 130048   ;;  %s240_s0 = inlined_call_operand.vmem [shape: bf16[4,36,8], index: 0, kind: input, shape index: {}]   ;;  %s241_s1 = inlined_call_operand.vmem [shape: bf16[144,8], index: 1, kind: output, shape index: {}]  }
   0x1   :  { %v196_v0 = vld [vmem:[%s240_s0 + $0x8] sm:$0xff]   ;;  %v200_v1 = vld [vmem:[%s240_s0] sm:$0xff]   ;;  %s212_s0 = smov 108   ;;  %vm154_vm4 = vcmask 1048416   ;;  %vm164_vm5 = vcmask 884288   ;;  %vm174_vm6 = vcmask 589088  }
   0x2   :  { %v17_v2 = vunpack.c.h.bf16 %v196_v0  ;;  %v49_v3 = vunpack.c.l.bf16 %v196_v0  ;;  %v81_v4 = vunpack.c.h.bf16 %v200_v1  ;;  %v112_v5 = vunpack.c.l.bf16 %v200_v1 }
   0x4   :  { %20 = vst [vmem:[#allocation1 + $0x30] ss:$8 sps:$4 sm:$0xff] %v17_v2   ;;  %52 = vst [vmem:[#allocation1 + $0x20] ss:$8 sps:$4 sm:$0xff] %v49_v3  }
   0x5   :  { %84 = vst [vmem:[#allocation1 + $0x10] ss:$8 sps:$4 sm:$0xff] %v81_v4   ;;  %115 = vst [vmem:[#allocation1] ss:$8 sps:$4 sm:$0xff] %v112_v5  }
   0xb   :  { %v138_v6 = vld [vmem:[#allocation1 + $0x3] ss:$8 sm:$0xf0]   ;;  %v159_v13 = vld [vmem:[#allocation1 + $0x2] ss:$8 sm:$0xf0]  }
   0xc   :  { %v144_v7 = vld [vmem:[#allocation1 + $0x3] ss:$8 sm:$0xf0]   ;;  %v157_v12 = vld [vmem:[#allocation1 + $0x2] ss:$8 sm:$0xf]  }
   0xd   :  { %v136_v8 = vld [vmem:[#allocation1 + $0x3] ss:$8 sm:$0xf]   ;;  %v167_v15 = vld [vmem:[#allocation1 + $0x1] ss:$8 sm:$0xf]   ;;  %v161_v20 = vsel %vm131_vm0, %v159_v13, %v157_v12 }
   0xe   :  { %v142_v9 = vld [vmem:[#allocation1 + $0x3] ss:$8 sm:$0xf]   ;;  %v140_v10 = vsel %vm131_vm0, %v138_v6, %v136_v8  ;;  %v169_v16 = vld [vmem:[#allocation1 + $0x1] ss:$8 sm:$0xf0]  }
   0xf   :  { %v146_v11 = vsel %vm131_vm0, %v144_v7, %v142_v9  ;;  %v171_v17 = vsel %vm131_vm0, %v169_v16, %v167_v15  ;;  %v129_v18 = vld [vmem:[#allocation1] ss:$8 sm:$0xf]  }
  0x10   :  { %v148_v14 = vsel %vm147_vm1, %v146_v11, %v140_v10  ;;  %v130_v19 = vld [vmem:[#allocation1] ss:$8 sm:$0xf0]   ;;  %172 = vrot.lane.b32.xlu1 %v171_v17, %s213_s10 }
  0x11   :  { %149 = vrot.lane.b32.xlu0 %v148_v14, %s212_s0  ;;  %v132_v21 = vsel %vm131_vm0, %v130_v19, %v129_v18 }
  0x12   :  { %134 = vst.msk [vmem:[#allocation0] sm:$0xff] %vm133_vm2, %v132_v21  }
  0x15   :  { %162 = vrot.lane.b32.xlu0 %v161_v20, %s214_s11 }
  0x82   :  { %v173_v23 = vpop.permute.xlu1 %172  }
  0x83   :  { %v150_v22 = vpop.permute.xlu0 %149  }
  0x84   :  { %153 = vst.msk [vmem:[#allocation0 + $0x8] sm:$0xff] %vm151_vm3, %v150_v22  }
  0x85   :  { %155 = vst.msk [vmem:[#allocation0] sm:$0xff] %vm154_vm4, %v150_v22  }
  0x87   :  { %v163_v24 = vpop.permute.xlu0 %162  }
  0x88   :  { %165 = vst.msk [vmem:[#allocation0] sm:$0xff] %vm164_vm5, %v163_v24  }
  0x89   :  { %175 = vst.msk [vmem:[#allocation0] sm:$0xff] %vm174_vm6, %v173_v23  }
  0x8b   :  { %v185_v25 = vld [vmem:[#allocation0 + $0x8] sm:$0xff] }
  0x90   :  { %v180_v26 = vld [vmem:[#allocation0] sm:$0xff] }
  0x91   :  { %v207_v27 = vpack.c.bf16 %v185_v25, %v180_v26 }
  0x93   :  { %208 = vst [vmem:[%s241_s1] sm:$0xff] %v207_v27  }

// kernel: _lambda_.3
= control target key start
LH: loop header
LB: loop body
LE: loop exit
PB: predicated region body
PF: predicated region fallthrough
CT: control target
= control target key end

     0   :  { %s1248_s15 = smov 0   ;;  %s1557_s0 = inlined_call_operand.vmem [shape: f32[512,128], index: 0, kind: input, shape index: {}]   ;;  %s1558_s1 = inlined_call_operand.vmem [shape: bf16[512,144], index: 1, kind: input, shape index: {}]   ;;  %s1559_s2 = inlined_call_operand.vmem [shape: f32[128,144], index: 2, kind: input, shape index: {}]   ;;  %s1560_s3 = inlined_call_operand.vmem [shape: bf16[144,128], index: 3, kind: input, shape index: {}]   ;;  %s1561_s4 = inlined_call_operand.vmem [shape: f32[512,128], index: 4, kind: output, shape index: {}]  }
   0x1 LB: > { %s1122_s16 = sadd.s32 4294967295, %s1219_s15   ;;  %p1126_p0 = scmp.ge.s32.totalorder %s1219_s15, 1  ;;  %s1219_s15 = sphi %s1248_s15, %s14_s15  }
   0x2   : > { %p175_p1 = scmp.lt.s32.totalorder %s1219_s15, 3 }
   0x4   : > { %p176_p2 = pnand %p1126_p0, %p175_p1 }
   0x5   : > { %v260_v0 = vld [vmem:[%s1559_s2 + $0x8] sm:$0xff] (!%p176_p2)  ;;  %v262_v1 = vld [vmem:[%s1559_s2 + $0x18] sm:$0xff] (!%p176_p2)  ;;  %v259_v2 = vld [vmem:[%s1559_s2] sm:$0xff] (!%p176_p2)  ;;  %v1221_v7 = vmov (!%p176_p2), 0.0   ;;  %s1127_s7 = sshll.u32 (!%p176_p2), %s1122_s16, 5  ;;  %v1222_v51 = vmov (!%p176_p2), 0  }
   0x6   : > { %179 = sbr.rel (%p176_p2) target bundleno = 597 (0x255), region = 36  ;;  %v1162_v3 = vpack.c.bf16 (!%p176_p2), %v262_v1, %v260_v0  ;;  %v261_v4 = vld [vmem:[%s1559_s2 + $0x10] sm:$0xff] (!%p176_p2)  ;;  %v264_v5 = vld [vmem:[%s1559_s2 + $0x28] sm:$0xff] (!%p176_p2)  ;;  %v266_v6 = vld [vmem:[%s1559_s2 + $0x38] sm:$0xff] (!%p176_p2)  ;;  %355 = vmatprep.mubr.f32.mxu0 (!%p176_p2), %v1221_v7  ;;  %p208_p3 = scmp.lt.s32.totalorder (!%p176_p2), %s1127_s7, 63  ;;  %861 = vmatprep.subr.bf16.mxu1 (!%p176_p2), %v1222_v51  ;;  %vm812_vm0 = vcmask (!%p176_p2), 130048  }
   0x7   : > { %v1164_v8 = vpack.c.bf16 (!%p176_p2), %v261_v4, %v259_v2  ;;  %v1166_v9 = vpack.c.bf16 (!%p176_p2), %v266_v6, %v264_v5  ;;  %v263_v10 = vld [vmem:[%s1559_s2 + $0x20] sm:$0xff] (!%p176_p2)  ;;  %v265_v11 = vld [vmem:[%s1559_s2 + $0x30] sm:$0xff] (!%p176_p2)  ;;  %v268_v12 = vld [vmem:[%s1559_s2 + $0x48] sm:$0xff] (!%p176_p2) }
   0x8   : > { %1163 = vmatprep.subr.bf16.mxu0 (!%p176_p2), %v1162_v3  ;;  %v270_v13 = vld [vmem:[%s1559_s2 + $0x58] sm:$0xff] (!%p176_p2)  ;;  %v1168_v14 = vpack.c.bf16 (!%p176_p2), %v265_v11, %v263_v10  ;;  %v267_v16 = vld [vmem:[%s1559_s2 + $0x40] sm:$0xff] (!%p176_p2)  ;;  %v269_v17 = vld [vmem:[%s1559_s2 + $0x50] sm:$0xff] (!%p176_p2) }
   0x9   : > { %1165 = vmatpush1.bf16.msra.mxu0 (!%p176_p2), %v1164_v8  ;;  %v1170_v15 = vpack.c.bf16 (!%p176_p2), %v270_v13, %v268_v12  ;;  %v272_v18 = vld [vmem:[%s1559_s2 + $0x68] sm:$0xff] (!%p176_p2)  ;;  %v274_v19 = vld [vmem:[%s1559_s2 + $0x78] sm:$0xff] (!%p176_p2)  ;;  %v1172_v20 = vpack.c.bf16 (!%p176_p2), %v269_v17, %v267_v16  ;;  %v271_v22 = vld [vmem:[%s1559_s2 + $0x60] sm:$0xff] (!%p176_p2) }
   0xa   : > { %1167 = vmatprep.subr.bf16.mxu0 (!%p176_p2), %v1166_v9  ;;  %v1174_v21 = vpack.c.bf16 (!%p176_p2), %v274_v19, %v272_v18  ;;  %v273_v23 = vld [vmem:[%s1559_s2 + $0x70] sm:$0xff] (!%p176_p2)  ;;  %v276_v24 = vld [vmem:[%s1559_s2 + $0x88] sm:$0xff] (!%p176_p2)  ;;  %v278_v25 = vld [vmem:[%s1559_s2 + $0x98] sm:$0xff] (!%p176_p2) }
   0xb   : > { %v1176_v26 = vpack.c.bf16 (!%p176_p2), %v273_v23, %v271_v22  ;;  %v1178_v27 = vpack.c.bf16 (!%p176_p2), %v278_v25, %v276_v24  ;;  %v275_v28 = vld [vmem:[%s1559_s2 + $0x80] sm:$0xff] (!%p176_p2)  ;;  %v277_v29 = vld [vmem:[%s1559_s2 + $0x90] sm:$0xff] (!%p176_p2)  ;;  %v280_v30 = vld [vmem:[%s1559_s2 + $0xa8] sm:$0xff] (!%p176_p2) }
   0xc   : > { %v282_v31 = vld [vmem:[%s1559_s2 + $0xb8] sm:$0xff] (!%p176_p2)  ;;  %v1180_v32 = vpack.c.bf16 (!%p176_p2), %v277_v29, %v275_v28  ;;  %v279_v34 = vld [vmem:[%s1559_s2 + $0xa0] sm:$0xff] (!%p176_p2)  ;;  %v281_v35 = vld [vmem:[%s1559_s2 + $0xb0] sm:$0xff] (!%p176_p2) }
   0xd   : > { %1169 = vmatpush1.bf16.msra.mxu0 %v1168_v14  ;;  %v1182_v33 = vpack.c.bf16 %v282_v31, %v280_v30  ;;  %v284_v36 = vld [vmem:[%s1559_s2 + $0xc8] sm:$0xff]  ;;  %v286_v37 = vld [vmem:[%s1559_s2 + $0xd8] sm:$0xff]  ;;  %v283_v38 = vld [vmem:[%s1559_s2 + $0xc0] sm:$0xff]  ;;  %v1184_v40 = vpack.c.bf16 %v281_v35, %v279_v34  ;;  %s1563_s7 = smov (!%p208_p3, %s1127_s7), 63 }
   0xe   : > { %1171 = vmatprep.subr.bf16.mxu0 %v1170_v15  ;;  %v285_v39 = vld [vmem:[%s1559_s2 + $0xd0] sm:$0xff]  ;;  %v288_v41 = vld [vmem:[%s1559_s2 + $0xe8] sm:$0xff]  ;;  %v290_v42 = vld [vmem:[%s1559_s2 + $0xf8] sm:$0xff]  ;;  %v1186_v43 = vpack.c.bf16 %v286_v37, %v284_v36  ;;  %s1355_s8 = sshll.u32 %s1563_s7, 3 }
   0xf   : > { %v287_v44 = vld [vmem:[%s1559_s2 + $0xe0] sm:$0xff]  ;;  %v1188_v45 = vpack.c.bf16 %v285_v39, %v283_v38  ;;  %v289_v46 = vld [vmem:[%s1559_s2 + $0xf0] sm:$0xff]  ;;  %v1190_v47 = vpack.c.bf16 %v290_v42, %v288_v41  ;;  %s1361_s11 = scalar_lea.vmem %s1557_s0, %s1355_s8  ;;  %v1205_v52 = vld [vmem:[%s1560_s3 + $0x8] sm:$0xff]   ;;  %s1466_s6 = scalar_lea.vmem %s1558_s1, %s1355_s8 }
  0x10   : > { %v1192_v48 = vpack.c.bf16 %v289_v46, %v287_v44  ;;  %v1204_v49 = vld [vmem:[%s1560_s3] sm:$0xff]   ;;  %v228_v53 = vld [vmem:[%s1361_s11 + $0x8] sm:$0xff]  ;;  %v1206_v54 = vld [vmem:[%s1560_s3 + $0x10] sm:$0xff]  }
  0x11   : > { %1173 = vmatpush1.bf16.msra.mxu0 %v1172_v20  ;;  %v227_v50 = vld [vmem:[%s1361_s11] sm:$0xff]  ;;  %862 = vmatpush1.bf16.msra.mxu1 %v1204_v49  ;;  %v229_v55 = vld [vmem:[%s1361_s11 + $0x10] sm:$0xff]  ;;  %v1207_v56 = vld [vmem:[%s1560_s3 + $0x18] sm:$0xff]  }
  0x12   : > { %1175 = vmatprep.subr.bf16.mxu0 %v1174_v21  ;;  %863 = vmatprep.subr.bf16.mxu1 %v1222_v51  ;;  %v230_v57 = vld [vmem:[%s1361_s11 + $0x18] sm:$0xff]  ;;  %v1208_v58 = vld [vmem:[%s1560_s3 + $0x20] sm:$0xff]   ;;  %v1209_v60 = vld [vmem:[%s1560_s3 + $0x28] sm:$0xff]  }
  0x13   : > { %v231_v59 = vld [vmem:[%s1361_s11 + $0x20] sm:$0xff]  ;;  %v232_v61 = vld [vmem:[%s1361_s11 + $0x28] sm:$0xff]  ;;  %v233_v62 = vld [vmem:[%s1361_s11 + $0x30] sm:$0xff] }
  0x14   : > { %v234_v63 = vld [vmem:[%s1361_s11 + $0x38] sm:$0xff]  ;;  %v235_v0 = vld [vmem:[%s1361_s11 + $0x40] sm:$0xff]  ;;  %v236_v1 = vld [vmem:[%s1361_s11 + $0x48] sm:$0xff] }
  0x15   : > { %1177 = vmatpush1.bf16.msra.mxu0 %v1176_v26  ;;  %864 = vmatpush1.bf16.msra.mxu1 %v1205_v52  ;;  %v237_v2 = vld [vmem:[%s1361_s11 + $0x50] sm:$0xff]  ;;  %v238_v3 = vld [vmem:[%s1361_s11 + $0x58] sm:$0xff]  ;;  %v239_v4 = vld [vmem:[%s1361_s11 + $0x60] sm:$0xff] }
  0x16   : > { %1179 = vmatprep.subr.bf16.mxu0 %v1178_v27  ;;  %865 = vmatprep.subr.bf16.mxu1 %v1222_v51  ;;  %v240_v5 = vld [vmem:[%s1361_s11 + $0x68] sm:$0xff]  ;;  %v241_v6 = vld [vmem:[%s1361_s11 + $0x70] sm:$0xff]  ;;  %v242_v8 = vld [vmem:[%s1361_s11 + $0x78] sm:$0xff] }
  0x17   : > { %v243_v9 = vld [vmem:[%s1361_s11 + $0x80] sm:$0xff]  ;;  %v244_v10 = vld [vmem:[%s1361_s11 + $0x88] sm:$0xff]  ;;  %v245_v11 = vld [vmem:[%s1361_s11 + $0x90] sm:$0xff] }
  0x18   : > { %v246_v12 = vld [vmem:[%s1361_s11 + $0x98] sm:$0xff]  ;;  %v247_v13 = vld [vmem:[%s1361_s11 + $0xa0] sm:$0xff]  ;;  %v248_v14 = vld [vmem:[%s1361_s11 + $0xa8] sm:$0xff] }
  0x19   : > { %1181 = vmatpush1.bf16.msra.mxu0 %v1180_v32  ;;  %866 = vmatpush1.bf16.msra.mxu1 %v1206_v54  ;;  %v1210_v15 = vld [vmem:[%s1560_s3 + $0x30] sm:$0xff]   ;;  %v1211_v17 = vld [vmem:[%s1560_s3 + $0x38] sm:$0xff]   ;;  %v1212_v19 = vld [vmem:[%s1560_s3 + $0x40] sm:$0xff]  }
  0x1a   : > { %1183 = vmatprep.subr.bf16.mxu0 %v1182_v33  ;;  %867 = vmatprep.subr.bf16.mxu1 %v1222_v51  ;;  %v249_v16 = vld [vmem:[%s1361_s11 + $0xb0] sm:$0xff]  ;;  %v250_v18 = vld [vmem:[%s1361_s11 + $0xb8] sm:$0xff]  ;;  %v251_v20 = vld [vmem:[%s1361_s11 + $0xc0] sm:$0xff] }
  0x1b   : > { %v252_v21 = vld [vmem:[%s1361_s11 + $0xc8] sm:$0xff]  ;;  %v253_v22 = vld [vmem:[%s1361_s11 + $0xd0] sm:$0xff]  ;;  %v254_v23 = vld [vmem:[%s1361_s11 + $0xd8] sm:$0xff] }
  0x1c   : > { %v255_v24 = vld [vmem:[%s1361_s11 + $0xe0] sm:$0xff]  ;;  %v256_v25 = vld [vmem:[%s1361_s11 + $0xe8] sm:$0xff]  ;;  %v257_v26 = vld [vmem:[%s1361_s11 + $0xf0] sm:$0xff] }
  0x1d   : > { %1185 = vmatpush1.bf16.msra.mxu0 %v1184_v40  ;;  %868 = vmatpush1.bf16.msra.mxu1 %v1207_v56  ;;  %v258_v27 = vld [vmem:[%s1361_s11 + $0xf8] sm:$0xff]  ;;  %v548_v28 = vld [vmem:[%s1466_s6] sm:$0xff]  ;;  %v549_v29 = vld [vmem:[%s1466_s6 + $0x8] sm:$0xff]  ;;  %s1520_s11 = scalar_lea.vmem %s1561_s4, %s1355_s8 }
  0x1e   : > { %1187 = vmatprep.subr.bf16.mxu0 %v1186_v43  ;;  %869 = vmatprep.subr.bf16.mxu1 %v1222_v51  ;;  %v580_v31 = vunpack.c.l.bf16 %v548_v28  ;;  %v582_v33 = vunpack.c.l.bf16 %v549_v29  ;;  %v581_v34 = vunpack.c.h.bf16 %v548_v28  ;;  %v583_v35 = vunpack.c.h.bf16 %v549_v29  ;;  %v550_v41 = vld [vmem:[%s1466_s6 + $0x10] sm:$0xff]  ;;  %v551_v42 = vld [vmem:[%s1466_s6 + $0x18] sm:$0xff] }
  0x1f   : > { %v584_v46 = vunpack.c.l.bf16 %v550_v41  ;;  %v585_v49 = vunpack.c.h.bf16 %v550_v41  ;;  %v558_v41 = vld [vmem:[%s1466_s6 + $0x50] sm:$0xff] }
  0x21   : > { %1189 = vmatpush1.bf16.msra.mxu0 %v1188_v45  ;;  %870 = vmatpush1.bf16.msra.mxu1 %v1208_v58  ;;  %v553_v58 = vld [vmem:[%s1466_s6 + $0x28] sm:$0xff] }
  0x22   : > { %1191 = vmatprep.subr.bf16.mxu0 %v1190_v47  ;;  %871 = vmatprep.subr.bf16.mxu1 %v1222_v51 }
  0x25   : > { %1193 = vmatpush1.bf16.msra.mxu0 %v1192_v48  ;;  %872 = vmatpush1.bf16.msra.mxu1 %v1209_v60  ;;  %v586_v48 = vunpack.c.l.bf16 %v551_v42 }
  0x26   : > { %873 = vmatprep.subr.bf16.mxu1 %v1222_v51 }
  0x28   : > { %356 = vmatmul.mubr.f32.vlgmr.msra.gmra.mrb[0].mxu0 %v227_v50  ;;  %v587_v50 = vunpack.c.h.bf16 %v551_v42  ;;  %v559_v42 = vld [vmem:[%s1466_s6 + $0x58] sm:$0xff] }
  0x29   : > { %361 = vmatprep.mubr.f32.mxu0 %v1221_v7  ;;  %874 = vmatpush1.bf16.msra.mxu1 %v1210_v15 }
  0x2a   : > { %875 = vmatprep.subr.bf16.mxu1 %v1222_v51 }
  0x2c   : > { %362 = vmatmul.mubr.f32.gmra.mrb[2].mxu0 %v228_v53 }
  0x2d   : > { %367 = vmatprep.mubr.f32.mxu0 %v1221_v7  ;;  %876 = vmatpush1.bf16.msra.mxu1 %v1211_v17 }
  0x2e   : > { %877 = vmatprep.subr.bf16.mxu1 %v1222_v51 }
  0x30   : > { %368 = vmatmul.mubr.f32.gmra.mrb[4].mxu0 %v229_v55 }
  0x31   : > { %373 = vmatprep.mubr.f32.mxu0 %v1221_v7  ;;  %878 = vmatpush1.bf16.msra.mxu1 %v1212_v19 }
  0x34   : > { %374 = vmatmul.mubr.f32.gmra.mrb[6].mxu0 %v230_v57  ;;  %v552_v57 = vld [vmem:[%s1466_s6 + $0x20] sm:$0xff] }
  0x35   : > { %379 = vmatprep.mubr.f32.mxu0 %v1221_v7 }
  0x38   : > { %380 = vmatmul.mubr.f32.gmra.mrb[8].mxu0 %v231_v59 }
  0x39   : > { %385 = vmatprep.mubr.f32.mxu0 %v1221_v7 }
  0x3c   : > { %386 = vmatmul.mubr.f32.gmra.mrb[10].mxu0 %v232_v61 }
  0x3d   : > { %391 = vmatprep.mubr.f32.mxu0 %v1221_v7 }
  0x40   : > { %392 = vmatmul.mubr.f32.gmra.mrb[12].mxu0 %v233_v62  ;;  %v588_v62 = vunpack.c.l.bf16 %v552_v57 }
  0x41   : > { %397 = vmatprep.mubr.f32.mxu0 %v1221_v7 }
  0x44   : > { %398 = vmatmul.mubr.f32.gmra.mrb[14].mxu0 %v234_v63 }
  0x45   : > { %403 = vmatprep.mubr.f32.mxu0 %v1221_v7 }
  0x48   : > { %404 = vmatmul.mubr.f32.gmra.mrb[16].mxu0 %v235_v0  ;;  %v590_v0 = vunpack.c.l.bf16 %v553_v58 }
  0x49   : > { %409 = vmatprep.mubr.f32.mxu0 %v1221_v7 }
  0x4c   : > { %410 = vmatmul.mubr.f32.gmra.mrb[18].mxu0 %v236_v1  ;;  %v589_v1 = vunpack.c.h.bf16 %v552_v57  ;;  %v560_v57 = vld [vmem:[%s1466_s6 + $0x60] sm:$0xff] }
  0x4d   : > { %415 = vmatprep.mubr.f32.mxu0 %v1221_v7 }
  0x50   : > { %416 = vmatmul.mubr.f32.gmra.mrb[20].mxu0 %v237_v2  ;;  %v591_v2 = vunpack.c.h.bf16 %v553_v58  ;;  %v561_v58 = vld [vmem:[%s1466_s6 + $0x68] sm:$0xff] }
  0x51   : > { %421 = vmatprep.mubr.f32.mxu0 %v1221_v7 }
  0x54   : > { %422 = vmatmul.mubr.f32.gmra.mrb[22].mxu0 %v238_v3 }
  0x55   : > { %427 = vmatprep.mubr.f32.mxu0 %v1221_v7 }
  0x58   : > { %428 = vmatmul.mubr.f32.gmra.mrb[24].mxu0 %v239_v4 }
  0x59   : > { %433 = vmatprep.mubr.f32.mxu0 %v1221_v7 }
  0x5c   : > { %434 = vmatmul.mubr.f32.gmra.mrb[26].mxu0 %v240_v5 }
  0x5d   : > { %439 = vmatprep.mubr.f32.mxu0 %v1221_v7 }
  0x60   : > { %440 = vmatmul.mubr.f32.gmra.mrb[28].mxu0 %v241_v6 }
  0x61   : > { %445 = vmatprep.mubr.f32.mxu0 %v1221_v7 }
  0x64   : > { %446 = vmatmul.mubr.f32.gmra.mrb[30].mxu0 %v242_v8 }
  0x65   : > { %451 = vmatprep.mubr.f32.mxu0 %v1221_v7 }
  0x68   : > { %452 = vmatmul.mubr.f32.gmra.mrb[32].mxu0 %v243_v9 }
  0x69   : > { %457 = vmatprep.mubr.f32.mxu0 %v1221_v7 }
  0x6c   : > { %458 = vmatmul.mubr.f32.gmra.mrb[34].mxu0 %v244_v10  ;;  %v554_v10 = vld [vmem:[%s1466_s6 + $0x30] sm:$0xff] }
  0x6d   : > { %463 = vmatprep.mubr.f32.mxu0 %v1221_v7  ;;  %v592_v15 = vunpack.c.l.bf16 %v554_v10 }
  0x70   : > { %464 = vmatmul.mubr.f32.gmra.mrb[36].mxu0 %v245_v11  ;;  %v555_v11 = vld [vmem:[%s1466_s6 + $0x38] sm:$0xff] }
  0x71   : > { %469 = vmatprep.mubr.f32.mxu0 %v1221_v7  ;;  %v594_v17 = vunpack.c.l.bf16 %v555_v11  ;;  %v595_v19 = vunpack.c.h.bf16 %v555_v11  ;;  %v563_v11 = vld [vmem:[%s1466_s6 + $0x78] sm:$0xff] }
  0x74   : > { %470 = vmatmul.mubr.f32.gmra.mrb[38].mxu0 %v246_v12 }
  0x75   : > { %475 = vmatprep.mubr.f32.mxu0 %v1221_v7 }
  0x78   : > { %476 = vmatmul.mubr.f32.gmra.mrb[40].mxu0 %v247_v13 }
  0x79   : > { %481 = vmatprep.mubr.f32.mxu0 %v1221_v7 }
  0x7c   : > { %482 = vmatmul.mubr.f32.gmra.mrb[42].mxu0 %v248_v14 }
  0x7d   : > { %487 = vmatprep.mubr.f32.mxu0 %v1221_v7 }
  0x80   : > { %488 = vmatmul.mubr.f32.gmra.mrb[44].mxu0 %v249_v16 }
  0x81   : > { %493 = vmatprep.mubr.f32.mxu0 %v1221_v7 }
  0x84   : > { %494 = vmatmul.mubr.f32.gmra.mrb[46].mxu0 %v250_v18  ;;  %v593_v18 = vunpack.c.h.bf16 %v554_v10  ;;  %v562_v10 = vld [vmem:[%s1466_s6 + $0x70] sm:$0xff] }
  0x85   : > { %499 = vmatprep.mubr.f32.mxu0 %v1221_v7 }
  0x88   : > { %500 = vmatmul.mubr.f32.gmra.mrb[48].mxu0 %v251_v20 }
  0x89   : > { %505 = vmatprep.mubr.f32.mxu0 %v1221_v7 }
  0x8c   : > { %506 = vmatmul.mubr.f32.gmra.mrb[50].mxu0 %v252_v21 }
  0x8d   : > { %511 = vmatprep.mubr.f32.mxu0 %v1221_v7 }
  0x90   : > { %512 = vmatmul.mubr.f32.gmra.mrb[52].mxu0 %v253_v22 }
  0x91   : > { %517 = vmatprep.mubr.f32.mxu0 %v1221_v7 }
  0x94   : > { %518 = vmatmul.mubr.f32.gmra.mrb[54].mxu0 %v254_v23 }
  0x95   : > { %523 = vmatprep.mubr.f32.mxu0 %v1221_v7 }
  0x98   : > { %524 = vmatmul.mubr.f32.gmra.mrb[56].mxu0 %v255_v24 }
  0x99   : > { %529 = vmatprep.mubr.f32.mxu0 %v1221_v7 }
  0x9c   : > { %530 = vmatmul.mubr.f32.gmra.mrb[58].mxu0 %v256_v25 }
  0x9d   : > { %535 = vmatprep.mubr.f32.mxu0 %v1221_v7 }
  0xa0   : > { %536 = vmatmul.mubr.f32.gmra.mrb[60].mxu0 %v257_v26  ;;  %v556_v26 = vld [vmem:[%s1466_s6 + $0x40] sm:$0xff] }
  0xa1   : > { %541 = vmatprep.mubr.f32.mxu0 %v1221_v7 }
  0xa4   : > { %542 = vmatmul.mubr.f32.gmra.mrb[62].mxu0 %v258_v27  ;;  %v557_v27 = vld [vmem:[%s1466_s6 + $0x48] sm:$0xff] }
  0xfb   : > { %v357_v30 = vpop.f32.mrb[0].mxu0 }
  0xfc   : > { %v359_v32 = vpop.f32.mrb[1].mxu0  ;;  %v644_v36 = vmul.f32 %v580_v31, %v357_v30  ;;  %v596_v31 = vunpack.c.l.bf16 %v556_v26 }
  0xfd   : > { %v645_v39 = vmul.f32 %v581_v34, %v359_v32  ;;  %v597_v34 = vunpack.c.h.bf16 %v556_v26  ;;  %v564_v26 = vld [vmem:[%s1466_s6 + $0x80] sm:$0xff] }
  0xff   : > { %v363_v7 = vpop.f32.mrb[2].mxu0 }
 0x100   : > { %v646_v37 = vmul.f32 %v582_v33, %v363_v7  ;;  %v365_v38 = vpop.f32.mrb[3].mxu0  ;;  %v598_v33 = vunpack.c.l.bf16 %v557_v27 }
 0x101   : > { %v647_v40 = vmul.f32 %v583_v35, %v365_v38  ;;  %v599_v35 = vunpack.c.h.bf16 %v557_v27  ;;  %v565_v27 = vld [vmem:[%s1466_s6 + $0x88] sm:$0xff] }
 0x102   : > { %v708_v43 = vpack.c.bf16 %v646_v37, %v644_v36 }
 0x103   : > { %v369_v44 = vpop.f32.mrb[4].mxu0  ;;  %v709_v45 = vpack.c.bf16 %v647_v40, %v645_v39 }
 0x104   : > { %v371_v47 = vpop.f32.mrb[5].mxu0  ;;  %v648_v52 = vmul.f32 %v584_v46, %v369_v44  ;;  %v600_v46 = vunpack.c.l.bf16 %v558_v41 }
 0x105   : > { %1143 = vmatprep.mubr.msk.bf16.mxu1 %vm812_vm0, %v709_v45  ;;  %v649_v55 = vmul.f32 %v585_v49, %v371_v47  ;;  %v601_v49 = vunpack.c.h.bf16 %v558_v41  ;;  %v566_v41 = vld [vmem:[%s1466_s6 + $0x90] sm:$0xff] }
 0x106   : > { %894 = vmatmul.mubr.bf16.vlgmr.msra.gmra.mrb[0].mxu1 %v708_v43 }
 0x107   : > { %v375_v51 = vpop.f32.mrb[6].mxu0 }
 0x108   : > { %v650_v53 = vmul.f32 %v586_v48, %v375_v51  ;;  %v377_v54 = vpop.f32.mrb[7].mxu0  ;;  %v602_v48 = vunpack.c.l.bf16 %v559_v42 }
 0x109   : > { %v651_v56 = vmul.f32 %v587_v50, %v377_v54  ;;  %v603_v50 = vunpack.c.h.bf16 %v559_v42  ;;  %v567_v42 = vld [vmem:[%s1466_s6 + $0x98] sm:$0xff] }
 0x10a   : > { %v710_v59 = vpack.c.bf16 %v650_v53, %v648_v52 }
 0x10b   : > { %v711_v60 = vpack.c.bf16 %v651_v56, %v649_v55  ;;  %v381_v61 = vpop.f32.mrb[8].mxu0 }
 0x10c   : > { %v383_v63 = vpop.f32.mrb[9].mxu0  ;;  %v652_v4 = vmul.f32 %v588_v62, %v381_v61  ;;  %v604_v62 = vunpack.c.l.bf16 %v560_v57 }
 0x10d   : > { %1144 = vmatprep.mubr.msk.bf16.mxu1 %vm812_vm0, %v711_v60  ;;  %v653_v8 = vmul.f32 %v589_v1, %v383_v63  ;;  %v605_v1 = vunpack.c.h.bf16 %v560_v57  ;;  %v568_v57 = vld [vmem:[%s1466_s6 + $0xa0] sm:$0xff] }
 0x10e   : > { %902 = vmatmul.mubr.bf16.gmra.mrb[4].mxu1 %v710_v59 }
 0x10f   : > { %v387_v3 = vpop.f32.mrb[10].mxu0 }
 0x110   : > { %v654_v5 = vmul.f32 %v590_v0, %v387_v3  ;;  %v389_v6 = vpop.f32.mrb[11].mxu0  ;;  %v606_v0 = vunpack.c.l.bf16 %v561_v58 }
 0x111   : > { %v655_v9 = vmul.f32 %v591_v2, %v389_v6  ;;  %v607_v2 = vunpack.c.h.bf16 %v561_v58  ;;  %v569_v58 = vld [vmem:[%s1466_s6 + $0xa8] sm:$0xff] }
 0x112   : > { %v712_v12 = vpack.c.bf16 %v654_v5, %v652_v4 }
 0x113   : > { %v713_v13 = vpack.c.bf16 %v655_v9, %v653_v8  ;;  %v393_v14 = vpop.f32.mrb[12].mxu0 }
 0x114   : > { %v395_v16 = vpop.f32.mrb[13].mxu0  ;;  %v656_v21 = vmul.f32 %v592_v15, %v393_v14  ;;  %v608_v15 = vunpack.c.l.bf16 %v562_v10 }
 0x115   : > { %1145 = vmatprep.mubr.msk.bf16.mxu1 %vm812_vm0, %v713_v13  ;;  %v657_v24 = vmul.f32 %v593_v18, %v395_v16  ;;  %v609_v18 = vunpack.c.h.bf16 %v562_v10  ;;  %v570_v10 = vld [vmem:[%s1466_s6 + $0xb0] sm:$0xff] }
 0x116   : > { %910 = vmatmul.mubr.bf16.gmra.mrb[8].mxu1 %v712_v12 }
 0x117   : > { %v399_v20 = vpop.f32.mrb[14].mxu0 }
 0x118   : > { %v658_v22 = vmul.f32 %v594_v17, %v399_v20  ;;  %v401_v23 = vpop.f32.mrb[15].mxu0  ;;  %v610_v17 = vunpack.c.l.bf16 %v563_v11 }
 0x119   : > { %v659_v25 = vmul.f32 %v595_v19, %v401_v23  ;;  %v611_v19 = vunpack.c.h.bf16 %v563_v11  ;;  %v571_v11 = vld [vmem:[%s1466_s6 + $0xb8] sm:$0xff] }
 0x11a   : > { %v714_v28 = vpack.c.bf16 %v658_v22, %v656_v21 }
 0x11b   : > { %v715_v29 = vpack.c.bf16 %v659_v25, %v657_v24  ;;  %v405_v30 = vpop.f32.mrb[16].mxu0 }
 0x11c   : > { %v407_v32 = vpop.f32.mrb[17].mxu0  ;;  %v660_v36 = vmul.f32 %v596_v31, %v405_v30  ;;  %v612_v31 = vunpack.c.l.bf16 %v564_v26 }
 0x11d   : > { %1146 = vmatprep.mubr.msk.bf16.mxu1 %vm812_vm0, %v715_v29  ;;  %v661_v39 = vmul.f32 %v597_v34, %v407_v32  ;;  %v613_v34 = vunpack.c.h.bf16 %v564_v26  ;;  %v572_v26 = vld [vmem:[%s1466_s6 + $0xc0] sm:$0xff] }
 0x11e   : > { %918 = vmatmul.mubr.bf16.gmra.mrb[12].mxu1 %v714_v28 }
 0x11f   : > { %v411_v7 = vpop.f32.mrb[18].mxu0 }
 0x120   : > { %v662_v37 = vmul.f32 %v598_v33, %v411_v7  ;;  %v413_v38 = vpop.f32.mrb[19].mxu0  ;;  %v614_v33 = vunpack.c.l.bf16 %v565_v27 }
 0x121   : > { %v663_v40 = vmul.f32 %v599_v35, %v413_v38  ;;  %v615_v35 = vunpack.c.h.bf16 %v565_v27  ;;  %v573_v27 = vld [vmem:[%s1466_s6 + $0xc8] sm:$0xff] }
 0x122   : > { %v716_v43 = vpack.c.bf16 %v662_v37, %v660_v36 }
 0x123   : > { %v717_v44 = vpack.c.bf16 %v663_v40, %v661_v39  ;;  %v417_v45 = vpop.f32.mrb[20].mxu0 }
 0x124   : > { %v419_v47 = vpop.f32.mrb[21].mxu0  ;;  %v664_v52 = vmul.f32 %v600_v46, %v417_v45  ;;  %v616_v46 = vunpack.c.l.bf16 %v566_v41 }
 0x125   : > { %1147 = vmatprep.mubr.msk.bf16.mxu1 %vm812_vm0, %v717_v44  ;;  %v665_v55 = vmul.f32 %v601_v49, %v419_v47  ;;  %v617_v49 = vunpack.c.h.bf16 %v566_v41  ;;  %v574_v41 = vld [vmem:[%s1466_s6 + $0xd0] sm:$0xff] }
 0x126   : > { %926 = vmatmul.mubr.bf16.gmra.mrb[16].mxu1 %v716_v43 }
 0x127   : > { %v423_v51 = vpop.f32.mrb[22].mxu0 }
 0x128   : > { %v666_v53 = vmul.f32 %v602_v48, %v423_v51  ;;  %v425_v54 = vpop.f32.mrb[23].mxu0  ;;  %v618_v48 = vunpack.c.l.bf16 %v567_v42 }
 0x129   : > { %v667_v56 = vmul.f32 %v603_v50, %v425_v54  ;;  %v619_v50 = vunpack.c.h.bf16 %v567_v42  ;;  %v575_v42 = vld [vmem:[%s1466_s6 + $0xd8] sm:$0xff] }
 0x12a   : > { %v718_v59 = vpack.c.bf16 %v666_v53, %v664_v52 }
 0x12b   : > { %v719_v60 = vpack.c.bf16 %v667_v56, %v665_v55  ;;  %v429_v61 = vpop.f32.mrb[24].mxu0 }
 0x12c   : > { %v431_v63 = vpop.f32.mrb[25].mxu0  ;;  %v668_v4 = vmul.f32 %v604_v62, %v429_v61  ;;  %v620_v62 = vunpack.c.l.bf16 %v568_v57 }
 0x12d   : > { %1148 = vmatprep.mubr.msk.bf16.mxu1 %vm812_vm0, %v719_v60  ;;  %v669_v8 = vmul.f32 %v605_v1, %v431_v63  ;;  %v621_v1 = vunpack.c.h.bf16 %v568_v57  ;;  %v576_v57 = vld [vmem:[%s1466_s6 + $0xe0] sm:$0xff] }
 0x12e   : > { %934 = vmatmul.mubr.bf16.gmra.mrb[20].mxu1 %v718_v59 }
 0x12f   : > { %v435_v3 = vpop.f32.mrb[26].mxu0 }
 0x130   : > { %v670_v5 = vmul.f32 %v606_v0, %v435_v3  ;;  %v437_v6 = vpop.f32.mrb[27].mxu0  ;;  %v622_v0 = vunpack.c.l.bf16 %v569_v58 }
 0x131   : > { %v671_v9 = vmul.f32 %v607_v2, %v437_v6  ;;  %v623_v2 = vunpack.c.h.bf16 %v569_v58  ;;  %v577_v58 = vld [vmem:[%s1466_s6 + $0xe8] sm:$0xff] }
 0x132   : > { %v720_v12 = vpack.c.bf16 %v670_v5, %v668_v4 }
 0x133   : > { %v721_v13 = vpack.c.bf16 %v671_v9, %v669_v8  ;;  %v441_v14 = vpop.f32.mrb[28].mxu0 }
 0x134   : > { %v443_v16 = vpop.f32.mrb[29].mxu0  ;;  %v672_v21 = vmul.f32 %v608_v15, %v441_v14  ;;  %v624_v15 = vunpack.c.l.bf16 %v570_v10 }
 0x135   : > { %1149 = vmatprep.mubr.msk.bf16.mxu1 %vm812_vm0, %v721_v13  ;;  %v673_v24 = vmul.f32 %v609_v18, %v443_v16  ;;  %v625_v18 = vunpack.c.h.bf16 %v570_v10  ;;  %v578_v10 = vld [vmem:[%s1466_s6 + $0xf0] sm:$0xff] }
 0x136   : > { %942 = vmatmul.mubr.bf16.gmra.mrb[24].mxu1 %v720_v12 }
 0x137   : > { %v447_v20 = vpop.f32.mrb[30].mxu0 }
 0x138   : > { %v674_v22 = vmul.f32 %v610_v17, %v447_v20  ;;  %v449_v23 = vpop.f32.mrb[31].mxu0  ;;  %v626_v17 = vunpack.c.l.bf16 %v571_v11 }
 0x139   : > { %v675_v25 = vmul.f32 %v611_v19, %v449_v23  ;;  %v627_v19 = vunpack.c.h.bf16 %v571_v11  ;;  %v579_v11 = vld [vmem:[%s1466_s6 + $0xf8] sm:$0xff] }
 0x13a   : > { %v722_v28 = vpack.c.bf16 %v674_v22, %v672_v21 }
 0x13b   : > { %v723_v29 = vpack.c.bf16 %v675_v25, %v673_v24  ;;  %v453_v30 = vpop.f32.mrb[32].mxu0 }
 0x13c   : > { %v455_v32 = vpop.f32.mrb[33].mxu0  ;;  %v676_v36 = vmul.f32 %v612_v31, %v453_v30  ;;  %v628_v31 = vunpack.c.l.bf16 %v572_v26 }
 0x13d   : > { %1150 = vmatprep.mubr.msk.bf16.mxu1 %vm812_vm0, %v723_v29  ;;  %v677_v39 = vmul.f32 %v613_v34, %v455_v32  ;;  %v629_v34 = vunpack.c.h.bf16 %v572_v26 }
 0x13e   : > { %950 = vmatmul.mubr.bf16.gmra.mrb[28].mxu1 %v722_v28 }
 0x13f   : > { %v459_v7 = vpop.f32.mrb[34].mxu0 }
 0x140   : > { %v678_v37 = vmul.f32 %v614_v33, %v459_v7  ;;  %v461_v38 = vpop.f32.mrb[35].mxu0  ;;  %v630_v33 = vunpack.c.l.bf16 %v573_v27 }
 0x141   : > { %v679_v40 = vmul.f32 %v615_v35, %v461_v38  ;;  %v631_v35 = vunpack.c.h.bf16 %v573_v27 }
 0x142   : > { %v724_v43 = vpack.c.bf16 %v678_v37, %v676_v36 }
 0x143   : > { %v725_v44 = vpack.c.bf16 %v679_v40, %v677_v39  ;;  %v465_v45 = vpop.f32.mrb[36].mxu0 }
 0x144   : > { %v467_v47 = vpop.f32.mrb[37].mxu0  ;;  %v680_v52 = vmul.f32 %v616_v46, %v465_v45  ;;  %v632_v46 = vunpack.c.l.bf16 %v574_v41 }
 0x145   : > { %1151 = vmatprep.mubr.msk.bf16.mxu1 %vm812_vm0, %v725_v44  ;;  %v681_v55 = vmul.f32 %v617_v49, %v467_v47  ;;  %v633_v49 = vunpack.c.h.bf16 %v574_v41 }
 0x146   : > { %958 = vmatmul.mubr.bf16.gmra.mrb[32].mxu1 %v724_v43 }
 0x147   : > { %v471_v51 = vpop.f32.mrb[38].mxu0 }
 0x148   : > { %v682_v53 = vmul.f32 %v618_v48, %v471_v51  ;;  %v473_v54 = vpop.f32.mrb[39].mxu0  ;;  %v634_v48 = vunpack.c.l.bf16 %v575_v42 }
 0x149   : > { %v683_v56 = vmul.f32 %v619_v50, %v473_v54  ;;  %v635_v50 = vunpack.c.h.bf16 %v575_v42 }
 0x14a   : > { %v726_v59 = vpack.c.bf16 %v682_v53, %v680_v52 }
 0x14b   : > { %v727_v60 = vpack.c.bf16 %v683_v56, %v681_v55  ;;  %v477_v61 = vpop.f32.mrb[40].mxu0 }
 0x14c   : > { %v479_v63 = vpop.f32.mrb[41].mxu0  ;;  %v684_v4 = vmul.f32 %v620_v62, %v477_v61  ;;  %v636_v62 = vunpack.c.l.bf16 %v576_v57 }
 0x14d   : > { %1152 = vmatprep.mubr.msk.bf16.mxu1 %vm812_vm0, %v727_v60  ;;  %v685_v8 = vmul.f32 %v621_v1, %v479_v63  ;;  %v637_v1 = vunpack.c.h.bf16 %v576_v57 }
 0x14e   : > { %966 = vmatmul.mubr.bf16.gmra.mrb[36].mxu1 %v726_v59 }
 0x14f   : > { %v483_v3 = vpop.f32.mrb[42].mxu0 }
 0x150   : > { %v686_v5 = vmul.f32 %v622_v0, %v483_v3  ;;  %v485_v6 = vpop.f32.mrb[43].mxu0  ;;  %v638_v0 = vunpack.c.l.bf16 %v577_v58 }
 0x151   : > { %v687_v9 = vmul.f32 %v623_v2, %v485_v6  ;;  %v639_v2 = vunpack.c.h.bf16 %v577_v58 }
 0x152   : > { %v728_v12 = vpack.c.bf16 %v686_v5, %v684_v4 }
 0x153   : > { %v729_v13 = vpack.c.bf16 %v687_v9, %v685_v8  ;;  %v489_v14 = vpop.f32.mrb[44].mxu0 }
 0x154   : > { %v491_v16 = vpop.f32.mrb[45].mxu0  ;;  %v688_v21 = vmul.f32 %v624_v15, %v489_v14  ;;  %v640_v15 = vunpack.c.l.bf16 %v578_v10 }
 0x155   : > { %1153 = vmatprep.mubr.msk.bf16.mxu1 %vm812_vm0, %v729_v13  ;;  %v689_v24 = vmul.f32 %v625_v18, %v491_v16  ;;  %v641_v18 = vunpack.c.h.bf16 %v578_v10 }
 0x156   : > { %974 = vmatmul.mubr.bf16.gmra.mrb[40].mxu1 %v728_v12 }
 0x157   : > { %v495_v20 = vpop.f32.mrb[46].mxu0 }
 0x158   : > { %v690_v22 = vmul.f32 %v626_v17, %v495_v20  ;;  %v497_v23 = vpop.f32.mrb[47].mxu0  ;;  %v642_v17 = vunpack.c.l.bf16 %v579_v11 }
 0x159   : > { %v691_v25 = vmul.f32 %v627_v19, %v497_v23  ;;  %v643_v19 = vunpack.c.h.bf16 %v579_v11 }
 0x15a   : > { %v730_v28 = vpack.c.bf16 %v690_v22, %v688_v21 }
 0x15b   : > { %v731_v29 = vpack.c.bf16 %v691_v25, %v689_v24  ;;  %v501_v30 = vpop.f32.mrb[48].mxu0 }
 0x15c   : > { %v503_v32 = vpop.f32.mrb[49].mxu0  ;;  %v692_v36 = vmul.f32 %v628_v31, %v501_v30 }
 0x15d   : > { %1154 = vmatprep.mubr.msk.bf16.mxu1 %vm812_vm0, %v731_v29  ;;  %v693_v39 = vmul.f32 %v629_v34, %v503_v32 }
 0x15e   : > { %982 = vmatmul.mubr.bf16.gmra.mrb[44].mxu1 %v730_v28 }
 0x15f   : > { %v507_v7 = vpop.f32.mrb[50].mxu0 }
 0x160   : > { %v694_v37 = vmul.f32 %v630_v33, %v507_v7  ;;  %v509_v38 = vpop.f32.mrb[51].mxu0 }
 0x161   : > { %v695_v40 = vmul.f32 %v631_v35, %v509_v38 }
 0x162   : > { %v732_v43 = vpack.c.bf16 %v694_v37, %v692_v36 }
 0x163   : > { %v733_v44 = vpack.c.bf16 %v695_v40, %v693_v39  ;;  %v513_v45 = vpop.f32.mrb[52].mxu0 }
 0x164   : > { %v515_v47 = vpop.f32.mrb[53].mxu0  ;;  %v696_v52 = vmul.f32 %v632_v46, %v513_v45 }
 0x165   : > { %1155 = vmatprep.mubr.msk.bf16.mxu1 %vm812_vm0, %v733_v44  ;;  %v697_v55 = vmul.f32 %v633_v49, %v515_v47 }
 0x166   : > { %990 = vmatmul.mubr.bf16.gmra.mrb[48].mxu1 %v732_v43 }
 0x167   : > { %v519_v51 = vpop.f32.mrb[54].mxu0 }
 0x168   : > { %v698_v53 = vmul.f32 %v634_v48, %v519_v51  ;;  %v521_v54 = vpop.f32.mrb[55].mxu0 }
 0x169   : > { %v699_v56 = vmul.f32 %v635_v50, %v521_v54 }
 0x16a   : > { %v734_v59 = vpack.c.bf16 %v698_v53, %v696_v52 }
 0x16b   : > { %v735_v60 = vpack.c.bf16 %v699_v56, %v697_v55  ;;  %v525_v61 = vpop.f32.mrb[56].mxu0 }
 0x16c   : > { %v527_v63 = vpop.f32.mrb[57].mxu0  ;;  %v700_v4 = vmul.f32 %v636_v62, %v525_v61 }
 0x16d   : > { %1156 = vmatprep.mubr.msk.bf16.mxu1 %vm812_vm0, %v735_v60  ;;  %v701_v8 = vmul.f32 %v637_v1, %v527_v63 }
 0x16e   : > { %998 = vmatmul.mubr.bf16.gmra.mrb[52].mxu1 %v734_v59 }
 0x16f   : > { %v531_v3 = vpop.f32.mrb[58].mxu0 }
 0x170   : > { %v702_v5 = vmul.f32 %v638_v0, %v531_v3  ;;  %v533_v6 = vpop.f32.mrb[59].mxu0 }
 0x171   : > { %v703_v9 = vmul.f32 %v639_v2, %v533_v6 }
 0x172   : > { %v736_v12 = vpack.c.bf16 %v702_v5, %v700_v4 }
 0x173   : > { %v737_v13 = vpack.c.bf16 %v703_v9, %v701_v8  ;;  %v537_v14 = vpop.f32.mrb[60].mxu0 }
 0x174   : > { %v539_v16 = vpop.f32.mrb[61].mxu0  ;;  %v704_v21 = vmul.f32 %v640_v15, %v537_v14 }
 0x175   : > { %1157 = vmatprep.mubr.msk.bf16.mxu1 %vm812_vm0, %v737_v13  ;;  %v705_v24 = vmul.f32 %v641_v18, %v539_v16 }
 0x176   : > { %1006 = vmatmul.mubr.bf16.gmra.mrb[56].mxu1 %v736_v12 }
 0x177   : > { %v543_v20 = vpop.f32.mrb[62].mxu0 }
 0x178   : > { %v706_v22 = vmul.f32 %v642_v17, %v543_v20  ;;  %v545_v23 = vpop.f32.mrb[63].mxu0 }
 0x179   : > { %v707_v25 = vmul.f32 %v643_v19, %v545_v23 }
 0x17a   : > { %v738_v26 = vpack.c.bf16 %v706_v22, %v704_v21 }
 0x17b   : > { %v739_v27 = vpack.c.bf16 %v707_v25, %v705_v24 }
 0x17d   : > { %1158 = vmatprep.mubr.msk.bf16.mxu1 %vm812_vm0, %v739_v27 }
 0x17e   : > { %1014 = vmatmul.mubr.bf16.gmra.mrb[60].mxu1 %v738_v26 }
 0x1d9   : > { %v895_v28 = vpop.f32.mrb[0].mxu1 }
 0x1da   : > { %1022 = vst [vmem:[%s1520_s11] sm:$0xff] %v895_v28  ;;  %v897_v29 = vpop.f32.mrb[1].mxu1 }
 0x1db   : > { %v898_v30 = vpop.f32.mrb[2].mxu1 }
 0x1dc   : > { %1023 = vst [vmem:[%s1520_s11 + $0x8] sm:$0xff] %v898_v30  ;;  %v900_v31 = vpop.f32.mrb[3].mxu1 }
 0x1e1   : > { %v903_v32 = vpop.f32.mrb[4].mxu1 }
 0x1e2   : > { %1024 = vst [vmem:[%s1520_s11 + $0x10] sm:$0xff] %v903_v32  ;;  %v905_v33 = vpop.f32.mrb[5].mxu1 }
 0x1e3   : > { %v906_v34 = vpop.f32.mrb[6].mxu1 }
 0x1e4   : > { %1025 = vst [vmem:[%s1520_s11 + $0x18] sm:$0xff] %v906_v34  ;;  %v908_v35 = vpop.f32.mrb[7].mxu1 }
 0x1e9   : > { %v911_v7 = vpop.f32.mrb[8].mxu1 }
 0x1ea   : > { %1026 = vst [vmem:[%s1520_s11 + $0x20] sm:$0xff] %v911_v7  ;;  %v913_v36 = vpop.f32.mrb[9].mxu1 }
 0x1eb   : > { %v914_v37 = vpop.f32.mrb[10].mxu1 }
 0x1ec   : > { %1027 = vst [vmem:[%s1520_s11 + $0x28] sm:$0xff] %v914_v37  ;;  %v916_v38 = vpop.f32.mrb[11].mxu1 }
 0x1f1   : > { %v919_v39 = vpop.f32.mrb[12].mxu1 }
 0x1f2   : > { %1028 = vst [vmem:[%s1520_s11 + $0x30] sm:$0xff] %v919_v39  ;;  %v921_v40 = vpop.f32.mrb[13].mxu1 }
 0x1f3   : > { %v922_v41 = vpop.f32.mrb[14].mxu1 }
 0x1f4   : > { %1029 = vst [vmem:[%s1520_s11 + $0x38] sm:$0xff] %v922_v41  ;;  %v924_v42 = vpop.f32.mrb[15].mxu1 }
 0x1f9   : > { %v927_v43 = vpop.f32.mrb[16].mxu1 }
 0x1fa   : > { %1030 = vst [vmem:[%s1520_s11 + $0x40] sm:$0xff] %v927_v43  ;;  %v929_v44 = vpop.f32.mrb[17].mxu1 }
 0x1fb   : > { %v930_v45 = vpop.f32.mrb[18].mxu1 }
 0x1fc   : > { %1031 = vst [vmem:[%s1520_s11 + $0x48] sm:$0xff] %v930_v45  ;;  %v932_v46 = vpop.f32.mrb[19].mxu1 }
 0x201   : > { %v935_v47 = vpop.f32.mrb[20].mxu1 }
 0x202   : > { %1032 = vst [vmem:[%s1520_s11 + $0x50] sm:$0xff] %v935_v47  ;;  %v937_v48 = vpop.f32.mrb[21].mxu1 }
 0x203   : > { %v938_v49 = vpop.f32.mrb[22].mxu1 }
 0x204   : > { %1033 = vst [vmem:[%s1520_s11 + $0x58] sm:$0xff] %v938_v49  ;;  %v940_v50 = vpop.f32.mrb[23].mxu1 }
 0x209   : > { %v943_v51 = vpop.f32.mrb[24].mxu1 }
 0x20a   : > { %1034 = vst [vmem:[%s1520_s11 + $0x60] sm:$0xff] %v943_v51  ;;  %v945_v52 = vpop.f32.mrb[25].mxu1 }
 0x20b   : > { %v946_v53 = vpop.f32.mrb[26].mxu1 }
 0x20c   : > { %1035 = vst [vmem:[%s1520_s11 + $0x68] sm:$0xff] %v946_v53  ;;  %v948_v54 = vpop.f32.mrb[27].mxu1 }
 0x211   : > { %v951_v55 = vpop.f32.mrb[28].mxu1 }
 0x212   : > { %1036 = vst [vmem:[%s1520_s11 + $0x70] sm:$0xff] %v951_v55  ;;  %v953_v56 = vpop.f32.mrb[29].mxu1 }
 0x213   : > { %v954_v57 = vpop.f32.mrb[30].mxu1 }
 0x214   : > { %1037 = vst [vmem:[%s1520_s11 + $0x78] sm:$0xff] %v954_v57  ;;  %v956_v58 = vpop.f32.mrb[31].mxu1 }
 0x219   : > { %v959_v59 = vpop.f32.mrb[32].mxu1 }
 0x21a   : > { %1038 = vst [vmem:[%s1520_s11 + $0x80] sm:$0xff] %v959_v59  ;;  %v961_v60 = vpop.f32.mrb[33].mxu1 }
 0x21b   : > { %v962_v61 = vpop.f32.mrb[34].mxu1 }
 0x21c   : > { %1039 = vst [vmem:[%s1520_s11 + $0x88] sm:$0xff] %v962_v61  ;;  %v964_v62 = vpop.f32.mrb[35].mxu1 }
 0x221   : > { %v967_v63 = vpop.f32.mrb[36].mxu1 }
 0x222   : > { %1040 = vst [vmem:[%s1520_s11 + $0x90] sm:$0xff] %v967_v63  ;;  %v969_v0 = vpop.f32.mrb[37].mxu1 }
 0x223   : > { %v970_v1 = vpop.f32.mrb[38].mxu1 }
 0x224   : > { %1041 = vst [vmem:[%s1520_s11 + $0x98] sm:$0xff] %v970_v1  ;;  %v972_v2 = vpop.f32.mrb[39].mxu1 }
 0x229   : > { %v975_v3 = vpop.f32.mrb[40].mxu1 }
 0x22a   : > { %1042 = vst [vmem:[%s1520_s11 + $0xa0] sm:$0xff] %v975_v3  ;;  %v977_v4 = vpop.f32.mrb[41].mxu1 }
 0x22b   : > { %v978_v5 = vpop.f32.mrb[42].mxu1 }
 0x22c   : > { %1043 = vst [vmem:[%s1520_s11 + $0xa8] sm:$0xff] %v978_v5  ;;  %v980_v6 = vpop.f32.mrb[43].mxu1 }
 0x231   : > { %v983_v8 = vpop.f32.mrb[44].mxu1 }
 0x232   : > { %1044 = vst [vmem:[%s1520_s11 + $0xb0] sm:$0xff] %v983_v8  ;;  %v985_v9 = vpop.f32.mrb[45].mxu1 }
 0x233   : > { %v986_v10 = vpop.f32.mrb[46].mxu1 }
 0x234   : > { %1045 = vst [vmem:[%s1520_s11 + $0xb8] sm:$0xff] %v986_v10  ;;  %v988_v11 = vpop.f32.mrb[47].mxu1 }
 0x239   : > { %v991_v12 = vpop.f32.mrb[48].mxu1 }
 0x23a   : > { %1046 = vst [vmem:[%s1520_s11 + $0xc0] sm:$0xff] %v991_v12  ;;  %v993_v13 = vpop.f32.mrb[49].mxu1 }
 0x23b   : > { %v994_v14 = vpop.f32.mrb[50].mxu1 }
 0x23c   : > { %1047 = vst [vmem:[%s1520_s11 + $0xc8] sm:$0xff] %v994_v14  ;;  %v996_v15 = vpop.f32.mrb[51].mxu1 }
 0x241   : > { %v999_v16 = vpop.f32.mrb[52].mxu1 }
 0x242   : > { %1048 = vst [vmem:[%s1520_s11 + $0xd0] sm:$0xff] %v999_v16  ;;  %v1001_v17 = vpop.f32.mrb[53].mxu1 }
 0x243   : > { %v1002_v18 = vpop.f32.mrb[54].mxu1 }
 0x244   : > { %1049 = vst [vmem:[%s1520_s11 + $0xd8] sm:$0xff] %v1002_v18  ;;  %v1004_v19 = vpop.f32.mrb[55].mxu1 }
 0x249   : > { %v1007_v20 = vpop.f32.mrb[56].mxu1 }
 0x24a   : > { %1050 = vst [vmem:[%s1520_s11 + $0xe0] sm:$0xff] %v1007_v20  ;;  %v1009_v21 = vpop.f32.mrb[57].mxu1 }
 0x24b   : > { %v1010_v22 = vpop.f32.mrb[58].mxu1 }
 0x24c   : > { %1051 = vst [vmem:[%s1520_s11 + $0xe8] sm:$0xff] %v1010_v22  ;;  %v1012_v23 = vpop.f32.mrb[59].mxu1 }
 0x251   : > { %v1015_v24 = vpop.f32.mrb[60].mxu1 }
 0x252   : > { %1052 = vst [vmem:[%s1520_s11 + $0xf0] sm:$0xff] %v1015_v24  ;;  %v1017_v25 = vpop.f32.mrb[61].mxu1 }
 0x253   : > { %v1018_v26 = vpop.f32.mrb[62].mxu1 }
 0x254   : > { %1053 = vst [vmem:[%s1520_s11 + $0xf8] sm:$0xff] %v1018_v26  ;;  %v1020_v27 = vpop.f32.mrb[63].mxu1 }
 0x255 PF: > { %s14_s15 = sadd.s32 1, %s1219_s15  }
 0x256   : > { %p11_p4 = scmp.ge.s32.totalorder %s14_s15, 4  }
 0x258   :  { %13 = sbr.rel (!%p11_p4) target bundleno = 1 (0x1), region = 69 }

</bundles_post_ra>
